<compile_context>
chip_gen: v5e
topology: v5e:2x2
jax: 0.10.0
libtpu: 0.0.40
codegen_flags: <defaults>
</compile_context>

<pallas_src>
import functools

import jax
import jax.numpy as jnp
from jax import lax
from jax.experimental import pallas as pl
from jax.experimental.pallas import tpu as pltpu


# Column offset of the image interior inside the VMEM pad scratch.  Using 8
# keeps the interior *store* sublane-aligned; the left/right zero-pad columns
# live at _PADL-1 and _PADL+W (never written, zeroed once per grid step).
_PADL = 8


# ----------------------------------------------------------------------------
# Fused Pallas kernel: one batch element per grid step.
# ----------------------------------------------------------------------------
def _vae_fused_kernel(x_ref, eps_ref,
                      w1_ref, b1_ref, w21_ref, b21_ref, w22_ref, b22_ref,
                      w3_ref, b3_ref, w4_ref, b4_ref,
                      recon_ref, mu_ref, logvar_ref,
                      xpad_ref, *, H, W, training):
    HW = H * W

    # Zero the pad scratch: provides the zero border for 'same' padding.  The
    # interior is overwritten (for the channels actually read) by every conv.
    xpad_ref[...] = jnp.zeros_like(xpad_ref)

    def conv3x3(act_hwc, heads):
        """3x3 'same' conv over a (H, W, C) channels-last activation.

        heads: list of (w_ref, b_ref, act_name); w_ref is (3, 3*C, Cout) with
        rows ordered kx-major / cin-minor, b_ref is (1, Cout).  All heads share
        the padded input and im2col patches; accumulation is in vregs.
        Returns one (H*W, Cout) f32 value per head.
        """
        C = act_hwc.shape[-1]
        # Place the activation in the (pre-zeroed) padded-scratch interior.
        xpad_ref[1:H + 1, _PADL:_PADL + W, 0:C] = act_hwc
        accs = [None] * len(heads)
        for ky in range(3):
            # im2col for kernel-row ky: concat the 3 kx-shifted windows along
            # lanes -> (H*W, 3*C); one MXU matmul per head with K = 3*C.
            cols = [
                xpad_ref[ky:ky + H, _PADL - 1 + kx:_PADL - 1 + kx + W, 0:C]
                .reshape(HW, C)
                for kx in range(3)
            ]
            patch = jnp.concatenate(cols, axis=-1)            # (HW, 3*C)
            for hi, (w_ref, _, _) in enumerate(heads):
                part = jnp.dot(patch, w_ref[ky],
                               preferred_element_type=jnp.float32)
                accs[hi] = part if accs[hi] is None else accs[hi] + part
        outs = []
        for acc, (_, b_ref, act_name) in zip(accs, heads):
            o = acc + b_ref[...]
            if act_name == "relu":
                o = jnp.maximum(o, 0.0)
            elif act_name == "tanh":
                o = jnp.tanh(o)
            outs.append(o)                                    # (HW, Cout)
        return outs

    x = x_ref[...].astype(jnp.float32)                        # (H, W, Cin)

    # ------------------------------ encoder ------------------------------
    (h1,) = conv3x3(x, [(w1_ref, b1_ref, "relu")])            # (HW, Ch)
    ch = h1.shape[-1]
    mu, logvar = conv3x3(
        h1.reshape(H, W, ch),
        [(w21_ref, b21_ref, None), (w22_ref, b22_ref, None)])  # (HW, Ci) each
    ci = mu.shape[-1]

    # --------------------------- reparameterize ---------------------------
    if training:
        eps = eps_ref[...].astype(jnp.float32).reshape(HW, ci)
        z = eps * jnp.exp(logvar * 0.5) + mu
    else:
        z = mu

    # ------------------------------ decoder ------------------------------
    (h3,) = conv3x3(z.reshape(H, W, ci), [(w3_ref, b3_ref, "relu")])     # (HW, Ch)
    (recon,) = conv3x3(h3.reshape(H, W, ch), [(w4_ref, b4_ref, "tanh")])  # (HW, Cin)

    recon_ref[...] = recon.reshape(H, W, recon.shape[-1]).astype(recon_ref.dtype)
    mu_ref[...] = mu.reshape(H, W, ci).astype(mu_ref.dtype)
    logvar_ref[...] = logvar.reshape(H, W, ci).astype(logvar_ref.dtype)


# ----------------------------------------------------------------------------
# Wrapper (pallas_call plumbing)
# ----------------------------------------------------------------------------
def _prep_conv_weight(w):
    # (3, 3, Cin, Cout) HWIO -> (3, 3*Cin, Cout); row index = kx*Cin + cin,
    # matching the lane order of the in-kernel im2col patch.
    kh, kw, cin, cout = w.shape
    return w.reshape(kh, kw * cin, cout)


@functools.partial(jax.jit, static_argnames=("training",))
def vae_forward(params, x_nchw, eps_key, training=True):
    """Mirrors VAE.forward: returns (reconstruction, mu, logvar, eps) in NCHW."""
    x = jnp.transpose(x_nchw, (0, 2, 3, 1))                   # NCHW -> NHWC
    N, H, W, Cin = x.shape
    Ch = params["w1"].shape[-1]
    Ci = params["w21"].shape[-1]
    Cmax = max(Cin, Ch, Ci)

    eps = (jax.random.normal(eps_key, (N, H, W, Ci), x.dtype)
           if training else jnp.zeros((N, H, W, Ci), x.dtype))

    weights = []
    in_specs = [
        pl.BlockSpec((None, H, W, Cin), lambda n: (n, 0, 0, 0)),   # x
        pl.BlockSpec((None, H, W, Ci), lambda n: (n, 0, 0, 0)),    # eps
    ]
    for wn, bn in (("w1", "b1"), ("w21", "b21"), ("w22", "b22"),
                   ("w3", "b3"), ("w4", "b4")):
        w3 = _prep_conv_weight(params[wn])
        b2 = params[bn].reshape(1, -1)
        weights += [w3, b2]
        in_specs += [pl.BlockSpec(w3.shape, lambda n: (0, 0, 0)),
                     pl.BlockSpec(b2.shape, lambda n: (0, 0))]

    out_shape = (jax.ShapeDtypeStruct((N, H, W, Cin), x.dtype),    # recon
                 jax.ShapeDtypeStruct((N, H, W, Ci), x.dtype),     # mu
                 jax.ShapeDtypeStruct((N, H, W, Ci), x.dtype))     # logvar
    out_specs = (pl.BlockSpec((None, H, W, Cin), lambda n: (n, 0, 0, 0)),
                 pl.BlockSpec((None, H, W, Ci), lambda n: (n, 0, 0, 0)),
                 pl.BlockSpec((None, H, W, Ci), lambda n: (n, 0, 0, 0)))

    kernel = functools.partial(_vae_fused_kernel, H=H, W=W, training=training)
    recon, mu, logvar = pl.pallas_call(
        kernel,
        out_shape=out_shape,
        grid=(N,),
        in_specs=in_specs,
        out_specs=out_specs,
        scratch_shapes=[pltpu.VMEM((H + 2, _PADL + W + 1, Cmax), jnp.float32)],
        compiler_params=pltpu.CompilerParams(
            dimension_semantics=("parallel",)),
    )(x, eps, *weights)

    to_nchw = lambda a: jnp.transpose(a, (0, 3, 1, 2))
    return (to_nchw(recon), to_nchw(mu), to_nchw(logvar),
            (eps if training else None))


# ----------------------------------------------------------------------------
# Parameter init (PyTorch-Conv2d-like uniform +-1/sqrt(fan_in), HWIO layout)
# ----------------------------------------------------------------------------
def init_vae_params(key, dim_input, dim_hidden, dim_inner, ksize=3):
    def conv_init(k, cin, cout):
        kw_, kb_ = jax.random.split(k)
        bound = 1.0 / jnp.sqrt(cin * ksize * ksize)
        w = jax.random.uniform(kw_, (ksize, ksize, cin, cout),
                               jnp.float32, -bound, bound)
        b = jax.random.uniform(kb_, (cout,), jnp.float32, -bound, bound)
        return w, b

    keys = jax.random.split(key, 5)
    p = {}
    p["w1"], p["b1"] = conv_init(keys[0], dim_input, dim_hidden)
    p["w21"], p["b21"] = conv_init(keys[1], dim_hidden, dim_inner)
    p["w22"], p["b22"] = conv_init(keys[2], dim_hidden, dim_inner)
    p["w3"], p["b3"] = conv_init(keys[3], dim_inner, dim_hidden)
    p["w4"], p["b4"] = conv_init(keys[4], dim_hidden, dim_input)
    return p


# ----------------------------------------------------------------------------
# Pure-JAX reference (correctness check)
# ----------------------------------------------------------------------------
def _ref_conv3x3(x_nhwc, w, b):
    y = lax.conv_general_dilated(
        x_nhwc, w, window_strides=(1, 1), padding="SAME",
        dimension_numbers=("NHWC", "HWIO", "NHWC"))
    return y + b.reshape(1, 1, 1, -1)


def vae_forward_ref(params, x_nchw, eps_nhwc):
    x = jnp.transpose(x_nchw, (0, 2, 3, 1))
    h1 = jnp.maximum(_ref_conv3x3(x, params["w1"], params["b1"]), 0.0)
    mu = _ref_conv3x3(h1, params["w21"], params["b21"])
    logvar = _ref_conv3x3(h1, params["w22"], params["b22"])
    z = eps_nhwc * jnp.exp(0.5 * logvar) + mu
    h3 = jnp.maximum(_ref_conv3x3(z, params["w3"], params["b3"]), 0.0)
    recon = jnp.tanh(_ref_conv3x3(h3, params["w4"], params["b4"]))
    to_nchw = lambda a: jnp.transpose(a, (0, 3, 1, 2))
    return to_nchw(recon), to_nchw(mu), to_nchw(logvar)


# ----------------------------------------------------------------------------
if __name__ == "__main__":
    dim_input, dim_hidden, dim_inner = 4, 32, 8
    N, H, W = 2, 16, 16

    root = jax.random.PRNGKey(0)
    k_params, k_x, k_eps = jax.random.split(root, 3)

    params = init_vae_params(k_params, dim_input, dim_hidden, dim_inner)
    x = jax.random.normal(k_x, (N, dim_input, H, W), jnp.float32)   # NCHW input

    recon, mu, logvar, eps_nhwc = vae_forward(params, x, k_eps, training=True)
    jax.block_until_ready((recon, mu, logvar))

    # sanity check against a pure-JAX reference using the same eps
    r_ref, mu_ref, lv_ref = vae_forward_ref(params, x, eps_nhwc)
    assert recon.shape == (N, dim_input, H, W)
    assert mu.shape == (N, dim_inner, H, W)
    assert logvar.shape == (N, dim_inner, H, W)
    assert jnp.allclose(mu, mu_ref, atol=1e-4, rtol=1e-4)
    assert jnp.allclose(logvar, lv_ref, atol=1e-4, rtol=1e-4)
    assert jnp.allclose(recon, r_ref, atol=1e-4, rtol=1e-4)

    print("KERNEL_OK")
</pallas_src>

<mosaic_0001>
module attributes {stable_mosaic.version = 11 : i64} {
  func.func @_vae_fused_kernel(%arg0: i32, %arg1: memref<1x16x16x4xf32, #tpu.memory_space<vmem>>, %arg2: memref<1x16x16x8xf32, #tpu.memory_space<vmem>>, %arg3: memref<3x12x32xf32, #tpu.memory_space<vmem>>, %arg4: memref<1x32xf32, #tpu.memory_space<vmem>>, %arg5: memref<3x96x8xf32, #tpu.memory_space<vmem>>, %arg6: memref<1x8xf32, #tpu.memory_space<vmem>>, %arg7: memref<3x96x8xf32, #tpu.memory_space<vmem>>, %arg8: memref<1x8xf32, #tpu.memory_space<vmem>>, %arg9: memref<3x24x32xf32, #tpu.memory_space<vmem>>, %arg10: memref<1x32xf32, #tpu.memory_space<vmem>>, %arg11: memref<3x96x4xf32, #tpu.memory_space<vmem>>, %arg12: memref<1x4xf32, #tpu.memory_space<vmem>>, %arg13: memref<1x16x16x4xf32, #tpu.memory_space<vmem>>, %arg14: memref<1x16x16x8xf32, #tpu.memory_space<vmem>>, %arg15: memref<1x16x16x8xf32, #tpu.memory_space<vmem>>, %arg16: memref<18x25x32xf32, #tpu.memory_space<vmem>>) attributes {dimension_semantics = [#tpu.dimension_semantics<parallel>], iteration_bounds = array<i64: 2>, scalar_prefetch = 0 : i64, scratch_operands = 1 : i64, tpu.core_type = #tpu.core_type<tc>, window_params = [{transform_indices = @transform_0, window_bounds = array<i64: 1, 16, 16, 4>}, {transform_indices = @transform_1, window_bounds = array<i64: 1, 16, 16, 8>}, {pipeline_mode = #tpu.pipeline_mode<synchronous>, transform_indices = @transform_2, window_bounds = array<i64: 3, 12, 32>}, {pipeline_mode = #tpu.pipeline_mode<synchronous>, transform_indices = @transform_3, window_bounds = array<i64: 1, 32>}, {pipeline_mode = #tpu.pipeline_mode<synchronous>, transform_indices = @transform_4, window_bounds = array<i64: 3, 96, 8>}, {pipeline_mode = #tpu.pipeline_mode<synchronous>, transform_indices = @transform_5, window_bounds = array<i64: 1, 8>}, {pipeline_mode = #tpu.pipeline_mode<synchronous>, transform_indices = @transform_6, window_bounds = array<i64: 3, 96, 8>}, {pipeline_mode = #tpu.pipeline_mode<synchronous>, transform_indices = @transform_7, window_bounds = array<i64: 1, 8>}, {pipeline_mode = #tpu.pipeline_mode<synchronous>, transform_indices = @transform_8, window_bounds = array<i64: 3, 24, 32>}, {pipeline_mode = #tpu.pipeline_mode<synchronous>, transform_indices = @transform_9, window_bounds = array<i64: 1, 32>}, {pipeline_mode = #tpu.pipeline_mode<synchronous>, transform_indices = @transform_10, window_bounds = array<i64: 3, 96, 4>}, {pipeline_mode = #tpu.pipeline_mode<synchronous>, transform_indices = @transform_11, window_bounds = array<i64: 1, 4>}, {transform_indices = @transform_12, window_bounds = array<i64: 1, 16, 16, 4>}, {transform_indices = @transform_13, window_bounds = array<i64: 1, 16, 16, 8>}, {transform_indices = @transform_14, window_bounds = array<i64: 1, 16, 16, 8>}]} {
    %cst = arith.constant 0.000000e+00 : f32
    %0 = vector.broadcast %cst : f32 to vector<18x25x32xf32>
    %c0 = arith.constant 0 : index
    %c0_0 = arith.constant 0 : index
    %c0_1 = arith.constant 0 : index
    %1 = vector.load %arg16[%c0, %c0_0, %c0_1] : memref<18x25x32xf32, #tpu.memory_space<vmem>>, vector<18x25x32xf32>
    tpu.vector_store %arg16[%c0, %c0_0, %c0_1], %0 {strides = array<i32>} : memref<18x25x32xf32, #tpu.memory_space<vmem>>, vector<18x25x32xf32>,
    %c0_2 = arith.constant 0 : index
    %c0_3 = arith.constant 0 : index
    %c0_4 = arith.constant 0 : index
    %c0_5 = arith.constant 0 : index
    %2 = vector.load %arg1[%c0_2, %c0_3, %c0_4, %c0_5] : memref<1x16x16x4xf32, #tpu.memory_space<vmem>>, vector<1x16x16x4xf32>
    %3 = vector.shape_cast %2 : vector<1x16x16x4xf32> to vector<16x16x4xf32>
    %c1 = arith.constant 1 : index
    %c8 = arith.constant 8 : index
    %c0_6 = arith.constant 0 : index
    %4 = vector.load %arg16[%c1, %c8, %c0_6] : memref<18x25x32xf32, #tpu.memory_space<vmem>>, vector<16x16x4xf32>
    tpu.vector_store %arg16[%c1, %c8, %c0_6], %3 {strides = array<i32>} : memref<18x25x32xf32, #tpu.memory_space<vmem>>, vector<16x16x4xf32>,
    %c0_7 = arith.constant 0 : index
    %c7 = arith.constant 7 : index
    %c0_8 = arith.constant 0 : index
    %5 = vector.load %arg16[%c0_7, %c7, %c0_8] : memref<18x25x32xf32, #tpu.memory_space<vmem>>, vector<16x16x4xf32>
    %6 = vector.shape_cast %5 : vector<16x16x4xf32> to vector<256x4xf32>
    %c0_9 = arith.constant 0 : index
    %c8_10 = arith.constant 8 : index
    %c0_11 = arith.constant 0 : index
    %7 = vector.load %arg16[%c0_9, %c8_10, %c0_11] : memref<18x25x32xf32, #tpu.memory_space<vmem>>, vector<16x16x4xf32>
    %8 = vector.shape_cast %7 : vector<16x16x4xf32> to vector<256x4xf32>
    %c0_12 = arith.constant 0 : index
    %c9 = arith.constant 9 : index
    %c0_13 = arith.constant 0 : index
    %9 = vector.load %arg16[%c0_12, %c9, %c0_13] : memref<18x25x32xf32, #tpu.memory_space<vmem>>, vector<16x16x4xf32>
    %10 = vector.shape_cast %9 : vector<16x16x4xf32> to vector<256x4xf32>
    %11 = tpu.concatenate %6, %8, %10 in 1 : vector<256x4xf32>, vector<256x4xf32>, vector<256x4xf32> -> vector<256x12xf32>
    %c0_14 = arith.constant 0 : index
    %c0_15 = arith.constant 0 : index
    %c0_16 = arith.constant 0 : index
    %12 = vector.load %arg3[%c0_14, %c0_15, %c0_16] : memref<3x12x32xf32, #tpu.memory_space<vmem>>, vector<1x12x32xf32>
    %13 = vector.shape_cast %12 : vector<1x12x32xf32> to vector<12x32xf32>
    %cst_17 = arith.constant dense<0.000000e+00> : vector<256x32xf32>
    %14 = tpu.matmul %11, %13, %cst_17 {dimension_numbers = #tpu.dot_dimension_numbers<[1], [0], [0], [1], [0, 0, 1, 1], [], []>} : vector<256x12xf32>, vector<12x32xf32>, vector<256x32xf32> -> vector<256x32xf32>
    %c1_18 = arith.constant 1 : index
    %c7_19 = arith.constant 7 : index
    %c0_20 = arith.constant 0 : index
    %15 = vector.load %arg16[%c1_18, %c7_19, %c0_20] : memref<18x25x32xf32, #tpu.memory_space<vmem>>, vector<16x16x4xf32>
    %16 = vector.shape_cast %15 : vector<16x16x4xf32> to vector<256x4xf32>
    %c1_21 = arith.constant 1 : index
    %c8_22 = arith.constant 8 : index
    %c0_23 = arith.constant 0 : index
    %17 = vector.load %arg16[%c1_21, %c8_22, %c0_23] : memref<18x25x32xf32, #tpu.memory_space<vmem>>, vector<16x16x4xf32>
    %18 = vector.shape_cast %17 : vector<16x16x4xf32> to vector<256x4xf32>
    %c1_24 = arith.constant 1 : index
    %c9_25 = arith.constant 9 : index
    %c0_26 = arith.constant 0 : index
    %19 = vector.load %arg16[%c1_24, %c9_25, %c0_26] : memref<18x25x32xf32, #tpu.memory_space<vmem>>, vector<16x16x4xf32>
    %20 = vector.shape_cast %19 : vector<16x16x4xf32> to vector<256x4xf32>
    %21 = tpu.concatenate %16, %18, %20 in 1 : vector<256x4xf32>, vector<256x4xf32>, vector<256x4xf32> -> vector<256x12xf32>
    %c1_27 = arith.constant 1 : index
    %c0_28 = arith.constant 0 : index
    %c0_29 = arith.constant 0 : index
    %22 = vector.load %arg3[%c1_27, %c0_28, %c0_29] : memref<3x12x32xf32, #tpu.memory_space<vmem>>, vector<1x12x32xf32>
    %23 = vector.shape_cast %22 : vector<1x12x32xf32> to vector<12x32xf32>
    %cst_30 = arith.constant dense<0.000000e+00> : vector<256x32xf32>
    %24 = tpu.matmul %21, %23, %cst_30 {dimension_numbers = #tpu.dot_dimension_numbers<[1], [0], [0], [1], [0, 0, 1, 1], [], []>} : vector<256x12xf32>, vector<12x32xf32>, vector<256x32xf32> -> vector<256x32xf32>
    %25 = arith.addf %14, %24 : vector<256x32xf32>
    %c2 = arith.constant 2 : index
    %c7_31 = arith.constant 7 : index
    %c0_32 = arith.constant 0 : index
    %26 = vector.load %arg16[%c2, %c7_31, %c0_32] : memref<18x25x32xf32, #tpu.memory_space<vmem>>, vector<16x16x4xf32>
    %27 = vector.shape_cast %26 : vector<16x16x4xf32> to vector<256x4xf32>
    %c2_33 = arith.constant 2 : index
    %c8_34 = arith.constant 8 : index
    %c0_35 = arith.constant 0 : index
    %28 = vector.load %arg16[%c2_33, %c8_34, %c0_35] : memref<18x25x32xf32, #tpu.memory_space<vmem>>, vector<16x16x4xf32>
    %29 = vector.shape_cast %28 : vector<16x16x4xf32> to vector<256x4xf32>
    %c2_36 = arith.constant 2 : index
    %c9_37 = arith.constant 9 : index
    %c0_38 = arith.constant 0 : index
    %30 = vector.load %arg16[%c2_36, %c9_37, %c0_38] : memref<18x25x32xf32, #tpu.memory_space<vmem>>, vector<16x16x4xf32>
    %31 = vector.shape_cast %30 : vector<16x16x4xf32> to vector<256x4xf32>
    %32 = tpu.concatenate %27, %29, %31 in 1 : vector<256x4xf32>, vector<256x4xf32>, vector<256x4xf32> -> vector<256x12xf32>
    %c2_39 = arith.constant 2 : index
    %c0_40 = arith.constant 0 : index
    %c0_41 = arith.constant 0 : index
    %33 = vector.load %arg3[%c2_39, %c0_40, %c0_41] : memref<3x12x32xf32, #tpu.memory_space<vmem>>, vector<1x12x32xf32>
    %34 = vector.shape_cast %33 : vector<1x12x32xf32> to vector<12x32xf32>
    %cst_42 = arith.constant dense<0.000000e+00> : vector<256x32xf32>
    %35 = tpu.matmul %32, %34, %cst_42 {dimension_numbers = #tpu.dot_dimension_numbers<[1], [0], [0], [1], [0, 0, 1, 1], [], []>} : vector<256x12xf32>, vector<12x32xf32>, vector<256x32xf32> -> vector<256x32xf32>
    %36 = arith.addf %25, %35 : vector<256x32xf32>
    %c0_43 = arith.constant 0 : index
    %c0_44 = arith.constant 0 : index
    %37 = vector.load %arg4[%c0_43, %c0_44] : memref<1x32xf32, #tpu.memory_space<vmem>>, vector<1x32xf32>
    %38 = vector.broadcast %37 : vector<1x32xf32> to vector<256x32xf32>
    %39 = arith.addf %36, %38 : vector<256x32xf32>
    %cst_45 = arith.constant 0.000000e+00 : f32
    %40 = vector.broadcast %cst_45 : f32 to vector<256x32xf32>
    %41 = arith.maximumf %39, %40 : vector<256x32xf32>
    %42 = vector.shape_cast %41 : vector<256x32xf32> to vector<16x16x32xf32>
    %c1_46 = arith.constant 1 : index
    %c8_47 = arith.constant 8 : index
    %c0_48 = arith.constant 0 : index
    %43 = vector.load %arg16[%c1_46, %c8_47, %c0_48] : memref<18x25x32xf32, #tpu.memory_space<vmem>>, vector<16x16x32xf32>
    tpu.vector_store %arg16[%c1_46, %c8_47, %c0_48], %42 {strides = array<i32>} : memref<18x25x32xf32, #tpu.memory_space<vmem>>, vector<16x16x32xf32>,
    %c0_49 = arith.constant 0 : index
    %c7_50 = arith.constant 7 : index
    %c0_51 = arith.constant 0 : index
    %44 = vector.load %arg16[%c0_49, %c7_50, %c0_51] : memref<18x25x32xf32, #tpu.memory_space<vmem>>, vector<16x16x32xf32>
    %45 = vector.shape_cast %44 : vector<16x16x32xf32> to vector<256x32xf32>
    %c0_52 = arith.constant 0 : index
    %c8_53 = arith.constant 8 : index
    %c0_54 = arith.constant 0 : index
    %46 = vector.load %arg16[%c0_52, %c8_53, %c0_54] : memref<18x25x32xf32, #tpu.memory_space<vmem>>, vector<16x16x32xf32>
    %47 = vector.shape_cast %46 : vector<16x16x32xf32> to vector<256x32xf32>
    %c0_55 = arith.constant 0 : index
    %c9_56 = arith.constant 9 : index
    %c0_57 = arith.constant 0 : index
    %48 = vector.load %arg16[%c0_55, %c9_56, %c0_57] : memref<18x25x32xf32, #tpu.memory_space<vmem>>, vector<16x16x32xf32>
    %49 = vector.shape_cast %48 : vector<16x16x32xf32> to vector<256x32xf32>
    %50 = tpu.concatenate %45, %47, %49 in 1 : vector<256x32xf32>, vector<256x32xf32>, vector<256x32xf32> -> vector<256x96xf32>
    %c0_58 = arith.constant 0 : index
    %c0_59 = arith.constant 0 : index
    %c0_60 = arith.constant 0 : index
    %51 = vector.load %arg5[%c0_58, %c0_59, %c0_60] : memref<3x96x8xf32, #tpu.memory_space<vmem>>, vector<1x96x8xf32>
    %52 = vector.shape_cast %51 : vector<1x96x8xf32> to vector<96x8xf32>
    %cst_61 = arith.constant dense<0.000000e+00> : vector<256x8xf32>
    %53 = tpu.matmul %50, %52, %cst_61 {dimension_numbers = #tpu.dot_dimension_numbers<[1], [0], [0], [1], [0, 0, 1, 1], [], []>} : vector<256x96xf32>, vector<96x8xf32>, vector<256x8xf32> -> vector<256x8xf32>
    %c0_62 = arith.constant 0 : index
    %c0_63 = arith.constant 0 : index
    %c0_64 = arith.constant 0 : index
    %54 = vector.load %arg7[%c0_62, %c0_63, %c0_64] : memref<3x96x8xf32, #tpu.memory_space<vmem>>, vector<1x96x8xf32>
    %55 = vector.shape_cast %54 : vector<1x96x8xf32> to vector<96x8xf32>
    %cst_65 = arith.constant dense<0.000000e+00> : vector<256x8xf32>
    %56 = tpu.matmul %50, %55, %cst_65 {dimension_numbers = #tpu.dot_dimension_numbers<[1], [0], [0], [1], [0, 0, 1, 1], [], []>} : vector<256x96xf32>, vector<96x8xf32>, vector<256x8xf32> -> vector<256x8xf32>
    %c1_66 = arith.constant 1 : index
    %c7_67 = arith.constant 7 : index
    %c0_68 = arith.constant 0 : index
    %57 = vector.load %arg16[%c1_66, %c7_67, %c0_68] : memref<18x25x32xf32, #tpu.memory_space<vmem>>, vector<16x16x32xf32>
    %58 = vector.shape_cast %57 : vector<16x16x32xf32> to vector<256x32xf32>
    %c1_69 = arith.constant 1 : index
    %c8_70 = arith.constant 8 : index
    %c0_71 = arith.constant 0 : index
    %59 = vector.load %arg16[%c1_69, %c8_70, %c0_71] : memref<18x25x32xf32, #tpu.memory_space<vmem>>, vector<16x16x32xf32>
    %60 = vector.shape_cast %59 : vector<16x16x32xf32> to vector<256x32xf32>
    %c1_72 = arith.constant 1 : index
    %c9_73 = arith.constant 9 : index
    %c0_74 = arith.constant 0 : index
    %61 = vector.load %arg16[%c1_72, %c9_73, %c0_74] : memref<18x25x32xf32, #tpu.memory_space<vmem>>, vector<16x16x32xf32>
    %62 = vector.shape_cast %61 : vector<16x16x32xf32> to vector<256x32xf32>
    %63 = tpu.concatenate %58, %60, %62 in 1 : vector<256x32xf32>, vector<256x32xf32>, vector<256x32xf32> -> vector<256x96xf32>
    %c1_75 = arith.constant 1 : index
    %c0_76 = arith.constant 0 : index
    %c0_77 = arith.constant 0 : index
    %64 = vector.load %arg5[%c1_75, %c0_76, %c0_77] : memref<3x96x8xf32, #tpu.memory_space<vmem>>, vector<1x96x8xf32>
    %65 = vector.shape_cast %64 : vector<1x96x8xf32> to vector<96x8xf32>
    %cst_78 = arith.constant dense<0.000000e+00> : vector<256x8xf32>
    %66 = tpu.matmul %63, %65, %cst_78 {dimension_numbers = #tpu.dot_dimension_numbers<[1], [0], [0], [1], [0, 0, 1, 1], [], []>} : vector<256x96xf32>, vector<96x8xf32>, vector<256x8xf32> -> vector<256x8xf32>
    %67 = arith.addf %53, %66 : vector<256x8xf32>
    %c1_79 = arith.constant 1 : index
    %c0_80 = arith.constant 0 : index
    %c0_81 = arith.constant 0 : index
    %68 = vector.load %arg7[%c1_79, %c0_80, %c0_81] : memref<3x96x8xf32, #tpu.memory_space<vmem>>, vector<1x96x8xf32>
    %69 = vector.shape_cast %68 : vector<1x96x8xf32> to vector<96x8xf32>
    %cst_82 = arith.constant dense<0.000000e+00> : vector<256x8xf32>
    %70 = tpu.matmul %63, %69, %cst_82 {dimension_numbers = #tpu.dot_dimension_numbers<[1], [0], [0], [1], [0, 0, 1, 1], [], []>} : vector<256x96xf32>, vector<96x8xf32>, vector<256x8xf32> -> vector<256x8xf32>
    %71 = arith.addf %56, %70 : vector<256x8xf32>
    %c2_83 = arith.constant 2 : index
    %c7_84 = arith.constant 7 : index
    %c0_85 = arith.constant 0 : index
    %72 = vector.load %arg16[%c2_83, %c7_84, %c0_85] : memref<18x25x32xf32, #tpu.memory_space<vmem>>, vector<16x16x32xf32>
    %73 = vector.shape_cast %72 : vector<16x16x32xf32> to vector<256x32xf32>
    %c2_86 = arith.constant 2 : index
    %c8_87 = arith.constant 8 : index
    %c0_88 = arith.constant 0 : index
    %74 = vector.load %arg16[%c2_86, %c8_87, %c0_88] : memref<18x25x32xf32, #tpu.memory_space<vmem>>, vector<16x16x32xf32>
    %75 = vector.shape_cast %74 : vector<16x16x32xf32> to vector<256x32xf32>
    %c2_89 = arith.constant 2 : index
    %c9_90 = arith.constant 9 : index
    %c0_91 = arith.constant 0 : index
    %76 = vector.load %arg16[%c2_89, %c9_90, %c0_91] : memref<18x25x32xf32, #tpu.memory_space<vmem>>, vector<16x16x32xf32>
    %77 = vector.shape_cast %76 : vector<16x16x32xf32> to vector<256x32xf32>
    %78 = tpu.concatenate %73, %75, %77 in 1 : vector<256x32xf32>, vector<256x32xf32>, vector<256x32xf32> -> vector<256x96xf32>
    %c2_92 = arith.constant 2 : index
    %c0_93 = arith.constant 0 : index
    %c0_94 = arith.constant 0 : index
    %79 = vector.load %arg5[%c2_92, %c0_93, %c0_94] : memref<3x96x8xf32, #tpu.memory_space<vmem>>, vector<1x96x8xf32>
    %80 = vector.shape_cast %79 : vector<1x96x8xf32> to vector<96x8xf32>
    %cst_95 = arith.constant dense<0.000000e+00> : vector<256x8xf32>
    %81 = tpu.matmul %78, %80, %cst_95 {dimension_numbers = #tpu.dot_dimension_numbers<[1], [0], [0], [1], [0, 0, 1, 1], [], []>} : vector<256x96xf32>, vector<96x8xf32>, vector<256x8xf32> -> vector<256x8xf32>
    %82 = arith.addf %67, %81 : vector<256x8xf32>
    %c2_96 = arith.constant 2 : index
    %c0_97 = arith.constant 0 : index
    %c0_98 = arith.constant 0 : index
    %83 = vector.load %arg7[%c2_96, %c0_97, %c0_98] : memref<3x96x8xf32, #tpu.memory_space<vmem>>, vector<1x96x8xf32>
    %84 = vector.shape_cast %83 : vector<1x96x8xf32> to vector<96x8xf32>
    %cst_99 = arith.constant dense<0.000000e+00> : vector<256x8xf32>
    %85 = tpu.matmul %78, %84, %cst_99 {dimension_numbers = #tpu.dot_dimension_numbers<[1], [0], [0], [1], [0, 0, 1, 1], [], []>} : vector<256x96xf32>, vector<96x8xf32>, vector<256x8xf32> -> vector<256x8xf32>
    %86 = arith.addf %71, %85 : vector<256x8xf32>
    %c0_100 = arith.constant 0 : index
    %c0_101 = arith.constant 0 : index
    %87 = vector.load %arg6[%c0_100, %c0_101] : memref<1x8xf32, #tpu.memory_space<vmem>>, vector<1x8xf32>
    %88 = vector.broadcast %87 : vector<1x8xf32> to vector<256x8xf32>
    %89 = arith.addf %82, %88 : vector<256x8xf32>
    %c0_102 = arith.constant 0 : index
    %c0_103 = arith.constant 0 : index
    %90 = vector.load %arg8[%c0_102, %c0_103] : memref<1x8xf32, #tpu.memory_space<vmem>>, vector<1x8xf32>
    %91 = vector.broadcast %90 : vector<1x8xf32> to vector<256x8xf32>
    %92 = arith.addf %86, %91 : vector<256x8xf32>
    %c0_104 = arith.constant 0 : index
    %c0_105 = arith.constant 0 : index
    %c0_106 = arith.constant 0 : index
    %c0_107 = arith.constant 0 : index
    %93 = vector.load %arg2[%c0_104, %c0_105, %c0_106, %c0_107] : memref<1x16x16x8xf32, #tpu.memory_space<vmem>>, vector<1x16x16x8xf32>
    %94 = vector.shape_cast %93 : vector<1x16x16x8xf32> to vector<16x16x8xf32>
    %95 = vector.shape_cast %94 : vector<16x16x8xf32> to vector<256x8xf32>
    %cst_108 = arith.constant 5.000000e-01 : f32
    %96 = vector.broadcast %cst_108 : f32 to vector<256x8xf32>
    %97 = arith.mulf %92, %96 : vector<256x8xf32>
    %98 = math.exp %97 : vector<256x8xf32>
    %99 = arith.mulf %95, %98 : vector<256x8xf32>
    %100 = arith.addf %99, %89 : vector<256x8xf32>
    %101 = vector.shape_cast %100 : vector<256x8xf32> to vector<16x16x8xf32>
    %c1_109 = arith.constant 1 : index
    %c8_110 = arith.constant 8 : index
    %c0_111 = arith.constant 0 : index
    %102 = vector.load %arg16[%c1_109, %c8_110, %c0_111] : memref<18x25x32xf32, #tpu.memory_space<vmem>>, vector<16x16x8xf32>
    tpu.vector_store %arg16[%c1_109, %c8_110, %c0_111], %101 {strides = array<i32>} : memref<18x25x32xf32, #tpu.memory_space<vmem>>, vector<16x16x8xf32>,
    %c0_112 = arith.constant 0 : index
    %c7_113 = arith.constant 7 : index
    %c0_114 = arith.constant 0 : index
    %103 = vector.load %arg16[%c0_112, %c7_113, %c0_114] : memref<18x25x32xf32, #tpu.memory_space<vmem>>, vector<16x16x8xf32>
    %104 = vector.shape_cast %103 : vector<16x16x8xf32> to vector<256x8xf32>
    %c0_115 = arith.constant 0 : index
    %c8_116 = arith.constant 8 : index
    %c0_117 = arith.constant 0 : index
    %105 = vector.load %arg16[%c0_115, %c8_116, %c0_117] : memref<18x25x32xf32, #tpu.memory_space<vmem>>, vector<16x16x8xf32>
    %106 = vector.shape_cast %105 : vector<16x16x8xf32> to vector<256x8xf32>
    %c0_118 = arith.constant 0 : index
    %c9_119 = arith.constant 9 : index
    %c0_120 = arith.constant 0 : index
    %107 = vector.load %arg16[%c0_118, %c9_119, %c0_120] : memref<18x25x32xf32, #tpu.memory_space<vmem>>, vector<16x16x8xf32>
    %108 = vector.shape_cast %107 : vector<16x16x8xf32> to vector<256x8xf32>
    %109 = tpu.concatenate %104, %106, %108 in 1 : vector<256x8xf32>, vector<256x8xf32>, vector<256x8xf32> -> vector<256x24xf32>
    %c0_121 = arith.constant 0 : index
    %c0_122 = arith.constant 0 : index
    %c0_123 = arith.constant 0 : index
    %110 = vector.load %arg9[%c0_121, %c0_122, %c0_123] : memref<3x24x32xf32, #tpu.memory_space<vmem>>, vector<1x24x32xf32>
    %111 = vector.shape_cast %110 : vector<1x24x32xf32> to vector<24x32xf32>
    %cst_124 = arith.constant dense<0.000000e+00> : vector<256x32xf32>
    %112 = tpu.matmul %109, %111, %cst_124 {dimension_numbers = #tpu.dot_dimension_numbers<[1], [0], [0], [1], [0, 0, 1, 1], [], []>} : vector<256x24xf32>, vector<24x32xf32>, vector<256x32xf32> -> vector<256x32xf32>
    %c1_125 = arith.constant 1 : index
    %c7_126 = arith.constant 7 : index
    %c0_127 = arith.constant 0 : index
    %113 = vector.load %arg16[%c1_125, %c7_126, %c0_127] : memref<18x25x32xf32, #tpu.memory_space<vmem>>, vector<16x16x8xf32>
    %114 = vector.shape_cast %113 : vector<16x16x8xf32> to vector<256x8xf32>
    %c1_128 = arith.constant 1 : index
    %c8_129 = arith.constant 8 : index
    %c0_130 = arith.constant 0 : index
    %115 = vector.load %arg16[%c1_128, %c8_129, %c0_130] : memref<18x25x32xf32, #tpu.memory_space<vmem>>, vector<16x16x8xf32>
    %116 = vector.shape_cast %115 : vector<16x16x8xf32> to vector<256x8xf32>
    %c1_131 = arith.constant 1 : index
    %c9_132 = arith.constant 9 : index
    %c0_133 = arith.constant 0 : index
    %117 = vector.load %arg16[%c1_131, %c9_132, %c0_133] : memref<18x25x32xf32, #tpu.memory_space<vmem>>, vector<16x16x8xf32>
    %118 = vector.shape_cast %117 : vector<16x16x8xf32> to vector<256x8xf32>
    %119 = tpu.concatenate %114, %116, %118 in 1 : vector<256x8xf32>, vector<256x8xf32>, vector<256x8xf32> -> vector<256x24xf32>
    %c1_134 = arith.constant 1 : index
    %c0_135 = arith.constant 0 : index
    %c0_136 = arith.constant 0 : index
    %120 = vector.load %arg9[%c1_134, %c0_135, %c0_136] : memref<3x24x32xf32, #tpu.memory_space<vmem>>, vector<1x24x32xf32>
    %121 = vector.shape_cast %120 : vector<1x24x32xf32> to vector<24x32xf32>
    %cst_137 = arith.constant dense<0.000000e+00> : vector<256x32xf32>
    %122 = tpu.matmul %119, %121, %cst_137 {dimension_numbers = #tpu.dot_dimension_numbers<[1], [0], [0], [1], [0, 0, 1, 1], [], []>} : vector<256x24xf32>, vector<24x32xf32>, vector<256x32xf32> -> vector<256x32xf32>
    %123 = arith.addf %112, %122 : vector<256x32xf32>
    %c2_138 = arith.constant 2 : index
    %c7_139 = arith.constant 7 : index
    %c0_140 = arith.constant 0 : index
    %124 = vector.load %arg16[%c2_138, %c7_139, %c0_140] : memref<18x25x32xf32, #tpu.memory_space<vmem>>, vector<16x16x8xf32>
    %125 = vector.shape_cast %124 : vector<16x16x8xf32> to vector<256x8xf32>
    %c2_141 = arith.constant 2 : index
    %c8_142 = arith.constant 8 : index
    %c0_143 = arith.constant 0 : index
    %126 = vector.load %arg16[%c2_141, %c8_142, %c0_143] : memref<18x25x32xf32, #tpu.memory_space<vmem>>, vector<16x16x8xf32>
    %127 = vector.shape_cast %126 : vector<16x16x8xf32> to vector<256x8xf32>
    %c2_144 = arith.constant 2 : index
    %c9_145 = arith.constant 9 : index
    %c0_146 = arith.constant 0 : index
    %128 = vector.load %arg16[%c2_144, %c9_145, %c0_146] : memref<18x25x32xf32, #tpu.memory_space<vmem>>, vector<16x16x8xf32>
    %129 = vector.shape_cast %128 : vector<16x16x8xf32> to vector<256x8xf32>
    %130 = tpu.concatenate %125, %127, %129 in 1 : vector<256x8xf32>, vector<256x8xf32>, vector<256x8xf32> -> vector<256x24xf32>
    %c2_147 = arith.constant 2 : index
    %c0_148 = arith.constant 0 : index
    %c0_149 = arith.constant 0 : index
    %131 = vector.load %arg9[%c2_147, %c0_148, %c0_149] : memref<3x24x32xf32, #tpu.memory_space<vmem>>, vector<1x24x32xf32>
    %132 = vector.shape_cast %131 : vector<1x24x32xf32> to vector<24x32xf32>
    %cst_150 = arith.constant dense<0.000000e+00> : vector<256x32xf32>
    %133 = tpu.matmul %130, %132, %cst_150 {dimension_numbers = #tpu.dot_dimension_numbers<[1], [0], [0], [1], [0, 0, 1, 1], [], []>} : vector<256x24xf32>, vector<24x32xf32>, vector<256x32xf32> -> vector<256x32xf32>
    %134 = arith.addf %123, %133 : vector<256x32xf32>
    %c0_151 = arith.constant 0 : index
    %c0_152 = arith.constant 0 : index
    %135 = vector.load %arg10[%c0_151, %c0_152] : memref<1x32xf32, #tpu.memory_space<vmem>>, vector<1x32xf32>
    %136 = vector.broadcast %135 : vector<1x32xf32> to vector<256x32xf32>
    %137 = arith.addf %134, %136 : vector<256x32xf32>
    %cst_153 = arith.constant 0.000000e+00 : f32
    %138 = vector.broadcast %cst_153 : f32 to vector<256x32xf32>
    %139 = arith.maximumf %137, %138 : vector<256x32xf32>
    %140 = vector.shape_cast %139 : vector<256x32xf32> to vector<16x16x32xf32>
    %c1_154 = arith.constant 1 : index
    %c8_155 = arith.constant 8 : index
    %c0_156 = arith.constant 0 : index
    %141 = vector.load %arg16[%c1_154, %c8_155, %c0_156] : memref<18x25x32xf32, #tpu.memory_space<vmem>>, vector<16x16x32xf32>
    tpu.vector_store %arg16[%c1_154, %c8_155, %c0_156], %140 {strides = array<i32>} : memref<18x25x32xf32, #tpu.memory_space<vmem>>, vector<16x16x32xf32>,
    %c0_157 = arith.constant 0 : index
    %c7_158 = arith.constant 7 : index
    %c0_159 = arith.constant 0 : index
    %142 = vector.load %arg16[%c0_157, %c7_158, %c0_159] : memref<18x25x32xf32, #tpu.memory_space<vmem>>, vector<16x16x32xf32>
    %143 = vector.shape_cast %142 : vector<16x16x32xf32> to vector<256x32xf32>
    %c0_160 = arith.constant 0 : index
    %c8_161 = arith.constant 8 : index
    %c0_162 = arith.constant 0 : index
    %144 = vector.load %arg16[%c0_160, %c8_161, %c0_162] : memref<18x25x32xf32, #tpu.memory_space<vmem>>, vector<16x16x32xf32>
    %145 = vector.shape_cast %144 : vector<16x16x32xf32> to vector<256x32xf32>
    %c0_163 = arith.constant 0 : index
    %c9_164 = arith.constant 9 : index
    %c0_165 = arith.constant 0 : index
    %146 = vector.load %arg16[%c0_163, %c9_164, %c0_165] : memref<18x25x32xf32, #tpu.memory_space<vmem>>, vector<16x16x32xf32>
    %147 = vector.shape_cast %146 : vector<16x16x32xf32> to vector<256x32xf32>
    %148 = tpu.concatenate %143, %145, %147 in 1 : vector<256x32xf32>, vector<256x32xf32>, vector<256x32xf32> -> vector<256x96xf32>
    %c0_166 = arith.constant 0 : index
    %c0_167 = arith.constant 0 : index
    %c0_168 = arith.constant 0 : index
    %149 = vector.load %arg11[%c0_166, %c0_167, %c0_168] : memref<3x96x4xf32, #tpu.memory_space<vmem>>, vector<1x96x4xf32>
    %150 = vector.shape_cast %149 : vector<1x96x4xf32> to vector<96x4xf32>
    %cst_169 = arith.constant dense<0.000000e+00> : vector<256x4xf32>
    %151 = tpu.matmul %148, %150, %cst_169 {dimension_numbers = #tpu.dot_dimension_numbers<[1], [0], [0], [1], [0, 0, 1, 1], [], []>} : vector<256x96xf32>, vector<96x4xf32>, vector<256x4xf32> -> vector<256x4xf32>
    %c1_170 = arith.constant 1 : index
    %c7_171 = arith.constant 7 : index
    %c0_172 = arith.constant 0 : index
    %152 = vector.load %arg16[%c1_170, %c7_171, %c0_172] : memref<18x25x32xf32, #tpu.memory_space<vmem>>, vector<16x16x32xf32>
    %153 = vector.shape_cast %152 : vector<16x16x32xf32> to vector<256x32xf32>
    %c1_173 = arith.constant 1 : index
    %c8_174 = arith.constant 8 : index
    %c0_175 = arith.constant 0 : index
    %154 = vector.load %arg16[%c1_173, %c8_174, %c0_175] : memref<18x25x32xf32, #tpu.memory_space<vmem>>, vector<16x16x32xf32>
    %155 = vector.shape_cast %154 : vector<16x16x32xf32> to vector<256x32xf32>
    %c1_176 = arith.constant 1 : index
    %c9_177 = arith.constant 9 : index
    %c0_178 = arith.constant 0 : index
    %156 = vector.load %arg16[%c1_176, %c9_177, %c0_178] : memref<18x25x32xf32, #tpu.memory_space<vmem>>, vector<16x16x32xf32>
    %157 = vector.shape_cast %156 : vector<16x16x32xf32> to vector<256x32xf32>
    %158 = tpu.concatenate %153, %155, %157 in 1 : vector<256x32xf32>, vector<256x32xf32>, vector<256x32xf32> -> vector<256x96xf32>
    %c1_179 = arith.constant 1 : index
    %c0_180 = arith.constant 0 : index
    %c0_181 = arith.constant 0 : index
    %159 = vector.load %arg11[%c1_179, %c0_180, %c0_181] : memref<3x96x4xf32, #tpu.memory_space<vmem>>, vector<1x96x4xf32>
    %160 = vector.shape_cast %159 : vector<1x96x4xf32> to vector<96x4xf32>
    %cst_182 = arith.constant dense<0.000000e+00> : vector<256x4xf32>
    %161 = tpu.matmul %158, %160, %cst_182 {dimension_numbers = #tpu.dot_dimension_numbers<[1], [0], [0], [1], [0, 0, 1, 1], [], []>} : vector<256x96xf32>, vector<96x4xf32>, vector<256x4xf32> -> vector<256x4xf32>
    %162 = arith.addf %151, %161 : vector<256x4xf32>
    %c2_183 = arith.constant 2 : index
    %c7_184 = arith.constant 7 : index
    %c0_185 = arith.constant 0 : index
    %163 = vector.load %arg16[%c2_183, %c7_184, %c0_185] : memref<18x25x32xf32, #tpu.memory_space<vmem>>, vector<16x16x32xf32>
    %164 = vector.shape_cast %163 : vector<16x16x32xf32> to vector<256x32xf32>
    %c2_186 = arith.constant 2 : index
    %c8_187 = arith.constant 8 : index
    %c0_188 = arith.constant 0 : index
    %165 = vector.load %arg16[%c2_186, %c8_187, %c0_188] : memref<18x25x32xf32, #tpu.memory_space<vmem>>, vector<16x16x32xf32>
    %166 = vector.shape_cast %165 : vector<16x16x32xf32> to vector<256x32xf32>
    %c2_189 = arith.constant 2 : index
    %c9_190 = arith.constant 9 : index
    %c0_191 = arith.constant 0 : index
    %167 = vector.load %arg16[%c2_189, %c9_190, %c0_191] : memref<18x25x32xf32, #tpu.memory_space<vmem>>, vector<16x16x32xf32>
    %168 = vector.shape_cast %167 : vector<16x16x32xf32> to vector<256x32xf32>
    %169 = tpu.concatenate %164, %166, %168 in 1 : vector<256x32xf32>, vector<256x32xf32>, vector<256x32xf32> -> vector<256x96xf32>
    %c2_192 = arith.constant 2 : index
    %c0_193 = arith.constant 0 : index
    %c0_194 = arith.constant 0 : index
    %170 = vector.load %arg11[%c2_192, %c0_193, %c0_194] : memref<3x96x4xf32, #tpu.memory_space<vmem>>, vector<1x96x4xf32>
    %171 = vector.shape_cast %170 : vector<1x96x4xf32> to vector<96x4xf32>
    %cst_195 = arith.constant dense<0.000000e+00> : vector<256x4xf32>
    %172 = tpu.matmul %169, %171, %cst_195 {dimension_numbers = #tpu.dot_dimension_numbers<[1], [0], [0], [1], [0, 0, 1, 1], [], []>} : vector<256x96xf32>, vector<96x4xf32>, vector<256x4xf32> -> vector<256x4xf32>
    %173 = arith.addf %162, %172 : vector<256x4xf32>
    %c0_196 = arith.constant 0 : index
    %c0_197 = arith.constant 0 : index
    %174 = vector.load %arg12[%c0_196, %c0_197] : memref<1x4xf32, #tpu.memory_space<vmem>>, vector<1x4xf32>
    %175 = vector.broadcast %174 : vector<1x4xf32> to vector<256x4xf32>
    %176 = arith.addf %173, %175 : vector<256x4xf32>
    %177 = math.tanh %176 : vector<256x4xf32>
    %178 = vector.shape_cast %177 : vector<256x4xf32> to vector<16x16x4xf32>
    %c0_198 = arith.constant 0 : index
    %c0_199 = arith.constant 0 : index
    %c0_200 = arith.constant 0 : index
    %c0_201 = arith.constant 0 : index
    %179 = vector.load %arg13[%c0_198, %c0_199, %c0_200, %c0_201] : memref<1x16x16x4xf32, #tpu.memory_space<vmem>>, vector<1x16x16x4xf32>
    %180 = vector.shape_cast %179 : vector<1x16x16x4xf32> to vector<16x16x4xf32>
    %181 = vector.shape_cast %178 : vector<16x16x4xf32> to vector<1x16x16x4xf32>
    tpu.vector_store %arg13[%c0_198, %c0_199, %c0_200, %c0_201], %181 {strides = array<i32>} : memref<1x16x16x4xf32, #tpu.memory_space<vmem>>, vector<1x16x16x4xf32>,
    %182 = vector.shape_cast %89 : vector<256x8xf32> to vector<16x16x8xf32>
    %c0_202 = arith.constant 0 : index
    %c0_203 = arith.constant 0 : index
    %c0_204 = arith.constant 0 : index
    %c0_205 = arith.constant 0 : index
    %183 = vector.load %arg14[%c0_202, %c0_203, %c0_204, %c0_205] : memref<1x16x16x8xf32, #tpu.memory_space<vmem>>, vector<1x16x16x8xf32>
    %184 = vector.shape_cast %183 : vector<1x16x16x8xf32> to vector<16x16x8xf32>
    %185 = vector.shape_cast %182 : vector<16x16x8xf32> to vector<1x16x16x8xf32>
    tpu.vector_store %arg14[%c0_202, %c0_203, %c0_204, %c0_205], %185 {strides = array<i32>} : memref<1x16x16x8xf32, #tpu.memory_space<vmem>>, vector<1x16x16x8xf32>,
    %186 = vector.shape_cast %92 : vector<256x8xf32> to vector<16x16x8xf32>
    %c0_206 = arith.constant 0 : index
    %c0_207 = arith.constant 0 : index
    %c0_208 = arith.constant 0 : index
    %c0_209 = arith.constant 0 : index
    %187 = vector.load %arg15[%c0_206, %c0_207, %c0_208, %c0_209] : memref<1x16x16x8xf32, #tpu.memory_space<vmem>>, vector<1x16x16x8xf32>
    %188 = vector.shape_cast %187 : vector<1x16x16x8xf32> to vector<16x16x8xf32>
    %189 = vector.shape_cast %186 : vector<16x16x8xf32> to vector<1x16x16x8xf32>
    tpu.vector_store %arg15[%c0_206, %c0_207, %c0_208, %c0_209], %189 {strides = array<i32>} : memref<1x16x16x8xf32, #tpu.memory_space<vmem>>, vector<1x16x16x8xf32>,
    return
  }
  func.func @transform_0(%arg0: i32) -> (i32, i32, i32, i32) {
    %c0_i32 = arith.constant 0 : i32
    %c0_i32_0 = arith.constant 0 : i32
    %c0_i32_1 = arith.constant 0 : i32
    %c0_i32_2 = arith.constant 0 : i32
    return %arg0, %c0_i32, %c0_i32_0, %c0_i32_1 : i32, i32, i32, i32
  }
  func.func @transform_1(%arg0: i32) -> (i32, i32, i32, i32) {
    %c0_i32 = arith.constant 0 : i32
    %c0_i32_0 = arith.constant 0 : i32
    %c0_i32_1 = arith.constant 0 : i32
    %c0_i32_2 = arith.constant 0 : i32
    return %arg0, %c0_i32, %c0_i32_0, %c0_i32_1 : i32, i32, i32, i32
  }
  func.func @transform_2(%arg0: i32) -> (i32, i32, i32) {
    %c0_i32 = arith.constant 0 : i32
    %c0_i32_0 = arith.constant 0 : i32
    %c0_i32_1 = arith.constant 0 : i32
    %c0_i32_2 = arith.constant 0 : i32
    return %c0_i32, %c0_i32_0, %c0_i32_1 : i32, i32, i32
  }
  func.func @transform_3(%arg0: i32) -> (i32, i32) {
    %c0_i32 = arith.constant 0 : i32
    %c0_i32_0 = arith.constant 0 : i32
    %c0_i32_1 = arith.constant 0 : i32
    return %c0_i32, %c0_i32_0 : i32, i32
  }
  func.func @transform_4(%arg0: i32) -> (i32, i32, i32) {
    %c0_i32 = arith.constant 0 : i32
    %c0_i32_0 = arith.constant 0 : i32
    %c0_i32_1 = arith.constant 0 : i32
    %c0_i32_2 = arith.constant 0 : i32
    return %c0_i32, %c0_i32_0, %c0_i32_1 : i32, i32, i32
  }
  func.func @transform_5(%arg0: i32) -> (i32, i32) {
    %c0_i32 = arith.constant 0 : i32
    %c0_i32_0 = arith.constant 0 : i32
    %c0_i32_1 = arith.constant 0 : i32
    return %c0_i32, %c0_i32_0 : i32, i32
  }
  func.func @transform_6(%arg0: i32) -> (i32, i32, i32) {
    %c0_i32 = arith.constant 0 : i32
    %c0_i32_0 = arith.constant 0 : i32
    %c0_i32_1 = arith.constant 0 : i32
    %c0_i32_2 = arith.constant 0 : i32
    return %c0_i32, %c0_i32_0, %c0_i32_1 : i32, i32, i32
  }
  func.func @transform_7(%arg0: i32) -> (i32, i32) {
    %c0_i32 = arith.constant 0 : i32
    %c0_i32_0 = arith.constant 0 : i32
    %c0_i32_1 = arith.constant 0 : i32
    return %c0_i32, %c0_i32_0 : i32, i32
  }
  func.func @transform_8(%arg0: i32) -> (i32, i32, i32) {
    %c0_i32 = arith.constant 0 : i32
    %c0_i32_0 = arith.constant 0 : i32
    %c0_i32_1 = arith.constant 0 : i32
    %c0_i32_2 = arith.constant 0 : i32
    return %c0_i32, %c0_i32_0, %c0_i32_1 : i32, i32, i32
  }
  func.func @transform_9(%arg0: i32) -> (i32, i32) {
    %c0_i32 = arith.constant 0 : i32
    %c0_i32_0 = arith.constant 0 : i32
    %c0_i32_1 = arith.constant 0 : i32
    return %c0_i32, %c0_i32_0 : i32, i32
  }
  func.func @transform_10(%arg0: i32) -> (i32, i32, i32) {
    %c0_i32 = arith.constant 0 : i32
    %c0_i32_0 = arith.constant 0 : i32
    %c0_i32_1 = arith.constant 0 : i32
    %c0_i32_2 = arith.constant 0 : i32
    return %c0_i32, %c0_i32_0, %c0_i32_1 : i32, i32, i32
  }
  func.func @transform_11(%arg0: i32) -> (i32, i32) {
    %c0_i32 = arith.constant 0 : i32
    %c0_i32_0 = arith.constant 0 : i32
    %c0_i32_1 = arith.constant 0 : i32
    return %c0_i32, %c0_i32_0 : i32, i32
  }
  func.func @transform_12(%arg0: i32) -> (i32, i32, i32, i32) {
    %c0_i32 = arith.constant 0 : i32
    %c0_i32_0 = arith.constant 0 : i32
    %c0_i32_1 = arith.constant 0 : i32
    %c0_i32_2 = arith.constant 0 : i32
    return %arg0, %c0_i32, %c0_i32_0, %c0_i32_1 : i32, i32, i32, i32
  }
  func.func @transform_13(%arg0: i32) -> (i32, i32, i32, i32) {
    %c0_i32 = arith.constant 0 : i32
    %c0_i32_0 = arith.constant 0 : i32
    %c0_i32_1 = arith.constant 0 : i32
    %c0_i32_2 = arith.constant 0 : i32
    return %arg0, %c0_i32, %c0_i32_0, %c0_i32_1 : i32, i32, i32, i32
  }
  func.func @transform_14(%arg0: i32) -> (i32, i32, i32, i32) {
    %c0_i32 = arith.constant 0 : i32
    %c0_i32_0 = arith.constant 0 : i32
    %c0_i32_1 = arith.constant 0 : i32
    %c0_i32_2 = arith.constant 0 : i32
    return %arg0, %c0_i32, %c0_i32_0, %c0_i32_1 : i32, i32, i32, i32
  }
}

</mosaic_0001>

<bundles_post_ra>
// kernel: vae_forward.1
= control target key start
LH: loop header
LB: loop body
LE: loop exit
PB: predicated region body
PF: predicated region fallthrough
CT: control target
= control target key end

     0   :  { %s10430_s29 = smov 0   ;;  %s17396_s0 = inlined_call_operand.vmem [shape: f32[2,16,16,4], index: 0, kind: input, shape index: {}]   ;;  %s17397_s1 = inlined_call_operand.vmem [shape: f32[2,16,16,8], index: 1, kind: input, shape index: {}]   ;;  %s17398_s2 = inlined_call_operand.vmem [shape: f32[3,12,32], index: 2, kind: input, shape index: {}]   ;;  %s17399_s3 = inlined_call_operand.vmem [shape: f32[1,32], index: 3, kind: input, shape index: {}]   ;;  %s17400_s4 = inlined_call_operand.vmem [shape: f32[3,96,8], index: 4, kind: input, shape index: {}]   ;;  %s17401_s5 = inlined_call_operand.vmem [shape: f32[1,8], index: 5, kind: input, shape index: {}]   ;;  %s17402_s6 = inlined_call_operand.vmem [shape: f32[3,96,8], index: 6, kind: input, shape index: {}]   ;;  %s17403_s7 = inlined_call_operand.vmem [shape: f32[1,8], index: 7, kind: input, shape index: {}]   ;;  %s17404_s8 = inlined_call_operand.vmem [shape: f32[3,24,32], index: 8, kind: input, shape index: {}]   ;;  %s17405_s9 = inlined_call_operand.vmem [shape: f32[1,32], index: 9, kind: input, shape index: {}]   ;;  %s17406_s10 = inlined_call_operand.vmem [shape: f32[3,96,4], index: 10, kind: input, shape index: {}]   ;;  %s17407_s11 = inlined_call_operand.vmem [shape: f32[1,4], index: 11, kind: input, shape index: {}]   ;;  %s17408_s12 = inlined_call_operand.vmem [shape: f32[2,16,16,4], index: 12, kind: output, shape index: {0}]   ;;  %s17409_s13 = inlined_call_operand.vmem [shape: f32[2,16,16,8], index: 13, kind: output, shape index: {1}]   ;;  %s17410_s14 = inlined_call_operand.vmem [shape: f32[2,16,16,8], index: 14, kind: output, shape index: {2}]  }
   0x1 LB: > { %s9595_s30 = sadd.s32 4294967295, %s10347_s29   ;;  %p9599_p0 = scmp.ge.s32.totalorder %s10347_s29, 1  ;;  %s10347_s29 = sphi %s10430_s29, %s25_s29  }
   0x2   : > { %p427_p1 = scmp.lt.s32.totalorder %s10347_s29, 3 }
   0x4   : > { %p428_p2 = pnand %p9599_p0, %p427_p1 }
   0x6   : > { %431 = sbr.rel (%p428_p2) target bundleno = 3399 (0xd47), region = 68 }
   0xb   : > { %vm513_vm0 = vcmask 261120   ;;  %v10349_v0 = vmov 0.0   ;;  %s10350_s15 = smov 4   ;;  %p488_p3 = scmp.lt.s32.totalorder %s9595_s30, 1  ;;  %vm620_vm1 = vcmask 31744   ;;  %vm517_vm2 = vcmask 253952  }
   0xc   : > { %515 = vst.msk [vmem:[#allocation2 + $0x8] sm:$0xff] %vm513_vm0, %v10349_v0  ;;  %s10351_s20 = smov 8   ;;  %vm1588_vm3 = vcmask 1043456   ;;  %vm1037_vm4 = vcmask 64512   ;;  %vm1491_vm5 = vcmask 97280   ;;  %s10353_s23 = smov 64  }
   0xd   : > { %514 = vst.msk [vmem:[#allocation2] sm:$0xff] %vm513_vm0, %v10349_v0  ;;  %s17867_s30 = smov (!%p488_p3, %s9595_s30), 1  ;;  %vm3065_vm6 = vcmask 523264   ;;  %vm3551_vm7 = vcmask 785408   ;;  %s10354_s17 = smov 16   ;;  %vm5717_vm8 = vcmask 130048  }
   0xe   : > { %516 = vst.msk [vmem:[#allocation2 + $0x10] sm:$0xff] %vm513_vm0, %v10349_v0  ;;  %s10536_s16 = sshll.u32 %s17867_s30, 8  ;;  %vm6173_vm9 = vcmask 195584  }
   0xf   : > { %519 = vst.msk [vmem:[#allocation2 + $0x20] sm:$0xff] %vm513_vm0, %v10349_v0  ;;  %s10548_s19 = scalar_lea.vmem %s17396_s0, %s10536_s16  ;;  %s13913_s30 = scalar_lea.vmem %s17410_s14, %s10536_s16 }
  0x10   : > { %520 = vst.msk [vmem:[#allocation2 + $0x28] sm:$0xff] %vm513_vm0, %v10349_v0  ;;  %v589_v3 = vld [vmem:[%s10548_s19 + $0x10] sm:$0xff]  ;;  %v587_v4 = vld [vmem:[%s10548_s19] sm:$0xff]  ;;  %v590_v5 = vld [vmem:[%s10548_s19 + $0x18] sm:$0xff]  ;;  %s14143_s18 = scalar_lea.vmem %s17397_s1, %s10536_s16  ;;  %s14172_s26 = scalar_lea.vmem %s17409_s13, %s10536_s16 }
  0x11   : > { %521 = vst.msk [vmem:[#allocation2 + $0x30] sm:$0xff] %vm513_vm0, %v10349_v0  ;;  %v588_v6 = vld [vmem:[%s10548_s19 + $0x8] sm:$0xff]  ;;  %v591_v7 = vld [vmem:[%s10548_s19 + $0x20] sm:$0xff]  ;;  %v593_v8 = vld [vmem:[%s10548_s19 + $0x30] sm:$0xff]  ;;  %s16914_s22 = scalar_lea.vmem %s17408_s12, %s10536_s16 }
  0x12   : > { %523 = vst.msk [vmem:[#allocation2 + $0x40] sm:$0xff] %vm513_vm0, %v10349_v0  ;;  %v592_v9 = vld [vmem:[%s10548_s19 + $0x28] sm:$0xff]  ;;  %v594_v10 = vld [vmem:[%s10548_s19 + $0x38] sm:$0xff]  ;;  %v595_v12 = vld [vmem:[%s10548_s19 + $0x40] sm:$0xff] }
  0x13   : > { %v685_v1 = vld [vmem:[#allocation2 + $0x8] sm:$0xff]  ;;  %524 = vst.msk [vmem:[#allocation2 + $0x48] sm:$0xff] %vm513_vm0, %v10349_v0  ;;  %v597_v14 = vld [vmem:[%s10548_s19 + $0x50] sm:$0xff]  ;;  %v599_v16 = vld [vmem:[%s10548_s19 + $0x60] sm:$0xff] }
  0x14   : > { %781 = vrot.lane.b32.xlu0 %v685_v1, %s10350_s15  ;;  %525 = vst.msk [vmem:[#allocation2 + $0x50] sm:$0xff] %vm513_vm0, %v10349_v0  ;;  %v596_v11 = vld [vmem:[%s10548_s19 + $0x48] sm:$0xff]  ;;  %v598_v17 = vld [vmem:[%s10548_s19 + $0x58] sm:$0xff]  ;;  %v601_v21 = vld [vmem:[%s10548_s19 + $0x70] sm:$0xff] }
  0x15   : > { %527 = vst.msk [vmem:[#allocation2 + $0x60] sm:$0xff] %vm513_vm0, %v10349_v0  ;;  %v686_v2 = vld [vmem:[#allocation2 + $0x10] sm:$0xff]  ;;  %v600_v18 = vld [vmem:[%s10548_s19 + $0x68] sm:$0xff]  ;;  %v602_v20 = vld [vmem:[%s10548_s19 + $0x78] sm:$0xff] }
  0x16   : > { %528 = vst.msk [vmem:[#allocation2 + $0x68] sm:$0xff] %vm513_vm0, %v10349_v0  ;;  %v603_v23 = vld [vmem:[%s10548_s19 + $0x80] sm:$0xff]  ;;  %v605_v25 = vld [vmem:[%s10548_s19 + $0x90] sm:$0xff]  ;;  %v604_v26 = vld [vmem:[%s10548_s19 + $0x88] sm:$0xff] }
  0x17   : > { %529 = vst.msk [vmem:[#allocation2 + $0x70] sm:$0xff] %vm513_vm0, %v10349_v0  ;;  %v606_v28 = vld [vmem:[%s10548_s19 + $0x98] sm:$0xff]  ;;  %v608_v31 = vld [vmem:[%s10548_s19 + $0xa8] sm:$0xff]  ;;  %v607_v32 = vld [vmem:[%s10548_s19 + $0xa0] sm:$0xff] }
  0x18   : > { %531 = vst.msk [vmem:[#allocation2 + $0x80] sm:$0xff] %vm513_vm0, %v10349_v0  ;;  %v609_v34 = vld [vmem:[%s10548_s19 + $0xb0] sm:$0xff]  ;;  %v611_v37 = vld [vmem:[%s10548_s19 + $0xc0] sm:$0xff]  ;;  %v610_v38 = vld [vmem:[%s10548_s19 + $0xb8] sm:$0xff] }
  0x19   : > { %532 = vst.msk [vmem:[#allocation2 + $0x88] sm:$0xff] %vm513_vm0, %v10349_v0  ;;  %v612_v40 = vld [vmem:[%s10548_s19 + $0xc8] sm:$0xff]  ;;  %v614_v43 = vld [vmem:[%s10548_s19 + $0xd8] sm:$0xff]  ;;  %v613_v44 = vld [vmem:[%s10548_s19 + $0xd0] sm:$0xff] }
  0x1a   : > { %533 = vst.msk [vmem:[#allocation2 + $0x90] sm:$0xff] %vm513_vm0, %v10349_v0  ;;  %v615_v46 = vld [vmem:[%s10548_s19 + $0xe0] sm:$0xff]  ;;  %v616_v49 = vld [vmem:[%s10548_s19 + $0xe8] sm:$0xff] }
  0x1b   : > { %535 = vst.msk [vmem:[#allocation2 + $0xa0] sm:$0xff] %vm513_vm0, %v10349_v0  ;;  %v717_v63 = vld [vmem:[#allocation2 + $0x9] sm:$0xff] }
  0x1c   : > { %536 = vst.msk [vmem:[#allocation2 + $0xa8] sm:$0xff] %vm513_vm0, %v10349_v0  ;;  %783 = vrot.lane.b32.xlu0 %v686_v2, %s10350_s15 }
  0x1d   : > { %537 = vst.msk [vmem:[#allocation2 + $0xb0] sm:$0xff] %vm513_vm0, %v10349_v0 }
  0x1e   : > { %539 = vst.msk [vmem:[#allocation2 + $0xc0] sm:$0xff] %vm513_vm0, %v10349_v0 }
  0x1f   : > { %540 = vst.msk [vmem:[#allocation2 + $0xc8] sm:$0xff] %vm513_vm0, %v10349_v0 }
  0x20   : > { %541 = vst.msk [vmem:[#allocation2 + $0xd0] sm:$0xff] %vm513_vm0, %v10349_v0 }
  0x21   : > { %543 = vst.msk [vmem:[#allocation2 + $0xe0] sm:$0xff] %vm513_vm0, %v10349_v0 }
  0x22   : > { %544 = vst.msk [vmem:[#allocation2 + $0xe8] sm:$0xff] %vm513_vm0, %v10349_v0 }
  0x23   : > { %545 = vst.msk [vmem:[#allocation2 + $0xf0] sm:$0xff] %vm513_vm0, %v10349_v0 }
  0x24   : > { %547 = vst.msk [vmem:[#allocation2 + $0x100] sm:$0xff] %vm513_vm0, %v10349_v0 }
  0x25   : > { %548 = vst.msk [vmem:[#allocation2 + $0x108] sm:$0xff] %vm513_vm0, %v10349_v0 }
  0x26   : > { %549 = vst.msk [vmem:[#allocation2 + $0x110] sm:$0xff] %vm513_vm0, %v10349_v0 }
  0x27   : > { %551 = vst.msk [vmem:[#allocation2 + $0x120] sm:$0xff] %vm513_vm0, %v10349_v0 }
  0x28   : > { %552 = vst.msk [vmem:[#allocation2 + $0x128] sm:$0xff] %vm513_vm0, %v10349_v0 }
  0x29   : > { %553 = vst.msk [vmem:[#allocation2 + $0x130] sm:$0xff] %vm513_vm0, %v10349_v0 }
  0x2a   : > { %555 = vst.msk [vmem:[#allocation2 + $0x140] sm:$0xff] %vm513_vm0, %v10349_v0 }
  0x2b   : > { %556 = vst.msk [vmem:[#allocation2 + $0x148] sm:$0xff] %vm513_vm0, %v10349_v0 }
  0x2c   : > { %557 = vst.msk [vmem:[#allocation2 + $0x150] sm:$0xff] %vm513_vm0, %v10349_v0 }
  0x2d   : > { %559 = vst.msk [vmem:[#allocation2 + $0x160] sm:$0xff] %vm513_vm0, %v10349_v0 }
  0x2e   : > { %560 = vst.msk [vmem:[#allocation2 + $0x168] sm:$0xff] %vm513_vm0, %v10349_v0 }
  0x2f   : > { %561 = vst.msk [vmem:[#allocation2 + $0x170] sm:$0xff] %vm513_vm0, %v10349_v0 }
  0x30   : > { %563 = vst.msk [vmem:[#allocation2 + $0x180] sm:$0xff] %vm513_vm0, %v10349_v0 }
  0x31   : > { %564 = vst.msk [vmem:[#allocation2 + $0x188] sm:$0xff] %vm513_vm0, %v10349_v0 }
  0x32   : > { %565 = vst.msk [vmem:[#allocation2 + $0x190] sm:$0xff] %vm513_vm0, %v10349_v0 }
  0x33   : > { %567 = vst.msk [vmem:[#allocation2 + $0x1a0] sm:$0xff] %vm513_vm0, %v10349_v0 }
  0x34   : > { %568 = vst.msk [vmem:[#allocation2 + $0x1a8] sm:$0xff] %vm513_vm0, %v10349_v0 }
  0x35   : > { %569 = vst.msk [vmem:[#allocation2 + $0x1b0] sm:$0xff] %vm513_vm0, %v10349_v0 }
  0x36   : > { %571 = vst.msk [vmem:[#allocation2 + $0x1c0] sm:$0xff] %vm513_vm0, %v10349_v0 }
  0x37   : > { %572 = vst.msk [vmem:[#allocation2 + $0x1c8] sm:$0xff] %vm513_vm0, %v10349_v0 }
  0x38   : > { %573 = vst.msk [vmem:[#allocation2 + $0x1d0] sm:$0xff] %vm513_vm0, %v10349_v0 }
  0x39   : > { %575 = vst.msk [vmem:[#allocation2 + $0x1e0] sm:$0xff] %vm513_vm0, %v10349_v0 }
  0x3a   : > { %576 = vst.msk [vmem:[#allocation2 + $0x1e8] sm:$0xff] %vm513_vm0, %v10349_v0 }
  0x3b   : > { %577 = vst.msk [vmem:[#allocation2 + $0x1f0] sm:$0xff] %vm513_vm0, %v10349_v0 }
  0x3c   : > { %579 = vst.msk [vmem:[#allocation2 + $0x200] sm:$0xff] %vm513_vm0, %v10349_v0 }
  0x3d   : > { %580 = vst.msk [vmem:[#allocation2 + $0x208] sm:$0xff] %vm513_vm0, %v10349_v0 }
  0x3e   : > { %581 = vst.msk [vmem:[#allocation2 + $0x210] sm:$0xff] %vm513_vm0, %v10349_v0 }
  0x3f   : > { %583 = vst.msk [vmem:[#allocation2 + $0x220] sm:$0xff] %vm513_vm0, %v10349_v0 }
  0x40   : > { %584 = vst.msk [vmem:[#allocation2 + $0x228] sm:$0xff] %vm513_vm0, %v10349_v0 }
  0x41   : > { %585 = vst.msk [vmem:[#allocation2 + $0x230] sm:$0xff] %vm513_vm0, %v10349_v0 }
  0x42   : > { %623 = vst.msk [vmem:[#allocation2 + $0x48] sm:$0xff] %vm620_vm1, %v589_v3 }
  0x43   : > { %621 = vst.msk [vmem:[#allocation2 + $0x28] sm:$0xff] %vm620_vm1, %v587_v4 }
  0x44   : > { %624 = vst.msk [vmem:[#allocation2 + $0x50] sm:$0xff] %vm620_vm1, %v590_v5 }
  0x45   : > { %622 = vst.msk [vmem:[#allocation2 + $0x30] sm:$0xff] %vm620_vm1, %v588_v6 }
  0x46   : > { %625 = vst.msk [vmem:[#allocation2 + $0x68] sm:$0xff] %vm620_vm1, %v591_v7 }
  0x47   : > { %627 = vst.msk [vmem:[#allocation2 + $0x88] sm:$0xff] %vm620_vm1, %v593_v8 }
  0x48   : > { %626 = vst.msk [vmem:[#allocation2 + $0x70] sm:$0xff] %vm620_vm1, %v592_v9 }
  0x49   : > { %v10577_v13 = vld [vmem:[#allocation2 + $0x48] sm:$0xff]  ;;  %628 = vst.msk [vmem:[#allocation2 + $0x90] sm:$0xff] %vm620_vm1, %v594_v10 }
  0x4a   : > { %789 = vrot.lane.b32.xlu2 %v10577_v13, %s10350_s15  ;;  %v10583_v15 = vld [vmem:[#allocation2 + $0x28] sm:$0xff]  ;;  %630 = vst.msk [vmem:[#allocation2 + $0xb0] sm:$0xff] %vm620_vm1, %v596_v11 }
  0x4b   : > { %785 = vrot.lane.b32.xlu1 %v10583_v15, %s10350_s15  ;;  %629 = vst.msk [vmem:[#allocation2 + $0xa8] sm:$0xff] %vm620_vm1, %v595_v12  ;;  %v10601_v22 = vld [vmem:[#allocation2 + $0x50] sm:$0xff] }
  0x4c   : > { %631 = vst.msk [vmem:[#allocation2 + $0xc8] sm:$0xff] %vm620_vm1, %v597_v14  ;;  %v10605_v24 = vld [vmem:[#allocation2 + $0x30] sm:$0xff] }
  0x4d   : > { %v10593_v19 = vld [vmem:[#allocation2 + $0x68] sm:$0xff]  ;;  %633 = vst.msk [vmem:[#allocation2 + $0xe8] sm:$0xff] %vm620_vm1, %v599_v16 }
  0x4e   : > { %793 = vrot.lane.b32.xlu0 %v10593_v19, %s10350_s15  ;;  %632 = vst.msk [vmem:[#allocation2 + $0xd0] sm:$0xff] %vm620_vm1, %v598_v17  ;;  %v10624_v29 = vld [vmem:[#allocation2 + $0x88] sm:$0xff] }
  0x4f   : > { %634 = vst.msk [vmem:[#allocation2 + $0xf0] sm:$0xff] %vm620_vm1, %v600_v18  ;;  %v10626_v30 = vld [vmem:[#allocation2 + $0x70] sm:$0xff] }
  0x50   : > { %636 = vst.msk [vmem:[#allocation2 + $0x110] sm:$0xff] %vm620_vm1, %v602_v20  ;;  %v10616_v27 = vld [vmem:[#allocation2 + $0x90] sm:$0xff] }
  0x51   : > { %635 = vst.msk [vmem:[#allocation2 + $0x108] sm:$0xff] %vm620_vm1, %v601_v21  ;;  %v10642_v35 = vld [vmem:[#allocation2 + $0xb0] sm:$0xff] }
  0x52   : > { %791 = vrot.lane.b32.xlu2 %v10601_v22, %s10350_s15  ;;  %637 = vst.msk [vmem:[#allocation2 + $0x128] sm:$0xff] %vm620_vm1, %v603_v23  ;;  %v10644_v36 = vld [vmem:[#allocation2 + $0xa8] sm:$0xff] }
  0x53   : > { %787 = vrot.lane.b32.xlu1 %v10605_v24, %s10350_s15  ;;  %639 = vst.msk [vmem:[#allocation2 + $0x148] sm:$0xff] %vm620_vm1, %v605_v25  ;;  %v10634_v33 = vld [vmem:[#allocation2 + $0xc8] sm:$0xff] }
  0x54   : > { %638 = vst.msk [vmem:[#allocation2 + $0x130] sm:$0xff] %vm620_vm1, %v604_v26  ;;  %v10660_v41 = vld [vmem:[#allocation2 + $0xe8] sm:$0xff] }
  0x55   : > { %640 = vst.msk [vmem:[#allocation2 + $0x150] sm:$0xff] %vm620_vm1, %v606_v28  ;;  %v10662_v42 = vld [vmem:[#allocation2 + $0xd0] sm:$0xff] }
  0x56   : > { %799 = vrot.lane.b32.xlu0 %v10616_v27, %s10350_s15  ;;  %642 = vst.msk [vmem:[#allocation2 + $0x170] sm:$0xff] %vm620_vm1, %v608_v31  ;;  %v10652_v39 = vld [vmem:[#allocation2 + $0xf0] sm:$0xff] }
  0x57   : > { %641 = vst.msk [vmem:[#allocation2 + $0x168] sm:$0xff] %vm620_vm1, %v607_v32  ;;  %v10678_v47 = vld [vmem:[#allocation2 + $0x110] sm:$0xff] }
  0x58   : > { %643 = vst.msk [vmem:[#allocation2 + $0x188] sm:$0xff] %vm620_vm1, %v609_v34  ;;  %v10680_v48 = vld [vmem:[#allocation2 + $0x108] sm:$0xff] }
  0x59   : > { %645 = vst.msk [vmem:[#allocation2 + $0x1a8] sm:$0xff] %vm620_vm1, %v611_v37  ;;  %v10670_v45 = vld [vmem:[#allocation2 + $0x128] sm:$0xff] }
  0x5a   : > { %797 = vrot.lane.b32.xlu2 %v10624_v29, %s10350_s15  ;;  %644 = vst.msk [vmem:[#allocation2 + $0x190] sm:$0xff] %vm620_vm1, %v610_v38  ;;  %v10696_v51 = vld [vmem:[#allocation2 + $0x148] sm:$0xff] }
  0x5b   : > { %795 = vrot.lane.b32.xlu1 %v10626_v30, %s10350_s15  ;;  %646 = vst.msk [vmem:[#allocation2 + $0x1b0] sm:$0xff] %vm620_vm1, %v612_v40  ;;  %v10700_v52 = vld [vmem:[#allocation2 + $0x130] sm:$0xff] }
  0x5c   : > { %648 = vst.msk [vmem:[#allocation2 + $0x1d0] sm:$0xff] %vm620_vm1, %v614_v43  ;;  %v10687_v50 = vld [vmem:[#allocation2 + $0x150] sm:$0xff] }
  0x5d   : > { %647 = vst.msk [vmem:[#allocation2 + $0x1c8] sm:$0xff] %vm620_vm1, %v613_v44  ;;  %v10724_v54 = vld [vmem:[#allocation2 + $0x170] sm:$0xff] }
  0x5e   : > { %805 = vrot.lane.b32.xlu0 %v10634_v33, %s10350_s15  ;;  %649 = vst.msk [vmem:[#allocation2 + $0x1e8] sm:$0xff] %vm620_vm1, %v615_v46  ;;  %v10728_v55 = vld [vmem:[#allocation2 + $0x168] sm:$0xff] }
  0x5f   : > { %650 = vst.msk [vmem:[#allocation2 + $0x1f0] sm:$0xff] %vm620_vm1, %v616_v49  ;;  %v10712_v53 = vld [vmem:[#allocation2 + $0x188] sm:$0xff] }
  0x60   : > { %518 = vst.msk [vmem:[#allocation2 + $0x18] sm:$0x1] %vm517_vm2, %v10349_v0  ;;  %v10752_v57 = vld [vmem:[#allocation2 + $0x1a8] sm:$0xff] }
  0x61   : > { %522 = vst.msk [vmem:[#allocation2 + $0x38] sm:$0x1] %vm517_vm2, %v10349_v0  ;;  %v10754_v58 = vld [vmem:[#allocation2 + $0x190] sm:$0xff] }
  0x62   : > { %803 = vrot.lane.b32.xlu2 %v10642_v35, %s10350_s15  ;;  %526 = vst.msk [vmem:[#allocation2 + $0x58] sm:$0x1] %vm517_vm2, %v10349_v0  ;;  %v10740_v56 = vld [vmem:[#allocation2 + $0x1b0] sm:$0xff] }
  0x63   : > { %801 = vrot.lane.b32.xlu1 %v10644_v36, %s10350_s15  ;;  %530 = vst.msk [vmem:[#allocation2 + $0x78] sm:$0x1] %vm517_vm2, %v10349_v0  ;;  %v10764_v60 = vld [vmem:[#allocation2 + $0x1d0] sm:$0xff] }
  0x64   : > { %534 = vst.msk [vmem:[#allocation2 + $0x98] sm:$0x1] %vm517_vm2, %v10349_v0  ;;  %v10766_v61 = vld [vmem:[#allocation2 + $0x1c8] sm:$0xff] }
  0x65   : > { %538 = vst.msk [vmem:[#allocation2 + $0xb8] sm:$0x1] %vm517_vm2, %v10349_v0  ;;  %v10760_v59 = vld [vmem:[#allocation2 + $0x1e8] sm:$0xff] }
  0x66   : > { %811 = vrot.lane.b32.xlu0 %v10652_v39, %s10350_s15  ;;  %542 = vst.msk [vmem:[#allocation2 + $0xd8] sm:$0x1] %vm517_vm2, %v10349_v0  ;;  %v10778_v1 = vld [vmem:[#allocation2 + $0x49] sm:$0xff] }
  0x67   : > { %546 = vst.msk [vmem:[#allocation2 + $0xf8] sm:$0x1] %vm517_vm2, %v10349_v0  ;;  %v718_v62 = vld [vmem:[#allocation2 + $0x11] sm:$0xff]  ;;  %v10784_v3 = vld [vmem:[#allocation2 + $0x29] sm:$0xff] }
  0x68   : > { %550 = vst.msk [vmem:[#allocation2 + $0x118] sm:$0x1] %vm517_vm2, %v10349_v0  ;;  %v10782_v2 = vld [vmem:[#allocation2 + $0x31] sm:$0xff]  ;;  %v10796_v6 = vld [vmem:[#allocation2 + $0x69] sm:$0xff] }
  0x69   : > { %554 = vst.msk [vmem:[#allocation2 + $0x138] sm:$0x1] %vm517_vm2, %v10349_v0  ;;  %v10798_v7 = vld [vmem:[#allocation2 + $0x51] sm:$0xff]  ;;  %v10804_v8 = vld [vmem:[#allocation2 + $0xa9] sm:$0xff] }
  0x6a   : > { %809 = vrot.lane.b32.xlu2 %v10660_v41, %s10350_s15  ;;  %558 = vst.msk [vmem:[#allocation2 + $0x158] sm:$0x1] %vm517_vm2, %v10349_v0  ;;  %v10790_v4 = vld [vmem:[#allocation2 + $0x71] sm:$0xff]  ;;  %v10814_v12 = vld [vmem:[#allocation2 + $0x89] sm:$0xff] }
  0x6b   : > { %807 = vrot.lane.b32.xlu1 %v10662_v42, %s10350_s15  ;;  %562 = vst.msk [vmem:[#allocation2 + $0x178] sm:$0x1] %vm517_vm2, %v10349_v0  ;;  %v10812_v11 = vld [vmem:[#allocation2 + $0x91] sm:$0xff]  ;;  %v10828_v18 = vld [vmem:[#allocation2 + $0xc9] sm:$0xff] }
  0x6c   : > { %566 = vst.msk [vmem:[#allocation2 + $0x198] sm:$0x1] %vm517_vm2, %v10349_v0  ;;  %v10830_v20 = vld [vmem:[#allocation2 + $0xb1] sm:$0xff]  ;;  %v10836_v21 = vld [vmem:[#allocation2 + $0x109] sm:$0xff] }
  0x6d   : > { %570 = vst.msk [vmem:[#allocation2 + $0x1b8] sm:$0x1] %vm517_vm2, %v10349_v0  ;;  %v10820_v14 = vld [vmem:[#allocation2 + $0xd1] sm:$0xff]  ;;  %v10846_v28 = vld [vmem:[#allocation2 + $0xe9] sm:$0xff] }
  0x6e   : > { %817 = vrot.lane.b32.xlu0 %v10670_v45, %s10350_s15  ;;  %574 = vst.msk [vmem:[#allocation2 + $0x1d8] sm:$0x1] %vm517_vm2, %v10349_v0  ;;  %v10844_v26 = vld [vmem:[#allocation2 + $0xf1] sm:$0xff]  ;;  %v10862_v38 = vld [vmem:[#allocation2 + $0x129] sm:$0xff] }
  0x6f   : > { %578 = vst.msk [vmem:[#allocation2 + $0x1f8] sm:$0x1] %vm517_vm2, %v10349_v0  ;;  %v10864_v40 = vld [vmem:[#allocation2 + $0x111] sm:$0xff]  ;;  %v10872_v44 = vld [vmem:[#allocation2 + $0x169] sm:$0xff] }
  0x70   : > { %582 = vst.msk [vmem:[#allocation2 + $0x218] sm:$0x1] %vm517_vm2, %v10349_v0  ;;  %v10854_v32 = vld [vmem:[#allocation2 + $0x131] sm:$0xff] }
  0x71   : > { %586 = vst.msk [vmem:[#allocation2 + $0x238] sm:$0x1] %vm517_vm2, %v10349_v0  ;;  %v10773_v0 = vld [vmem:[#allocation2 + $0x1f0] sm:$0xff] }
  0x72   : > { %815 = vrot.lane.b32.xlu2 %v10678_v47, %s10350_s15  ;;  %17468 = vst [vmem:[#allocation3_spill] sm:$0xff] %v10836_v21 }
  0x73   : > { %813 = vrot.lane.b32.xlu1 %v10680_v48, %s10350_s15  ;;  %17469 = vst [vmem:[#allocation4_spill] sm:$0xff] %v10844_v26 }
  0x74   : > { %17470 = vst [vmem:[#allocation5_spill] sm:$0xff] %v10854_v32 }
  0x75   : > { %17472 = vst [vmem:[#allocation7_spill] sm:$0xff] %v10862_v38 }
  0x76   : > { %823 = vrot.lane.b32.xlu0 %v10687_v50, %s10350_s15  ;;  %17473 = vst [vmem:[#allocation8_spill] sm:$0xff] %v10864_v40 }
  0x77   : > { %17474 = vst [vmem:[#allocation9_spill] sm:$0xff] %v10872_v44 }
  0x7a   : > { %821 = vrot.lane.b32.xlu2 %v10696_v51, %s10350_s15 }
  0x7b   : > { %819 = vrot.lane.b32.xlu1 %v10700_v52, %s10350_s15 }
  0x7e   : > { %829 = vrot.lane.b32.xlu0 %v10712_v53, %s10350_s15 }
  0x82   : > { %827 = vrot.lane.b32.xlu2 %v10724_v54, %s10350_s15 }
  0x83   : > { %825 = vrot.lane.b32.xlu1 %v10728_v55, %s10350_s15 }
  0x86   : > { %835 = vrot.lane.b32.xlu0 %v10740_v56, %s10350_s15  ;;  %v10808_v10 = vpop.permute.xlu0 %781 }
  0x8a   : > { %833 = vrot.lane.b32.xlu2 %v10752_v57, %s10350_s15 }
  0x8b   : > { %831 = vrot.lane.b32.xlu1 %v10754_v58, %s10350_s15 }
  0x8e   : > { %841 = vrot.lane.b32.xlu0 %v10760_v59, %s10350_s15  ;;  %v10826_v17 = vpop.permute.xlu0 %783 }
  0x92   : > { %839 = vrot.lane.b32.xlu2 %v10764_v60, %s10350_s15 }
  0x93   : > { %837 = vrot.lane.b32.xlu1 %v10766_v61, %s10350_s15 }
  0x96   : > { %911 = vrot.lane.b32.xlu0 %v718_v62, %s10351_s20  ;;  %v10880_v62 = vld [vmem:[#allocation2 + $0x151] sm:$0xff] }
  0x97   : > { %17476 = vst [vmem:[#allocation11_spill] sm:$0xff] %v10880_v62 }
  0x9a   : > { %909 = vrot.lane.b32.xlu2 %v717_v63, %s10351_s20  ;;  %v10882_v63 = vld [vmem:[#allocation2 + $0x149] sm:$0xff] }
  0x9b   : > { %843 = vrot.lane.b32.xlu1 %v10773_v0, %s10350_s15  ;;  %17477 = vst [vmem:[#allocation12_spill] sm:$0xff] %v10882_v63 }
  0x9e   : > { %917 = vrot.lane.b32.xlu0 %v10778_v1, %s10351_s20 }
  0xa2   : > { %915 = vrot.lane.b32.xlu2 %v10782_v2, %s10351_s20 }
  0xa3   : > { %913 = vrot.lane.b32.xlu1 %v10784_v3, %s10351_s20 }
  0xa4   : > { %v10792_v5 = vpop.permute.xlu2 %789 }
  0xa6   : > { %923 = vrot.lane.b32.xlu0 %v10790_v4, %s10351_s20 }
  0xaa   : > { %921 = vrot.lane.b32.xlu2 %v10796_v6, %s10351_s20 }
  0xab   : > { %919 = vrot.lane.b32.xlu1 %v10798_v7, %s10351_s20 }
  0xac   : > { %v10806_v9 = vpop.permute.xlu2 %791 }
  0xae   : > { %929 = vrot.lane.b32.xlu0 %v10804_v8, %s10351_s20 }
  0xb2   : > { %927 = vrot.lane.b32.xlu2 %v10812_v11, %s10351_s20 }
  0xb3   : > { %925 = vrot.lane.b32.xlu1 %v10814_v12, %s10351_s20 }
  0xb4   : > { %v10822_v16 = vpop.permute.xlu2 %797 }
  0xb6   : > { %935 = vrot.lane.b32.xlu0 %v10820_v14, %s10351_s20 }
  0xba   : > { %933 = vrot.lane.b32.xlu2 %v10828_v18, %s10351_s20 }
  0xbb   : > { %931 = vrot.lane.b32.xlu1 %v10830_v20, %s10351_s20 }
  0xbc   : > { %v10838_v23 = vpop.permute.xlu2 %803 }
  0xbd   : > { %v10840_v25 = vpop.permute.xlu1 %785 }
  0xbe   : > { %941 = vrot.lane.b32.xlu0 %v10836_v21, %s10351_s20 }
  0xc0   : > { %v10848_v31 = vpop.permute.xlu0 %793 }
  0xc2   : > { %939 = vrot.lane.b32.xlu2 %v10844_v26, %s10351_s20  ;;  %v10913_v26 = vld [vmem:[#allocation2 + $0x171] sm:$0xff] }
  0xc3   : > { %937 = vrot.lane.b32.xlu1 %v10846_v28, %s10351_s20  ;;  %17483 = vst [vmem:[#allocation18_spill] sm:$0xff] %v10913_v26 }
  0xc4   : > { %v10856_v34 = vpop.permute.xlu2 %809 }
  0xc5   : > { %17471 = vst [vmem:[#allocation6_spill] sm:$0xff] %v10856_v34  ;;  %v10858_v37 = vpop.permute.xlu1 %787 }
  0xc6   : > { %947 = vrot.lane.b32.xlu0 %v10854_v32, %s10351_s20 }
  0xc8   : > { %v10866_v43 = vpop.permute.xlu0 %799 }
  0xca   : > { %945 = vrot.lane.b32.xlu2 %v10862_v38, %s10351_s20  ;;  %v10890_v38 = vld [vmem:[#allocation2 + $0x191] sm:$0xff] }
  0xcb   : > { %943 = vrot.lane.b32.xlu1 %v10864_v40, %s10351_s20  ;;  %17478 = vst [vmem:[#allocation13_spill] sm:$0xff] %v10890_v38 }
  0xcc   : > { %v10874_v46 = vpop.permute.xlu2 %815 }
  0xcd   : > { %17475 = vst [vmem:[#allocation10_spill] sm:$0xff] %v10874_v46  ;;  %v10876_v49 = vpop.permute.xlu1 %795  ;;  %v10895_v46 = vld [vmem:[%s17398_s2 + $0x8] sm:$0xf] }
  0xce   : > { %953 = vrot.lane.b32.xlu0 %v10872_v44, %s10351_s20  ;;  %17479 = vst [vmem:[#allocation14_spill] sm:$0xff] %v10895_v46  ;;  %9645 = vmatpush.msk.msra.mxu1 %vm1588_vm3, %v10895_v46  ;;  %v10921_v46 = vld [vmem:[#allocation2 + $0x1c9] sm:$0xff] }
  0xcf   : > { %17485 = vst [vmem:[#allocation20_spill] sm:$0xff] %v10921_v46 }
  0xd0   : > { %v10884_v34 = vpop.permute.xlu0 %805 }
  0xd2   : > { %951 = vrot.lane.b32.xlu2 %v10880_v62, %s10351_s20  ;;  %v10906_v62 = vld [vmem:[%s17398_s2] sm:$0xff] }
  0xd3   : > { %949 = vrot.lane.b32.xlu1 %v10882_v63, %s10351_s20  ;;  %17481 = vst [vmem:[#allocation16_spill] sm:$0xff] %v10906_v62  ;;  %1819 = vmatpush.msra.mxu1 %v10906_v62  ;;  %v10911_v63 = vld [vmem:[#allocation2 + $0x189] sm:$0xff]  ;;  %v10929_v62 = vld [vmem:[#allocation2 + $0x1b1] sm:$0xff] }
  0xd4   : > { %v10897_v44 = vpop.permute.xlu2 %821  ;;  %17482 = vst [vmem:[#allocation17_spill] sm:$0xff] %v10911_v63 }
  0xd5   : > { %17480 = vst [vmem:[#allocation15_spill] sm:$0xff] %v10897_v44  ;;  %v10901_v32 = vpop.permute.xlu1 %801 }
  0xd6   : > { %959 = vrot.lane.b32.xlu0 %v10890_v38, %s10351_s20  ;;  %17488 = vst [vmem:[#allocation23_spill] sm:$0xff] %v10929_v62  ;;  %v10931_v38 = vld [vmem:[#allocation2 + $0x1a9] sm:$0xff] }
  0xd8   : > { %v10915_v44 = vpop.permute.xlu0 %811 }
  0xd9   : > { %17484 = vst [vmem:[#allocation19_spill] sm:$0xff] %v10915_v44 }
  0xda   : > { %957 = vrot.lane.b32.xlu2 %v10911_v63, %s10351_s20  ;;  %v10939_v63 = vld [vmem:[#allocation2 + $0x1f1] sm:$0xff] }
  0xdb   : > { %955 = vrot.lane.b32.xlu1 %v10913_v26, %s10351_s20  ;;  %17490 = vst [vmem:[#allocation25_spill] sm:$0xff] %v10939_v63 }
  0xdc   : > { %v10923_v21 = vpop.permute.xlu2 %827 }
  0xdd   : > { %17486 = vst [vmem:[#allocation21_spill] sm:$0xff] %v10923_v21  ;;  %v10925_v40 = vpop.permute.xlu1 %807 }
  0xde   : > { %17487 = vst [vmem:[#allocation22_spill] sm:$0xff] %v10925_v40  ;;  %965 = vrot.lane.b32.xlu0 %v10921_v46, %s10351_s20  ;;  %v10947_v46 = vld [vmem:[#allocation2 + $0x1e9] sm:$0xff]  ;;  %v10949_v40 = vld [vmem:[#allocation2 + $0x1d1] sm:$0xff] }
  0xdf   : > { %17493 = vst [vmem:[#allocation28_spill] sm:$0xff] %v10947_v46 }
  0xe0   : > { %v10933_v44 = vpop.permute.xlu0 %817 }
  0xe1   : > { %17489 = vst [vmem:[#allocation24_spill] sm:$0xff] %v10933_v44 }
  0xe2   : > { %963 = vrot.lane.b32.xlu2 %v10929_v62, %s10351_s20 }
  0xe3   : > { %961 = vrot.lane.b32.xlu1 %v10931_v38, %s10351_s20 }
  0xe4   : > { %v10941_v21 = vpop.permute.xlu2 %833 }
  0xe5   : > { %17491 = vst [vmem:[#allocation26_spill] sm:$0xff] %v10941_v21  ;;  %v10943_v26 = vpop.permute.xlu1 %813 }
  0xe6   : > { %17492 = vst [vmem:[#allocation27_spill] sm:$0xff] %v10943_v26  ;;  %971 = vrot.lane.b32.xlu0 %v10939_v63, %s10351_s20  ;;  %v653_v26 = vld [vmem:[#allocation2 + $0x7] sm:$0xff] }
  0xe8   : > { %v10951_v44 = vpop.permute.xlu0 %823 }
  0xe9   : > { %17494 = vst [vmem:[#allocation29_spill] sm:$0xff] %v10951_v44  ;;  %v1005_v44 = vsel %vm620_vm1, %v653_v26, %v10808_v10 }
  0xea   : > { %969 = vrot.lane.b32.xlu2 %v10947_v46, %s10351_s20 }
  0xeb   : > { %967 = vrot.lane.b32.xlu1 %v10949_v40, %s10351_s20 }
  0xec   : > { %v10957_v62 = vpop.permute.xlu2 %839 }
  0xed   : > { %17495 = vst [vmem:[#allocation30_spill] sm:$0xff] %v10957_v62  ;;  %v10959_v21 = vpop.permute.xlu1 %819 }
  0xee   : > { %17496 = vst [vmem:[#allocation31_spill] sm:$0xff] %v10959_v21  ;;  %1204 = vrot.lane.b32.xlu0 %v10577_v13, %s10350_s15 }
  0xf0   : > { %v10963_v63 = vpop.permute.xlu0 %829 }
  0xf2   : > { %1202 = vrot.lane.b32.xlu2 %v10605_v24, %s10350_s15 }
  0xf3   : > { %1200 = vrot.lane.b32.xlu1 %v10583_v15, %s10350_s15 }
  0xf4   : > { %v910_v62 = vpop.permute.xlu2 %909 }
  0xf5   : > { %v10971_v46 = vpop.permute.xlu1 %825  ;;  %v1038_v21 = vsel %vm1037_vm4, %v1005_v44, %v910_v62 }
  0xf6   : > { %9646 = vmatmul.msk.f32.vlgmr.msra.gmra.mxu1 %vm1491_vm5, %v1038_v21  ;;  %1210 = vrot.lane.b32.xlu0 %v10626_v30, %s10350_s15 }
  0xf8   : > { %v10977_v13 = vpop.permute.xlu0 %835 }
  0xf9   : > { %17497 = vst [vmem:[#allocation32_spill] sm:$0xff] %v10977_v13 }
  0xfa   : > { %1208 = vrot.lane.b32.xlu2 %v10593_v19, %s10350_s15  ;;  %v654_v19 = vld [vmem:[#allocation2 + $0xf] sm:$0xff] }
  0xfb   : > { %1206 = vrot.lane.b32.xlu1 %v10601_v22, %s10350_s15  ;;  %v1006_v22 = vsel %vm620_vm1, %v654_v19, %v10826_v17  ;;  %v11013_v17 = vld [vmem:[#allocation2 + $0x27] sm:$0xff]  ;;  %v11028_v19 = vld [vmem:[#allocation2 + $0x2f] sm:$0xff] }
  0xfc   : > { %v916_v15 = vpop.permute.xlu2 %915 }
  0xfd   : > { %v10983_v24 = vpop.permute.xlu1 %831 }
  0xfe   : > { %17498 = vst [vmem:[#allocation33_spill] sm:$0xff] %v10983_v24  ;;  %1216 = vrot.lane.b32.xlu0 %v10644_v36, %s10350_s15  ;;  %v11413_v24 = vld [vmem:[#allocation2 + $0x167] sm:$0xff] }
 0x100   : > { %v10987_v10 = vpop.permute.xlu0 %841 }
 0x101   : > { %17499 = vst [vmem:[#allocation34_spill] sm:$0xff] %v10987_v10  ;;  %v17531_v10 = vld [vmem:[#allocation25_spill] sm:$0xff] }
 0x102   : > { %1214 = vrot.lane.b32.xlu2 %v10616_v27, %s10350_s15 }
 0x103   : > { %1212 = vrot.lane.b32.xlu1 %v10624_v29, %s10350_s15 }
 0x104   : > { %v10993_v30 = vpop.permute.xlu2 %921 }
 0x105   : > { %v10995_v21 = vpop.permute.xlu1 %837 }
 0x106   : > { %17500 = vst [vmem:[#allocation35_spill] sm:$0xff] %v10995_v21  ;;  %1222 = vrot.lane.b32.xlu0 %v10662_v42, %s10350_s15 }
 0x108   : > { %v912_v36 = vpop.permute.xlu0 %911 }
 0x109   : > { %v1039_v26 = vsel %vm1037_vm4, %v1006_v22, %v912_v36 }
 0x10a   : > { %1220 = vrot.lane.b32.xlu2 %v10634_v33, %s10350_s15  ;;  %9647 = vmatmul.msk.f32.gmra.mxu1 %vm1491_vm5, %v1039_v26 }
 0x10b   : > { %1218 = vrot.lane.b32.xlu1 %v10642_v35, %s10350_s15  ;;  %v1007_v35 = vsel %vm620_vm1, %v11013_v17, %v10840_v25 }
 0x10c   : > { %v11007_v27 = vpop.permute.xlu2 %927 }
 0x10d   : > { %v11009_v29 = vpop.permute.xlu1 %843 }
 0x10e   : > { %17501 = vst [vmem:[#allocation36_spill] sm:$0xff] %v11009_v29  ;;  %1228 = vrot.lane.b32.xlu0 %v10680_v48, %s10350_s15  ;;  %v17528_v29 = vld [vmem:[#allocation23_spill] sm:$0xff] }
 0x110   : > { %v918_v42 = vpop.permute.xlu0 %917 }
 0x112   : > { %1226 = vrot.lane.b32.xlu2 %v10652_v39, %s10350_s15  ;;  %v618_v39 = vld [vmem:[%s10548_s19 + $0xf8] sm:$0xff] }
 0x113   : > { %1224 = vrot.lane.b32.xlu1 %v10660_v41, %s10350_s15  ;;  %v617_v41 = vld [vmem:[%s10548_s19 + $0xf0] sm:$0xff]  ;;  %652 = vst.msk [vmem:[#allocation2 + $0x210] sm:$0xff] %vm620_vm1, %v618_v39  ;;  %s10352_s19 = smov 32  }
 0x114   : > { %v11019_v33 = vpop.permute.xlu2 %933  ;;  %651 = vst.msk [vmem:[#allocation2 + $0x208] sm:$0xff] %vm620_vm1, %v617_v41  ;;  %v11105_v39 = vld [vmem:[#allocation2 + $0x6f] sm:$0xff] }
 0x115   : > { %v914_v44 = vpop.permute.xlu1 %913 }
 0x116   : > { %v1040_v62 = vsel %vm1037_vm4, %v1007_v35, %v914_v44  ;;  %1234 = vrot.lane.b32.xlu0 %v10700_v52, %s10350_s15  ;;  %v1008_v52 = vsel %vm620_vm1, %v11028_v19, %v10858_v37 }
 0x117   : > { %9648 = vmatmul.msk.f32.gmra.mxu1 %vm1491_vm5, %v1040_v62  ;;  %v1041_v36 = vsel %vm1037_vm4, %v1008_v52, %v916_v15  ;;  %v11128_v52 = vld [vmem:[#allocation2 + $0x87] sm:$0xff] }
 0x118   : > { %v924_v48 = vpop.permute.xlu0 %923 }
 0x11a   : > { %1232 = vrot.lane.b32.xlu2 %v10670_v45, %s10350_s15  ;;  %v11122_v41 = vld [vmem:[#allocation2 + $0x210] sm:$0xff] }
 0x11b   : > { %1230 = vrot.lane.b32.xlu1 %v10678_v47, %s10350_s15  ;;  %v11049_v47 = vld [vmem:[#allocation2 + $0x47] sm:$0xff] }
 0x11c   : > { %v11037_v25 = vpop.permute.xlu2 %939  ;;  %v1009_v37 = vsel %vm620_vm1, %v11049_v47, %v10792_v5 }
 0x11d   : > { %v920_v22 = vpop.permute.xlu1 %919 }
 0x11e   : > { %1240 = vrot.lane.b32.xlu0 %v10728_v55, %s10350_s15  ;;  %v1042_v55 = vsel %vm1037_vm4, %v1009_v37, %v918_v42  ;;  %v11147_v37 = vld [vmem:[#allocation2 + $0x8f] sm:$0xff] }
 0x11f   : > { %9649 = vmatmul.msk.f32.gmra.mxu1 %vm1491_vm5, %v1041_v36 }
 0x120   : > { %v11047_v45 = vpop.permute.xlu0 %929 }
 0x122   : > { %1238 = vrot.lane.b32.xlu2 %v10687_v50, %s10350_s15  ;;  %v11066_v50 = vld [vmem:[#allocation2 + $0x4f] sm:$0xff] }
 0x123   : > { %1236 = vrot.lane.b32.xlu1 %v10696_v51, %s10350_s15  ;;  %v1010_v5 = vsel %vm620_vm1, %v11066_v50, %v10806_v9 }
 0x124   : > { %v11055_v26 = vpop.permute.xlu2 %945 }
 0x125   : > { %v926_v15 = vpop.permute.xlu1 %925 }
 0x126   : > { %1246 = vrot.lane.b32.xlu0 %v10754_v58, %s10350_s15  ;;  %v1043_v58 = vsel %vm1037_vm4, %v1010_v5, %v920_v22  ;;  %v11167_v5 = vld [vmem:[#allocation2 + $0xa7] sm:$0xff] }
 0x127   : > { %9650 = vmatmul.msk.f32.gmra.mxu1 %vm1491_vm5, %v1042_v55 }
 0x128   : > { %v11064_v35 = vpop.permute.xlu0 %935 }
 0x12a   : > { %1244 = vrot.lane.b32.xlu2 %v10712_v53, %s10350_s15  ;;  %v11085_v53 = vld [vmem:[#allocation2 + $0x67] sm:$0xff] }
 0x12b   : > { %1242 = vrot.lane.b32.xlu1 %v10724_v54, %s10350_s15  ;;  %v1011_v9 = vsel %vm620_vm1, %v11085_v53, %v10848_v31  ;;  %v1012_v31 = vsel %vm620_vm1, %v11105_v39, %v10876_v49 }
 0x12c   : > { %v11072_v51 = vpop.permute.xlu2 %951 }
 0x12d   : > { %v11077_v42 = vpop.permute.xlu1 %931 }
 0x12e   : > { %1252 = vrot.lane.b32.xlu0 %v10766_v61, %s10350_s15  ;;  %v1044_v61 = vsel %vm1037_vm4, %v1011_v9, %v10993_v30  ;;  %v11207_v9 = vld [vmem:[#allocation2 + $0xc7] sm:$0xff] }
 0x12f   : > { %9651 = vmatmul.msk.f32.gmra.mxu1 %vm1491_vm5, %v1043_v58  ;;  %v11187_v58 = vld [vmem:[#allocation2 + $0xaf] sm:$0xff] }
 0x130   : > { %v11083_v44 = vpop.permute.xlu0 %941 }
 0x132   : > { %1250 = vrot.lane.b32.xlu2 %v10740_v56, %s10350_s15 }
 0x133   : > { %1248 = vrot.lane.b32.xlu1 %v10752_v57, %s10350_s15 }
 0x134   : > { %v11091_v54 = vpop.permute.xlu2 %957 }
 0x135   : > { %v11096_v62 = vpop.permute.xlu1 %937 }
 0x136   : > { %1258 = vrot.lane.b32.xlu0 %v10773_v0, %s10350_s15  ;;  %v1045_v0 = vsel %vm1037_vm4, %v1012_v31, %v924_v48  ;;  %v11227_v31 = vld [vmem:[#allocation2 + $0xcf] sm:$0xff] }
 0x137   : > { %9652 = vmatmul.msk.f32.gmra.mxu1 %vm1491_vm5, %v1044_v61  ;;  %v17509_v61 = vld [vmem:[#allocation8_spill] sm:$0xff] }
 0x138   : > { %v11103_v56 = vpop.permute.xlu0 %947 }
 0x13a   : > { %1256 = vrot.lane.b32.xlu2 %v10760_v59, %s10350_s15  ;;  %v11124_v59 = vld [vmem:[#allocation2 + $0x208] sm:$0xff] }
 0x13b   : > { %1254 = vrot.lane.b32.xlu1 %v10764_v60, %s10350_s15 }
 0x13c   : > { %v11111_v57 = vpop.permute.xlu2 %963 }
 0x13d   : > { %17502 = vst [vmem:[#allocation37_spill] sm:$0xff] %v11111_v57  ;;  %v11116_v30 = vpop.permute.xlu1 %943  ;;  %v17539_v57 = vld [vmem:[#allocation31_spill] sm:$0xff] }
 0x13e   : > { %1328 = vrot.lane.b32.xlu0 %v10784_v3, %s10351_s20  ;;  %v1013_v3 = vsel %vm620_vm1, %v11128_v52, %v10822_v16 }
 0x13f   : > { %9653 = vmatmul.msk.f32.gmra.mxu1 %vm1491_vm5, %v1045_v0  ;;  %v1046_v22 = vsel %vm1037_vm4, %v1013_v3, %v926_v15  ;;  %v1014_v15 = vsel %vm620_vm1, %v11147_v37, %v10866_v43  ;;  %v1015_v43 = vsel %vm620_vm1, %v11167_v5, %v10901_v32  ;;  %v1016_v32 = vsel %vm620_vm1, %v11187_v58, %v10838_v23  ;;  %v17511_v0 = vld [vmem:[#allocation4_spill] sm:$0xff]  ;;  %v17512_v3 = vld [vmem:[#allocation22_spill] sm:$0xff] }
 0x140   : > { %v11126_v60 = vpop.permute.xlu0 %953  ;;  %v1017_v23 = vsel %vm620_vm1, %v11207_v9, %v10884_v34 }
 0x142   : > { %1262 = vrot.lane.b32.xlu2 %v11122_v41, %s10350_s15 }
 0x143   : > { %1260 = vrot.lane.b32.xlu1 %v11124_v59, %s10350_s15 }
 0x144   : > { %v11134_v49 = vpop.permute.xlu2 %969 }
 0x145   : > { %17503 = vst [vmem:[#allocation38_spill] sm:$0xff] %v11134_v49  ;;  %v11139_v48 = vpop.permute.xlu1 %949 }
 0x146   : > { %1334 = vrot.lane.b32.xlu0 %v10798_v7, %s10351_s20  ;;  %v1047_v7 = vsel %vm1037_vm4, %v1014_v15, %v11007_v27 }
 0x147   : > { %9654 = vmatmul.msk.f32.gmra.mxu1 %vm1491_vm5, %v1046_v22 }
 0x148   : > { %v11145_v36 = vpop.permute.xlu0 %959 }
 0x149   : > { %17504 = vst [vmem:[#allocation39_spill] sm:$0xff] %v11145_v36  ;;  %v17543_v36 = vld [vmem:[#allocation29_spill] sm:$0xff] }
 0x14a   : > { %1332 = vrot.lane.b32.xlu2 %v10778_v1, %s10351_s20 }
 0x14b   : > { %1330 = vrot.lane.b32.xlu1 %v10782_v2, %s10351_s20 }
 0x14c   : > { %v11153_v16 = vpop.permute.xlu2 %1202 }
 0x14d   : > { %v11158_v55 = vpop.permute.xlu1 %955 }
 0x14e   : > { %1340 = vrot.lane.b32.xlu0 %v10814_v12, %s10351_s20  ;;  %v1048_v12 = vsel %vm1037_vm4, %v1015_v43, %v11047_v45 }
 0x14f   : > { %9655 = vmatmul.msk.f32.gmra.mxu1 %vm1491_vm5, %v1047_v7  ;;  %v17513_v7 = vld [vmem:[#allocation12_spill] sm:$0xff] }
 0x150   : > { %v11165_v1 = vpop.permute.xlu0 %965 }
 0x151   : > { %17505 = vst [vmem:[#allocation40_spill] sm:$0xff] %v11165_v1  ;;  %v17533_v1 = vld [vmem:[#allocation24_spill] sm:$0xff] }
 0x152   : > { %1338 = vrot.lane.b32.xlu2 %v10790_v4, %s10351_s20 }
 0x153   : > { %1336 = vrot.lane.b32.xlu1 %v10796_v6, %s10351_s20 }
 0x154   : > { %v11173_v2 = vpop.permute.xlu2 %1208 }
 0x155   : > { %v11178_v27 = vpop.permute.xlu1 %961 }
 0x156   : > { %17506 = vst [vmem:[#allocation41_spill] sm:$0xff] %v11178_v27  ;;  %1346 = vrot.lane.b32.xlu0 %v10830_v20, %s10351_s20  ;;  %v1049_v20 = vsel %vm1037_vm4, %v1016_v32, %v11077_v42  ;;  %v17514_v32 = vld [vmem:[#allocation5_spill] sm:$0xff]  ;;  %v11379_v27 = vld [vmem:[#allocation2 + $0x147] sm:$0xff] }
 0x157   : > { %9656 = vmatmul.msk.f32.gmra.mxu1 %vm1491_vm5, %v1048_v12  ;;  %v11247_v12 = vld [vmem:[#allocation2 + $0xe7] sm:$0xff] }
 0x158   : > { %v11185_v4 = vpop.permute.xlu0 %971 }
 0x159   : > { %17507 = vst [vmem:[#allocation42_spill] sm:$0xff] %v11185_v4  ;;  %v17525_v4 = vld [vmem:[#allocation27_spill] sm:$0xff] }
 0x15a   : > { %1344 = vrot.lane.b32.xlu2 %v10804_v8, %s10351_s20 }
 0x15b   : > { %1342 = vrot.lane.b32.xlu1 %v10812_v11, %s10351_s20 }
 0x15c   : > { %v11193_v6 = vpop.permute.xlu2 %1214 }
 0x15d   : > { %v11198_v45 = vpop.permute.xlu1 %967 }
 0x15e   : > { %17508 = vst [vmem:[#allocation43_spill] sm:$0xff] %v11198_v45  ;;  %1352 = vrot.lane.b32.xlu0 %v10846_v28, %s10351_s20  ;;  %v1050_v28 = vsel %vm1037_vm4, %v1017_v23, %v11019_v33  ;;  %v1018_v33 = vsel %vm620_vm1, %v11227_v31, %v17512_v3 }
 0x15f   : > { %9657 = vmatmul.msk.f32.gmra.mxu1 %vm1491_vm5, %v1049_v20  ;;  %v1051_v15 = vsel %vm1037_vm4, %v1018_v33, %v11064_v35  ;;  %v17515_v20 = vld [vmem:[#allocation7_spill] sm:$0xff]  ;;  %v11267_v33 = vld [vmem:[#allocation2 + $0xef] sm:$0xff] }
 0x160   : > { %v11205_v8 = vpop.permute.xlu0 %1204 }
 0x162   : > { %1350 = vrot.lane.b32.xlu2 %v10820_v14, %s10351_s20 }
 0x163   : > { %1348 = vrot.lane.b32.xlu1 %v10828_v18, %s10351_s20  ;;  %v17510_v18 = vld [vmem:[#allocation3_spill] sm:$0xff] }
 0x164   : > { %v11213_v11 = vpop.permute.xlu2 %1220 }
 0x165   : > { %v11218_v42 = vpop.permute.xlu1 %1200 }
 0x166   : > { %1358 = vrot.lane.b32.xlu0 %v17509_v61, %s10351_s20 }
 0x167   : > { %9658 = vmatmul.msk.f32.gmra.mxu1 %vm1491_vm5, %v1050_v28  ;;  %v17516_v28 = vld [vmem:[#allocation6_spill] sm:$0xff] }
 0x168   : > { %v11225_v14 = vpop.permute.xlu0 %1210  ;;  %v1019_v35 = vsel %vm620_vm1, %v11247_v12, %v17516_v28 }
 0x16a   : > { %1356 = vrot.lane.b32.xlu2 %v17510_v18, %s10351_s20  ;;  %v1052_v18 = vsel %vm1037_vm4, %v1019_v35, %v11096_v62 }
 0x16b   : > { %1354 = vrot.lane.b32.xlu1 %v17511_v0, %s10351_s20  ;;  %v17517_v0 = vld [vmem:[#allocation18_spill] sm:$0xff] }
 0x16c   : > { %v11233_v34 = vpop.permute.xlu2 %1226  ;;  %17541 = vst [vmem:[#allocation18_spill] sm:$0xff] %v11379_v27 }
 0x16d   : > { %v11238_v22 = vpop.permute.xlu1 %1206 }
 0x16e   : > { %1364 = vrot.lane.b32.xlu0 %v17513_v7, %s10351_s20  ;;  %v17519_v7 = vld [vmem:[#allocation11_spill] sm:$0xff] }
 0x16f   : > { %9659 = vmatmul.msk.f32.gmra.mxu1 %vm1491_vm5, %v1051_v15  ;;  %v17518_v15 = vld [vmem:[#allocation9_spill] sm:$0xff] }
 0x170   : > { %v11245_v43 = vpop.permute.xlu0 %1216  ;;  %17544 = vst [vmem:[#allocation9_spill] sm:$0xff] %v11413_v24 }
 0x172   : > { %1362 = vrot.lane.b32.xlu2 %v17514_v32, %s10351_s20 }
 0x173   : > { %1360 = vrot.lane.b32.xlu1 %v17515_v20, %s10351_s20  ;;  %v17521_v20 = vld [vmem:[#allocation19_spill] sm:$0xff] }
 0x174   : > { %v11253_v23 = vpop.permute.xlu2 %1232  ;;  %v1020_v62 = vsel %vm620_vm1, %v11267_v33, %v17521_v20 }
 0x175   : > { %v11258_v61 = vpop.permute.xlu1 %1212  ;;  %v1053_v35 = vsel %vm1037_vm4, %v1020_v62, %v11037_v25 }
 0x176   : > { %1370 = vrot.lane.b32.xlu0 %v17517_v0, %s10351_s20  ;;  %v11287_v0 = vld [vmem:[#allocation2 + $0x107] sm:$0xff] }
 0x177   : > { %9660 = vmatmul.msk.f32.gmra.mxu1 %vm1491_vm5, %v1052_v18  ;;  %v1021_v25 = vsel %vm620_vm1, %v11287_v0, %v17525_v4  ;;  %v11313_v4 = vld [vmem:[#allocation2 + $0x209] sm:$0xff] }
 0x178   : > { %v11265_v3 = vpop.permute.xlu0 %1222 }
 0x17a   : > { %1368 = vrot.lane.b32.xlu2 %v17518_v15, %s10351_s20  ;;  %v17522_v15 = vld [vmem:[#allocation13_spill] sm:$0xff] }
 0x17b   : > { %1366 = vrot.lane.b32.xlu1 %v17519_v7, %s10351_s20  ;;  %v17523_v7 = vld [vmem:[#allocation17_spill] sm:$0xff] }
 0x17c   : > { %v11273_v32 = vpop.permute.xlu2 %1238 }
 0x17d   : > { %17520 = vst [vmem:[#allocation8_spill] sm:$0xff] %v11273_v32  ;;  %v11278_v28 = vpop.permute.xlu1 %1218  ;;  %v1952_v32 = vld [vmem:[#allocation2 + $0x68] sm:$0xff] }
 0x17e   : > { %1376 = vrot.lane.b32.xlu0 %v10931_v38, %s10351_s20  ;;  %v1054_v38 = vsel %vm1037_vm4, %v1021_v25, %v11083_v44  ;;  %v17529_v44 = vld [vmem:[#allocation10_spill] sm:$0xff] }
 0x17f   : > { %9661 = vmatmul.msk.f32.gmra.mxu1 %vm1491_vm5, %v1053_v35 }
 0x180   : > { %v11285_v18 = vpop.permute.xlu0 %1228 }
 0x182   : > { %1374 = vrot.lane.b32.xlu2 %v17522_v15, %s10351_s20  ;;  %v11307_v15 = vld [vmem:[#allocation2 + $0x10f] sm:$0xff] }
 0x183   : > { %1372 = vrot.lane.b32.xlu1 %v17523_v7, %s10351_s20  ;;  %v17527_v7 = vld [vmem:[#allocation20_spill] sm:$0xff] }
 0x184   : > { %v11293_v20 = vpop.permute.xlu2 %1244 }
 0x185   : > { %17524 = vst [vmem:[#allocation3_spill] sm:$0xff] %v11293_v20  ;;  %v11298_v62 = vpop.permute.xlu1 %1224  ;;  %v17532_v20 = vld [vmem:[#allocation28_spill] sm:$0xff] }
 0x186   : > { %1382 = vrot.lane.b32.xlu0 %v10949_v40, %s10351_s20  ;;  %v1022_v40 = vsel %vm620_vm1, %v11307_v15, %v17529_v44  ;;  %v1951_v44 = vld [vmem:[#allocation2 + $0x50] sm:$0xff] }
 0x187   : > { %9662 = vmatmul.msk.f32.gmra.mxu1 %vm1491_vm5, %v1054_v38  ;;  %v1055_v38 = vsel %vm1037_vm4, %v1022_v40, %v11116_v30 }
 0x188   : > { %v11305_v35 = vpop.permute.xlu0 %1234 }
 0x189   : > { %17526 = vst [vmem:[#allocation4_spill] sm:$0xff] %v11305_v35 }
 0x18a   : > { %1380 = vrot.lane.b32.xlu2 %v17527_v7, %s10351_s20 }
 0x18b   : > { %1378 = vrot.lane.b32.xlu1 %v17528_v29, %s10351_s20  ;;  %v11329_v29 = vld [vmem:[#allocation2 + $0x127] sm:$0xff] }
 0x18c   : > { %v11315_v49 = vpop.permute.xlu2 %1250  ;;  %v1023_v30 = vsel %vm620_vm1, %v11329_v29, %v17533_v1  ;;  %v1950_v1 = vld [vmem:[#allocation2 + $0x48] sm:$0xff] }
 0x18d   : > { %v11320_v25 = vpop.permute.xlu1 %1230 }
 0x18e   : > { %1388 = vrot.lane.b32.xlu0 %v11313_v4, %s10351_s20 }
 0x18f   : > { %9663 = vmatmul.msk.f32.gmra.mxu1 %vm1491_vm5, %v1055_v38  ;;  %v9611_v38 = vld [vmem:[%s17398_s2 + $0x18] sm:$0xf] }
 0x190   : > { %v11327_v7 = vpop.permute.xlu0 %1240  ;;  %9612 = vmatpush.msk.msra.mxu0 %vm1588_vm3, %v9611_v38  ;;  %10182 = vmatpush.msk.msra.mxu3 %vm1588_vm3, %v9611_v38  ;;  %v17538_v38 = vld [vmem:[#allocation16_spill] sm:$0xff] }
 0x191   : > { %17530 = vst [vmem:[#allocation22_spill] sm:$0xff] %v11327_v7  ;;  %v1056_v7 = vsel %vm1037_vm4, %v1023_v30, %v11055_v26  ;;  %v11358_v26 = vld [vmem:[#allocation2 + $0x12f] sm:$0xff] }
 0x192   : > { %1386 = vrot.lane.b32.xlu2 %v17531_v10, %s10351_s20  ;;  %v9610_v10 = vld [vmem:[%s17398_s2 + $0x10] sm:$0xff]  ;;  %17536 = vst [vmem:[#allocation7_spill] sm:$0xff] %v11358_v26 }
 0x193   : > { %1384 = vrot.lane.b32.xlu1 %v17532_v20, %s10351_s20  ;;  %v11354_v20 = vld [vmem:[#allocation2 + $0x211] sm:$0xff]  ;;  %1607 = vmatpush.msra.mxu0 %v9610_v10 }
 0x194   : > { %v11335_v45 = vpop.permute.xlu2 %1256  ;;  %10183 = vmatpush.msra.mxu3 %v9610_v10 }
 0x195   : > { %v11340_v40 = vpop.permute.xlu1 %1236 }
 0x196   : > { %17534 = vst [vmem:[#allocation12_spill] sm:$0xff] %v11340_v40  ;;  %2048 = vrot.lane.b32.xlu0 %v1951_v44, %s10350_s15  ;;  %v17537_v44 = vld [vmem:[#allocation14_spill] sm:$0xff]  ;;  %v1955_v40 = vld [vmem:[#allocation2 + $0x90] sm:$0xff] }
 0x197   : > { %9664 = vmatmul.msk.f32.gmra.mxu1 %vm1491_vm5, %v1056_v7  ;;  %10184 = vmatpush.msk.msrb.mxu3 %vm1588_vm3, %v17537_v44  ;;  %v1954_v7 = vld [vmem:[#allocation2 + $0x88] sm:$0xff]  ;;  %v1953_v44 = vld [vmem:[#allocation2 + $0x70] sm:$0xff] }
 0x198   : > { %v11356_v21 = vpop.permute.xlu0 %1246 }
 0x199   : > { %17535 = vst [vmem:[#allocation5_spill] sm:$0xff] %v11356_v21  ;;  %10185 = vmatpush.msrb.mxu3 %v17538_v38  ;;  %v1024_v21 = vsel %vm620_vm1, %v11358_v26, %v17539_v57  ;;  %v1957_v57 = vld [vmem:[#allocation2 + $0xb0] sm:$0xff] }
 0x19a   : > { %2046 = vrot.lane.b32.xlu2 %v1950_v1, %s10350_s15  ;;  %v1057_v1 = vsel %vm1037_vm4, %v1024_v21, %v11103_v56 }
 0x19b   : > { %1390 = vrot.lane.b32.xlu1 %v11354_v20, %s10351_s20 }
 0x19c   : > { %v11365_v30 = vpop.permute.xlu2 %1262 }
 0x19d   : > { %v11371_v10 = vpop.permute.xlu1 %1242 }
 0x19e   : > { %17540 = vst [vmem:[#allocation6_spill] sm:$0xff] %v11371_v10  ;;  %2054 = vrot.lane.b32.xlu0 %v1954_v7, %s10350_s15  ;;  %v17542_v10 = vld [vmem:[#allocation15_spill] sm:$0xff] }
 0x19f   : > { %9665 = vmatmul.msk.f32.gmra.mxu1 %vm1491_vm5, %v1057_v1  ;;  %v1025_v21 = vsel %vm620_vm1, %v11379_v27, %v17542_v10  ;;  %v1956_v1 = vld [vmem:[#allocation2 + $0xa8] sm:$0xff] }
 0x1a0   : > { %v11377_v13 = vpop.permute.xlu0 %1252  ;;  %v1058_v7 = vsel %vm1037_vm4, %v1025_v21, %v11139_v48  ;;  %v1960_v10 = vld [vmem:[#allocation2 + $0xe8] sm:$0xff] }
 0x1a2   : > { %2052 = vrot.lane.b32.xlu2 %v1953_v44, %s10350_s15 }
 0x1a3   : > { %2050 = vrot.lane.b32.xlu1 %v1952_v32, %s10350_s15  ;;  %v11394_v32 = vld [vmem:[#allocation2 + $0x14f] sm:$0xff] }
 0x1a4   : > { %v1333_v38 = vpop.permute.xlu2 %1332  ;;  %v1026_v48 = vsel %vm620_vm1, %v11394_v32, %v17543_v36 }
 0x1a5   : > { %v11386_v56 = vpop.permute.xlu1 %1248  ;;  %v1059_v21 = vsel %vm1037_vm4, %v1026_v48, %v11072_v51  ;;  %v1963_v51 = vld [vmem:[#allocation2 + $0x110] sm:$0xff] }
 0x1a6   : > { %2060 = vrot.lane.b32.xlu0 %v1957_v57, %s10350_s15 }
 0x1a7   : > { %9666 = vmatmul.msk.f32.gmra.mxu1 %vm1491_vm5, %v1058_v7  ;;  %v1959_v7 = vld [vmem:[#allocation2 + $0xd0] sm:$0xff] }
 0x1a8   : > { %v11392_v44 = vpop.permute.xlu0 %1258 }
 0x1aa   : > { %2058 = vrot.lane.b32.xlu2 %v1956_v1, %s10350_s15  ;;  %v1958_v1 = vld [vmem:[#allocation2 + $0xc8] sm:$0xff] }
 0x1ab   : > { %2056 = vrot.lane.b32.xlu1 %v1955_v40, %s10350_s15  ;;  %v1424_v40 = vsel %vm620_vm1, %v11013_v17, %v11218_v42 }
 0x1ac   : > { %v11398_v27 = vpop.permute.xlu2 %1338 }
 0x1ad   : > { %v11403_v57 = vpop.permute.xlu1 %1254 }
 0x1ae   : > { %2066 = vrot.lane.b32.xlu0 %v1960_v10, %s10350_s15  ;;  %v1027_v10 = vsel %vm620_vm1, %v11413_v24, %v10971_v46 }
 0x1af   : > { %9667 = vmatmul.msk.f32.gmra.mxu1 %vm1491_vm5, %v1059_v21  ;;  %v1060_v42 = vsel %vm1037_vm4, %v1027_v10, %v11126_v60  ;;  %v11429_v21 = vld [vmem:[#allocation2 + $0x16f] sm:$0xff] }
 0x1b0   : > { %v1329_v26 = vpop.permute.xlu0 %1328 }
 0x1b1   : > { %v1456_v35 = vsel %vm1037_vm4, %v1424_v40, %v1329_v26  ;;  %v1962_v26 = vld [vmem:[#allocation2 + $0x108] sm:$0xff]  ;;  %v17545_v40 = vld [vmem:[#allocation21_spill] sm:$0xff] }
 0x1b2   : > { %2064 = vrot.lane.b32.xlu2 %v1959_v7, %s10350_s15  ;;  %9613 = vmatmul.msk.f32.vlgmr.msra.gmra.mxu0 %vm1491_vm5, %v1456_v35  ;;  %v1961_v35 = vld [vmem:[#allocation2 + $0xf0] sm:$0xff]  ;;  %v1966_v7 = vld [vmem:[#allocation2 + $0x148] sm:$0xff]  ;;  %v1028_v60 = vsel %vm620_vm1, %v11429_v21, %v17545_v40 }
 0x1b3   : > { %2062 = vrot.lane.b32.xlu1 %v1958_v1, %s10350_s15  ;;  %v1425_v1 = vsel %vm620_vm1, %v11028_v19, %v11153_v16  ;;  %v1969_v19 = vld [vmem:[#allocation2 + $0x170] sm:$0xff] }
 0x1b4   : > { %v11418_v36 = vpop.permute.xlu2 %1344 }
 0x1b5   : > { %v11423_v17 = vpop.permute.xlu1 %1260 }
 0x1b6   : > { %2072 = vrot.lane.b32.xlu0 %v1963_v51, %s10350_s15 }
 0x1b7   : > { %9668 = vmatmul.msk.f32.gmra.mxu1 %vm1491_vm5, %v1060_v42  ;;  %v1061_v42 = vsel %vm1037_vm4, %v1028_v60, %v11158_v55  ;;  %v1426_v55 = vsel %vm620_vm1, %v11049_v47, %v11205_v8  ;;  %v1968_v60 = vld [vmem:[#allocation2 + $0x168] sm:$0xff]  ;;  %v1427_v47 = vsel %vm620_vm1, %v11066_v50, %v11238_v22  ;;  %v1428_v50 = vsel %vm620_vm1, %v11085_v53, %v11173_v2 }
 0x1b8   : > { %v1335_v48 = vpop.permute.xlu0 %1334  ;;  %v1429_v53 = vsel %vm620_vm1, %v11105_v39, %v11225_v14  ;;  %v1430_v14 = vsel %vm620_vm1, %v11128_v52, %v11258_v61  ;;  %v1431_v52 = vsel %vm620_vm1, %v11147_v37, %v11193_v6  ;;  %v1987_v37 = vld [vmem:[#allocation2 + $0x91] sm:$0xff] }
 0x1ba   : > { %2070 = vrot.lane.b32.xlu2 %v1962_v26, %s10350_s15  ;;  %v1965_v26 = vld [vmem:[#allocation2 + $0x130] sm:$0xff] }
 0x1bb   : > { %2068 = vrot.lane.b32.xlu1 %v1961_v35, %s10350_s15  ;;  %v1964_v35 = vld [vmem:[#allocation2 + $0x128] sm:$0xff] }
 0x1bc   : > { %v11433_v46 = vpop.permute.xlu2 %1350 }
 0x1bd   : > { %v1331_v51 = vpop.permute.xlu1 %1330 }
 0x1be   : > { %v1457_v10 = vsel %vm1037_vm4, %v1425_v1, %v1331_v51  ;;  %2078 = vrot.lane.b32.xlu0 %v1966_v7, %s10350_s15  ;;  %v1458_v7 = vsel %vm1037_vm4, %v1426_v55, %v1333_v38  ;;  %v1967_v1 = vld [vmem:[#allocation2 + $0x150] sm:$0xff]  ;;  %v1459_v38 = vsel %vm1037_vm4, %v1427_v47, %v1335_v48 }
 0x1bf   : > { %9614 = vmatmul.msk.f32.gmra.mxu0 %vm1491_vm5, %v1457_v10  ;;  %9669 = vmatmul.msk.f32.gmra.mxu1 %vm1491_vm5, %v1061_v42  ;;  %v1972_v10 = vld [vmem:[#allocation2 + $0x1a8] sm:$0xff]  ;;  %v1975_v55 = vld [vmem:[#allocation2 + $0x1d0] sm:$0xff] }
 0x1c0   : > { %v1341_v24 = vpop.permute.xlu0 %1340 }
 0x1c2   : > { %2076 = vrot.lane.b32.xlu2 %v1965_v26, %s10350_s15  ;;  %v1971_v26 = vld [vmem:[#allocation2 + $0x190] sm:$0xff] }
 0x1c3   : > { %2074 = vrot.lane.b32.xlu1 %v1964_v35, %s10350_s15  ;;  %v1970_v35 = vld [vmem:[#allocation2 + $0x188] sm:$0xff] }
 0x1c4   : > { %v11449_v16 = vpop.permute.xlu2 %1356 }
 0x1c5   : > { %v1337_v40 = vpop.permute.xlu1 %1336 }
 0x1c6   : > { %2084 = vrot.lane.b32.xlu0 %v1969_v19, %s10350_s15  ;;  %v1460_v48 = vsel %vm1037_vm4, %v1428_v50, %v1337_v40  ;;  %v1461_v40 = vsel %vm1037_vm4, %v1429_v53, %v11398_v27  ;;  %v1980_v50 = vld [vmem:[#allocation2 + $0x228] sm:$0xff] }
 0x1c7   : > { %9615 = vmatmul.msk.f32.gmra.mxu0 %vm1491_vm5, %v1458_v7  ;;  %v11525_v53 = vld [vmem:[#allocation2 + $0x1a7] sm:$0xff] }
 0x1c8   : > { %v11457_v51 = vpop.permute.xlu0 %1346 }
 0x1ca   : > { %2082 = vrot.lane.b32.xlu2 %v1968_v60, %s10350_s15  ;;  %v1974_v60 = vld [vmem:[#allocation2 + $0x1c8] sm:$0xff] }
 0x1cb   : > { %2080 = vrot.lane.b32.xlu1 %v1967_v1, %s10350_s15  ;;  %v1973_v1 = vld [vmem:[#allocation2 + $0x1b0] sm:$0xff] }
 0x1cc   : > { %v11461_v42 = vpop.permute.xlu2 %1362 }
 0x1cd   : > { %v1343_v8 = vpop.permute.xlu1 %1342 }
 0x1ce   : > { %2090 = vrot.lane.b32.xlu0 %v1972_v10, %s10350_s15  ;;  %v1463_v61 = vsel %vm1037_vm4, %v1431_v52, %v1343_v8  ;;  %v1432_v8 = vsel %vm620_vm1, %v11167_v5, %v11245_v43  ;;  %v1990_v52 = vld [vmem:[#allocation2 + $0xc9] sm:$0xff]  ;;  %v1433_v43 = vsel %vm620_vm1, %v11187_v58, %v11278_v28 }
 0x1cf   : > { %9616 = vmatmul.msk.f32.gmra.mxu0 %vm1491_vm5, %v1459_v38  ;;  %v1977_v38 = vld [vmem:[#allocation2 + $0x1f0] sm:$0xff]  ;;  %v11568_v58 = vld [vmem:[#allocation2 + $0x1c7] sm:$0xff] }
 0x1d0   : > { %v11469_v19 = vpop.permute.xlu0 %1352 }
 0x1d2   : > { %2088 = vrot.lane.b32.xlu2 %v1971_v26, %s10350_s15  ;;  %v1976_v26 = vld [vmem:[#allocation2 + $0x1e8] sm:$0xff] }
 0x1d3   : > { %2086 = vrot.lane.b32.xlu1 %v1970_v35, %s10350_s15 }
 0x1d4   : > { %v11473_v7 = vpop.permute.xlu2 %1368 }
 0x1d5   : > { %v11478_v22 = vpop.permute.xlu1 %1348 }
 0x1d6   : > { %2096 = vrot.lane.b32.xlu0 %v1975_v55, %s10350_s15  ;;  %v1981_v55 = vld [vmem:[#allocation2 + $0x230] sm:$0xff] }
 0x1d7   : > { %9617 = vmatmul.msk.f32.gmra.mxu0 %vm1491_vm5, %v1460_v48 }
 0x1d8   : > { %v11483_v10 = vpop.permute.xlu0 %1358 }
 0x1da   : > { %2094 = vrot.lane.b32.xlu2 %v1974_v60, %s10350_s15  ;;  %v1984_v60 = vld [vmem:[#allocation2 + $0x69] sm:$0xff] }
 0x1db   : > { %2092 = vrot.lane.b32.xlu1 %v1973_v1, %s10350_s15 }
 0x1dc   : > { %v11487_v47 = vpop.permute.xlu2 %1374 }
 0x1dd   : > { %v11492_v2 = vpop.permute.xlu1 %1354 }
 0x1de   : > { %2102 = vrot.lane.b32.xlu0 %v11124_v59, %s10350_s15  ;;  %v1462_v59 = vsel %vm1037_vm4, %v1430_v14, %v1341_v24 }
 0x1df   : > { %9618 = vmatmul.msk.f32.gmra.mxu0 %vm1491_vm5, %v1461_v40  ;;  %v1983_v40 = vld [vmem:[#allocation2 + $0x51] sm:$0xff] }
 0x1e0   : > { %v11499_v35 = vpop.permute.xlu0 %1364 }
 0x1e2   : > { %2100 = vrot.lane.b32.xlu2 %v1977_v38, %s10350_s15  ;;  %v1982_v38 = vld [vmem:[#allocation2 + $0x49] sm:$0xff] }
 0x1e3   : > { %2098 = vrot.lane.b32.xlu1 %v1976_v26, %s10350_s15 }
 0x1e4   : > { %v1381_v39 = vpop.permute.xlu2 %1380 }
 0x1e5   : > { %v11506_v27 = vpop.permute.xlu1 %1360 }
 0x1e6   : > { %2108 = vrot.lane.b32.xlu0 %v1981_v55, %s10350_s15 }
 0x1e7   : > { %9619 = vmatmul.msk.f32.gmra.mxu0 %vm1491_vm5, %v1462_v59  ;;  %v1986_v59 = vld [vmem:[#allocation2 + $0x89] sm:$0xff] }
 0x1e8   : > { %v11511_v48 = vpop.permute.xlu0 %1370 }
 0x1ea   : > { %2106 = vrot.lane.b32.xlu2 %v1980_v50, %s10350_s15  ;;  %v1985_v50 = vld [vmem:[#allocation2 + $0x71] sm:$0xff] }
 0x1eb   : > { %2104 = vrot.lane.b32.xlu1 %v11122_v41, %s10350_s15  ;;  %v1448_v41 = vsel %vm620_vm1, %v11525_v53, %v11386_v56  ;;  %v1464_v56 = vsel %vm1037_vm4, %v1432_v8, %v11418_v36  ;;  %v1450_v8 = vsel %vm620_vm1, %v11568_v58, %v11377_v13  ;;  %v1996_v13 = vld [vmem:[#allocation2 + $0x129] sm:$0xff] }
 0x1ec   : > { %v11516_v1 = vpop.permute.xlu2 %1386 }
 0x1ed   : > { %v11521_v24 = vpop.permute.xlu1 %1366 }
 0x1ee   : > { %2178 = vrot.lane.b32.xlu0 %v1984_v60, %s10351_s20 }
 0x1ef   : > { %9620 = vmatmul.msk.f32.gmra.mxu0 %vm1491_vm5, %v1463_v61  ;;  %v11548_v61 = vld [vmem:[#allocation2 + $0x1af] sm:$0xff] }
 0x1f0   : > { %v1377_v26 = vpop.permute.xlu0 %1376  ;;  %v1449_v36 = vsel %vm620_vm1, %v11548_v61, %v11315_v49  ;;  %v1993_v49 = vld [vmem:[#allocation2 + $0xf1] sm:$0xff] }
 0x1f1   : > { %v1480_v55 = vsel %vm1037_vm4, %v1448_v41, %v1377_v26  ;;  %v1465_v41 = vsel %vm1037_vm4, %v1433_v43, %v11457_v51  ;;  %v1989_v26 = vld [vmem:[#allocation2 + $0xb1] sm:$0xff]  ;;  %v1434_v51 = vsel %vm620_vm1, %v11207_v9, %v11213_v11 }
 0x1f2   : > { %2176 = vrot.lane.b32.xlu2 %v1983_v40, %s10351_s20  ;;  %9637 = vmatmul.msk.f32.vlgmr.msra.gmra.mxu3 %vm1491_vm5, %v1480_v55  ;;  %v1988_v55 = vld [vmem:[#allocation2 + $0xa9] sm:$0xff]  ;;  %v1991_v43 = vld [vmem:[#allocation2 + $0xd1] sm:$0xff] }
 0x1f3   : > { %2174 = vrot.lane.b32.xlu1 %v1982_v38, %s10351_s20  ;;  %v11588_v9 = vld [vmem:[#allocation2 + $0x1cf] sm:$0xff] }
 0x1f4   : > { %v11535_v6 = vpop.permute.xlu2 %2046 }
 0x1f5   : > { %v11540_v14 = vpop.permute.xlu1 %1372 }
 0x1f6   : > { %2184 = vrot.lane.b32.xlu0 %v1987_v37, %s10351_s20 }
 0x1f7   : > { %9621 = vmatmul.msk.f32.gmra.mxu0 %vm1491_vm5, %v1464_v56 }
 0x1f8   : > { %v1383_v60 = vpop.permute.xlu0 %1382 }
 0x1fa   : > { %2182 = vrot.lane.b32.xlu2 %v1986_v59, %s10351_s20  ;;  %v1466_v59 = vsel %vm1037_vm4, %v1434_v51, %v11478_v22  ;;  %v1435_v22 = vsel %vm620_vm1, %v11227_v31, %v11265_v3  ;;  %v1999_v3 = vld [vmem:[#allocation2 + $0x151] sm:$0xff] }
 0x1fb   : > { %2180 = vrot.lane.b32.xlu1 %v1985_v50, %s10351_s20  ;;  %v1482_v50 = vsel %vm1037_vm4, %v1450_v8, %v1381_v39  ;;  %v1451_v39 = vsel %vm620_vm1, %v11588_v9, %v11403_v57  ;;  %v11610_v57 = vld [vmem:[#allocation2 + $0x1e7] sm:$0xff] }
 0x1fc   : > { %v11550_v5 = vpop.permute.xlu2 %2052 }
 0x1fd   : > { %v1379_v40 = vpop.permute.xlu1 %1378 }
 0x1fe   : > { %v1481_v38 = vsel %vm1037_vm4, %v1449_v36, %v1379_v40  ;;  %2190 = vrot.lane.b32.xlu0 %v1990_v52, %s10351_s20  ;;  %v1992_v52 = vld [vmem:[#allocation2 + $0xe9] sm:$0xff] }
 0x1ff   : > { %9622 = vmatmul.msk.f32.gmra.mxu0 %vm1491_vm5, %v1465_v41  ;;  %9638 = vmatmul.msk.f32.gmra.mxu3 %vm1491_vm5, %v1481_v38  ;;  %v1467_v41 = vsel %vm1037_vm4, %v1435_v22, %v11433_v46  ;;  %v1483_v38 = vsel %vm1037_vm4, %v1451_v39, %v1383_v60  ;;  %v1436_v46 = vsel %vm620_vm1, %v11247_v12, %v11298_v62  ;;  %v1998_v12 = vld [vmem:[#allocation2 + $0x149] sm:$0xff]  ;;  %v1997_v62 = vld [vmem:[#allocation2 + $0x131] sm:$0xff] }
 0x200   : > { %v11564_v37 = vpop.permute.xlu0 %1388  ;;  %v1452_v60 = vsel %vm620_vm1, %v11610_v57, %v11335_v45  ;;  %v1468_v8 = vsel %vm1037_vm4, %v1436_v46, %v11469_v19  ;;  %v2002_v45 = vld [vmem:[#allocation2 + $0x189] sm:$0xff]  ;;  %v1437_v19 = vsel %vm620_vm1, %v11267_v33, %v11233_v34  ;;  %v2001_v34 = vld [vmem:[#allocation2 + $0x171] sm:$0xff] }
 0x201   : > { %v2000_v33 = vld [vmem:[#allocation2 + $0x169] sm:$0xff] }
 0x202   : > { %2188 = vrot.lane.b32.xlu2 %v1989_v26, %s10351_s20  ;;  %v1995_v26 = vld [vmem:[#allocation2 + $0x111] sm:$0xff]  ;;  %v2004_v46 = vld [vmem:[#allocation2 + $0x1a9] sm:$0xff] }
 0x203   : > { %2186 = vrot.lane.b32.xlu1 %v1988_v55, %s10351_s20  ;;  %v1994_v55 = vld [vmem:[#allocation2 + $0x109] sm:$0xff] }
 0x204   : > { %v11570_v28 = vpop.permute.xlu2 %2058 }
 0x205   : > { %v1385_v56 = vpop.permute.xlu1 %1384 }
 0x206   : > { %2196 = vrot.lane.b32.xlu0 %v1993_v49, %s10351_s20 }
 0x207   : > { %9623 = vmatmul.msk.f32.gmra.mxu0 %vm1491_vm5, %v1466_v59  ;;  %9639 = vmatmul.msk.f32.gmra.mxu3 %vm1491_vm5, %v1482_v50  ;;  %v1484_v59 = vsel %vm1037_vm4, %v1452_v60, %v1385_v56 }
 0x208   : > { %v11584_v36 = vpop.permute.xlu0 %2048 }
 0x20a   : > { %2194 = vrot.lane.b32.xlu2 %v1992_v52, %s10351_s20  ;;  %v11632_v52 = vld [vmem:[#allocation2 + $0x1ef] sm:$0xff] }
 0x20b   : > { %2192 = vrot.lane.b32.xlu1 %v1991_v43, %s10351_s20  ;;  %v1453_v56 = vsel %vm620_vm1, %v11632_v52, %v11392_v44  ;;  %v11653_v44 = vld [vmem:[#allocation2 + $0x207] sm:$0xff] }
 0x20c   : > { %v11590_v11 = vpop.permute.xlu2 %2064  ;;  %v1485_v22 = vsel %vm1037_vm4, %v1453_v56, %v11516_v1  ;;  %v1438_v1 = vsel %vm620_vm1, %v11287_v0, %v11285_v18  ;;  %v2003_v18 = vld [vmem:[#allocation2 + $0x191] sm:$0xff] }
 0x20d   : > { %v11598_v40 = vpop.permute.xlu1 %1390 }
 0x20e   : > { %2202 = vrot.lane.b32.xlu0 %v1996_v13, %s10351_s20  ;;  %v1469_v13 = vsel %vm1037_vm4, %v1437_v19, %v11492_v2  ;;  %v2005_v2 = vld [vmem:[#allocation2 + $0x1b1] sm:$0xff]  ;;  %v11697_v19 = vld [vmem:[#allocation2 + $0x187] sm:$0xff] }
 0x20f   : > { %9624 = vmatmul.msk.f32.gmra.mxu0 %vm1491_vm5, %v1467_v41  ;;  %9640 = vmatmul.msk.f32.gmra.mxu3 %vm1491_vm5, %v1483_v38  ;;  %v1454_v38 = vsel %vm620_vm1, %v11653_v44, %v11423_v17  ;;  %v11676_v17 = vld [vmem:[#allocation2 + $0x20f] sm:$0xff] }
 0x210   : > { %v11606_v31 = vpop.permute.xlu0 %2054 }
 0x212   : > { %2200 = vrot.lane.b32.xlu2 %v1995_v26, %s10351_s20 }
 0x213   : > { %2198 = vrot.lane.b32.xlu1 %v1994_v55, %s10351_s20  ;;  %v1470_v55 = vsel %vm1037_vm4, %v1438_v1, %v11449_v16  ;;  %v2008_v16 = vld [vmem:[#allocation2 + $0x1e9] sm:$0xff] }
 0x214   : > { %v11618_v49 = vpop.permute.xlu2 %2070 }
 0x215   : > { %v11620_v51 = vpop.permute.xlu1 %2050 }
 0x216   : > { %2208 = vrot.lane.b32.xlu0 %v1999_v3, %s10351_s20  ;;  %v1486_v3 = vsel %vm1037_vm4, %v1454_v38, %v11564_v37  ;;  %v1439_v37 = vsel %vm620_vm1, %v11307_v15, %v11320_v25  ;;  %v2006_v15 = vld [vmem:[#allocation2 + $0x1c9] sm:$0xff] }
 0x217   : > { %9625 = vmatmul.msk.f32.gmra.mxu0 %vm1491_vm5, %v1468_v8  ;;  %9641 = vmatmul.msk.f32.gmra.mxu3 %vm1491_vm5, %v1484_v59  ;;  %v1455_v8 = vsel %vm620_vm1, %v11676_v17, %v11365_v30 }
 0x218   : > { %v11628_v50 = vpop.permute.xlu0 %2060 }
 0x21a   : > { %2206 = vrot.lane.b32.xlu2 %v1998_v12, %s10351_s20  ;;  %v1471_v12 = vsel %vm1037_vm4, %v1439_v37, %v11483_v10  ;;  %v1029_v10 = vsel %vm620_vm1, %v11697_v19, %v10963_v63  ;;  %v2009_v63 = vld [vmem:[#allocation2 + $0x1f1] sm:$0xff] }
 0x21b   : > { %2204 = vrot.lane.b32.xlu1 %v1997_v62, %s10351_s20  ;;  %v1487_v62 = vsel %vm1037_vm4, %v1455_v8, %v11598_v40  ;;  %v1440_v40 = vsel %vm620_vm1, %v11329_v29, %v11253_v23  ;;  %v17547_v29 = vld [vmem:[#allocation4_spill] sm:$0xff] }
 0x21c   : > { %v11647_v39 = vpop.permute.xlu2 %2076  ;;  %v17551_v8 = vld [vmem:[#allocation12_spill] sm:$0xff] }
 0x21d   : > { %v11640_v43 = vpop.permute.xlu1 %2056 }
 0x21e   : > { %2214 = vrot.lane.b32.xlu0 %v2002_v45, %s10351_s20  ;;  %v2007_v45 = vld [vmem:[#allocation2 + $0x1d1] sm:$0xff] }
 0x21f   : > { %9626 = vmatmul.msk.f32.gmra.mxu0 %vm1491_vm5, %v1469_v13  ;;  %9642 = vmatmul.msk.f32.gmra.mxu3 %vm1491_vm5, %v1485_v22  ;;  %v1062_v13 = vsel %vm1037_vm4, %v1029_v10, %v11091_v54  ;;  %v1472_v22 = vsel %vm1037_vm4, %v1440_v40, %v11506_v27  ;;  %v17546_v54 = vld [vmem:[#allocation33_spill] sm:$0xff] }
 0x220   : > { %v11651_v41 = vpop.permute.xlu0 %2066  ;;  %v17553_v40 = vld [vmem:[#allocation41_spill] sm:$0xff] }
 0x222   : > { %2212 = vrot.lane.b32.xlu2 %v2001_v34, %s10351_s20 }
 0x223   : > { %2210 = vrot.lane.b32.xlu1 %v2000_v33, %s10351_s20  ;;  %v11721_v33 = vld [vmem:[#allocation2 + $0x18f] sm:$0xff] }
 0x224   : > { %v11674_v60 = vpop.permute.xlu2 %2082  ;;  %v1030_v23 = vsel %vm620_vm1, %v11721_v33, %v17546_v54 }
 0x225   : > { %v11663_v26 = vpop.permute.xlu1 %2062 }
 0x226   : > { %2220 = vrot.lane.b32.xlu0 %v2005_v2, %s10351_s20 }
 0x227   : > { %9627 = vmatmul.msk.f32.gmra.mxu0 %vm1491_vm5, %v1470_v55  ;;  %9643 = vmatmul.msk.f32.gmra.mxu3 %vm1491_vm5, %v1486_v3  ;;  %v17549_v55 = vld [vmem:[#allocation39_spill] sm:$0xff]  ;;  %v2013_v3 = vld [vmem:[#allocation2 + $0x231] sm:$0xff] }
 0x228   : > { %v11672_v0 = vpop.permute.xlu0 %2072 }
 0x22a   : > { %2218 = vrot.lane.b32.xlu2 %v2004_v46, %s10351_s20  ;;  %v9679_v46 = vld [vmem:[%s17398_s2 + $0x28] sm:$0xf] }
 0x22b   : > { %2216 = vrot.lane.b32.xlu1 %v2003_v18, %s10351_s20  ;;  %v2012_v18 = vld [vmem:[#allocation2 + $0x229] sm:$0xff]  ;;  %9680 = vmatpush.msk.msra.mxu2 %vm1588_vm3, %v9679_v46 }
 0x22c   : > { %v11700_v30 = vpop.permute.xlu2 %2088  ;;  %10186 = vmatpush.msk.msra.mxu3 %vm1588_vm3, %v9679_v46  ;;  %v17559_v46 = vld [vmem:[#allocation9_spill] sm:$0xff] }
 0x22d   : > { %v11686_v59 = vpop.permute.xlu1 %2068 }
 0x22e   : > { %2226 = vrot.lane.b32.xlu0 %v2008_v16, %s10351_s20 }
 0x22f   : > { %9628 = vmatmul.msk.f32.gmra.mxu0 %vm1491_vm5, %v1471_v12  ;;  %9644 = vmatmul.msk.f32.gmra.mxu3 %vm1491_vm5, %v1487_v62  ;;  %v17552_v12 = vld [vmem:[#allocation18_spill] sm:$0xff] }
 0x230   : > { %v11695_v25 = vpop.permute.xlu0 %2078  ;;  %v1442_v62 = vsel %vm620_vm1, %v17552_v12, %v17551_v8 }
 0x231   : > { %v1474_v10 = vsel %vm1037_vm4, %v1442_v62, %v11499_v35 }
 0x232   : > { %2224 = vrot.lane.b32.xlu2 %v2007_v45, %s10351_s20 }
 0x233   : > { %2222 = vrot.lane.b32.xlu1 %v2006_v15, %s10351_s20  ;;  %v9678_v15 = vld [vmem:[%s17398_s2 + $0x20] sm:$0xff] }
 0x234   : > { %v11732_v2 = vpop.permute.xlu2 %2094  ;;  %2451 = vmatpush.msra.mxu2 %v9678_v15  ;;  %10187 = vmatpush.msra.mxu3 %v9678_v15 }
 0x235   : > { %v11709_v56 = vpop.permute.xlu1 %2074 }
 0x236   : > { %2232 = vrot.lane.b32.xlu0 %v11354_v20, %s10351_s20  ;;  %v17548_v20 = vld [vmem:[#allocation7_spill] sm:$0xff] }
 0x237   : > { %9629 = vmatmul.msk.f32.gmra.mxu0 %vm1491_vm5, %v1472_v22  ;;  %9670 = vmatmul.msk.f32.vlgmr.msrb.gmra.mxu3 %vm1491_vm5, %v1062_v13  ;;  %v1441_v27 = vsel %vm620_vm1, %v17548_v20, %v17547_v29 }
 0x238   : > { %v11719_v34 = vpop.permute.xlu0 %2084  ;;  %v1473_v38 = vsel %vm1037_vm4, %v1441_v27, %v11461_v42  ;;  %v17550_v42 = vld [vmem:[#allocation26_spill] sm:$0xff]  ;;  %v17556_v27 = vld [vmem:[#allocation37_spill] sm:$0xff] }
 0x239   : > { %v1031_v37 = vsel %vm620_vm1, %v11525_v53, %v17550_v42 }
 0x23a   : > { %2230 = vrot.lane.b32.xlu2 %v11313_v4, %s10351_s20  ;;  %v1063_v4 = vsel %vm1037_vm4, %v1030_v23, %v17549_v55  ;;  %v1064_v13 = vsel %vm1037_vm4, %v1031_v37, %v17553_v40  ;;  %v17555_v23 = vld [vmem:[#allocation8_spill] sm:$0xff] }
 0x23b   : > { %2228 = vrot.lane.b32.xlu1 %v2009_v63, %s10351_s20  ;;  %v17554_v63 = vld [vmem:[#allocation32_spill] sm:$0xff]  ;;  %v1443_v35 = vsel %vm620_vm1, %v11394_v32, %v17555_v23 }
 0x23c   : > { %v11766_v22 = vpop.permute.xlu2 %2100  ;;  %v1032_v54 = vsel %vm620_vm1, %v11548_v61, %v17554_v63  ;;  %v1475_v20 = vsel %vm1037_vm4, %v1443_v35, %v11521_v24  ;;  %v17557_v61 = vld [vmem:[#allocation35_spill] sm:$0xff]  ;;  %v17560_v37 = vld [vmem:[#allocation40_spill] sm:$0xff] }
 0x23d   : > { %v11734_v1 = vpop.permute.xlu1 %2080  ;;  %v1033_v32 = vsel %vm620_vm1, %v11568_v58, %v17557_v61  ;;  %v17561_v58 = vld [vmem:[#allocation30_spill] sm:$0xff]  ;;  %v17563_v63 = vld [vmem:[#allocation43_spill] sm:$0xff] }
 0x23e   : > { %v1066_v8 = vsel %vm1037_vm4, %v1033_v32, %v17560_v37  ;;  %v1034_v15 = vsel %vm620_vm1, %v11588_v9, %v17561_v58  ;;  %v1918_v23 = vld [vmem:[#allocation2 + $0x47] sm:$0xff]  ;;  %v17565_v61 = vld [vmem:[#allocation34_spill] sm:$0xff] }
 0x23f   : > { %9630 = vmatmul.msk.f32.gmra.mxu0 %vm1491_vm5, %v1473_v38  ;;  %9671 = vmatmul.msk.f32.gmra.mxu3 %vm1491_vm5, %v1063_v4  ;;  %v1065_v38 = vsel %vm1037_vm4, %v1032_v54, %v17556_v27  ;;  %v1067_v54 = vsel %vm1037_vm4, %v1034_v15, %v17563_v63 }
 0x240   : > { %v11745_v16 = vpop.permute.xlu0 %2090 }
 0x242   : > { %2236 = vrot.lane.b32.xlu2 %v2013_v3, %s10351_s20  ;;  %v17558_v3 = vld [vmem:[#allocation22_spill] sm:$0xff] }
 0x243   : > { %2234 = vrot.lane.b32.xlu1 %v2012_v18, %s10351_s20  ;;  %v1444_v18 = vsel %vm620_vm1, %v17559_v46, %v17558_v3  ;;  %v17566_v46 = vld [vmem:[#allocation38_spill] sm:$0xff] }
 0x244   : > { %v11788_v4 = vpop.permute.xlu2 %2106  ;;  %v1476_v42 = vsel %vm1037_vm4, %v1444_v18, %v11473_v7  ;;  %v17567_v18 = vld [vmem:[#allocation5_spill] sm:$0xff] }
 0x245   : > { %v11757_v45 = vpop.permute.xlu1 %2086 }
 0x247   : > { %9631 = vmatmul.msk.f32.gmra.mxu0 %vm1491_vm5, %v1474_v10  ;;  %9672 = vmatmul.msk.f32.gmra.mxu3 %vm1491_vm5, %v1064_v13  ;;  %v17562_v10 = vld [vmem:[#allocation6_spill] sm:$0xff] }
 0x248   : > { %v11770_v53 = vpop.permute.xlu0 %2096  ;;  %v1445_v40 = vsel %vm620_vm1, %v11429_v21, %v17562_v10  ;;  %v2270_v21 = vsel %vm620_vm1, %v1918_v23, %v11535_v6  ;;  %v1919_v6 = vld [vmem:[#allocation2 + $0x4f] sm:$0xff] }
 0x249   : > { %v1477_v7 = vsel %vm1037_vm4, %v1445_v40, %v11511_v48  ;;  %v1035_v48 = vsel %vm620_vm1, %v11610_v57, %v17565_v61  ;;  %v2271_v57 = vsel %vm620_vm1, %v1919_v6, %v11584_v36  ;;  %v1920_v36 = vld [vmem:[#allocation2 + $0x67] sm:$0xff]  ;;  %v1921_v23 = vld [vmem:[#allocation2 + $0x6f] sm:$0xff] }
 0x24a   : > { %v2272_v63 = vsel %vm620_vm1, %v1920_v36, %v11620_v51  ;;  %v1922_v51 = vld [vmem:[#allocation2 + $0x87] sm:$0xff] }
 0x24c   : > { %v2177_v62 = vpop.permute.xlu2 %2176 }
 0x24d   : > { %v11778_v29 = vpop.permute.xlu1 %2092  ;;  %v2303_v15 = vsel %vm1037_vm4, %v2271_v57, %v2177_v62 }
 0x24f   : > { %9632 = vmatmul.msk.f32.gmra.mxu0 %vm1491_vm5, %v1475_v20  ;;  %9673 = vmatmul.msk.f32.gmra.mxu3 %vm1491_vm5, %v1065_v38  ;;  %v17564_v20 = vld [vmem:[#allocation3_spill] sm:$0xff] }
 0x250   : > { %v11786_v55 = vpop.permute.xlu0 %2102  ;;  %v1446_v9 = vsel %vm620_vm1, %v11697_v19, %v17564_v20  ;;  %v1068_v19 = vsel %vm1037_vm4, %v1035_v48, %v17566_v46  ;;  %v2273_v20 = vsel %vm620_vm1, %v1921_v23, %v11550_v5  ;;  %v1923_v5 = vld [vmem:[#allocation2 + $0x8f] sm:$0xff] }
 0x251   : > { %v1478_v3 = vsel %vm1037_vm4, %v1446_v9, %v11540_v14  ;;  %v17568_v14 = vld [vmem:[#allocation36_spill] sm:$0xff] }
 0x252   : > { %v1036_v58 = vsel %vm620_vm1, %v11632_v52, %v17568_v14 }
 0x254   : > { %v2183_v27 = vpop.permute.xlu2 %2182 }
 0x255   : > { %v11796_v24 = vpop.permute.xlu1 %2098 }
 0x257   : > { %9633 = vmatmul.msk.f32.gmra.mxu0 %vm1491_vm5, %v1476_v42  ;;  %9674 = vmatmul.msk.f32.gmra.mxu3 %vm1491_vm5, %v1066_v8  ;;  %v1447_v42 = vsel %vm620_vm1, %v11721_v33, %v17567_v18  ;;  %v17569_v33 = vld [vmem:[#allocation42_spill] sm:$0xff] }
 0x258   : > { %v11804_v12 = vpop.permute.xlu0 %2108  ;;  %v1479_v10 = vsel %vm1037_vm4, %v1447_v42, %v11487_v47  ;;  %v1924_v42 = vld [vmem:[#allocation2 + $0xa7] sm:$0xff] }
 0x25c   : > { %v2189_v40 = vpop.permute.xlu2 %2188 }
 0x25d   : > { %v11812_v13 = vpop.permute.xlu1 %2104 }
 0x25f   : > { %9634 = vmatmul.msk.f32.gmra.mxu0 %vm1491_vm5, %v1477_v7  ;;  %9675 = vmatmul.msk.f32.gmra.mxu3 %vm1491_vm5, %v1067_v54  ;;  %v1069_v7 = vsel %vm1037_vm4, %v1036_v58, %v17569_v33 }
 0x260   : > { %v2179_v35 = vpop.permute.xlu0 %2178 }
 0x261   : > { %v2304_v62 = vsel %vm1037_vm4, %v2272_v63, %v2179_v35  ;;  %v2274_v35 = vsel %vm620_vm1, %v1922_v51, %v11606_v31  ;;  %v1926_v63 = vld [vmem:[#allocation2 + $0xc7] sm:$0xff]  ;;  %v1927_v51 = vld [vmem:[#allocation2 + $0xcf] sm:$0xff] }
 0x264   : > { %v11856_v47 = vpop.permute.xlu2 %2194 }
 0x265   : > { %v2175_v38 = vpop.permute.xlu1 %2174 }
 0x266   : > { %v2302_v32 = vsel %vm1037_vm4, %v2270_v21, %v2175_v38 }
 0x267   : > { %9681 = vmatmul.msk.f32.vlgmr.msra.gmra.mxu2 %vm1491_vm5, %v2302_v32  ;;  %9635 = vmatmul.msk.f32.gmra.mxu0 %vm1491_vm5, %v1478_v3  ;;  %v2306_v32 = vsel %vm1037_vm4, %v2274_v35, %v2183_v27  ;;  %v2276_v27 = vsel %vm620_vm1, %v1924_v42, %v11570_v28  ;;  %v1943_v35 = vld [vmem:[#allocation2 + $0x1cf] sm:$0xff]  ;;  %v1944_v42 = vld [vmem:[#allocation2 + $0x1e7] sm:$0xff] }
 0x268   : > { %9676 = vmatmul.msk.f32.gmra.mxu3 %vm1491_vm5, %v1068_v19  ;;  %v2185_v8 = vpop.permute.xlu0 %2184  ;;  %v2275_v19 = vsel %vm620_vm1, %v1923_v5, %v11640_v43 }
 0x269   : > { %v2307_v31 = vsel %vm1037_vm4, %v2275_v19, %v2185_v8 }
 0x26c   : > { %v11864_v61 = vpop.permute.xlu2 %2200 }
 0x26d   : > { %v2181_v37 = vpop.permute.xlu1 %2180 }
 0x26e   : > { %v2305_v21 = vsel %vm1037_vm4, %v2273_v20, %v2181_v37 }
 0x26f   : > { %9682 = vmatmul.msk.f32.gmra.mxu2 %vm1491_vm5, %v2303_v15  ;;  %9636 = vmatmul.msk.f32.gmra.mxu0 %vm1491_vm5, %v1479_v10  ;;  %v1925_v15 = vld [vmem:[#allocation2 + $0xaf] sm:$0xff] }
 0x270   : > { %9677 = vmatmul.msk.f32.gmra.mxu3 %vm1491_vm5, %v1069_v7  ;;  %v2191_v54 = vpop.permute.xlu0 %2190  ;;  %v2277_v8 = vsel %vm620_vm1, %v1925_v15, %v11628_v50 }
 0x271   : > { %v2309_v28 = vsel %vm1037_vm4, %v2277_v8, %v2189_v40  ;;  %v11937_v8 = vpop.f32.mrf.mxu0 }
 0x274   : > { %v11878_v6 = vpop.permute.xlu2 %2206 }
 0x275   : > { %v2187_v52 = vpop.permute.xlu1 %2186  ;;  %v11874_v46 = vpop.f32.mrf.mxu3 }
 0x276   : > { %v2308_v43 = vsel %vm1037_vm4, %v2276_v27, %v2187_v52  ;;  %v1942_v52 = vld [vmem:[#allocation2 + $0x1c7] sm:$0xff] }
 0x277   : > { %9683 = vmatmul.msk.f32.gmra.mxu2 %vm1491_vm5, %v2304_v62  ;;  %v2278_v62 = vsel %vm620_vm1, %v1926_v63, %v11663_v26  ;;  %v2294_v50 = vsel %vm620_vm1, %v1942_v52, %v11732_v2  ;;  %v2279_v26 = vsel %vm620_vm1, %v1927_v51, %v11590_v11  ;;  %v2295_v2 = vsel %vm620_vm1, %v1943_v35, %v11770_v53  ;;  %v1945_v63 = vld [vmem:[#allocation2 + $0x1ef] sm:$0xff]  ;;  %v11941_v52 = vpop.f32.mrf.mxu1 }
 0x278   : > { %v11862_v38 = vpop.permute.xlu0 %2196  ;;  %v2310_v40 = vsel %vm1037_vm4, %v2278_v62, %v2191_v54  ;;  %v2296_v11 = vsel %vm620_vm1, %v1944_v42, %v11796_v24  ;;  %v2297_v24 = vsel %vm620_vm1, %v1945_v63, %v11766_v22  ;;  %v2298_v35 = vsel %vm620_vm1, %v11653_v44, %v11786_v55  ;;  %v1932_v42 = vld [vmem:[#allocation2 + $0x127] sm:$0xff]  ;;  %v1949_v63 = vld [vmem:[#allocation2 + $0x22f] sm:$0xff] }
 0x279   : > { %v2299_v55 = vsel %vm620_vm1, %v11676_v17, %v11812_v13 }
 0x27c   : > { %v11893_v58 = vpop.permute.xlu2 %2212 }
 0x27d   : > { %v2193_v9 = vpop.permute.xlu1 %2192 }
 0x27e   : > { %v2311_v19 = vsel %vm1037_vm4, %v2279_v26, %v2193_v9 }
 0x27f   : > { %9684 = vmatmul.msk.f32.gmra.mxu2 %vm1491_vm5, %v2305_v21  ;;  %v11956_v51 = vpop.f32.mrf.mxu1 }
 0x280   : > { %v11872_v3 = vpop.permute.xlu0 %2202 }
 0x282   : > { %v11890_v14 = vpop.f32.mrf.mxu3 }
 0x284   : > { %v11906_v36 = vpop.permute.xlu2 %2218 }
 0x285   : > { %v11868_v48 = vpop.permute.xlu1 %2198 }
 0x287   : > { %9685 = vmatmul.msk.f32.gmra.mxu2 %vm1491_vm5, %v2306_v32 }
 0x288   : > { %v11886_v57 = vpop.permute.xlu0 %2208 }
 0x28a   : > { %v11904_v7 = vpop.f32.mrf.mxu3 }
 0x28c   : > { %v2225_v5 = vpop.permute.xlu2 %2224 }
 0x28d   : > { %v11880_v18 = vpop.permute.xlu1 %2204  ;;  %v2327_v54 = vsel %vm1037_vm4, %v2295_v2, %v2225_v5  ;;  %v1931_v2 = vld [vmem:[#allocation2 + $0x10f] sm:$0xff] }
 0x28e   : > { %v2283_v44 = vsel %vm620_vm1, %v1931_v2, %v11672_v0  ;;  %v2284_v0 = vsel %vm620_vm1, %v1932_v42, %v11709_v56  ;;  %v1933_v56 = vld [vmem:[#allocation2 + $0x12f] sm:$0xff]  ;;  %v1936_v42 = vld [vmem:[#allocation2 + $0x167] sm:$0xff] }
 0x28f   : > { %9686 = vmatmul.msk.f32.gmra.mxu2 %vm1491_vm5, %v2307_v31  ;;  %v1928_v31 = vld [vmem:[#allocation2 + $0xe7] sm:$0xff]  ;;  %v1935_v2 = vld [vmem:[#allocation2 + $0x14f] sm:$0xff] }
 0x290   : > { %v11901_v33 = vpop.permute.xlu0 %2214  ;;  %v2280_v15 = vsel %vm620_vm1, %v1928_v31, %v11651_v41 }
 0x291   : > { %v2312_v53 = vsel %vm1037_vm4, %v2280_v15, %v11856_v47 }
 0x292   : > { %v11918_v32 = vpop.f32.mrf.mxu3 }
 0x295   : > { %v11888_v37 = vpop.permute.xlu1 %2210 }
 0x297   : > { %9687 = vmatmul.msk.f32.gmra.mxu2 %vm1491_vm5, %v2308_v43 }
 0x298   : > { %v11916_v21 = vpop.permute.xlu0 %2220 }
 0x29a   : > { %v11928_v43 = vpop.f32.mrf.mxu3 }
 0x29d   : > { %v11898_v10 = vpop.permute.xlu1 %2216 }
 0x29f   : > { %9688 = vmatmul.msk.f32.gmra.mxu2 %vm1491_vm5, %v2309_v28  ;;  %v1929_v28 = vld [vmem:[#allocation2 + $0xef] sm:$0xff] }
 0x2a0   : > { %v2227_v27 = vpop.permute.xlu0 %2226  ;;  %v2281_v41 = vsel %vm620_vm1, %v1929_v28, %v11686_v59  ;;  %v2231_v59 = vpop.permute.xlu2 %2230  ;;  %v2713_v28 = vld [vmem:[#allocation2 + $0x8] sm:$0xff] }
 0x2a1   : > { %v2328_v9 = vsel %vm1037_vm4, %v2296_v11, %v2227_v27  ;;  %v2330_v5 = vsel %vm1037_vm4, %v2298_v35, %v2231_v59  ;;  %v1948_v27 = vld [vmem:[#allocation2 + $0x227] sm:$0xff]  ;;  %2809 = vrot.lane.b32.xlu0 %v2713_v28, %s10352_s19  ;;  %v1822_v35 = vadd.f32 %v11941_v52, %v11937_v8  ;;  %v1937_v28 = vld [vmem:[#allocation2 + $0x16f] sm:$0xff] }
 0x2a2   : > { %v11947_v47 = vpop.f32.mrf.mxu3  ;;  %v2300_v17 = vsel %vm620_vm1, %v1948_v27, %v11788_v4 }
 0x2a5   : > { %v2223_v23 = vpop.permute.xlu1 %2222 }
 0x2a6   : > { %v2326_v20 = vsel %vm1037_vm4, %v2294_v50, %v2223_v23  ;;  %v2313_v50 = vsel %vm1037_vm4, %v2281_v41, %v11862_v38  ;;  %v2301_v41 = vsel %vm620_vm1, %v1949_v63, %v11804_v12 }
 0x2a7   : > { %9689 = vmatmul.msk.f32.gmra.mxu2 %vm1491_vm5, %v2310_v40  ;;  %9705 = vmatmul.msk.f32.vlgmr.msra.gmra.mxu3 %vm1491_vm5, %v2326_v20  ;;  %v11954_v20 = vpop.f32.mrf.mxu0  ;;  %v1930_v40 = vld [vmem:[#allocation2 + $0x107] sm:$0xff] }
 0x2a8   : > { %v2282_v22 = vsel %vm620_vm1, %v1930_v40, %v11618_v49  ;;  %v11972_v49 = vpop.f32.mrf.mxu1  ;;  %v2237_v4 = vpop.permute.xlu2 %2236  ;;  %v2714_v40 = vld [vmem:[#allocation2 + $0x10] sm:$0xff] }
 0x2a9   : > { %v2314_v38 = vsel %vm1037_vm4, %v2282_v22, %v11868_v48  ;;  %v2315_v48 = vsel %vm1037_vm4, %v2283_v44, %v11864_v61  ;;  %v2316_v61 = vsel %vm1037_vm4, %v2284_v0, %v11872_v3  ;;  %v2285_v3 = vsel %vm620_vm1, %v1933_v56, %v11647_v39  ;;  %2811 = vrot.lane.b32.xlu1 %v2714_v40, %s10352_s19  ;;  %v1934_v39 = vld [vmem:[#allocation2 + $0x147] sm:$0xff] }
 0x2aa   : > { %v11968_v26 = vpop.f32.mrf.mxu3  ;;  %v2286_v12 = vsel %vm620_vm1, %v1934_v39, %v11695_v25 }
 0x2ad   : > { %v2229_v62 = vpop.permute.xlu1 %2228 }
 0x2ae   : > { %v2329_v23 = vsel %vm1037_vm4, %v2297_v24, %v2229_v62  ;;  %v2317_v24 = vsel %vm1037_vm4, %v2285_v3, %v11880_v18  ;;  %v2318_v18 = vsel %vm1037_vm4, %v2286_v12, %v11878_v6  ;;  %v2287_v6 = vsel %vm620_vm1, %v1935_v2, %v11734_v1 }
 0x2af   : > { %9690 = vmatmul.msk.f32.gmra.mxu2 %vm1491_vm5, %v2311_v19  ;;  %9706 = vmatmul.msk.f32.gmra.mxu3 %vm1491_vm5, %v2327_v54  ;;  %v11970_v19 = vpop.f32.mrf.mxu0  ;;  %v2233_v54 = vpop.permute.xlu0 %2232  ;;  %v2319_v8 = vsel %vm1037_vm4, %v2287_v6, %v11886_v57  ;;  %v2288_v57 = vsel %vm620_vm1, %v1936_v42, %v11674_v60 }
 0x2b0   : > { %v2331_v31 = vsel %vm1037_vm4, %v2299_v55, %v2233_v54 }
 0x2b2   : > { %v11984_v15 = vpop.f32.mrf.mxu3 }
 0x2b5   : > { %v2235_v11 = vpop.permute.xlu1 %2234 }
 0x2b7   : > { %9691 = vmatmul.msk.f32.gmra.mxu2 %vm1491_vm5, %v2312_v53  ;;  %9707 = vmatmul.msk.f32.gmra.mxu3 %vm1491_vm5, %v2328_v9  ;;  %v11990_v13 = vpop.f32.mrf.mxu0  ;;  %v2332_v53 = vsel %vm1037_vm4, %v2300_v17, %v2235_v11  ;;  %v11995_v9 = vpop.f32.mrf.mxu1 }
 0x2ba   : > { %v12000_v62 = vpop.f32.mrf.mxu3 }
 0x2bf   : > { %9692 = vmatmul.msk.f32.gmra.mxu2 %vm1491_vm5, %v2313_v50  ;;  %9708 = vmatmul.msk.f32.gmra.mxu3 %vm1491_vm5, %v2329_v23  ;;  %v2333_v50 = vsel %vm1037_vm4, %v2301_v41, %v2237_v4  ;;  %v12009_v23 = vpop.f32.mrf.mxu0  ;;  %v12013_v59 = vpop.f32.mrf.mxu1 }
 0x2c2   : > { %v12018_v22 = vpop.f32.mrf.mxu3 }
 0x2c7   : > { %9693 = vmatmul.msk.f32.gmra.mxu2 %vm1491_vm5, %v2314_v38  ;;  %9709 = vmatmul.msk.f32.gmra.mxu3 %vm1491_vm5, %v2330_v5  ;;  %v12025_v38 = vpop.f32.mrf.mxu0  ;;  %v12030_v5 = vld [vmem:[%s17399_s3] ss:$0 sm:$0xff]  ;;  %v12032_v25 = vpop.f32.mrf.mxu1 }
 0x2cf   : > { %9694 = vmatmul.msk.f32.gmra.mxu2 %vm1491_vm5, %v2315_v48  ;;  %9710 = vmatmul.msk.f32.gmra.mxu3 %vm1491_vm5, %v2331_v31  ;;  %v12040_v48 = vpop.f32.mrf.mxu3  ;;  %v1825_v31 = vadd.f32 %v11956_v51, %v11954_v20  ;;  %v12045_v11 = vpop.f32.mrf.mxu0  ;;  %v1828_v51 = vadd.f32 %v11972_v49, %v11970_v19 }
 0x2d0   : > { %v12047_v0 = vpop.f32.mrf.mxu1 }
 0x2d7   : > { %9695 = vmatmul.msk.f32.gmra.mxu2 %vm1491_vm5, %v2316_v61  ;;  %9711 = vmatmul.msk.f32.gmra.mxu3 %vm1491_vm5, %v2332_v53  ;;  %v2320_v61 = vsel %vm1037_vm4, %v2288_v57, %v11888_v37  ;;  %v12062_v60 = vpop.f32.mrf.mxu3  ;;  %v2289_v37 = vsel %vm620_vm1, %v1937_v28, %v11719_v34  ;;  %v12066_v4 = vpop.f32.mrf.mxu0  ;;  %v1938_v34 = vld [vmem:[#allocation2 + $0x187] sm:$0xff]  ;;  %v1840_v28 = vadd.f32 %v12047_v0, %v12045_v11 }
 0x2d8   : > { %v2321_v19 = vsel %vm1037_vm4, %v2289_v37, %v11893_v58  ;;  %v1842_v49 = vpop.f32.mrf.mxu1  ;;  %v2290_v58 = vsel %vm620_vm1, %v1938_v34, %v11757_v45  ;;  %v1939_v45 = vld [vmem:[#allocation2 + $0x18f] sm:$0xff] }
 0x2d9   : > { %v1843_v0 = vadd.f32 %v1842_v49, %v12066_v4  ;;  %v1894_v4 = vadd.f32 %v12000_v62, %v11874_v46  ;;  %v1897_v62 = vadd.f32 %v12018_v22, %v11890_v14 }
 0x2df   : > { %9696 = vmatmul.msk.f32.gmra.mxu2 %vm1491_vm5, %v2317_v24  ;;  %9712 = vmatmul.msk.f32.gmra.mxu3 %vm1491_vm5, %v2333_v50  ;;  %v1831_v50 = vadd.f32 %v11995_v9, %v11990_v13  ;;  %v12079_v12 = vpop.f32.mrf.mxu3  ;;  %v1633_v2 = vpop.f32.mrf.mxu0 }
 0x2e7   : > { %9697 = vmatmul.msk.f32.gmra.mxu2 %vm1491_vm5, %v2318_v18 }
 0x2ea   : > { %v2453_v54 = vpop.f32.mrf.mxu2 }
 0x2eb   : > { %v2549_v44 = vadd.f32 %v2453_v54, %v1822_v35  ;;  %v2322_v35 = vsel %vm1037_vm4, %v2290_v58, %v11901_v33  ;;  %v1845_v54 = vpop.f32.mrf.mxu1  ;;  %v2291_v33 = vsel %vm620_vm1, %v1939_v45, %v11700_v30  ;;  %v1940_v30 = vld [vmem:[#allocation2 + $0x1a7] sm:$0xff] }
 0x2ed   : > { %v2585_v55 = vadd.f32 %v12030_v5, %v2549_v44  ;;  %v1834_v44 = vadd.f32 %v12013_v59, %v12009_v23  ;;  %v1837_v59 = vadd.f32 %v12032_v25, %v12025_v38 }
 0x2ef   : > { %v2617_v52 = vmax.f32 %v2585_v55, 0.0  ;;  %9698 = vmatmul.msk.f32.gmra.mxu2 %vm1491_vm5, %v2319_v8 }
 0x2f1   : > { %2649 = vst.msk [vmem:[#allocation2 + $0x28] sm:$0xff] %vm513_vm0, %v2617_v52  ;;  %v12097_v52 = vpop.f32.mrf.mxu3 }
 0x2f2   : > { %v2456_v27 = vpop.f32.mrf.mxu2 }
 0x2f3   : > { %v2550_v1 = vadd.f32 %v2456_v27, %v1825_v31  ;;  %v2323_v31 = vsel %vm1037_vm4, %v2291_v33, %v11898_v10  ;;  %v1636_v27 = vpop.f32.mrf.mxu0  ;;  %v1848_v57 = vpop.f32.mrf.mxu1  ;;  %v2292_v10 = vsel %vm620_vm1, %v1940_v30, %v11745_v16  ;;  %v1941_v16 = vld [vmem:[#allocation2 + $0x1af] sm:$0xff] }
 0x2f4   : > { %v1849_v46 = vadd.f32 %v1848_v57, %v1636_v27 }
 0x2f5   : > { %v2586_v17 = vadd.f32 %v12030_v5, %v2550_v1 }
 0x2f7   : > { %v2618_v53 = vmax.f32 %v2586_v17, 0.0  ;;  %9699 = vmatmul.msk.f32.gmra.mxu2 %vm1491_vm5, %v2320_v61 }
 0x2f8   : > { %v12055_v20 = vld [vmem:[#allocation2 + $0x28] sm:$0xff] }
 0x2f9   : > { %2650 = vst.msk [vmem:[#allocation2 + $0x30] sm:$0xff] %vm513_vm0, %v2618_v53  ;;  %2813 = vrot.lane.b32.xlu2 %v12055_v20, %s10352_s19  ;;  %v2324_v53 = vsel %vm1037_vm4, %v2292_v10, %v11906_v36  ;;  %v12115_v38 = vpop.f32.mrf.mxu3 }
 0x2fa   : > { %v2459_v56 = vpop.f32.mrf.mxu2 }
 0x2fb   : > { %v2551_v63 = vadd.f32 %v2459_v56, %v1828_v51  ;;  %v1851_v36 = vpop.f32.mrf.mxu1 }
 0x2fd   : > { %v2587_v3 = vadd.f32 %v12030_v5, %v2551_v63  ;;  %v1639_v63 = vpop.f32.mrf.mxu0 }
 0x2fe   : > { %v1852_v14 = vadd.f32 %v1851_v36, %v1639_v63 }
 0x2ff   : > { %v2619_v41 = vmax.f32 %v2587_v3, 0.0  ;;  %9700 = vmatmul.msk.f32.gmra.mxu2 %vm1491_vm5, %v2321_v19  ;;  %v2293_v3 = vsel %vm620_vm1, %v1941_v16, %v11778_v29 }
 0x300   : > { %v12072_v24 = vld [vmem:[#allocation2 + $0x30] sm:$0xff] }
 0x301   : > { %2651 = vst.msk [vmem:[#allocation2 + $0x48] sm:$0xff] %vm513_vm0, %v2619_v41  ;;  %2815 = vrot.lane.b32.xlu0 %v12072_v24, %s10352_s19  ;;  %v2325_v41 = vsel %vm1037_vm4, %v2293_v3, %v11916_v21  ;;  %v12136_v34 = vpop.f32.mrf.mxu3 }
 0x302   : > { %v2462_v40 = vpop.f32.mrf.mxu2 }
 0x303   : > { %v2552_v39 = vadd.f32 %v2462_v40, %v1831_v50  ;;  %v1854_v21 = vpop.f32.mrf.mxu1 }
 0x305   : > { %v2588_v18 = vadd.f32 %v12030_v5, %v2552_v39  ;;  %v1642_v39 = vpop.f32.mrf.mxu0 }
 0x307   : > { %v2620_v13 = vmax.f32 %v2588_v18, 0.0  ;;  %9701 = vmatmul.msk.f32.gmra.mxu2 %vm1491_vm5, %v2322_v35 }
 0x308   : > { %v12087_v9 = vld [vmem:[#allocation2 + $0x48] sm:$0xff] }
 0x309   : > { %2652 = vst.msk [vmem:[#allocation2 + $0x50] sm:$0xff] %vm513_vm0, %v2620_v13  ;;  %2817 = vrot.lane.b32.xlu1 %v12087_v9, %s10352_s19  ;;  %v1846_v13 = vadd.f32 %v1845_v54, %v1633_v2 }
 0x30a   : > { %v2465_v6 = vpop.f32.mrf.mxu2 }
 0x30b   : > { %v2553_v55 = vadd.f32 %v2465_v6, %v1834_v44  ;;  %v1857_v54 = vpop.f32.mrf.mxu1 }
 0x30d   : > { %v2589_v8 = vadd.f32 %v12030_v5, %v2553_v55 }
 0x30f   : > { %v2621_v42 = vmax.f32 %v2589_v8, 0.0  ;;  %9702 = vmatmul.msk.f32.gmra.mxu2 %vm1491_vm5, %v2323_v31  ;;  %v1645_v8 = vpop.f32.mrf.mxu0 }
 0x310   : > { %v12102_v23 = vld [vmem:[#allocation2 + $0x50] sm:$0xff] }
 0x311   : > { %2653 = vst.msk [vmem:[#allocation2 + $0x68] sm:$0xff] %vm513_vm0, %v2621_v42  ;;  %2819 = vrot.lane.b32.xlu2 %v12102_v23, %s10352_s19 }
 0x312   : > { %v2468_v1 = vpop.f32.mrf.mxu2 }
 0x313   : > { %v2554_v17 = vadd.f32 %v2468_v1, %v1837_v59 }
 0x315   : > { %v2590_v61 = vadd.f32 %v12030_v5, %v2554_v17 }
 0x317   : > { %v2622_v51 = vmax.f32 %v2590_v61, 0.0  ;;  %9703 = vmatmul.msk.f32.gmra.mxu2 %vm1491_vm5, %v2324_v53  ;;  %v1648_v22 = vpop.f32.mrf.mxu0 }
 0x318   : > { %v12117_v25 = vld [vmem:[#allocation2 + $0x68] sm:$0xff] }
 0x319   : > { %2654 = vst.msk [vmem:[#allocation2 + $0x70] sm:$0xff] %vm513_vm0, %v2622_v51  ;;  %2821 = vrot.lane.b32.xlu0 %v12117_v25, %s10352_s19  ;;  %v1900_v51 = vadd.f32 %v12040_v48, %v11904_v7  ;;  %v1855_v7 = vadd.f32 %v1854_v21, %v1642_v39  ;;  %v1903_v48 = vadd.f32 %v12062_v60, %v11918_v32 }
 0x31a   : > { %v2471_v56 = vpop.f32.mrf.mxu2  ;;  %v1858_v60 = vadd.f32 %v1857_v54, %v1645_v8 }
 0x31b   : > { %v2555_v37 = vadd.f32 %v2471_v56, %v1840_v28  ;;  %v1860_v56 = vpop.f32.mrf.mxu1 }
 0x31d   : > { %v2591_v19 = vadd.f32 %v12030_v5, %v2555_v37 }
 0x31f   : > { %v2623_v50 = vmax.f32 %v2591_v19, 0.0  ;;  %9704 = vmatmul.msk.f32.gmra.mxu2 %vm1491_vm5, %v2325_v41 }
 0x320   : > { %v12130_v11 = vld [vmem:[#allocation2 + $0x70] sm:$0xff] }
 0x321   : > { %2655 = vst.msk [vmem:[#allocation2 + $0x88] sm:$0xff] %vm513_vm0, %v2623_v50  ;;  %2823 = vrot.lane.b32.xlu1 %v12130_v11, %s10352_s19 }
 0x322   : > { %v2474_v29 = vpop.f32.mrf.mxu2 }
 0x323   : > { %v2556_v40 = vadd.f32 %v2474_v29, %v1843_v0 }
 0x325   : > { %v2592_v58 = vadd.f32 %v12030_v5, %v2556_v40  ;;  %v1651_v40 = vpop.f32.mrf.mxu0 }
 0x327   : > { %v2624_v18 = vmax.f32 %v2592_v58, 0.0 }
 0x328   : > { %v12139_v35 = vld [vmem:[#allocation2 + $0x88] sm:$0xff] }
 0x329   : > { %2656 = vst.msk [vmem:[#allocation2 + $0x90] sm:$0xff] %vm513_vm0, %v2624_v18  ;;  %2825 = vrot.lane.b32.xlu2 %v12139_v35, %s10352_s19 }
 0x32a   : > { %v2477_v49 = vpop.f32.mrf.mxu2  ;;  %v2525_v44 = vpop.f32.mrf.mxu3 }
 0x32b   : > { %v2557_v45 = vadd.f32 %v2477_v49, %v1846_v13  ;;  %v2573_v6 = vadd.f32 %v2525_v44, %v1894_v4  ;;  %v1863_v13 = vpop.f32.mrf.mxu1  ;;  %v1906_v44 = vadd.f32 %v12079_v12, %v11928_v43  ;;  %v1861_v12 = vadd.f32 %v1860_v56, %v1648_v22 }
 0x32d   : > { %v2593_v55 = vadd.f32 %v12030_v5, %v2557_v45  ;;  %v2609_v33 = vadd.f32 %v12030_v5, %v2573_v6 }
 0x32f   : > { %v2625_v31 = vmax.f32 %v2593_v55, 0.0  ;;  %v2641_v42 = vmax.f32 %v2609_v33, 0.0 }
 0x330   : > { %v12148_v2 = vld [vmem:[#allocation2 + $0x90] sm:$0xff] }
 0x331   : > { %2657 = vst.msk [vmem:[#allocation2 + $0xa8] sm:$0xff] %vm513_vm0, %v2625_v31  ;;  %2827 = vrot.lane.b32.xlu0 %v12148_v2, %s10352_s19  ;;  %v1654_v31 = vpop.f32.mrf.mxu0 }
 0x332   : > { %2673 = vst.msk [vmem:[#allocation2 + $0x1a8] sm:$0xff] %vm513_vm0, %v2641_v42  ;;  %v2480_v59 = vpop.f32.mrf.mxu2  ;;  %v2528_v30 = vpop.f32.mrf.mxu3 }
 0x333   : > { %v2558_v1 = vadd.f32 %v2480_v59, %v1849_v46  ;;  %v2574_v17 = vadd.f32 %v2528_v30, %v1897_v62  ;;  %v1866_v8 = vpop.f32.mrf.mxu1  ;;  %v1909_v59 = vadd.f32 %v12097_v52, %v11947_v47  ;;  %v1864_v52 = vadd.f32 %v1863_v13, %v1651_v40 }
 0x335   : > { %v2594_v10 = vadd.f32 %v12030_v5, %v2558_v1  ;;  %v2610_v61 = vadd.f32 %v12030_v5, %v2574_v17 }
 0x337   : > { %v2626_v53 = vmax.f32 %v2594_v10, 0.0  ;;  %v2642_v27 = vmax.f32 %v2610_v61, 0.0 }
 0x338   : > { %v12158_v57 = vld [vmem:[#allocation2 + $0xa8] sm:$0xff] }
 0x339   : > { %2658 = vst.msk [vmem:[#allocation2 + $0xb0] sm:$0xff] %vm513_vm0, %v2626_v53  ;;  %2829 = vrot.lane.b32.xlu1 %v12158_v57, %s10352_s19 }
 0x33a   : > { %2674 = vst.msk [vmem:[#allocation2 + $0x1b0] sm:$0xff] %vm513_vm0, %v2642_v27  ;;  %v2483_v28 = vpop.f32.mrf.mxu2  ;;  %v2531_v16 = vpop.f32.mrf.mxu3 }
 0x33b   : > { %v2559_v37 = vadd.f32 %v2483_v28, %v1852_v14  ;;  %v2575_v3 = vadd.f32 %v2531_v16, %v1900_v51  ;;  %v1657_v27 = vpop.f32.mrf.mxu0  ;;  %v1869_v47 = vpop.f32.mrf.mxu1  ;;  %v1912_v28 = vadd.f32 %v12115_v38, %v11968_v26  ;;  %v1867_v26 = vadd.f32 %v1866_v8, %v1654_v31 }
 0x33d   : > { %v2595_v19 = vadd.f32 %v12030_v5, %v2559_v37  ;;  %v2611_v63 = vadd.f32 %v12030_v5, %v2575_v3 }
 0x33f   : > { %v2627_v36 = vmax.f32 %v2595_v19, 0.0  ;;  %v2643_v41 = vmax.f32 %v2611_v63, 0.0 }
 0x340   : > { %v12168_v50 = vld [vmem:[#allocation2 + $0xb0] sm:$0xff] }
 0x341   : > { %2659 = vst.msk [vmem:[#allocation2 + $0xc8] sm:$0xff] %vm513_vm0, %v2627_v36  ;;  %2831 = vrot.lane.b32.xlu2 %v12168_v50, %s10352_s19 }
 0x342   : > { %2675 = vst.msk [vmem:[#allocation2 + $0x1c8] sm:$0xff] %vm513_vm0, %v2643_v41  ;;  %v2486_v0 = vpop.f32.mrf.mxu2  ;;  %v2534_v29 = vpop.f32.mrf.mxu3 }
 0x343   : > { %v2560_v58 = vadd.f32 %v2486_v0, %v1855_v7  ;;  %v2576_v18 = vadd.f32 %v2534_v29, %v1903_v48  ;;  %v1660_v38 = vpop.f32.mrf.mxu0  ;;  %v1915_v48 = vadd.f32 %v12136_v34, %v11984_v15  ;;  %v1870_v15 = vadd.f32 %v1869_v47, %v1657_v27 }
 0x345   : > { %v2596_v4 = vadd.f32 %v12030_v5, %v2560_v58  ;;  %v2612_v39 = vadd.f32 %v12030_v5, %v2576_v18  ;;  %v1872_v18 = vpop.f32.mrf.mxu1 }
 0x346   : > { %v1873_v31 = vadd.f32 %v1872_v18, %v1660_v38 }
 0x347   : > { %v2628_v21 = vmax.f32 %v2596_v4, 0.0  ;;  %v2644_v49 = vmax.f32 %v2612_v39, 0.0 }
 0x348   : > { %v12178_v32 = vld [vmem:[#allocation2 + $0xc8] sm:$0xff] }
 0x349   : > { %2660 = vst.msk [vmem:[#allocation2 + $0xd0] sm:$0xff] %vm513_vm0, %v2628_v21  ;;  %2833 = vrot.lane.b32.xlu0 %v12178_v32, %s10352_s19 }
 0x34a   : > { %2676 = vst.msk [vmem:[#allocation2 + $0x1d0] sm:$0xff] %vm513_vm0, %v2644_v49  ;;  %v2489_v45 = vpop.f32.mrf.mxu2  ;;  %v2537_v6 = vpop.f32.mrf.mxu3 }
 0x34b   : > { %v2561_v55 = vadd.f32 %v2489_v45, %v1858_v60  ;;  %v2577_v33 = vadd.f32 %v2537_v6, %v1906_v44  ;;  %v1663_v44 = vpop.f32.mrf.mxu0 }
 0x34d   : > { %v2597_v42 = vadd.f32 %v12030_v5, %v2561_v55  ;;  %v2613_v46 = vadd.f32 %v12030_v5, %v2577_v33  ;;  %v1875_v6 = vpop.f32.mrf.mxu1 }
 0x34f   : > { %v2629_v54 = vmax.f32 %v2597_v42, 0.0  ;;  %v2645_v62 = vmax.f32 %v2613_v46, 0.0 }
 0x350   : > { %v12188_v43 = vld [vmem:[#allocation2 + $0xd0] sm:$0xff] }
 0x351   : > { %2661 = vst.msk [vmem:[#allocation2 + $0xe8] sm:$0xff] %vm513_vm0, %v2629_v54  ;;  %2835 = vrot.lane.b32.xlu1 %v12188_v43, %s10352_s19 }
 0x352   : > { %2677 = vst.msk [vmem:[#allocation2 + $0x1e8] sm:$0xff] %vm513_vm0, %v2645_v62  ;;  %v2492_v30 = vpop.f32.mrf.mxu2  ;;  %v2540_v1 = vpop.f32.mrf.mxu3 }
 0x353   : > { %v2562_v17 = vadd.f32 %v2492_v30, %v1861_v12  ;;  %v2578_v10 = vadd.f32 %v2540_v1, %v1909_v59  ;;  %v1666_v54 = vpop.f32.mrf.mxu0  ;;  %v1876_v30 = vadd.f32 %v1875_v6, %v1663_v44 }
 0x355   : > { %v2598_v61 = vadd.f32 %v12030_v5, %v2562_v17  ;;  %v2614_v53 = vadd.f32 %v12030_v5, %v2578_v10  ;;  %v1878_v12 = vpop.f32.mrf.mxu1 }
 0x357   : > { %v2630_v14 = vmax.f32 %v2598_v61, 0.0  ;;  %v2646_v22 = vmax.f32 %v2614_v53, 0.0 }
 0x358   : > { %v12198_v51 = vld [vmem:[#allocation2 + $0xe8] sm:$0xff] }
 0x359   : > { %2662 = vst.msk [vmem:[#allocation2 + $0xf0] sm:$0xff] %vm513_vm0, %v2630_v14  ;;  %2837 = vrot.lane.b32.xlu2 %v12198_v51, %s10352_s19  ;;  %v1879_v14 = vadd.f32 %v1878_v12, %v1666_v54  ;;  %v12276_v12 = vld [vmem:[#allocation2 + $0x1b0] sm:$0xff] }
 0x35a   : > { %2678 = vst.msk [vmem:[#allocation2 + $0x1f0] sm:$0xff] %vm513_vm0, %v2646_v22  ;;  %v2495_v16 = vpop.f32.mrf.mxu2  ;;  %v2543_v56 = vpop.f32.mrf.mxu3 }
 0x35b   : > { %v2563_v37 = vadd.f32 %v2495_v16, %v1864_v52  ;;  %v2579_v3 = vadd.f32 %v2543_v56, %v1912_v28  ;;  %v1669_v53 = vpop.f32.mrf.mxu0 }
 0x35d   : > { %v2599_v19 = vadd.f32 %v12030_v5, %v2563_v37  ;;  %v2615_v63 = vadd.f32 %v12030_v5, %v2579_v3  ;;  %v1881_v22 = vpop.f32.mrf.mxu1 }
 0x35e   : > { %v1882_v37 = vadd.f32 %v1881_v22, %v1669_v53  ;;  %v12297_v53 = vld [vmem:[#allocation2 + $0x31] sm:$0xff]  ;;  %v12306_v22 = vpop.permute.xlu2 %2813 }
 0x35f   : > { %v2631_v36 = vmax.f32 %v2599_v19, 0.0  ;;  %v2647_v41 = vmax.f32 %v2615_v63, 0.0 }
 0x360   : > { %v12208_v7 = vld [vmem:[#allocation2 + $0xf0] sm:$0xff] }
 0x361   : > { %2663 = vst.msk [vmem:[#allocation2 + $0x108] sm:$0xff] %vm513_vm0, %v2631_v36  ;;  %2839 = vrot.lane.b32.xlu0 %v12208_v7, %s10352_s19 }
 0x362   : > { %2679 = vst.msk [vmem:[#allocation2 + $0x208] sm:$0xff] %vm513_vm0, %v2647_v41  ;;  %v2498_v0 = vpop.f32.mrf.mxu2  ;;  %v2546_v29 = vpop.f32.mrf.mxu3 }
 0x363   : > { %v2564_v40 = vadd.f32 %v2498_v0, %v1867_v26  ;;  %v2580_v58 = vadd.f32 %v2546_v29, %v1915_v48  ;;  %v1672_v3 = vpop.f32.mrf.mxu0 }
 0x365   : > { %v2600_v13 = vadd.f32 %v12030_v5, %v2564_v40  ;;  %v2616_v4 = vadd.f32 %v12030_v5, %v2580_v58  ;;  %v1884_v36 = vpop.f32.mrf.mxu1 }
 0x366   : > { %v1885_v48 = vadd.f32 %v1884_v36, %v1672_v3  ;;  %v12324_v3 = vld [vmem:[#allocation2 + $0x71] sm:$0xff]  ;;  %v12336_v36 = vld [vmem:[#allocation2 + $0xc9] sm:$0xff] }
 0x367   : > { %v2632_v39 = vmax.f32 %v2600_v13, 0.0  ;;  %v2648_v21 = vmax.f32 %v2616_v4, 0.0 }
 0x368   : > { %v12218_v49 = vld [vmem:[#allocation2 + $0x108] sm:$0xff] }
 0x369   : > { %2664 = vst.msk [vmem:[#allocation2 + $0x110] sm:$0xff] %vm513_vm0, %v2632_v39  ;;  %2841 = vrot.lane.b32.xlu1 %v12218_v49, %s10352_s19 }
 0x36a   : > { %2680 = vst.msk [vmem:[#allocation2 + $0x210] sm:$0xff] %vm513_vm0, %v2648_v21  ;;  %v2501_v34 = vpop.f32.mrf.mxu2 }
 0x36b   : > { %v2565_v60 = vadd.f32 %v2501_v34, %v1870_v15  ;;  %v1675_v40 = vpop.f32.mrf.mxu0 }
 0x36d   : > { %v2601_v45 = vadd.f32 %v12030_v5, %v2565_v60  ;;  %v1887_v18 = vpop.f32.mrf.mxu1 }
 0x36e   : > { %v1888_v39 = vadd.f32 %v1887_v18, %v1675_v40  ;;  %v3121_v40 = vld [vmem:[%s17402_s6 + $0x58] sm:$0xff]  ;;  %v3120_v18 = vld [vmem:[%s17402_s6 + $0x50] sm:$0xff] }
 0x36f   : > { %v2633_v55 = vmax.f32 %v2601_v45, 0.0  ;;  %4100 = vmatpush.msrb.mxu2 %v3121_v40  ;;  %v12414_v40 = vld [vmem:[#allocation2 + $0xe9] sm:$0xff] }
 0x370   : > { %v12225_v33 = vld [vmem:[#allocation2 + $0x110] sm:$0xff] }
 0x371   : > { %2665 = vst.msk [vmem:[#allocation2 + $0x128] sm:$0xff] %vm513_vm0, %v2633_v55  ;;  %2843 = vrot.lane.b32.xlu2 %v12225_v33, %s10352_s19  ;;  %4101 = vmatpush.msrb.mxu2 %v3120_v18  ;;  %v3115_v18 = vld [vmem:[%s17402_s6 + $0x28] sm:$0xff] }
 0x372   : > { %v2504_v42 = vpop.f32.mrf.mxu2 }
 0x373   : > { %v2566_v46 = vadd.f32 %v2504_v42, %v1873_v31  ;;  %v1678_v60 = vpop.f32.mrf.mxu0 }
 0x375   : > { %v2602_v8 = vadd.f32 %v12030_v5, %v2566_v46  ;;  %v1890_v45 = vpop.f32.mrf.mxu1 }
 0x376   : > { %v1891_v55 = vadd.f32 %v1890_v45, %v1678_v60  ;;  %v3119_v60 = vld [vmem:[%s17402_s6 + $0x48] sm:$0xff] }
 0x377   : > { %v2634_v62 = vmax.f32 %v2602_v8, 0.0  ;;  %4102 = vmatpush.msrb.mxu2 %v3119_v60 }
 0x378   : > { %v12231_v59 = vld [vmem:[#allocation2 + $0x128] sm:$0xff] }
 0x379   : > { %2666 = vst.msk [vmem:[#allocation2 + $0x130] sm:$0xff] %vm513_vm0, %v2634_v62  ;;  %2845 = vrot.lane.b32.xlu0 %v12231_v59, %s10352_s19  ;;  %v12269_v62 = vld [vmem:[#allocation2 + $0x1a8] sm:$0xff] }
 0x37a   : > { %v2507_v1 = vpop.f32.mrf.mxu2 }
 0x37b   : > { %v2567_v17 = vadd.f32 %v2507_v1, %v1876_v30  ;;  %v12278_v30 = vld [vmem:[#allocation2 + $0x1d0] sm:$0xff] }
 0x37d   : > { %v2603_v10 = vadd.f32 %v12030_v5, %v2567_v17  ;;  %v12288_v17 = vld [vmem:[#allocation2 + $0x1e8] sm:$0xff] }
 0x37f   : > { %v2635_v61 = vmax.f32 %v2603_v10, 0.0  ;;  %v12293_v10 = vld [vmem:[#allocation2 + $0x1c8] sm:$0xff] }
 0x380   : > { %v12237_v27 = vld [vmem:[#allocation2 + $0x130] sm:$0xff] }
 0x381   : > { %2667 = vst.msk [vmem:[#allocation2 + $0x148] sm:$0xff] %vm513_vm0, %v2635_v61  ;;  %2847 = vrot.lane.b32.xlu1 %v12237_v27, %s10352_s19  ;;  %v2746_v61 = vld [vmem:[#allocation2 + $0x11] sm:$0xff] }
 0x382   : > { %v2510_v47 = vpop.f32.mrf.mxu2 }
 0x383   : > { %v2568_v52 = vadd.f32 %v2510_v47, %v1879_v14  ;;  %v12302_v14 = vld [vmem:[#allocation2 + $0x1f0] sm:$0xff] }
 0x384   : > { %v12308_v47 = vld [vmem:[#allocation2 + $0x69] sm:$0xff] }
 0x385   : > { %v2604_v28 = vadd.f32 %v12030_v5, %v2568_v52  ;;  %v12310_v52 = vld [vmem:[#allocation2 + $0x49] sm:$0xff] }
 0x387   : > { %v2636_v16 = vmax.f32 %v2604_v28, 0.0  ;;  %v12316_v28 = vld [vmem:[#allocation2 + $0x29] sm:$0xff] }
 0x388   : > { %v12243_v56 = vld [vmem:[#allocation2 + $0x148] sm:$0xff] }
 0x389   : > { %2668 = vst.msk [vmem:[#allocation2 + $0x150] sm:$0xff] %vm513_vm0, %v2636_v16  ;;  %2849 = vrot.lane.b32.xlu2 %v12243_v56, %s10352_s19  ;;  %v12320_v16 = vpop.permute.xlu2 %2819 }
 0x38a   : > { %v2513_v19 = vpop.f32.mrf.mxu2 }
 0x38b   : > { %v2569_v63 = vadd.f32 %v2513_v19, %v1882_v37  ;;  %v12322_v37 = vld [vmem:[#allocation2 + $0x91] sm:$0xff] }
 0x38c   : > { %v12330_v19 = vld [vmem:[#allocation2 + $0x51] sm:$0xff] }
 0x38d   : > { %v2605_v41 = vadd.f32 %v12030_v5, %v2569_v63 }
 0x38f   : > { %v2637_v26 = vmax.f32 %v2605_v41, 0.0  ;;  %v12338_v41 = vld [vmem:[#allocation2 + $0xa9] sm:$0xff] }
 0x390   : > { %v12249_v38 = vld [vmem:[#allocation2 + $0x150] sm:$0xff] }
 0x391   : > { %2669 = vst.msk [vmem:[#allocation2 + $0x168] sm:$0xff] %vm513_vm0, %v2637_v26  ;;  %2851 = vrot.lane.b32.xlu0 %v12249_v38, %s10352_s19  ;;  %v12334_v63 = vpop.permute.xlu2 %2825  ;;  %v12340_v26 = vpop.permute.xlu0 %2809 }
 0x392   : > { %v2516_v0 = vpop.f32.mrf.mxu2 }
 0x393   : > { %v2570_v29 = vadd.f32 %v2516_v0, %v1885_v48  ;;  %v12346_v48 = vld [vmem:[#allocation2 + $0x89] sm:$0xff] }
 0x395   : > { %v2606_v58 = vadd.f32 %v12030_v5, %v2570_v29  ;;  %v3109_v29 = vld [vmem:[%s17400_s4 + $0x58] sm:$0xff] }
 0x396   : > { %3861 = vmatpush.msrb.mxu0 %v3109_v29  ;;  %v3116_v29 = vld [vmem:[%s17402_s6 + $0x30] sm:$0xff] }
 0x397   : > { %v2638_v13 = vmax.f32 %v2606_v58, 0.0  ;;  %v3108_v58 = vld [vmem:[%s17400_s4 + $0x50] sm:$0xff] }
 0x398   : > { %v12255_v4 = vld [vmem:[#allocation2 + $0x168] sm:$0xff]  ;;  %3862 = vmatpush.msrb.mxu0 %v3108_v58 }
 0x399   : > { %2670 = vst.msk [vmem:[#allocation2 + $0x170] sm:$0xff] %vm513_vm0, %v2638_v13  ;;  %2853 = vrot.lane.b32.xlu1 %v12255_v4, %s10352_s19  ;;  %v12364_v13 = vld [vmem:[#allocation2 + $0xf1] sm:$0xff]  ;;  %v3103_v58 = vld [vmem:[%s17400_s4 + $0x28] sm:$0xff] }
 0x39a   : > { %v2519_v21 = vpop.f32.mrf.mxu2  ;;  %17570 = vst [vmem:[#allocation11_spill] sm:$0xff] %v12364_v13 }
 0x39b   : > { %v2571_v15 = vadd.f32 %v2519_v21, %v1888_v39  ;;  %v12350_v0 = vpop.permute.xlu2 %2831  ;;  %v12366_v39 = vld [vmem:[#allocation2 + $0xd1] sm:$0xff] }
 0x39c   : > { %v12372_v21 = vld [vmem:[#allocation2 + $0xb1] sm:$0xff] }
 0x39d   : > { %v2607_v34 = vadd.f32 %v12030_v5, %v2571_v15  ;;  %v12374_v15 = vpop.permute.xlu1 %2811 }
 0x39f   : > { %v2639_v44 = vmax.f32 %v2607_v34, 0.0  ;;  %v3107_v34 = vld [vmem:[%s17400_s4 + $0x48] sm:$0xff] }
 0x3a0   : > { %v12261_v6 = vld [vmem:[#allocation2 + $0x170] sm:$0xff]  ;;  %3863 = vmatpush.msrb.mxu0 %v3107_v34 }
 0x3a1   : > { %2671 = vst.msk [vmem:[#allocation2 + $0x188] sm:$0xff] %vm513_vm0, %v2639_v44  ;;  %2855 = vrot.lane.b32.xlu2 %v12261_v6, %s10352_s19  ;;  %v12384_v44 = vpop.permute.xlu0 %2815 }
 0x3a2   : > { %v2522_v31 = vpop.f32.mrf.mxu2 }
 0x3a3   : > { %v2572_v42 = vadd.f32 %v2522_v31, %v1891_v55  ;;  %v3106_v55 = vld [vmem:[%s17400_s4 + $0x40] sm:$0xff] }
 0x3a4   : > { %v3118_v31 = vld [vmem:[%s17402_s6 + $0x40] sm:$0xff]  ;;  %3864 = vmatpush.msrb.mxu0 %v3106_v55 }
 0x3a5   : > { %v2608_v46 = vadd.f32 %v12030_v5, %v2572_v42  ;;  %v2745_v5 = vld [vmem:[#allocation2 + $0x9] sm:$0xff]  ;;  %v3105_v42 = vld [vmem:[%s17400_s4 + $0x38] sm:$0xff]  ;;  %4103 = vmatpush.msrb.mxu2 %v3118_v31  ;;  %v12428_v55 = vpop.permute.xlu1 %2817  ;;  %v3102_v31 = vld [vmem:[%s17400_s4 + $0x20] sm:$0xff] }
 0x3a6   : > { %3865 = vmatpush.msrb.mxu0 %v3105_v42  ;;  %v3114_v42 = vld [vmem:[%s17402_s6 + $0x20] sm:$0xff] }
 0x3a7   : > { %v2640_v8 = vmax.f32 %v2608_v46, 0.0  ;;  %v3117_v46 = vld [vmem:[%s17402_s6 + $0x38] sm:$0xff] }
 0x3a8   : > { %v12267_v54 = vld [vmem:[#allocation2 + $0x188] sm:$0xff]  ;;  %4104 = vmatpush.msrb.mxu2 %v3117_v46  ;;  %v3101_v46 = vld [vmem:[%s17400_s4 + $0x18] sm:$0xff] }
 0x3a9   : > { %2672 = vst.msk [vmem:[#allocation2 + $0x190] sm:$0xff] %vm513_vm0, %v2640_v8  ;;  %2857 = vrot.lane.b32.xlu0 %v12267_v54, %s10352_s19  ;;  %2861 = vrot.lane.b32.xlu2 %v12269_v62, %s10352_s19  ;;  %v3104_v8 = vld [vmem:[%s17400_s4 + $0x30] sm:$0xff]  ;;  %v12424_v34 = vpop.permute.xlu0 %2821 }
 0x3aa   : > { %3866 = vmatpush.msrb.mxu0 %v3104_v8  ;;  %4105 = vmatpush.msrb.mxu2 %v3116_v29  ;;  %v3113_v8 = vld [vmem:[%s17402_s6 + $0x18] sm:$0xff] }
 0x3ab   : > { %v12442_v29 = vld [vmem:[#allocation2 + $0x151] sm:$0xff] }
 0x3ac   : > { %3867 = vmatpush.msrb.mxu0 %v3103_v58  ;;  %4106 = vmatpush.msrb.mxu2 %v3115_v18  ;;  %17574 = vst [vmem:[#allocation27_spill] sm:$0xff] %v12442_v29  ;;  %v12444_v58 = vld [vmem:[#allocation2 + $0x131] sm:$0xff] }
 0x3ad   : > { %17575 = vst [vmem:[#allocation20_spill] sm:$0xff] %v12444_v58  ;;  %v12453_v18 = vld [vmem:[#allocation2 + $0x111] sm:$0xff] }
 0x3ae   : > { %3868 = vmatpush.msrb.mxu0 %v3102_v31  ;;  %4107 = vmatpush.msrb.mxu2 %v3114_v42  ;;  %17576 = vst [vmem:[#allocation23_spill] sm:$0xff] %v12453_v18  ;;  %v3112_v31 = vld [vmem:[%s17402_s6 + $0x10] sm:$0xff]  ;;  %v3099_v42 = vld [vmem:[%s17400_s4 + $0x8] sm:$0xff] }
 0x3b0   : > { %v12280_v1 = vld [vmem:[#allocation2 + $0x190] sm:$0xff]  ;;  %3869 = vmatpush.msrb.mxu0 %v3101_v46  ;;  %4108 = vmatpush.msrb.mxu2 %v3113_v8  ;;  %v3098_v8 = vld [vmem:[%s17400_s4] sm:$0xff] }
 0x3b1   : > { %2863 = vrot.lane.b32.xlu0 %v12276_v12, %s10352_s19  ;;  %2867 = vrot.lane.b32.xlu2 %v12278_v30, %s10352_s19  ;;  %v12463_v46 = vpop.permute.xlu0 %2827 }
 0x3b2   : > { %2859 = vrot.lane.b32.xlu1 %v12280_v1, %s10352_s19  ;;  %4109 = vmatpush.msrb.mxu2 %v3112_v31  ;;  %v12486_v31 = vld [vmem:[#allocation2 + $0x149] sm:$0xff] }
 0x3b3   : > { %v12386_v45 = vpop.permute.xlu2 %2837  ;;  %17580 = vst [vmem:[#allocation24_spill] sm:$0xff] %v12486_v31 }
 0x3b4   : > { %17571 = vst [vmem:[#allocation19_spill] sm:$0xff] %v12386_v45  ;;  %v3111_v45 = vld [vmem:[%s17402_s6 + $0x8] sm:$0xff] }
 0x3b5   : > { %4110 = vmatpush.msrb.mxu2 %v3111_v45 }
 0x3b9   : > { %2869 = vrot.lane.b32.xlu0 %v12288_v17, %s10352_s19  ;;  %2937 = vrot.lane.b32.xlu2 %v2745_v5, %s10353_s23  ;;  %v12403_v5 = vld [vmem:[#allocation2 + $0x129] sm:$0xff] }
 0x3ba   : > { %2865 = vrot.lane.b32.xlu1 %v12293_v10, %s10352_s19  ;;  %17572 = vst [vmem:[#allocation13_spill] sm:$0xff] %v12403_v5 }
 0x3c1   : > { %2939 = vrot.lane.b32.xlu0 %v2746_v61, %s10353_s23  ;;  %2943 = vrot.lane.b32.xlu2 %v12297_v53, %s10353_s23  ;;  %v12405_v61 = vld [vmem:[#allocation2 + $0x109] sm:$0xff] }
 0x3c2   : > { %2871 = vrot.lane.b32.xlu1 %v12302_v14, %s10352_s19 }
 0x3c9   : > { %2949 = vrot.lane.b32.xlu2 %v12308_v47, %s10353_s23  ;;  %2945 = vrot.lane.b32.xlu0 %v12310_v52, %s10353_s23 }
 0x3ca   : > { %2941 = vrot.lane.b32.xlu1 %v12316_v28, %s10353_s23 }
 0x3cb   : > { %v12426_v60 = vpop.permute.xlu2 %2843 }
 0x3cc   : > { %17573 = vst [vmem:[#allocation17_spill] sm:$0xff] %v12426_v60  ;;  %v3100_v60 = vld [vmem:[%s17400_s4 + $0x10] sm:$0xff] }
 0x3cd   : > { %3870 = vmatpush.msrb.mxu0 %v3100_v60  ;;  %v12480_v60 = vld [vmem:[#allocation2 + $0x169] sm:$0xff] }
 0x3ce   : > { %17579 = vst [vmem:[#allocation28_spill] sm:$0xff] %v12480_v60 }
 0x3cf   : > { %3871 = vmatpush.msrb.mxu0 %v3099_v42  ;;  %v12490_v42 = vpop.permute.xlu0 %2833 }
 0x3d0   : > { %17581 = vst [vmem:[#allocation14_spill] sm:$0xff] %v12490_v42  ;;  %v12516_v42 = vld [vmem:[#allocation2 + $0x1c9] sm:$0xff] }
 0x3d1   : > { %2955 = vrot.lane.b32.xlu2 %v12322_v37, %s10353_s23  ;;  %2951 = vrot.lane.b32.xlu0 %v12324_v3, %s10353_s23 }
 0x3d2   : > { %2947 = vrot.lane.b32.xlu1 %v12330_v19, %s10353_s23  ;;  %3872 = vmatpush.msrb.mxu0 %v3098_v8 }
 0x3d9   : > { %2961 = vrot.lane.b32.xlu2 %v12336_v36, %s10353_s23  ;;  %2957 = vrot.lane.b32.xlu0 %v12338_v41, %s10353_s23 }
 0x3da   : > { %2953 = vrot.lane.b32.xlu1 %v12346_v48, %s10353_s23 }
 0x3e1   : > { %2967 = vrot.lane.b32.xlu2 %v12364_v13, %s10353_s23  ;;  %2963 = vrot.lane.b32.xlu0 %v12366_v39, %s10353_s23  ;;  %v3110_v13 = vld [vmem:[%s17402_s6] sm:$0xff] }
 0x3e2   : > { %2959 = vrot.lane.b32.xlu1 %v12372_v21, %s10353_s23  ;;  %4111 = vmatpush.msrb.mxu2 %v3110_v13  ;;  %v12498_v13 = vld [vmem:[#allocation2 + $0x191] sm:$0xff] }
 0x3e3   : > { %17584 = vst [vmem:[#allocation15_spill] sm:$0xff] %v12498_v13 }
 0x3e9   : > { %2973 = vrot.lane.b32.xlu2 %v12403_v5, %s10353_s23  ;;  %2969 = vrot.lane.b32.xlu0 %v12405_v61, %s10353_s23  ;;  %v12470_v5 = vpop.permute.xlu1 %2823 }
 0x3ea   : > { %2965 = vrot.lane.b32.xlu1 %v12414_v40, %s10353_s23 }
 0x3f1   : > { %2979 = vrot.lane.b32.xlu2 %v12442_v29, %s10353_s23  ;;  %2975 = vrot.lane.b32.xlu0 %v12444_v58, %s10353_s23  ;;  %v12465_v29 = vpop.permute.xlu2 %2849  ;;  %v12494_v8 = vpop.permute.xlu1 %2829  ;;  %v12514_v58 = vld [vmem:[#allocation2 + $0x1e9] sm:$0xff] }
 0x3f2   : > { %2971 = vrot.lane.b32.xlu1 %v12453_v18, %s10353_s23  ;;  %17577 = vst [vmem:[#allocation10_spill] sm:$0xff] %v12465_v29  ;;  %v12478_v29 = vld [vmem:[#allocation2 + $0x189] sm:$0xff]  ;;  %v12496_v18 = vld [vmem:[#allocation2 + $0x1b1] sm:$0xff] }
 0x3f3   : > { %17578 = vst [vmem:[#allocation25_spill] sm:$0xff] %v12478_v29 }
 0x3f4   : > { %17583 = vst [vmem:[#allocation31_spill] sm:$0xff] %v12496_v18 }
 0x3f5   : > { %17589 = vst [vmem:[#allocation7_spill] sm:$0xff] %v12514_v58 }
 0x3f9   : > { %2985 = vrot.lane.b32.xlu2 %v12478_v29, %s10353_s23  ;;  %2981 = vrot.lane.b32.xlu0 %v12480_v60, %s10353_s23  ;;  %v12504_v29 = vld [vmem:[#allocation2 + $0x171] sm:$0xff]  ;;  %v12512_v60 = vpop.permute.xlu1 %2835 }
 0x3fa   : > { %2977 = vrot.lane.b32.xlu1 %v12486_v31, %s10353_s23  ;;  %17585 = vst [vmem:[#allocation29_spill] sm:$0xff] %v12504_v29  ;;  %v12508_v31 = vpop.permute.xlu0 %2839 }
 0x3fb   : > { %v12492_v45 = vpop.permute.xlu2 %2855  ;;  %17586 = vst [vmem:[#allocation21_spill] sm:$0xff] %v12508_v31 }
 0x3fc   : > { %17582 = vst [vmem:[#allocation16_spill] sm:$0xff] %v12492_v45 }
 0x3fd   : > { %17588 = vst [vmem:[#allocation4_spill] sm:$0xff] %v12512_v60  ;;  %v12532_v60 = vld [vmem:[#allocation2 + $0x1f1] sm:$0xff] }
 0x401   : > { %2991 = vrot.lane.b32.xlu2 %v12496_v18, %s10353_s23  ;;  %2987 = vrot.lane.b32.xlu0 %v12498_v13, %s10353_s23  ;;  %v12522_v18 = vld [vmem:[#allocation2 + $0x1a9] sm:$0xff] }
 0x402   : > { %2983 = vrot.lane.b32.xlu1 %v12504_v29, %s10353_s23  ;;  %17590 = vst [vmem:[#allocation39_spill] sm:$0xff] %v12522_v18  ;;  %v12526_v31 = vpop.permute.xlu0 %2845  ;;  %v12530_v29 = vpop.permute.xlu1 %2841  ;;  %v2681_v13 = vld [vmem:[#allocation2 + $0x7] sm:$0xff] }
 0x403   : > { %v12510_v45 = vpop.permute.xlu2 %2861  ;;  %17591 = vst [vmem:[#allocation26_spill] sm:$0xff] %v12526_v31 }
 0x404   : > { %17587 = vst [vmem:[#allocation33_spill] sm:$0xff] %v12510_v45 }
 0x405   : > { %17593 = vst [vmem:[#allocation18_spill] sm:$0xff] %v12530_v29 }
 0x409   : > { %2997 = vrot.lane.b32.xlu2 %v12514_v58, %s10353_s23  ;;  %2993 = vrot.lane.b32.xlu0 %v12516_v42, %s10353_s23  ;;  %v12538_v58 = vld [vmem:[#allocation2 + $0x1d1] sm:$0xff] }
 0x40a   : > { %2989 = vrot.lane.b32.xlu1 %v12522_v18, %s10353_s23  ;;  %v12544_v31 = vpop.permute.xlu0 %2851  ;;  %v12546_v18 = vpop.permute.xlu1 %2847 }
 0x40b   : > { %v12528_v45 = vpop.permute.xlu2 %2867  ;;  %17594 = vst [vmem:[#allocation41_spill] sm:$0xff] %v12544_v31 }
 0x40c   : > { %17592 = vst [vmem:[#allocation12_spill] sm:$0xff] %v12528_v45  ;;  %v3033_v45 = vsel %vm513_vm0, %v2681_v13, %v12340_v26 }
 0x411   : > { %3252 = vrot.lane.b32.xlu2 %v12072_v24, %s10352_s19  ;;  %2999 = vrot.lane.b32.xlu0 %v12532_v60, %s10353_s23 }
 0x412   : > { %2995 = vrot.lane.b32.xlu1 %v12538_v58, %s10353_s23  ;;  %v12559_v31 = vpop.permute.xlu1 %2853 }
 0x413   : > { %v2938_v29 = vpop.permute.xlu2 %2937 }
 0x414   : > { %v3066_v24 = vsel %vm3065_vm6, %v3033_v45, %v2938_v29 }
 0x415   : > { %9757 = vmatmul.msk.f32.vlgmr.msrb.gmra.mxu0 %vm3551_vm7, %v3066_v24  ;;  %9833 = vmatmul.msk.f32.vlgmr.msrb.gmra.mxu2 %vm3551_vm7, %v3066_v24 }
 0x419   : > { %3258 = vrot.lane.b32.xlu2 %v12117_v25, %s10352_s19  ;;  %3254 = vrot.lane.b32.xlu0 %v12087_v9, %s10352_s19 }
 0x41a   : > { %3250 = vrot.lane.b32.xlu1 %v12055_v20, %s10352_s19 }
 0x41b   : > { %v12557_v26 = vpop.permute.xlu0 %2857  ;;  %v2944_v13 = vpop.permute.xlu2 %2943 }
 0x421   : > { %3264 = vrot.lane.b32.xlu2 %v12148_v2, %s10352_s19  ;;  %3260 = vrot.lane.b32.xlu0 %v12130_v11, %s10352_s19  ;;  %v2682_v2 = vld [vmem:[#allocation2 + $0xf] sm:$0xff] }
 0x422   : > { %3256 = vrot.lane.b32.xlu1 %v12102_v23, %s10352_s19 }
 0x423   : > { %v12567_v25 = vpop.permute.xlu0 %2863  ;;  %v12569_v9 = vpop.permute.xlu2 %2949 }
 0x424   : > { %v12571_v29 = vpop.permute.xlu1 %2859 }
 0x429   : > { %3270 = vrot.lane.b32.xlu2 %v12178_v32, %s10352_s19  ;;  %3266 = vrot.lane.b32.xlu0 %v12158_v57, %s10352_s19  ;;  %v3034_v57 = vsel %vm513_vm0, %v2682_v2, %v12374_v15 }
 0x42a   : > { %3262 = vrot.lane.b32.xlu1 %v12139_v35, %s10352_s19 }
 0x42b   : > { %v12579_v20 = vpop.permute.xlu0 %2869  ;;  %v12581_v11 = vpop.permute.xlu2 %2955 }
 0x42c   : > { %v12583_v23 = vpop.permute.xlu1 %2865 }
 0x431   : > { %3276 = vrot.lane.b32.xlu2 %v12208_v7, %s10352_s19  ;;  %3272 = vrot.lane.b32.xlu0 %v12188_v43, %s10352_s19 }
 0x432   : > { %3268 = vrot.lane.b32.xlu1 %v12168_v50, %s10352_s19  ;;  %v12606_v50 = vld [vmem:[#allocation2 + $0x27] sm:$0xff] }
 0x433   : > { %v2940_v35 = vpop.permute.xlu0 %2939  ;;  %v12593_v32 = vpop.permute.xlu2 %2961  ;;  %v3035_v15 = vsel %vm513_vm0, %v12606_v50, %v12306_v22 }
 0x434   : > { %v3067_v45 = vsel %vm3065_vm6, %v3034_v57, %v2940_v35  ;;  %v12596_v24 = vpop.permute.xlu1 %2871 }
 0x435   : > { %9758 = vmatmul.msk.f32.gmra.mxu0 %vm3551_vm7, %v3067_v45  ;;  %9834 = vmatmul.msk.f32.gmra.mxu2 %vm3551_vm7, %v3067_v45 }
 0x439   : > { %3282 = vrot.lane.b32.xlu2 %v12231_v59, %s10352_s19  ;;  %3278 = vrot.lane.b32.xlu0 %v12218_v49, %s10352_s19 }
 0x43a   : > { %3274 = vrot.lane.b32.xlu1 %v12198_v51, %s10352_s19  ;;  %v12622_v51 = vld [vmem:[#allocation2 + $0x2f] sm:$0xff] }
 0x43b   : > { %v12608_v43 = vpop.permute.xlu2 %2967  ;;  %v2946_v7 = vpop.permute.xlu0 %2945  ;;  %v3036_v22 = vsel %vm513_vm0, %v12622_v51, %v12384_v44 }
 0x43c   : > { %v2942_v2 = vpop.permute.xlu1 %2941  ;;  %v3069_v45 = vsel %vm3065_vm6, %v3036_v22, %v2944_v13 }
 0x43d   : > { %v3068_v57 = vsel %vm3065_vm6, %v3035_v15, %v2942_v2 }
 0x43e   : > { %9759 = vmatmul.msk.f32.gmra.mxu0 %vm3551_vm7, %v3068_v57  ;;  %9835 = vmatmul.msk.f32.gmra.mxu2 %vm3551_vm7, %v3068_v57 }
 0x441   : > { %3288 = vrot.lane.b32.xlu2 %v12249_v38, %s10352_s19  ;;  %3284 = vrot.lane.b32.xlu0 %v12237_v27, %s10352_s19 }
 0x442   : > { %3280 = vrot.lane.b32.xlu1 %v12225_v33, %s10352_s19  ;;  %v12638_v33 = vld [vmem:[#allocation2 + $0x47] sm:$0xff] }
 0x443   : > { %v12624_v49 = vpop.permute.xlu2 %2973  ;;  %v2952_v59 = vpop.permute.xlu0 %2951  ;;  %v3037_v44 = vsel %vm513_vm0, %v12638_v33, %v12428_v55 }
 0x444   : > { %v2948_v35 = vpop.permute.xlu1 %2947  ;;  %v3070_v15 = vsel %vm3065_vm6, %v3037_v44, %v2946_v7 }
 0x446   : > { %9760 = vmatmul.msk.f32.gmra.mxu0 %vm3551_vm7, %v3069_v45  ;;  %9836 = vmatmul.msk.f32.gmra.mxu2 %vm3551_vm7, %v3069_v45 }
 0x449   : > { %3294 = vrot.lane.b32.xlu2 %v12267_v54, %s10352_s19  ;;  %3290 = vrot.lane.b32.xlu0 %v12255_v4, %s10352_s19 }
 0x44a   : > { %3286 = vrot.lane.b32.xlu1 %v12243_v56, %s10352_s19  ;;  %v12656_v56 = vld [vmem:[#allocation2 + $0x4f] sm:$0xff] }
 0x44b   : > { %v12640_v27 = vpop.permute.xlu2 %2979  ;;  %v12642_v38 = vpop.permute.xlu0 %2957  ;;  %v3038_v55 = vsel %vm513_vm0, %v12656_v56, %v12320_v16 }
 0x44c   : > { %v2954_v13 = vpop.permute.xlu1 %2953 }
 0x44e   : > { %9761 = vmatmul.msk.f32.gmra.mxu0 %vm3551_vm7, %v3070_v15  ;;  %9837 = vmatmul.msk.f32.gmra.mxu2 %vm3551_vm7, %v3070_v15 }
 0x451   : > { %3300 = vrot.lane.b32.xlu2 %v12276_v12, %s10352_s19  ;;  %3296 = vrot.lane.b32.xlu0 %v12280_v1, %s10352_s19  ;;  %v3071_v12 = vsel %vm3065_vm6, %v3038_v55, %v2948_v35 }
 0x452   : > { %3292 = vrot.lane.b32.xlu1 %v12261_v6, %s10352_s19  ;;  %v12676_v6 = vld [vmem:[#allocation2 + $0x67] sm:$0xff] }
 0x453   : > { %v12658_v4 = vpop.permute.xlu2 %2985  ;;  %v12660_v54 = vpop.permute.xlu0 %2963  ;;  %v3039_v2 = vsel %vm513_vm0, %v12676_v6, %v12424_v34 }
 0x454   : > { %v12665_v7 = vpop.permute.xlu1 %2959 }
 0x456   : > { %9762 = vmatmul.msk.f32.gmra.mxu0 %vm3551_vm7, %v3071_v12  ;;  %9838 = vmatmul.msk.f32.gmra.mxu2 %vm3551_vm7, %v3071_v12 }
 0x459   : > { %3306 = vrot.lane.b32.xlu2 %v12288_v17, %s10352_s19  ;;  %3302 = vrot.lane.b32.xlu0 %v12293_v10, %s10352_s19  ;;  %v3072_v17 = vsel %vm3065_vm6, %v3039_v2, %v12569_v9  ;;  %v12699_v10 = vld [vmem:[#allocation2 + $0x6f] sm:$0xff] }
 0x45a   : > { %3298 = vrot.lane.b32.xlu1 %v12269_v62, %s10352_s19  ;;  %v12691_v62 = vld [vmem:[#allocation2 + $0x210] sm:$0xff]  ;;  %v3040_v22 = vsel %vm513_vm0, %v12699_v10, %v12470_v5 }
 0x45b   : > { %v12678_v1 = vpop.permute.xlu2 %2991  ;;  %v12680_v16 = vpop.permute.xlu0 %2969  ;;  %v3073_v45 = vsel %vm3065_vm6, %v3040_v22, %v2952_v59 }
 0x45c   : > { %v12685_v57 = vpop.permute.xlu1 %2965 }
 0x45e   : > { %9763 = vmatmul.msk.f32.gmra.mxu0 %vm3551_vm7, %v3072_v17  ;;  %9839 = vmatmul.msk.f32.gmra.mxu2 %vm3551_vm7, %v3072_v17 }
 0x461   : > { %3312 = vrot.lane.b32.xlu2 %v12691_v62, %s10352_s19  ;;  %3308 = vrot.lane.b32.xlu0 %v12302_v14, %s10352_s19  ;;  %v12721_v14 = vld [vmem:[#allocation2 + $0x87] sm:$0xff] }
 0x462   : > { %3304 = vrot.lane.b32.xlu1 %v12278_v30, %s10352_s19  ;;  %v12717_v30 = vld [vmem:[#allocation2 + $0x208] sm:$0xff]  ;;  %v3041_v44 = vsel %vm513_vm0, %v12721_v14, %v12334_v63 }
 0x463   : > { %v12701_v34 = vpop.permute.xlu2 %2997  ;;  %v12703_v9 = vpop.permute.xlu0 %2975 }
 0x464   : > { %v12708_v35 = vpop.permute.xlu1 %2971 }
 0x466   : > { %9764 = vmatmul.msk.f32.gmra.mxu0 %vm3551_vm7, %v3073_v45  ;;  %9840 = vmatmul.msk.f32.gmra.mxu2 %vm3551_vm7, %v3073_v45 }
 0x469   : > { %3382 = vrot.lane.b32.xlu2 %v12310_v52, %s10353_s23  ;;  %3378 = vrot.lane.b32.xlu0 %v12316_v28, %s10353_s23  ;;  %v3074_v52 = vsel %vm3065_vm6, %v3041_v44, %v2954_v13  ;;  %v12741_v28 = vld [vmem:[#allocation2 + $0x8f] sm:$0xff]  ;;  %v17595_v44 = vld [vmem:[#allocation14_spill] sm:$0xff] }
 0x46a   : > { %3310 = vrot.lane.b32.xlu1 %v12717_v30, %s10352_s19  ;;  %v3042_v13 = vsel %vm513_vm0, %v12741_v28, %v12463_v46 }
 0x46b   : > { %v12723_v5 = vpop.permute.xlu2 %3252  ;;  %v12725_v59 = vpop.permute.xlu0 %2981 }
 0x46c   : > { %v12730_v15 = vpop.permute.xlu1 %2977 }
 0x46e   : > { %9765 = vmatmul.msk.f32.gmra.mxu0 %vm3551_vm7, %v3074_v52  ;;  %9841 = vmatmul.msk.f32.gmra.mxu2 %vm3551_vm7, %v3074_v52 }
 0x471   : > { %3388 = vrot.lane.b32.xlu2 %v12324_v3, %s10353_s23  ;;  %3384 = vrot.lane.b32.xlu0 %v12330_v19, %s10353_s23  ;;  %v3075_v3 = vsel %vm3065_vm6, %v3042_v13, %v12581_v11 }
 0x472   : > { %3380 = vrot.lane.b32.xlu1 %v12297_v53, %s10353_s23  ;;  %v12762_v53 = vld [vmem:[#allocation2 + $0xa7] sm:$0xff] }
 0x473   : > { %v12743_v63 = vpop.permute.xlu2 %3258  ;;  %v12745_v55 = vpop.permute.xlu0 %2987  ;;  %v3043_v11 = vsel %vm513_vm0, %v12762_v53, %v12494_v8  ;;  %v12789_v8 = vld [vmem:[#allocation2 + $0xaf] sm:$0xff] }
 0x474   : > { %v12750_v12 = vpop.permute.xlu1 %2983 }
 0x476   : > { %9766 = vmatmul.msk.f32.gmra.mxu0 %vm3551_vm7, %v3075_v3  ;;  %9842 = vmatmul.msk.f32.gmra.mxu2 %vm3551_vm7, %v3075_v3  ;;  %v17597_v3 = vld [vmem:[#allocation23_spill] sm:$0xff] }
 0x479   : > { %3394 = vrot.lane.b32.xlu2 %v12338_v41, %s10353_s23  ;;  %3390 = vrot.lane.b32.xlu0 %v12346_v48, %s10353_s23  ;;  %v3076_v41 = vsel %vm3065_vm6, %v3043_v11, %v12642_v38  ;;  %v9724_v48 = vld [vmem:[%s17400_s4 + $0xb8] sm:$0xff]  ;;  %v17598_v11 = vld [vmem:[#allocation11_spill] sm:$0xff] }
 0x47a   : > { %3386 = vrot.lane.b32.xlu1 %v12308_v47, %s10353_s23  ;;  %3652 = vmatpush.msrb.mxu3 %v9724_v48  ;;  %v9723_v47 = vld [vmem:[%s17400_s4 + $0xb0] sm:$0xff] }
 0x47b   : > { %v12764_v19 = vpop.permute.xlu2 %3264  ;;  %v12766_v46 = vpop.permute.xlu0 %2993 }
 0x47c   : > { %v12771_v2 = vpop.permute.xlu1 %2989  ;;  %3653 = vmatpush.msrb.mxu3 %v9723_v47 }
 0x47e   : > { %9767 = vmatmul.msk.f32.gmra.mxu0 %vm3551_vm7, %v3076_v41  ;;  %9843 = vmatmul.msk.f32.gmra.mxu2 %vm3551_vm7, %v3076_v41  ;;  %v12840_v41 = vld [vmem:[#allocation2 + $0xcf] sm:$0xff] }
 0x481   : > { %3400 = vrot.lane.b32.xlu2 %v12366_v39, %s10353_s23  ;;  %3396 = vrot.lane.b32.xlu0 %v12372_v21, %s10353_s23  ;;  %v3044_v39 = vsel %vm513_vm0, %v12789_v8, %v12350_v0  ;;  %v9722_v21 = vld [vmem:[%s17400_s4 + $0xa8] sm:$0xff] }
 0x482   : > { %3392 = vrot.lane.b32.xlu1 %v12322_v37, %s10353_s23  ;;  %v3077_v37 = vsel %vm3065_vm6, %v3044_v39, %v12665_v7  ;;  %3654 = vmatpush.msrb.mxu3 %v9722_v21  ;;  %v12813_v0 = vld [vmem:[#allocation2 + $0xc7] sm:$0xff] }
 0x483   : > { %v12791_v38 = vpop.permute.xlu2 %3270  ;;  %v12793_v17 = vpop.permute.xlu0 %2999  ;;  %v3045_v52 = vsel %vm513_vm0, %v12813_v0, %v17595_v44  ;;  %v17600_v39 = vld [vmem:[#allocation4_spill] sm:$0xff] }
 0x484   : > { %v12798_v22 = vpop.permute.xlu1 %2995 }
 0x486   : > { %9768 = vmatmul.msk.f32.gmra.mxu0 %vm3551_vm7, %v3077_v37  ;;  %9844 = vmatmul.msk.f32.gmra.mxu2 %vm3551_vm7, %v3077_v37  ;;  %v3046_v37 = vsel %vm513_vm0, %v12840_v41, %v17600_v39 }
 0x487   : > { %v3079_v44 = vsel %vm3065_vm6, %v3046_v37, %v12660_v54 }
 0x489   : > { %3406 = vrot.lane.b32.xlu2 %v12405_v61, %s10353_s23  ;;  %3402 = vrot.lane.b32.xlu0 %v12414_v40, %s10353_s23  ;;  %v3078_v61 = vsel %vm3065_vm6, %v3045_v52, %v12593_v32  ;;  %v9721_v40 = vld [vmem:[%s17400_s4 + $0xa0] sm:$0xff]  ;;  %v9720_v32 = vld [vmem:[%s17400_s4 + $0x98] sm:$0xff] }
 0x48a   : > { %3398 = vrot.lane.b32.xlu1 %v12336_v36, %s10353_s23  ;;  %3655 = vmatpush.msrb.mxu3 %v9721_v40  ;;  %v17596_v36 = vld [vmem:[#allocation20_spill] sm:$0xff]  ;;  %v9719_v52 = vld [vmem:[%s17400_s4 + $0x90] sm:$0xff] }
 0x48b   : > { %v12815_v7 = vpop.permute.xlu2 %3276  ;;  %v12817_v45 = vpop.permute.xlu0 %3254  ;;  %v17602_v40 = vld [vmem:[#allocation24_spill] sm:$0xff] }
 0x48c   : > { %v12822_v13 = vpop.permute.xlu1 %3250  ;;  %3656 = vmatpush.msrb.mxu3 %v9720_v32  ;;  %v17605_v32 = vld [vmem:[#allocation19_spill] sm:$0xff] }
 0x48e   : > { %9769 = vmatmul.msk.f32.gmra.mxu0 %vm3551_vm7, %v3078_v61  ;;  %9845 = vmatmul.msk.f32.gmra.mxu2 %vm3551_vm7, %v3078_v61  ;;  %v17601_v61 = vld [vmem:[#allocation28_spill] sm:$0xff] }
 0x48f   : > { %3657 = vmatpush.msrb.mxu3 %v9719_v52  ;;  %v9718_v52 = vld [vmem:[%s17400_s4 + $0x88] sm:$0xff] }
 0x491   : > { %3412 = vrot.lane.b32.xlu2 %v17596_v36, %s10353_s23  ;;  %3408 = vrot.lane.b32.xlu0 %v17597_v3, %s10353_s23  ;;  %v17603_v36 = vld [vmem:[#allocation13_spill] sm:$0xff]  ;;  %v12864_v3 = vld [vmem:[#allocation2 + $0xe7] sm:$0xff] }
 0x492   : > { %3404 = vrot.lane.b32.xlu1 %v17598_v11, %s10353_s23  ;;  %v3047_v39 = vsel %vm513_vm0, %v12864_v3, %v17605_v32  ;;  %3658 = vmatpush.msrb.mxu3 %v9718_v52  ;;  %v12888_v32 = vld [vmem:[#allocation2 + $0xef] sm:$0xff] }
 0x493   : > { %v12842_v48 = vpop.permute.xlu2 %3282  ;;  %v12844_v47 = vpop.permute.xlu0 %3260  ;;  %17609 = vst [vmem:[#allocation37_spill] sm:$0xff] %v12888_v32  ;;  %v17611_v52 = vld [vmem:[#allocation21_spill] sm:$0xff] }
 0x494   : > { %17599 = vst [vmem:[#allocation32_spill] sm:$0xff] %v12842_v48  ;;  %v12849_v21 = vpop.permute.xlu1 %3256  ;;  %v17615_v48 = vld [vmem:[#allocation18_spill] sm:$0xff] }
 0x496   : > { %9770 = vmatmul.msk.f32.gmra.mxu0 %vm3551_vm7, %v3079_v44  ;;  %9846 = vmatmul.msk.f32.gmra.mxu2 %vm3551_vm7, %v3079_v44  ;;  %v3080_v44 = vsel %vm3065_vm6, %v3047_v39, %v12685_v57 }
 0x499   : > { %3418 = vrot.lane.b32.xlu2 %v17601_v61, %s10353_s23  ;;  %3414 = vrot.lane.b32.xlu0 %v17602_v40, %s10353_s23  ;;  %v17606_v61 = vld [vmem:[#allocation15_spill] sm:$0xff]  ;;  %v17607_v40 = vld [vmem:[#allocation29_spill] sm:$0xff] }
 0x49a   : > { %3410 = vrot.lane.b32.xlu1 %v17603_v36, %s10353_s23  ;;  %v17608_v36 = vld [vmem:[#allocation27_spill] sm:$0xff] }
 0x49b   : > { %v12866_v54 = vpop.permute.xlu2 %3288  ;;  %v12868_v11 = vpop.permute.xlu0 %3266 }
 0x49c   : > { %17604 = vst [vmem:[#allocation8_spill] sm:$0xff] %v12866_v54  ;;  %v12873_v37 = vpop.permute.xlu1 %3262 }
 0x49e   : > { %9771 = vmatmul.msk.f32.gmra.mxu0 %vm3551_vm7, %v3080_v44  ;;  %9847 = vmatmul.msk.f32.gmra.mxu2 %vm3551_vm7, %v3080_v44  ;;  %v9717_v44 = vld [vmem:[%s17400_s4 + $0x80] sm:$0xff] }
 0x49f   : > { %3659 = vmatpush.msrb.mxu3 %v9717_v44  ;;  %v9799_v44 = vld [vmem:[%s17402_s6 + $0xb0] sm:$0xff] }
 0x4a1   : > { %3424 = vrot.lane.b32.xlu2 %v17606_v61, %s10353_s23  ;;  %3420 = vrot.lane.b32.xlu0 %v17607_v40, %s10353_s23  ;;  %v3048_v61 = vsel %vm513_vm0, %v12888_v32, %v17611_v52  ;;  %v17613_v52 = vld [vmem:[#allocation25_spill] sm:$0xff] }
 0x4a2   : > { %3416 = vrot.lane.b32.xlu1 %v17608_v36, %s10353_s23  ;;  %v3081_v40 = vsel %vm3065_vm6, %v3048_v61, %v12608_v43  ;;  %v9800_v36 = vld [vmem:[%s17402_s6 + $0xb8] sm:$0xff]  ;;  %v17612_v43 = vld [vmem:[#allocation39_spill] sm:$0xff] }
 0x4a3   : > { %v12890_v57 = vpop.permute.xlu2 %3294  ;;  %v12892_v39 = vpop.permute.xlu0 %3272  ;;  %3987 = vmatpush.msrb.mxu1 %v9800_v36  ;;  %v12921_v61 = vld [vmem:[#allocation2 + $0x107] sm:$0xff] }
 0x4a4   : > { %17610 = vst [vmem:[#allocation35_spill] sm:$0xff] %v12890_v57  ;;  %v12900_v54 = vpop.permute.xlu1 %3268  ;;  %v9716_v57 = vld [vmem:[%s17400_s4 + $0x78] sm:$0xff] }
 0x4a5   : > { %3660 = vmatpush.msrb.mxu3 %v9716_v57  ;;  %3988 = vmatpush.msrb.mxu1 %v9799_v44  ;;  %v9798_v57 = vld [vmem:[%s17402_s6 + $0xa8] sm:$0xff] }
 0x4a6   : > { %9772 = vmatmul.msk.f32.gmra.mxu0 %vm3551_vm7, %v3081_v40  ;;  %9848 = vmatmul.msk.f32.gmra.mxu2 %vm3551_vm7, %v3081_v40 }
 0x4a7   : > { %3989 = vmatpush.msrb.mxu1 %v9798_v57  ;;  %v17616_v57 = vld [vmem:[#allocation31_spill] sm:$0xff] }
 0x4a9   : > { %3430 = vrot.lane.b32.xlu2 %v12516_v42, %s10353_s23  ;;  %3426 = vrot.lane.b32.xlu0 %v17612_v43, %s10353_s23  ;;  %v3049_v42 = vsel %vm513_vm0, %v12921_v61, %v17615_v48  ;;  %v9797_v43 = vld [vmem:[%s17402_s6 + $0xa0] sm:$0xff]  ;;  %v9796_v48 = vld [vmem:[%s17402_s6 + $0x98] sm:$0xff] }
 0x4aa   : > { %3422 = vrot.lane.b32.xlu1 %v17613_v52, %s10353_s23  ;;  %v3082_v44 = vsel %vm3065_vm6, %v3049_v42, %v12680_v16  ;;  %v9715_v52 = vld [vmem:[%s17400_s4 + $0x70] sm:$0xff]  ;;  %3990 = vmatpush.msrb.mxu1 %v9797_v43 }
 0x4ab   : > { %v12923_v40 = vpop.permute.xlu2 %3300  ;;  %v12925_v36 = vpop.permute.xlu0 %3278  ;;  %3661 = vmatpush.msrb.mxu3 %v9715_v52  ;;  %v9795_v16 = vld [vmem:[%s17402_s6 + $0x90] sm:$0xff] }
 0x4ac   : > { %17614 = vst [vmem:[#allocation22_spill] sm:$0xff] %v12923_v40  ;;  %v12933_v32 = vpop.permute.xlu1 %3274  ;;  %3991 = vmatpush.msrb.mxu1 %v9796_v48  ;;  %v12957_v42 = vld [vmem:[#allocation2 + $0x10f] sm:$0xff] }
 0x4ad   : > { %17617 = vst [vmem:[#allocation9_spill] sm:$0xff] %v12957_v42  ;;  %v17620_v52 = vld [vmem:[#allocation17_spill] sm:$0xff]  ;;  %v9794_v48 = vld [vmem:[%s17402_s6 + $0x88] sm:$0xff] }
 0x4ae   : > { %9773 = vmatmul.msk.f32.gmra.mxu0 %vm3551_vm7, %v3082_v44  ;;  %9849 = vmatmul.msk.f32.gmra.mxu2 %vm3551_vm7, %v3082_v44 }
 0x4af   : > { %3992 = vmatpush.msrb.mxu1 %v9795_v16  ;;  %v9713_v16 = vld [vmem:[%s17400_s4 + $0x60] sm:$0xff] }
 0x4b1   : > { %3436 = vrot.lane.b32.xlu2 %v12532_v60, %s10353_s23  ;;  %3432 = vrot.lane.b32.xlu0 %v12538_v58, %s10353_s23  ;;  %v9714_v60 = vld [vmem:[%s17400_s4 + $0x68] sm:$0xff]  ;;  %v3050_v58 = vsel %vm513_vm0, %v12957_v42, %v17620_v52 }
 0x4b2   : > { %3428 = vrot.lane.b32.xlu1 %v17616_v57, %s10353_s23  ;;  %3662 = vmatpush.msrb.mxu3 %v9714_v60  ;;  %v3083_v57 = vsel %vm3065_vm6, %v3050_v58, %v12708_v35  ;;  %v9793_v60 = vld [vmem:[%s17402_s6 + $0x80] sm:$0xff]  ;;  %v4241_v52 = vld [vmem:[#allocation2 + $0x48] sm:$0xff]  ;;  %v9792_v58 = vld [vmem:[%s17402_s6 + $0x78] sm:$0xff] }
 0x4b3   : > { %v12959_v44 = vpop.permute.xlu2 %3306  ;;  %v12961_v43 = vpop.permute.xlu0 %3284  ;;  %3993 = vmatpush.msrb.mxu1 %v9794_v48  ;;  %v12987_v35 = vld [vmem:[#allocation2 + $0x209] sm:$0xff]  ;;  %v17622_v48 = vld [vmem:[#allocation7_spill] sm:$0xff] }
 0x4b4   : > { %17618 = vst [vmem:[#allocation40_spill] sm:$0xff] %v12959_v44  ;;  %v12969_v40 = vpop.permute.xlu1 %3280  ;;  %v9920_v44 = vld [vmem:[%s17402_s6 + $0x118] sm:$0xff]  ;;  %3663 = vmatpush.msrb.mxu3 %v9713_v16 }
 0x4b5   : > { %17619 = vst [vmem:[#allocation30_spill] sm:$0xff] %v12961_v43  ;;  %4896 = vmatpush.msra.mxu0 %v9920_v44  ;;  %3994 = vmatpush.msrb.mxu1 %v9793_v60  ;;  %v17624_v43 = vld [vmem:[#allocation26_spill] sm:$0xff] }
 0x4b6   : > { %9774 = vmatmul.msk.f32.gmra.mxu0 %vm3551_vm7, %v3083_v57  ;;  %9850 = vmatmul.msk.f32.gmra.mxu2 %vm3551_vm7, %v3083_v57  ;;  %17621 = vst [vmem:[#allocation6_spill] sm:$0xff] %v12987_v35  ;;  %v12997_v57 = vld [vmem:[#allocation2 + $0x127] sm:$0xff] }
 0x4b7   : > { %v3051_v16 = vsel %vm513_vm0, %v12997_v57, %v17624_v43  ;;  %3995 = vmatpush.msrb.mxu1 %v9792_v58  ;;  %v9790_v43 = vld [vmem:[%s17402_s6 + $0x68] sm:$0xff]  ;;  %v9876_v58 = vld [vmem:[%s17400_s4 + $0x118] sm:$0xff] }
 0x4b8   : > { %v3084_v60 = vsel %vm3065_vm6, %v3051_v16, %v12624_v49  ;;  %4738 = vmatpush.msra.mxu3 %v9876_v58  ;;  %v13023_v49 = vld [vmem:[#allocation2 + $0x211] sm:$0xff] }
 0x4b9   : > { %4337 = vrot.lane.b32.xlu2 %v4241_v52, %s10352_s19  ;;  %3438 = vrot.lane.b32.xlu0 %v12987_v35, %s10353_s23  ;;  %v9791_v35 = vld [vmem:[%s17402_s6 + $0x70] sm:$0xff]  ;;  %17627 = vst [vmem:[#allocation38_spill] sm:$0xff] %v13023_v49 }
 0x4ba   : > { %3434 = vrot.lane.b32.xlu1 %v17622_v48, %s10353_s23  ;;  %3996 = vmatpush.msrb.mxu1 %v9791_v35  ;;  %v4244_v48 = vld [vmem:[#allocation2 + $0x70] sm:$0xff]  ;;  %v9789_v35 = vld [vmem:[%s17402_s6 + $0x60] sm:$0xff] }
 0x4bb   : > { %v12999_v44 = vpop.permute.xlu2 %3312  ;;  %v13004_v52 = vpop.permute.xlu0 %3290  ;;  %v13030_v16 = vld [vmem:[#allocation2 + $0x12f] sm:$0xff] }
 0x4bc   : > { %17623 = vst [vmem:[#allocation43_spill] sm:$0xff] %v12999_v44  ;;  %v13006_v42 = vpop.permute.xlu1 %3286  ;;  %v4242_v44 = vld [vmem:[#allocation2 + $0x50] sm:$0xff]  ;;  %3997 = vmatpush.msrb.mxu1 %v9790_v43  ;;  %v3052_v58 = vsel %vm513_vm0, %v13030_v16, %v12546_v18  ;;  %v4247_v43 = vld [vmem:[#allocation2 + $0xa8] sm:$0xff] }
 0x4bd   : > { %17625 = vst [vmem:[#allocation3_spill] sm:$0xff] %v13004_v52  ;;  %v3085_v52 = vsel %vm3065_vm6, %v3052_v58, %v12703_v9  ;;  %v13048_v18 = vld [vmem:[#allocation2 + $0x147] sm:$0xff] }
 0x4be   : > { %17626 = vst [vmem:[#allocation34_spill] sm:$0xff] %v13006_v42  ;;  %9775 = vmatmul.msk.f32.gmra.mxu0 %vm3551_vm7, %v3084_v60  ;;  %9851 = vmatmul.msk.f32.gmra.mxu2 %vm3551_vm7, %v3084_v60  ;;  %v4245_v42 = vld [vmem:[#allocation2 + $0x88] sm:$0xff] }
 0x4bf   : > { %17628 = vst [vmem:[#allocation5_spill] sm:$0xff] %v13030_v16  ;;  %3998 = vmatpush.msrb.mxu1 %v9789_v35  ;;  %v17632_v35 = vld [vmem:[#allocation10_spill] sm:$0xff]  ;;  %v4251_v16 = vld [vmem:[#allocation2 + $0xe8] sm:$0xff] }
 0x4c0   : > { %17631 = vst [vmem:[#allocation14_spill] sm:$0xff] %v13048_v18  ;;  %v3053_v9 = vsel %vm513_vm0, %v13048_v18, %v17632_v35  ;;  %v4248_v35 = vld [vmem:[#allocation2 + $0xb0] sm:$0xff]  ;;  %v4253_v18 = vld [vmem:[#allocation2 + $0x108] sm:$0xff] }
 0x4c1   : > { %4343 = vrot.lane.b32.xlu2 %v4244_v48, %s10352_s19  ;;  %4339 = vrot.lane.b32.xlu0 %v4242_v44, %s10352_s19 }
 0x4c2   : > { %3440 = vrot.lane.b32.xlu1 %v13023_v49, %s10353_s23  ;;  %v4243_v49 = vld [vmem:[#allocation2 + $0x68] sm:$0xff] }
 0x4c3   : > { %v13032_v60 = vpop.permute.xlu2 %3382  ;;  %v13037_v48 = vpop.permute.xlu0 %3296 }
 0x4c4   : > { %17629 = vst [vmem:[#allocation36_spill] sm:$0xff] %v13037_v48  ;;  %v13039_v44 = vpop.permute.xlu1 %3292 }
 0x4c5   : > { %17630 = vst [vmem:[#allocation42_spill] sm:$0xff] %v13039_v44  ;;  %v4250_v44 = vld [vmem:[#allocation2 + $0xd0] sm:$0xff] }
 0x4c6   : > { %9776 = vmatmul.msk.f32.gmra.mxu0 %vm3551_vm7, %v3085_v52  ;;  %9852 = vmatmul.msk.f32.gmra.mxu2 %vm3551_vm7, %v3085_v52 }
 0x4c9   : > { %4349 = vrot.lane.b32.xlu2 %v4247_v43, %s10352_s19  ;;  %4345 = vrot.lane.b32.xlu0 %v4245_v42, %s10352_s19  ;;  %v3086_v43 = vsel %vm3065_vm6, %v3053_v9, %v12730_v15  ;;  %v9919_v42 = vld [vmem:[%s17402_s6 + $0x110] sm:$0xff] }
 0x4ca   : > { %4341 = vrot.lane.b32.xlu1 %v4243_v49, %s10352_s19  ;;  %v13066_v49 = vpop.f32.mrf.mxu0  ;;  %4897 = vmatpush.msra.mxu0 %v9919_v42  ;;  %v13071_v15 = vld [vmem:[#allocation2 + $0x14f] sm:$0xff] }
 0x4cb   : > { %v13050_v48 = vpop.permute.xlu2 %3388  ;;  %v13055_v58 = vpop.permute.xlu0 %3302  ;;  %17635 = vst [vmem:[#allocation11_spill] sm:$0xff] %v13066_v49  ;;  %v9875_v9 = vld [vmem:[%s17400_s4 + $0x110] sm:$0xff] }
 0x4cc   : > { %17633 = vst [vmem:[#allocation20_spill] sm:$0xff] %v13055_v58  ;;  %v13057_v52 = vpop.permute.xlu1 %3298  ;;  %v4246_v58 = vld [vmem:[#allocation2 + $0x90] sm:$0xff]  ;;  %4739 = vmatpush.msra.mxu3 %v9875_v9  ;;  %v13094_v9 = vld [vmem:[#allocation2 + $0x167] sm:$0xff] }
 0x4cd   : > { %17634 = vst [vmem:[#allocation23_spill] sm:$0xff] %v13057_v52  ;;  %v17636_v52 = vld [vmem:[#allocation41_spill] sm:$0xff] }
 0x4ce   : > { %9777 = vmatmul.msk.f32.gmra.mxu0 %vm3551_vm7, %v3086_v43  ;;  %9853 = vmatmul.msk.f32.gmra.mxu2 %vm3551_vm7, %v3086_v43  ;;  %v3054_v43 = vsel %vm513_vm0, %v13071_v15, %v17636_v52  ;;  %v4249_v52 = vld [vmem:[#allocation2 + $0xc8] sm:$0xff] }
 0x4d1   : > { %4355 = vrot.lane.b32.xlu2 %v4250_v44, %s10352_s19  ;;  %4351 = vrot.lane.b32.xlu0 %v4248_v35, %s10352_s19  ;;  %v3087_v44 = vsel %vm3065_vm6, %v3054_v43, %v12640_v27  ;;  %v3055_v27 = vsel %vm513_vm0, %v13094_v9, %v12559_v31  ;;  %v3474_v43 = vsel %vm513_vm0, %v12606_v50, %v12822_v13  ;;  %v4256_v31 = vld [vmem:[#allocation2 + $0x130] sm:$0xff] }
 0x4d2   : > { %4347 = vrot.lane.b32.xlu1 %v4246_v58, %s10352_s19  ;;  %v13089_v58 = vpop.f32.mrf.mxu0  ;;  %v4254_v50 = vld [vmem:[#allocation2 + $0x110] sm:$0xff] }
 0x4d3   : > { %v13079_v42 = vpop.permute.xlu0 %3308  ;;  %v13085_v35 = vpop.permute.xlu2 %3394  ;;  %17637 = vst [vmem:[#allocation4_spill] sm:$0xff] %v13089_v58 }
 0x4d4   : > { %v13081_v49 = vpop.permute.xlu1 %3304 }
 0x4d6   : > { %9778 = vmatmul.msk.f32.gmra.mxu0 %vm3551_vm7, %v3087_v44  ;;  %9854 = vmatmul.msk.f32.gmra.mxu2 %vm3551_vm7, %v3087_v44 }
 0x4d9   : > { %4361 = vrot.lane.b32.xlu2 %v4253_v18, %s10352_s19  ;;  %4357 = vrot.lane.b32.xlu0 %v4251_v16, %s10352_s19  ;;  %v3088_v18 = vsel %vm3065_vm6, %v3055_v27, %v12725_v59  ;;  %v4252_v59 = vld [vmem:[#allocation2 + $0xf0] sm:$0xff]  ;;  %v9918_v27 = vld [vmem:[%s17402_s6 + $0x108] sm:$0xff] }
 0x4da   : > { %4353 = vrot.lane.b32.xlu1 %v4249_v52, %s10352_s19  ;;  %v13113_v13 = vpop.f32.mrf.mxu0  ;;  %4898 = vmatpush.msra.mxu0 %v9918_v27  ;;  %v4259_v27 = vld [vmem:[#allocation2 + $0x168] sm:$0xff] }
 0x4db   : > { %v3379_v44 = vpop.permute.xlu0 %3378  ;;  %v13109_v52 = vpop.permute.xlu2 %3400  ;;  %17639 = vst [vmem:[#allocation24_spill] sm:$0xff] %v13113_v13 }
 0x4dc   : > { %v13102_v58 = vpop.permute.xlu1 %3310  ;;  %v3506_v16 = vsel %vm3065_vm6, %v3474_v43, %v3379_v44  ;;  %v13121_v43 = vld [vmem:[#allocation2 + $0x16f] sm:$0xff]  ;;  %v13123_v44 = vpop.f32.mrf.mxu2 }
 0x4dd   : > { %17638 = vst [vmem:[#allocation28_spill] sm:$0xff] %v13102_v58  ;;  %9725 = vmatmul.msk.f32.vlgmr.msrb.gmra.mxu3 %vm3551_vm7, %v3506_v16  ;;  %9801 = vmatmul.msk.f32.vlgmr.msrb.gmra.mxu1 %vm3551_vm7, %v3506_v16 }
 0x4de   : > { %9779 = vmatmul.msk.f32.gmra.mxu0 %vm3551_vm7, %v3088_v18  ;;  %9855 = vmatmul.msk.f32.gmra.mxu2 %vm3551_vm7, %v3088_v18  ;;  %17640 = vst [vmem:[#allocation13_spill] sm:$0xff] %v13123_v44  ;;  %v17641_v18 = vld [vmem:[#allocation16_spill] sm:$0xff] }
 0x4df   : > { %v3056_v16 = vsel %vm513_vm0, %v13121_v43, %v17641_v18  ;;  %v4257_v18 = vld [vmem:[#allocation2 + $0x148] sm:$0xff] }
 0x4e0   : > { %v3089_v58 = vsel %vm3065_vm6, %v3056_v16, %v12750_v12  ;;  %v13146_v12 = vld [vmem:[#allocation2 + $0x187] sm:$0xff] }
 0x4e1   : > { %4367 = vrot.lane.b32.xlu2 %v4256_v31, %s10352_s19  ;;  %4363 = vrot.lane.b32.xlu0 %v4254_v50, %s10352_s19  ;;  %v3475_v31 = vsel %vm513_vm0, %v12622_v51, %v12723_v5  ;;  %v4255_v51 = vld [vmem:[#allocation2 + $0x128] sm:$0xff]  ;;  %v3057_v16 = vsel %vm513_vm0, %v13146_v12, %v12557_v26  ;;  %v4262_v26 = vld [vmem:[#allocation2 + $0x190] sm:$0xff] }
 0x4e2   : > { %4359 = vrot.lane.b32.xlu1 %v4252_v59, %s10352_s19  ;;  %v9874_v5 = vld [vmem:[%s17400_s4 + $0x108] sm:$0xff] }
 0x4e3   : > { %v3385_v50 = vpop.permute.xlu0 %3384  ;;  %v13138_v44 = vpop.permute.xlu2 %3406  ;;  %4740 = vmatpush.msra.mxu3 %v9874_v5  ;;  %v4260_v5 = vld [vmem:[#allocation2 + $0x170] sm:$0xff] }
 0x4e4   : > { %v3381_v13 = vpop.permute.xlu1 %3380 }
 0x4e5   : > { %v3507_v59 = vsel %vm3065_vm6, %v3475_v31, %v3381_v13  ;;  %v13148_v13 = vpop.f32.mrf.mxu2  ;;  %v3476_v31 = vsel %vm513_vm0, %v12638_v33, %v12817_v45  ;;  %v4258_v33 = vld [vmem:[#allocation2 + $0x150] sm:$0xff] }
 0x4e6   : > { %9726 = vmatmul.msk.f32.gmra.mxu3 %vm3551_vm7, %v3507_v59  ;;  %9780 = vmatmul.msk.f32.gmra.mxu0 %vm3551_vm7, %v3089_v58 }
 0x4e7   : > { %9802 = vmatmul.msk.f32.gmra.mxu1 %vm3551_vm7, %v3507_v59  ;;  %9856 = vmatmul.msk.f32.gmra.mxu2 %vm3551_vm7, %v3089_v58  ;;  %v13150_v58 = vpop.f32.mrf.mxu0 }
 0x4e8   : > { %17642 = vst [vmem:[#allocation19_spill] sm:$0xff] %v13150_v58 }
 0x4e9   : > { %4373 = vrot.lane.b32.xlu2 %v4259_v27, %s10352_s19  ;;  %4369 = vrot.lane.b32.xlu0 %v4257_v18, %s10352_s19  ;;  %v3090_v18 = vsel %vm3065_vm6, %v3057_v16, %v12658_v4  ;;  %v13171_v4 = vld [vmem:[#allocation2 + $0x18f] sm:$0xff]  ;;  %v3477_v16 = vsel %vm513_vm0, %v12656_v56, %v12849_v21 }
 0x4ea   : > { %4365 = vrot.lane.b32.xlu1 %v4255_v51, %s10352_s19  ;;  %v3508_v51 = vsel %vm3065_vm6, %v3476_v31, %v13032_v60  ;;  %v3058_v60 = vsel %vm513_vm0, %v13171_v4, %v12571_v29  ;;  %v9917_v29 = vld [vmem:[%s17402_s6 + $0x100] sm:$0xff]  ;;  %v4265_v56 = vld [vmem:[#allocation2 + $0x1c8] sm:$0xff] }
 0x4eb   : > { %v13158_v59 = vpop.permute.xlu0 %3390  ;;  %v13173_v45 = vpop.permute.xlu2 %3412  ;;  %4899 = vmatpush.msra.mxu0 %v9917_v29  ;;  %v4261_v21 = vld [vmem:[#allocation2 + $0x188] sm:$0xff] }
 0x4ec   : > { %v3387_v27 = vpop.permute.xlu1 %3386 }
 0x4ee   : > { %9727 = vmatmul.msk.f32.gmra.mxu3 %vm3551_vm7, %v3508_v51  ;;  %9781 = vmatmul.msk.f32.gmra.mxu0 %vm3551_vm7, %v3090_v18 }
 0x4ef   : > { %9803 = vmatmul.msk.f32.gmra.mxu1 %vm3551_vm7, %v3508_v51  ;;  %9857 = vmatmul.msk.f32.gmra.mxu2 %vm3551_vm7, %v3090_v18  ;;  %v3091_v51 = vsel %vm3065_vm6, %v3058_v60, %v12745_v55  ;;  %v4263_v55 = vld [vmem:[#allocation2 + $0x1a8] sm:$0xff]  ;;  %v17644_v60 = vld [vmem:[#allocation33_spill] sm:$0xff] }
 0x4f1   : > { %4379 = vrot.lane.b32.xlu2 %v4262_v26, %s10352_s19  ;;  %4375 = vrot.lane.b32.xlu0 %v4260_v5, %s10352_s19  ;;  %v13187_v26 = vpop.f32.mrf.mxu2  ;;  %v13189_v5 = vpop.f32.mrf.mxu0 }
 0x4f2   : > { %4371 = vrot.lane.b32.xlu1 %v4258_v33, %s10352_s19  ;;  %17643 = vst [vmem:[#allocation15_spill] sm:$0xff] %v13189_v5  ;;  %v3509_v33 = vsel %vm3065_vm6, %v3477_v16, %v3385_v50  ;;  %v13202_v50 = vld [vmem:[#allocation2 + $0x1a7] sm:$0xff] }
 0x4f3   : > { %v13181_v31 = vpop.permute.xlu0 %3396  ;;  %v3059_v16 = vsel %vm513_vm0, %v13202_v50, %v17644_v60 }
 0x4f4   : > { %v13183_v18 = vpop.permute.xlu1 %3392 }
 0x4f6   : > { %9728 = vmatmul.msk.f32.gmra.mxu3 %vm3551_vm7, %v3509_v33  ;;  %9782 = vmatmul.msk.f32.gmra.mxu0 %vm3551_vm7, %v3091_v51 }
 0x4f7   : > { %9804 = vmatmul.msk.f32.gmra.mxu1 %vm3551_vm7, %v3509_v33  ;;  %9858 = vmatmul.msk.f32.gmra.mxu2 %vm3551_vm7, %v3091_v51  ;;  %v3478_v51 = vsel %vm513_vm0, %v12676_v6, %v12743_v63  ;;  %v9873_v6 = vld [vmem:[%s17400_s4 + $0x100] sm:$0xff]  ;;  %v4268_v63 = vld [vmem:[#allocation2 + $0x1f0] sm:$0xff] }
 0x4f8   : > { %4741 = vmatpush.msra.mxu3 %v9873_v6 }
 0x4f9   : > { %4385 = vrot.lane.b32.xlu2 %v4265_v56, %s10352_s19  ;;  %4381 = vrot.lane.b32.xlu0 %v4263_v55, %s10352_s19  ;;  %v3092_v56 = vsel %vm3065_vm6, %v3059_v16, %v12771_v2  ;;  %v3510_v55 = vsel %vm3065_vm6, %v3478_v51, %v3387_v27  ;;  %v13221_v60 = vpop.f32.mrf.mxu2  ;;  %v13223_v5 = vpop.f32.mrf.mxu0  ;;  %v4266_v2 = vld [vmem:[#allocation2 + $0x1d0] sm:$0xff] }
 0x4fa   : > { %4377 = vrot.lane.b32.xlu1 %v4261_v21, %s10352_s19  ;;  %v13217_v21 = vpop.permute.xlu2 %3418  ;;  %17645 = vst [vmem:[#allocation29_spill] sm:$0xff] %v13223_v5  ;;  %v4264_v27 = vld [vmem:[#allocation2 + $0x1b0] sm:$0xff] }
 0x4fb   : > { %v13210_v33 = vpop.permute.xlu0 %3402  ;;  %v13233_v16 = vld [vmem:[#allocation2 + $0x1af] sm:$0xff] }
 0x4fc   : > { %v13212_v29 = vpop.permute.xlu1 %3398  ;;  %v3060_v51 = vsel %vm513_vm0, %v13233_v16, %v12567_v25 }
 0x4fe   : > { %9729 = vmatmul.msk.f32.gmra.mxu3 %vm3551_vm7, %v3510_v55  ;;  %9783 = vmatmul.msk.f32.gmra.mxu0 %vm3551_vm7, %v3092_v56 }
 0x4ff   : > { %9805 = vmatmul.msk.f32.gmra.mxu1 %vm3551_vm7, %v3510_v55  ;;  %9859 = vmatmul.msk.f32.gmra.mxu2 %vm3551_vm7, %v3092_v56  ;;  %v3479_v56 = vsel %vm513_vm0, %v12699_v10, %v12844_v47 }
 0x501   : > { %4391 = vrot.lane.b32.xlu2 %v4268_v63, %s10352_s19  ;;  %4387 = vrot.lane.b32.xlu0 %v4266_v2, %s10352_s19  ;;  %v3093_v63 = vsel %vm3065_vm6, %v3060_v51, %v12678_v1  ;;  %v3511_v2 = vsel %vm3065_vm6, %v3479_v56, %v13050_v48  ;;  %v13255_v10 = vpop.f32.mrf.mxu2  ;;  %v13257_v47 = vpop.f32.mrf.mxu0  ;;  %v4267_v1 = vld [vmem:[#allocation2 + $0x1e8] sm:$0xff]  ;;  %v3480_v56 = vsel %vm513_vm0, %v12721_v14, %v12873_v37  ;;  %v4274_v14 = vld [vmem:[#allocation2 + $0x51] sm:$0xff] }
 0x502   : > { %4383 = vrot.lane.b32.xlu1 %v4264_v27, %s10352_s19  ;;  %v4271_v27 = vld [vmem:[#allocation2 + $0x228] sm:$0xff]  ;;  %v13251_v25 = vpop.permute.xlu2 %3424  ;;  %17646 = vst [vmem:[#allocation27_spill] sm:$0xff] %v13257_v47 }
 0x503   : > { %v13241_v55 = vpop.permute.xlu0 %3408  ;;  %v13263_v48 = vld [vmem:[#allocation2 + $0x1c7] sm:$0xff] }
 0x504   : > { %v13243_v6 = vpop.permute.xlu1 %3404  ;;  %v3061_v51 = vsel %vm513_vm0, %v13263_v48, %v12583_v23  ;;  %v4272_v23 = vld [vmem:[#allocation2 + $0x230] sm:$0xff] }
 0x506   : > { %9730 = vmatmul.msk.f32.gmra.mxu3 %vm3551_vm7, %v3511_v2  ;;  %9784 = vmatmul.msk.f32.gmra.mxu0 %vm3551_vm7, %v3093_v63 }
 0x507   : > { %9806 = vmatmul.msk.f32.gmra.mxu1 %vm3551_vm7, %v3511_v2  ;;  %9860 = vmatmul.msk.f32.gmra.mxu2 %vm3551_vm7, %v3093_v63 }
 0x509   : > { %4397 = vrot.lane.b32.xlu2 %v4271_v27, %s10352_s19  ;;  %4393 = vrot.lane.b32.xlu0 %v12717_v30, %s10352_s19  ;;  %v3094_v30 = vsel %vm3065_vm6, %v3061_v51, %v12766_v46  ;;  %v3512_v27 = vsel %vm3065_vm6, %v3480_v56, %v13158_v59  ;;  %v13292_v46 = vld [vmem:[#allocation2 + $0x1cf] sm:$0xff]  ;;  %v13294_v59 = vpop.f32.mrf.mxu2  ;;  %v13296_v51 = vpop.f32.mrf.mxu0  ;;  %v9872_v56 = vld [vmem:[%s17400_s4 + $0xf8] sm:$0xff] }
 0x50a   : > { %4389 = vrot.lane.b32.xlu1 %v4267_v1, %s10352_s19  ;;  %v9916_v1 = vld [vmem:[%s17402_s6 + $0xf8] sm:$0xff]  ;;  %v13286_v37 = vpop.permute.xlu2 %3430  ;;  %17647 = vst [vmem:[#allocation21_spill] sm:$0xff] %v13296_v51  ;;  %4742 = vmatpush.msra.mxu3 %v9872_v56  ;;  %v4273_v56 = vld [vmem:[#allocation2 + $0x49] sm:$0xff] }
 0x50b   : > { %v13271_v63 = vpop.permute.xlu0 %3414  ;;  %4900 = vmatpush.msra.mxu0 %v9916_v1  ;;  %v3481_v1 = vsel %vm513_vm0, %v12741_v28, %v12764_v19  ;;  %v4277_v28 = vld [vmem:[#allocation2 + $0x89] sm:$0xff] }
 0x50c   : > { %v13273_v2 = vpop.permute.xlu1 %3410  ;;  %v3513_v51 = vsel %vm3065_vm6, %v3481_v1, %v13183_v18  ;;  %v4275_v19 = vld [vmem:[#allocation2 + $0x69] sm:$0xff] }
 0x50e   : > { %9731 = vmatmul.msk.f32.gmra.mxu3 %vm3551_vm7, %v3512_v27  ;;  %9785 = vmatmul.msk.f32.gmra.mxu0 %vm3551_vm7, %v3094_v30 }
 0x50f   : > { %9807 = vmatmul.msk.f32.gmra.mxu1 %vm3551_vm7, %v3512_v27  ;;  %9861 = vmatmul.msk.f32.gmra.mxu2 %vm3551_vm7, %v3094_v30  ;;  %v17648_v30 = vld [vmem:[#allocation12_spill] sm:$0xff] }
 0x510   : > { %v3062_v27 = vsel %vm513_vm0, %v13292_v46, %v17648_v30 }
 0x511   : > { %4467 = vrot.lane.b32.xlu2 %v4274_v14, %s10353_s23  ;;  %4399 = vrot.lane.b32.xlu0 %v4272_v23, %s10352_s19  ;;  %v3095_v14 = vsel %vm3065_vm6, %v3062_v27, %v12798_v22  ;;  %v13322_v22 = vld [vmem:[#allocation2 + $0x1e7] sm:$0xff] }
 0x512   : > { %4395 = vrot.lane.b32.xlu1 %v12691_v62, %s10352_s19  ;;  %v13324_v18 = vpop.permute.xlu2 %3436  ;;  %v3063_v30 = vsel %vm513_vm0, %v13322_v22, %v12579_v20  ;;  %v4280_v20 = vld [vmem:[#allocation2 + $0xb1] sm:$0xff] }
 0x513   : > { %v13307_v23 = vpop.permute.xlu0 %3420 }
 0x514   : > { %v13309_v62 = vpop.permute.xlu1 %3416 }
 0x516   : > { %9732 = vmatmul.msk.f32.gmra.mxu3 %vm3551_vm7, %v3513_v51  ;;  %9786 = vmatmul.msk.f32.gmra.mxu0 %vm3551_vm7, %v3095_v14 }
 0x517   : > { %9808 = vmatmul.msk.f32.gmra.mxu1 %vm3551_vm7, %v3513_v51  ;;  %9862 = vmatmul.msk.f32.gmra.mxu2 %vm3551_vm7, %v3095_v14  ;;  %v3482_v51 = vsel %vm513_vm0, %v12762_v53, %v12868_v11  ;;  %v3096_v14 = vsel %vm3065_vm6, %v3063_v30, %v12701_v34  ;;  %v4278_v53 = vld [vmem:[#allocation2 + $0x91] sm:$0xff] }
 0x518   : > { %v4276_v34 = vld [vmem:[#allocation2 + $0x71] sm:$0xff] }
 0x519   : > { %4473 = vrot.lane.b32.xlu2 %v4277_v28, %s10353_s23  ;;  %4469 = vrot.lane.b32.xlu0 %v4275_v19, %s10353_s23  ;;  %v3514_v28 = vsel %vm3065_vm6, %v3482_v51, %v13085_v35  ;;  %v13340_v19 = vpop.f32.mrf.mxu2  ;;  %v9915_v11 = vld [vmem:[%s17402_s6 + $0xf0] sm:$0xff]  ;;  %v3483_v51 = vsel %vm513_vm0, %v12789_v8, %v12900_v54 }
 0x51a   : > { %4465 = vrot.lane.b32.xlu1 %v4273_v56, %s10353_s23  ;;  %v13342_v56 = vpop.f32.mrf.mxu0  ;;  %4901 = vmatpush.msra.mxu0 %v9915_v11  ;;  %v13354_v35 = vld [vmem:[#allocation2 + $0x1ef] sm:$0xff] }
 0x51b   : > { %v13332_v27 = vpop.permute.xlu0 %3426  ;;  %17649 = vst [vmem:[#allocation39_spill] sm:$0xff] %v13342_v56  ;;  %v3064_v30 = vsel %vm513_vm0, %v13354_v35, %v12596_v24  ;;  %v4283_v8 = vld [vmem:[#allocation2 + $0xe9] sm:$0xff] }
 0x51c   : > { %v13334_v1 = vpop.permute.xlu1 %3422  ;;  %v4281_v54 = vld [vmem:[#allocation2 + $0xc9] sm:$0xff] }
 0x51e   : > { %9733 = vmatmul.msk.f32.gmra.mxu3 %vm3551_vm7, %v3514_v28  ;;  %9787 = vmatmul.msk.f32.gmra.mxu0 %vm3551_vm7, %v3096_v14 }
 0x51f   : > { %9809 = vmatmul.msk.f32.gmra.mxu1 %vm3551_vm7, %v3514_v28  ;;  %9863 = vmatmul.msk.f32.gmra.mxu2 %vm3551_vm7, %v3096_v14 }
 0x521   : > { %4479 = vrot.lane.b32.xlu2 %v4280_v20, %s10353_s23  ;;  %4475 = vrot.lane.b32.xlu0 %v4278_v53, %s10353_s23  ;;  %v3097_v20 = vsel %vm3065_vm6, %v3064_v30, %v12793_v17  ;;  %v3515_v53 = vsel %vm3065_vm6, %v3483_v51, %v13181_v31  ;;  %v13374_v24 = vpop.f32.mrf.mxu2  ;;  %v4279_v17 = vld [vmem:[#allocation2 + $0xa9] sm:$0xff]  ;;  %v3484_v30 = vsel %vm513_vm0, %v12813_v0, %v12791_v38  ;;  %v4282_v38 = vld [vmem:[#allocation2 + $0xd1] sm:$0xff] }
 0x522   : > { %4471 = vrot.lane.b32.xlu1 %v4276_v34, %s10353_s23  ;;  %v13370_v34 = vpop.permute.xlu2 %4337  ;;  %17650 = vst [vmem:[#allocation25_spill] sm:$0xff] %v13374_v24  ;;  %v13376_v11 = vpop.f32.mrf.mxu0  ;;  %v9871_v31 = vld [vmem:[%s17400_s4 + $0xf0] sm:$0xff]  ;;  %v3485_v0 = vsel %vm513_vm0, %v12840_v41, %v12892_v39 }
 0x523   : > { %v13362_v14 = vpop.permute.xlu0 %3432  ;;  %17651 = vst [vmem:[#allocation18_spill] sm:$0xff] %v13376_v11  ;;  %4743 = vmatpush.msra.mxu3 %v9871_v31  ;;  %v4285_v41 = vld [vmem:[#allocation2 + $0x109] sm:$0xff] }
 0x524   : > { %v13364_v28 = vpop.permute.xlu1 %3428 }
 0x526   : > { %9734 = vmatmul.msk.f32.gmra.mxu3 %vm3551_vm7, %v3515_v53  ;;  %9788 = vmatmul.msk.f32.gmra.mxu0 %vm3551_vm7, %v3097_v20 }
 0x527   : > { %9810 = vmatmul.msk.f32.gmra.mxu1 %vm3551_vm7, %v3515_v53  ;;  %9864 = vmatmul.msk.f32.gmra.mxu2 %vm3551_vm7, %v3097_v20  ;;  %v3516_v53 = vsel %vm3065_vm6, %v3484_v30, %v13212_v29 }
 0x529   : > { %4485 = vrot.lane.b32.xlu2 %v4283_v8, %s10353_s23  ;;  %4481 = vrot.lane.b32.xlu0 %v4281_v54, %s10353_s23  ;;  %v4286_v54 = vld [vmem:[#allocation2 + $0x111] sm:$0xff] }
 0x52a   : > { %4477 = vrot.lane.b32.xlu1 %v4279_v17, %s10353_s23  ;;  %v13396_v8 = vpop.permute.xlu2 %4343  ;;  %v4284_v17 = vld [vmem:[#allocation2 + $0xf1] sm:$0xff]  ;;  %v13399_v31 = vpop.f32.mrf.mxu0 }
 0x52b   : > { %v13389_v51 = vpop.permute.xlu0 %3438  ;;  %17652 = vst [vmem:[#allocation31_spill] sm:$0xff] %v13399_v31 }
 0x52c   : > { %v13391_v20 = vpop.permute.xlu1 %3434 }
 0x52e   : > { %9735 = vmatmul.msk.f32.gmra.mxu3 %vm3551_vm7, %v3516_v53 }
 0x52f   : > { %9811 = vmatmul.msk.f32.gmra.mxu1 %vm3551_vm7, %v3516_v53  ;;  %v3517_v53 = vsel %vm3065_vm6, %v3485_v0, %v13109_v52  ;;  %v3486_v52 = vsel %vm513_vm0, %v12864_v3, %v12933_v32  ;;  %v4288_v3 = vld [vmem:[#allocation2 + $0x131] sm:$0xff] }
 0x531   : > { %4491 = vrot.lane.b32.xlu2 %v4286_v54, %s10353_s23  ;;  %4487 = vrot.lane.b32.xlu0 %v4284_v17, %s10353_s23  ;;  %v9914_v54 = vld [vmem:[%s17402_s6 + $0xe8] sm:$0xff] }
 0x532   : > { %4483 = vrot.lane.b32.xlu1 %v4282_v38, %s10353_s23  ;;  %v4289_v17 = vld [vmem:[#allocation2 + $0x149] sm:$0xff]  ;;  %4902 = vmatpush.msra.mxu0 %v9914_v54  ;;  %v13418_v31 = vpop.permute.xlu2 %4349  ;;  %v13423_v39 = vpop.f32.mrf.mxu0  ;;  %v3518_v54 = vsel %vm3065_vm6, %v3486_v52, %v13210_v33 }
 0x533   : > { %v13407_v29 = vpop.permute.xlu0 %4339  ;;  %v4287_v38 = vld [vmem:[#allocation2 + $0x129] sm:$0xff]  ;;  %17653 = vst [vmem:[#allocation17_spill] sm:$0xff] %v13423_v39 }
 0x534   : > { %v13409_v30 = vpop.permute.xlu1 %3440  ;;  %v17654_v33 = vld [vmem:[#allocation37_spill] sm:$0xff] }
 0x535   : > { %v3487_v52 = vsel %vm513_vm0, %v17654_v33, %v12815_v7  ;;  %v4291_v7 = vld [vmem:[#allocation2 + $0x169] sm:$0xff] }
 0x536   : > { %9736 = vmatmul.msk.f32.gmra.mxu3 %vm3551_vm7, %v3517_v53 }
 0x537   : > { %9812 = vmatmul.msk.f32.gmra.mxu1 %vm3551_vm7, %v3517_v53 }
 0x539   : > { %4497 = vrot.lane.b32.xlu2 %v4289_v17, %s10353_s23  ;;  %4493 = vrot.lane.b32.xlu0 %v4287_v38, %s10353_s23  ;;  %v9870_v17 = vld [vmem:[%s17400_s4 + $0xe8] sm:$0xff]  ;;  %v4292_v38 = vld [vmem:[#allocation2 + $0x171] sm:$0xff] }
 0x53a   : > { %4489 = vrot.lane.b32.xlu1 %v4285_v41, %s10353_s23  ;;  %v4290_v41 = vld [vmem:[#allocation2 + $0x151] sm:$0xff]  ;;  %4744 = vmatpush.msra.mxu3 %v9870_v17  ;;  %v13442_v32 = vpop.permute.xlu2 %4355  ;;  %v3519_v17 = vsel %vm3065_vm6, %v3487_v52, %v13243_v6  ;;  %v13453_v11 = vpop.f32.mrf.mxu0 }
 0x53b   : > { %v13428_v0 = vpop.permute.xlu0 %4345  ;;  %17655 = vst [vmem:[#allocation7_spill] sm:$0xff] %v13453_v11 }
 0x53c   : > { %v13430_v53 = vpop.permute.xlu1 %4341 }
 0x53e   : > { %9737 = vmatmul.msk.f32.gmra.mxu3 %vm3551_vm7, %v3518_v54 }
 0x53f   : > { %9813 = vmatmul.msk.f32.gmra.mxu1 %vm3551_vm7, %v3518_v54 }
 0x541   : > { %4503 = vrot.lane.b32.xlu2 %v4292_v38, %s10353_s23  ;;  %4499 = vrot.lane.b32.xlu0 %v4290_v41, %s10353_s23  ;;  %v4295_v38 = vld [vmem:[#allocation2 + $0x1a9] sm:$0xff] }
 0x542   : > { %4495 = vrot.lane.b32.xlu1 %v4288_v3, %s10353_s23  ;;  %v4293_v41 = vld [vmem:[#allocation2 + $0x189] sm:$0xff]  ;;  %v3488_v3 = vsel %vm513_vm0, %v12921_v61, %v12925_v36  ;;  %v4298_v61 = vld [vmem:[#allocation2 + $0x1d1] sm:$0xff] }
 0x543   : > { %v13447_v54 = vpop.permute.xlu0 %4351  ;;  %v3520_v52 = vsel %vm3065_vm6, %v3488_v3, %v13138_v44  ;;  %v4296_v36 = vld [vmem:[#allocation2 + $0x1b1] sm:$0xff] }
 0x544   : > { %v13449_v39 = vpop.permute.xlu1 %4347  ;;  %v4294_v44 = vld [vmem:[#allocation2 + $0x191] sm:$0xff] }
 0x546   : > { %9738 = vmatmul.msk.f32.gmra.mxu3 %vm3551_vm7, %v3519_v17 }
 0x547   : > { %9814 = vmatmul.msk.f32.gmra.mxu1 %vm3551_vm7, %v3519_v17  ;;  %v13469_v17 = vpop.permute.xlu2 %4361 }
 0x549   : > { %4509 = vrot.lane.b32.xlu2 %v4295_v38, %s10353_s23  ;;  %4505 = vrot.lane.b32.xlu0 %v4293_v41, %s10353_s23  ;;  %v9913_v38 = vld [vmem:[%s17402_s6 + $0xe0] sm:$0xff]  ;;  %v13476_v41 = vpop.f32.mrf.mxu0 }
 0x54a   : > { %4501 = vrot.lane.b32.xlu1 %v4291_v7, %s10353_s23  ;;  %4903 = vmatpush.msra.mxu0 %v9913_v38  ;;  %17656 = vst [vmem:[#allocation26_spill] sm:$0xff] %v13476_v41  ;;  %v17657_v7 = vld [vmem:[#allocation9_spill] sm:$0xff] }
 0x54b   : > { %v13463_v6 = vpop.permute.xlu0 %4357  ;;  %v3489_v3 = vsel %vm513_vm0, %v17657_v7, %v12969_v40  ;;  %v17658_v40 = vld [vmem:[#allocation6_spill] sm:$0xff] }
 0x54c   : > { %v13465_v33 = vpop.permute.xlu1 %4353 }
 0x54e   : > { %9739 = vmatmul.msk.f32.gmra.mxu3 %vm3551_vm7, %v3520_v52 }
 0x54f   : > { %9815 = vmatmul.msk.f32.gmra.mxu1 %vm3551_vm7, %v3520_v52  ;;  %v3521_v52 = vsel %vm3065_vm6, %v3489_v3, %v13241_v55  ;;  %v4297_v55 = vld [vmem:[#allocation2 + $0x1c9] sm:$0xff] }
 0x550   : > { %v17660_v3 = vld [vmem:[#allocation32_spill] sm:$0xff] }
 0x551   : > { %4515 = vrot.lane.b32.xlu2 %v4298_v61, %s10353_s23  ;;  %4511 = vrot.lane.b32.xlu0 %v4296_v36, %s10353_s23  ;;  %v9869_v61 = vld [vmem:[%s17400_s4 + $0xe0] sm:$0xff]  ;;  %v13494_v36 = vpop.permute.xlu2 %4367  ;;  %v13500_v7 = vpop.f32.mrf.mxu0  ;;  %v3490_v41 = vsel %vm513_vm0, %v12997_v57, %v17660_v3  ;;  %v9912_v57 = vld [vmem:[%s17402_s6 + $0xd8] sm:$0xff] }
 0x552   : > { %4507 = vrot.lane.b32.xlu1 %v4294_v44, %s10353_s23  ;;  %4745 = vmatpush.msra.mxu3 %v9869_v61  ;;  %v4299_v44 = vld [vmem:[#allocation2 + $0x1e9] sm:$0xff]  ;;  %17659 = vst [vmem:[#allocation10_spill] sm:$0xff] %v13500_v7  ;;  %v3522_v56 = vsel %vm3065_vm6, %v3490_v41, %v13273_v2  ;;  %v4300_v7 = vld [vmem:[#allocation2 + $0x1f1] sm:$0xff] }
 0x553   : > { %v13488_v38 = vpop.permute.xlu0 %4363  ;;  %4904 = vmatpush.msra.mxu0 %v9912_v57  ;;  %v17663_v2 = vld [vmem:[#allocation30_spill] sm:$0xff]  ;;  %v17664_v41 = vld [vmem:[#allocation5_spill] sm:$0xff] }
 0x554   : > { %v13484_v11 = vpop.permute.xlu1 %4359  ;;  %v3491_v3 = vsel %vm513_vm0, %v17664_v41, %v17663_v2  ;;  %v9911_v2 = vld [vmem:[%s17402_s6 + $0xd0] sm:$0xff] }
 0x555   : > { %v3523_v47 = vsel %vm3065_vm6, %v3491_v3, %v13173_v45  ;;  %v9868_v45 = vld [vmem:[%s17400_s4 + $0xd8] sm:$0xff]  ;;  %4905 = vmatpush.msra.mxu0 %v9911_v2 }
 0x556   : > { %9740 = vmatmul.msk.f32.gmra.mxu3 %vm3551_vm7, %v3521_v52  ;;  %v17668_v3 = vld [vmem:[#allocation14_spill] sm:$0xff] }
 0x557   : > { %9816 = vmatmul.msk.f32.gmra.mxu1 %vm3551_vm7, %v3521_v52  ;;  %4746 = vmatpush.msra.mxu3 %v9868_v45  ;;  %v9909_v45 = vld [vmem:[%s17402_s6 + $0xc0] sm:$0xff] }
 0x559   : > { %4521 = vrot.lane.b32.xlu2 %v17658_v40, %s10353_s23  ;;  %4517 = vrot.lane.b32.xlu0 %v4299_v44, %s10353_s23  ;;  %v13514_v44 = vpop.permute.xlu2 %4373 }
 0x55a   : > { %4513 = vrot.lane.b32.xlu1 %v4297_v55, %s10353_s23  ;;  %v17662_v55 = vld [vmem:[#allocation38_spill] sm:$0xff] }
 0x55b   : > { %v13511_v61 = vpop.permute.xlu0 %4369 }
 0x55c   : > { %v13508_v52 = vpop.permute.xlu1 %4365 }
 0x55e   : > { %9741 = vmatmul.msk.f32.gmra.mxu3 %vm3551_vm7, %v3522_v56 }
 0x55f   : > { %9817 = vmatmul.msk.f32.gmra.mxu1 %vm3551_vm7, %v3522_v56  ;;  %v13527_v56 = vpop.f32.mrf.mxu0 }
 0x560   : > { %v13516_v40 = vpop.f32.mrf.mxu3  ;;  %17665 = vst [vmem:[#allocation16_spill] sm:$0xff] %v13527_v56 }
 0x561   : > { %17661 = vst [vmem:[#allocation41_spill] sm:$0xff] %v13516_v40  ;;  %4523 = vrot.lane.b32.xlu0 %v17662_v55, %s10353_s23  ;;  %v4304_v55 = vld [vmem:[#allocation2 + $0x231] sm:$0xff]  ;;  %v13547_v41 = vpop.permute.xlu2 %4379 }
 0x562   : > { %4519 = vrot.lane.b32.xlu1 %v4300_v7, %s10353_s23  ;;  %4527 = vrot.lane.b32.xlu2 %v4304_v55, %s10353_s23  ;;  %v4303_v7 = vld [vmem:[#allocation2 + $0x229] sm:$0xff] }
 0x563   : > { %v13536_v57 = vpop.permute.xlu0 %4375 }
 0x564   : > { %v13531_v5 = vpop.permute.xlu1 %4371 }
 0x566   : > { %9742 = vmatmul.msk.f32.gmra.mxu3 %vm3551_vm7, %v3523_v47 }
 0x567   : > { %9818 = vmatmul.msk.f32.gmra.mxu1 %vm3551_vm7, %v3523_v47  ;;  %v17667_v47 = vld [vmem:[#allocation34_spill] sm:$0xff]  ;;  %v13559_v40 = vpop.f32.mrf.mxu0 }
 0x568   : > { %v3492_v55 = vsel %vm513_vm0, %v17668_v3, %v17667_v47  ;;  %17669 = vst [vmem:[#allocation12_spill] sm:$0xff] %v13559_v40  ;;  %v17671_v47 = vld [vmem:[#allocation8_spill] sm:$0xff] }
 0x569   : > { %v13538_v58 = vpop.f32.mrf.mxu3  ;;  %v3524_v56 = vsel %vm3065_vm6, %v3492_v55, %v13271_v63  ;;  %v3493_v3 = vsel %vm513_vm0, %v13071_v15, %v17671_v47  ;;  %v13575_v40 = vpop.permute.xlu2 %4385 }
 0x56a   : > { %17666 = vst [vmem:[#allocation33_spill] sm:$0xff] %v13538_v58  ;;  %4525 = vrot.lane.b32.xlu1 %v4303_v7, %s10353_s23  ;;  %v9910_v58 = vld [vmem:[%s17402_s6 + $0xc8] sm:$0xff]  ;;  %v3525_v55 = vsel %vm3065_vm6, %v3493_v3, %v13309_v62 }
 0x56b   : > { %4906 = vmatpush.msra.mxu0 %v9910_v58  ;;  %v13568_v63 = vpop.permute.xlu0 %4381 }
 0x56c   : > { %v13554_v7 = vpop.permute.xlu1 %4377 }
 0x56d   : > { %4907 = vmatpush.msra.mxu0 %v9909_v45 }
 0x56e   : > { %9743 = vmatmul.msk.f32.gmra.mxu3 %vm3551_vm7, %v3524_v56 }
 0x56f   : > { %9819 = vmatmul.msk.f32.gmra.mxu1 %vm3551_vm7, %v3524_v56  ;;  %v13581_v56 = vpop.f32.mrf.mxu0 }
 0x570   : > { %17672 = vst [vmem:[#allocation9_spill] sm:$0xff] %v13581_v56 }
 0x571   : > { %v13566_v2 = vpop.f32.mrf.mxu3  ;;  %v13595_v3 = vpop.permute.xlu2 %4391 }
 0x572   : > { %17670 = vst [vmem:[#allocation37_spill] sm:$0xff] %v13566_v2  ;;  %v17674_v2 = vld [vmem:[#allocation3_spill] sm:$0xff] }
 0x573   : > { %v3494_v24 = vsel %vm513_vm0, %v13094_v9, %v17674_v2  ;;  %v13590_v62 = vpop.permute.xlu0 %4387  ;;  %17675 = vst [vmem:[#allocation32_spill] sm:$0xff] %v13595_v3 }
 0x574   : > { %v13577_v58 = vpop.permute.xlu1 %4383  ;;  %v3526_v15 = vsel %vm3065_vm6, %v3494_v24, %v13217_v21  ;;  %v17678_v21 = vld [vmem:[#allocation42_spill] sm:$0xff] }
 0x575   : > { %v3495_v24 = vsel %vm513_vm0, %v13121_v43, %v17678_v21  ;;  %v4209_v43 = vld [vmem:[#allocation2 + $0x47] sm:$0xff] }
 0x576   : > { %9744 = vmatmul.msk.f32.gmra.mxu3 %vm3551_vm7, %v3525_v55  ;;  %v3527_v2 = vsel %vm3065_vm6, %v3495_v24, %v13307_v23  ;;  %v4561_v23 = vsel %vm513_vm0, %v4209_v43, %v13370_v34  ;;  %v17684_v43 = vld [vmem:[#allocation36_spill] sm:$0xff] }
 0x577   : > { %9820 = vmatmul.msk.f32.gmra.mxu1 %vm3551_vm7, %v3525_v55  ;;  %v9867_v55 = vld [vmem:[%s17400_s4 + $0xd0] sm:$0xff]  ;;  %v13603_v9 = vpop.f32.mrf.mxu0 }
 0x578   : > { %4747 = vmatpush.msra.mxu3 %v9867_v55  ;;  %17677 = vst [vmem:[#allocation30_spill] sm:$0xff] %v13603_v9  ;;  %v17681_v9 = vld [vmem:[#allocation35_spill] sm:$0xff] }
 0x579   : > { %v13583_v45 = vpop.f32.mrf.mxu3  ;;  %v13616_v55 = vpop.permute.xlu2 %4397  ;;  %v3496_v3 = vsel %vm513_vm0, %v13146_v12, %v17681_v9 }
 0x57a   : > { %17673 = vst [vmem:[#allocation6_spill] sm:$0xff] %v13583_v45  ;;  %v3528_v24 = vsel %vm3065_vm6, %v3496_v3, %v13334_v1  ;;  %v13636_v12 = vpop.f32.mrf.mxu1  ;;  %v3497_v1 = vsel %vm513_vm0, %v13171_v4, %v17684_v43  ;;  %v17686_v43 = vld [vmem:[#allocation23_spill] sm:$0xff] }
 0x57b   : > { %v3529_v3 = vsel %vm3065_vm6, %v3497_v1, %v13251_v25  ;;  %v3498_v1 = vsel %vm513_vm0, %v13202_v50, %v17686_v43 }
 0x57c   : > { %v13592_v47 = vpop.permute.xlu1 %4389 }
 0x57e   : > { %9745 = vmatmul.msk.f32.gmra.mxu3 %vm3551_vm7, %v3526_v15 }
 0x57f   : > { %9821 = vmatmul.msk.f32.gmra.mxu1 %vm3551_vm7, %v3526_v15  ;;  %v13613_v15 = vpop.permute.xlu0 %4393  ;;  %v13623_v21 = vpop.f32.mrf.mxu0 }
 0x580   : > { %17682 = vst [vmem:[#allocation14_spill] sm:$0xff] %v13623_v21 }
 0x581   : > { %v13601_v56 = vpop.f32.mrf.mxu3  ;;  %v4468_v34 = vpop.permute.xlu2 %4467 }
 0x582   : > { %17676 = vst [vmem:[#allocation38_spill] sm:$0xff] %v13601_v56  ;;  %v13663_v25 = vpop.f32.mrf.mxu1 }
 0x584   : > { %v13610_v45 = vpop.permute.xlu1 %4395 }
 0x585   : > { %17679 = vst [vmem:[#allocation5_spill] sm:$0xff] %v13610_v45 }
 0x586   : > { %9746 = vmatmul.msk.f32.gmra.mxu3 %vm3551_vm7, %v3527_v2 }
 0x587   : > { %9822 = vmatmul.msk.f32.gmra.mxu1 %vm3551_vm7, %v3527_v2  ;;  %v13638_v9 = vpop.permute.xlu0 %4399 }
 0x589   : > { %v13618_v56 = vpop.f32.mrf.mxu3 }
 0x58a   : > { %17680 = vst [vmem:[#allocation34_spill] sm:$0xff] %v13618_v56  ;;  %v13652_v56 = vpop.f32.mrf.mxu0 }
 0x58b   : > { %17685 = vst [vmem:[#allocation3_spill] sm:$0xff] %v13652_v56  ;;  %v17688_v56 = vld [vmem:[#allocation22_spill] sm:$0xff] }
 0x58c   : > { %v4466_v45 = vpop.permute.xlu1 %4465 }
 0x58d   : > { %v13630_v2 = vsel %vm3065_vm6, %v4561_v23, %v4466_v45  ;;  %v4210_v45 = vld [vmem:[#allocation2 + $0x4f] sm:$0xff] }
 0x58e   : > { %9747 = vmatmul.msk.f32.gmra.mxu3 %vm3551_vm7, %v3528_v24  ;;  %9921 = vmatmul.msk.f32.vlgmr.msra.gmra.mxu0 %vm3551_vm7, %v13630_v2  ;;  %v4562_v23 = vsel %vm513_vm0, %v4210_v45, %v13407_v29  ;;  %v4211_v45 = vld [vmem:[#allocation2 + $0x67] sm:$0xff] }
 0x58f   : > { %9823 = vmatmul.msk.f32.gmra.mxu1 %vm3551_vm7, %v3528_v24  ;;  %v9866_v24 = vld [vmem:[%s17400_s4 + $0xc8] sm:$0xff]  ;;  %v4470_v29 = vpop.permute.xlu0 %4469 }
 0x590   : > { %4748 = vmatpush.msra.mxu3 %v9866_v24 }
 0x591   : > { %v13640_v21 = vpop.f32.mrf.mxu3 }
 0x592   : > { %17683 = vst [vmem:[#allocation8_spill] sm:$0xff] %v13640_v21  ;;  %v13655_v21 = vsel %vm3065_vm6, %v4562_v23, %v4468_v34  ;;  %v3530_v34 = vsel %vm3065_vm6, %v3498_v1, %v13332_v27  ;;  %v13679_v24 = vpop.f32.mrf.mxu0  ;;  %v3499_v27 = vsel %vm513_vm0, %v13233_v16, %v17688_v56 }
 0x593   : > { %17687 = vst [vmem:[#allocation42_spill] sm:$0xff] %v13679_v24  ;;  %v3531_v1 = vsel %vm3065_vm6, %v3499_v27, %v13364_v28  ;;  %v9865_v28 = vld [vmem:[%s17400_s4 + $0xc0] sm:$0xff] }
 0x594   : > { %v4472_v43 = vpop.permute.xlu1 %4471  ;;  %4749 = vmatpush.msra.mxu3 %v9865_v28  ;;  %v4213_v27 = vld [vmem:[#allocation2 + $0x87] sm:$0xff] }
 0x596   : > { %9748 = vmatmul.msk.f32.gmra.mxu3 %vm3551_vm7, %v3529_v3  ;;  %9922 = vmatmul.msk.f32.gmra.mxu0 %vm3551_vm7, %v13655_v21 }
 0x597   : > { %9824 = vmatmul.msk.f32.gmra.mxu1 %vm3551_vm7, %v3529_v3  ;;  %v4563_v3 = vsel %vm513_vm0, %v4211_v45, %v13430_v53  ;;  %v4212_v53 = vld [vmem:[#allocation2 + $0x6f] sm:$0xff]  ;;  %v13690_v45 = vpop.f32.mrf.mxu1  ;;  %v4476_v28 = vpop.permute.xlu0 %4475 }
 0x598   : > { %v13673_v23 = vsel %vm3065_vm6, %v4563_v3, %v4470_v29  ;;  %v4564_v29 = vsel %vm513_vm0, %v4212_v53, %v13396_v8  ;;  %v4474_v8 = vpop.permute.xlu2 %4473  ;;  %v17690_v3 = vld [vmem:[#allocation20_spill] sm:$0xff] }
 0x599   : > { %v13661_v4 = vpop.f32.mrf.mxu3 }
 0x59a   : > { %v13701_v56 = vpop.f32.mrf.mxu0 }
 0x59b   : > { %17689 = vst [vmem:[#allocation35_spill] sm:$0xff] %v13701_v56 }
 0x59e   : > { %9749 = vmatmul.msk.f32.gmra.mxu3 %vm3551_vm7, %v3530_v34  ;;  %9923 = vmatmul.msk.f32.gmra.mxu0 %vm3551_vm7, %v13673_v23 }
 0x59f   : > { %9825 = vmatmul.msk.f32.gmra.mxu1 %vm3551_vm7, %v3530_v34  ;;  %v13693_v34 = vsel %vm3065_vm6, %v4564_v29, %v4472_v43  ;;  %v3500_v43 = vsel %vm513_vm0, %v13263_v48, %v17690_v3  ;;  %v4565_v29 = vsel %vm513_vm0, %v4213_v27, %v13428_v0  ;;  %v13717_v56 = vpop.f32.mrf.mxu1  ;;  %v4214_v0 = vld [vmem:[#allocation2 + $0x8f] sm:$0xff] }
 0x5a0   : > { %v3532_v53 = vsel %vm3065_vm6, %v3500_v43, %v13286_v37  ;;  %v3501_v37 = vsel %vm513_vm0, %v13292_v46, %v13081_v49  ;;  %v4566_v43 = vsel %vm513_vm0, %v4214_v0, %v13449_v39  ;;  %v4215_v39 = vld [vmem:[#allocation2 + $0xa7] sm:$0xff] }
 0x5a1   : > { %v13681_v50 = vpop.f32.mrf.mxu3  ;;  %v13734_v27 = vsel %vm3065_vm6, %v4566_v43, %v4476_v28  ;;  %v4567_v28 = vsel %vm513_vm0, %v4215_v39, %v13418_v31  ;;  %v4480_v43 = vpop.permute.xlu2 %4479  ;;  %v4216_v31 = vld [vmem:[#allocation2 + $0xaf] sm:$0xff] }
 0x5a2   : > { %v13727_v3 = vpop.f32.mrf.mxu0 }
 0x5a3   : > { %17691 = vst [vmem:[#allocation36_spill] sm:$0xff] %v13727_v3 }
 0x5a6   : > { %9750 = vmatmul.msk.f32.gmra.mxu3 %vm3551_vm7, %v3531_v1  ;;  %9924 = vmatmul.msk.f32.gmra.mxu0 %vm3551_vm7, %v13693_v34 }
 0x5a7   : > { %9826 = vmatmul.msk.f32.gmra.mxu1 %vm3551_vm7, %v3531_v1  ;;  %v13714_v1 = vsel %vm3065_vm6, %v4565_v29, %v4474_v8  ;;  %v3533_v8 = vsel %vm3065_vm6, %v3501_v37, %v13362_v14  ;;  %v13740_v49 = vpop.f32.mrf.mxu1  ;;  %v17692_v29 = vld [vmem:[#allocation40_spill] sm:$0xff] }
 0x5a8   : > { %v3502_v14 = vsel %vm513_vm0, %v13322_v22, %v17692_v29 }
 0x5a9   : > { %v13699_v16 = vpop.f32.mrf.mxu3  ;;  %v3534_v37 = vsel %vm3065_vm6, %v3502_v14, %v13391_v20  ;;  %v3503_v20 = vsel %vm513_vm0, %v13354_v35, %v13079_v42  ;;  %v4568_v14 = vsel %vm513_vm0, %v4216_v31, %v13447_v54  ;;  %v13782_v35 = vld [vmem:[#allocation2 + $0x207] sm:$0xff] }
 0x5aa   : > { %v13751_v0 = vpop.f32.mrf.mxu0  ;;  %v13772_v39 = vsel %vm3065_vm6, %v4568_v14, %v4480_v43  ;;  %v4217_v43 = vld [vmem:[#allocation2 + $0xc7] sm:$0xff] }
 0x5ab   : > { %17693 = vst [vmem:[#allocation23_spill] sm:$0xff] %v13751_v0  ;;  %v4569_v31 = vsel %vm513_vm0, %v4217_v43, %v13465_v33  ;;  %v17697_v0 = vld [vmem:[#allocation43_spill] sm:$0xff]  ;;  %v4218_v43 = vld [vmem:[#allocation2 + $0xcf] sm:$0xff] }
 0x5ae   : > { %9751 = vmatmul.msk.f32.gmra.mxu3 %vm3551_vm7, %v3532_v53  ;;  %9925 = vmatmul.msk.f32.gmra.mxu0 %vm3551_vm7, %v13714_v1 }
 0x5af   : > { %9827 = vmatmul.msk.f32.gmra.mxu1 %vm3551_vm7, %v3532_v53  ;;  %v4478_v53 = vpop.permute.xlu1 %4477  ;;  %v13762_v29 = vpop.f32.mrf.mxu1 }
 0x5b1   : > { %v13722_v48 = vpop.f32.mrf.mxu3 }
 0x5b6   : > { %9752 = vmatmul.msk.f32.gmra.mxu3 %vm3551_vm7, %v3533_v8  ;;  %9926 = vmatmul.msk.f32.gmra.mxu0 %vm3551_vm7, %v13734_v27 }
 0x5b7   : > { %9828 = vmatmul.msk.f32.gmra.mxu1 %vm3551_vm7, %v3533_v8  ;;  %v13754_v8 = vsel %vm3065_vm6, %v4567_v28, %v4478_v53  ;;  %v3535_v53 = vsel %vm3065_vm6, %v3503_v20, %v13324_v18  ;;  %v13778_v28 = vpop.f32.mrf.mxu0  ;;  %v4482_v18 = vpop.permute.xlu0 %4481 }
 0x5b8   : > { %17694 = vst [vmem:[#allocation22_spill] sm:$0xff] %v13778_v28  ;;  %v13794_v14 = vsel %vm3065_vm6, %v4569_v31, %v4482_v18  ;;  %v4570_v18 = vsel %vm513_vm0, %v4218_v43, %v13442_v32 }
 0x5b9   : > { %v13742_v46 = vpop.f32.mrf.mxu3 }
 0x5be   : > { %9753 = vmatmul.msk.f32.gmra.mxu3 %vm3551_vm7, %v3534_v37  ;;  %9927 = vmatmul.msk.f32.gmra.mxu0 %vm3551_vm7, %v13754_v8 }
 0x5bf   : > { %9829 = vmatmul.msk.f32.gmra.mxu1 %vm3551_vm7, %v3534_v37  ;;  %v17695_v37 = vld [vmem:[#allocation28_spill] sm:$0xff]  ;;  %v13802_v28 = vpop.f32.mrf.mxu0  ;;  %v4488_v43 = vpop.permute.xlu0 %4487 }
 0x5c0   : > { %v3504_v54 = vsel %vm513_vm0, %v13782_v35, %v17695_v37  ;;  %17696 = vst [vmem:[#allocation20_spill] sm:$0xff] %v13802_v28  ;;  %v4219_v28 = vld [vmem:[#allocation2 + $0xe7] sm:$0xff] }
 0x5c1   : > { %v13760_v22 = vpop.f32.mrf.mxu3  ;;  %v3536_v20 = vsel %vm3065_vm6, %v3504_v54, %v13389_v51  ;;  %v3153_v51 = vld [vmem:[#allocation2 + $0x20f] sm:$0xff]  ;;  %v4484_v54 = vpop.permute.xlu1 %4483 }
 0x5c2   : > { %v3505_v33 = vsel %vm513_vm0, %v3153_v51, %v17697_v0  ;;  %v4486_v51 = vpop.permute.xlu2 %4485 }
 0x5c3   : > { %v3537_v31 = vsel %vm3065_vm6, %v3505_v33, %v13409_v30  ;;  %v4571_v30 = vsel %vm513_vm0, %v4219_v28, %v13463_v6 }
 0x5c6   : > { %9754 = vmatmul.msk.f32.gmra.mxu3 %vm3551_vm7, %v3535_v53  ;;  %9928 = vmatmul.msk.f32.gmra.mxu0 %vm3551_vm7, %v13772_v39 }
 0x5c7   : > { %9830 = vmatmul.msk.f32.gmra.mxu1 %vm3551_vm7, %v3535_v53  ;;  %v13791_v53 = vpop.f32.mrf.mxu1  ;;  %v13821_v32 = vpop.f32.mrf.mxu0 }
 0x5c8   : > { %17698 = vst [vmem:[#allocation40_spill] sm:$0xff] %v13821_v32 }
 0x5c9   : > { %v13780_v42 = vpop.f32.mrf.mxu3  ;;  %v4490_v28 = vpop.permute.xlu1 %4489 }
 0x5ce   : > { %9755 = vmatmul.msk.f32.gmra.mxu3 %vm3551_vm7, %v3536_v20  ;;  %9929 = vmatmul.msk.f32.gmra.mxu0 %vm3551_vm7, %v13794_v14 }
 0x5cf   : > { %9831 = vmatmul.msk.f32.gmra.mxu1 %vm3551_vm7, %v3536_v20  ;;  %v13811_v20 = vsel %vm3065_vm6, %v4570_v18, %v4484_v54  ;;  %v13814_v3 = vpop.f32.mrf.mxu1  ;;  %v13826_v54 = vsel %vm3065_vm6, %v4571_v30, %v4486_v51  ;;  %v4220_v18 = vld [vmem:[#allocation2 + $0xef] sm:$0xff]  ;;  %v13836_v32 = vpop.f32.mrf.mxu0  ;;  %v4221_v51 = vld [vmem:[#allocation2 + $0x107] sm:$0xff] }
 0x5d0   : > { %17699 = vst [vmem:[#allocation28_spill] sm:$0xff] %v13836_v32  ;;  %v4573_v30 = vsel %vm513_vm0, %v4221_v51, %v13469_v17  ;;  %v4494_v51 = vpop.permute.xlu0 %4493 }
 0x5d1   : > { %v13800_v37 = vpop.f32.mrf.mxu3 }
 0x5d6   : > { %9756 = vmatmul.msk.f32.gmra.mxu3 %vm3551_vm7, %v3537_v31  ;;  %9930 = vmatmul.msk.f32.gmra.mxu0 %vm3551_vm7, %v13811_v20 }
 0x5d7   : > { %9832 = vmatmul.msk.f32.gmra.mxu1 %vm3551_vm7, %v3537_v31  ;;  %v4572_v31 = vsel %vm513_vm0, %v4220_v18, %v13484_v11  ;;  %v13850_v11 = vsel %vm3065_vm6, %v4573_v30, %v4490_v28  ;;  %v4492_v18 = vpop.permute.xlu2 %4491  ;;  %v4223_v30 = vld [vmem:[#allocation2 + $0x127] sm:$0xff] }
 0x5d8   : > { %v13839_v6 = vsel %vm3065_vm6, %v4572_v31, %v4488_v43  ;;  %v4222_v31 = vld [vmem:[#allocation2 + $0x10f] sm:$0xff] }
 0x5d9   : > { %v13819_v0 = vpop.f32.mrf.mxu3  ;;  %v4574_v32 = vsel %vm513_vm0, %v4222_v31, %v13488_v38 }
 0x5da   : > { %v13863_v17 = vsel %vm3065_vm6, %v4574_v32, %v4492_v18  ;;  %v4496_v32 = vpop.permute.xlu1 %4495  ;;  %v4224_v18 = vld [vmem:[#allocation2 + $0x12f] sm:$0xff] }
 0x5de   : > { %9877 = vmatmul.msk.f32.vlgmr.msra.gmra.mxu3 %vm3551_vm7, %v13630_v2  ;;  %9931 = vmatmul.msk.f32.gmra.mxu0 %vm3551_vm7, %v13826_v54 }
 0x5e1   : > { %v13832_v33 = vpop.f32.mrf.mxu3 }
 0x5e6   : > { %9878 = vmatmul.msk.f32.gmra.mxu3 %vm3551_vm7, %v13655_v21  ;;  %9932 = vmatmul.msk.f32.gmra.mxu0 %vm3551_vm7, %v13839_v6  ;;  %v13856_v21 = vpop.f32.mrf.mxu0 }
 0x5e7   : > { %17700 = vst [vmem:[#allocation43_spill] sm:$0xff] %v13856_v21  ;;  %v4575_v21 = vsel %vm513_vm0, %v4223_v30, %v13508_v52  ;;  %v4498_v30 = vpop.permute.xlu2 %4497 }
 0x5e8   : > { %v13876_v38 = vsel %vm3065_vm6, %v4575_v21, %v4494_v51  ;;  %v17703_v21 = vld [vmem:[#allocation13_spill] sm:$0xff] }
 0x5e9   : > { %v13845_v2 = vpop.f32.mrf.mxu3  ;;  %v4114_v51 = vadd.f32 %v17703_v21, %v13636_v12  ;;  %v4117_v21 = vadd.f32 %v13148_v13, %v13663_v25  ;;  %v4120_v25 = vadd.f32 %v13187_v26, %v13690_v45 }
 0x5ee   : > { %9879 = vmatmul.msk.f32.gmra.mxu3 %vm3551_vm7, %v13673_v23  ;;  %9933 = vmatmul.msk.f32.gmra.mxu0 %vm3551_vm7, %v13850_v11  ;;  %v13871_v28 = vpop.f32.mrf.mxu0 }
 0x5ef   : > { %17701 = vst [vmem:[#allocation44_spill] sm:$0xff] %v13871_v28  ;;  %v4576_v28 = vsel %vm513_vm0, %v4224_v18, %v13494_v36  ;;  %v4225_v36 = vld [vmem:[#allocation2 + $0x147] sm:$0xff]  ;;  %v4504_v45 = vpop.permute.xlu2 %4503 }
 0x5f0   : > { %v13889_v52 = vsel %vm3065_vm6, %v4576_v28, %v4496_v32  ;;  %v4577_v32 = vsel %vm513_vm0, %v4225_v36, %v13511_v61 }
 0x5f1   : > { %v13858_v43 = vpop.f32.mrf.mxu3  ;;  %v13907_v18 = vsel %vm3065_vm6, %v4577_v32, %v4498_v30  ;;  %v4226_v30 = vld [vmem:[#allocation2 + $0x14f] sm:$0xff] }
 0x5f6   : > { %9880 = vmatmul.msk.f32.gmra.mxu3 %vm3551_vm7, %v13693_v34  ;;  %9934 = vmatmul.msk.f32.gmra.mxu0 %vm3551_vm7, %v13863_v17  ;;  %v13884_v31 = vpop.f32.mrf.mxu0 }
 0x5f7   : > { %17702 = vst [vmem:[#allocation45_spill] sm:$0xff] %v13884_v31  ;;  %v13902_v31 = vld [vmem:[%s17403_s7] ss:$0 sm:$0xff] }
 0x5f9   : > { %v13869_v23 = vpop.f32.mrf.mxu3 }
 0x5fe   : > { %9881 = vmatmul.msk.f32.gmra.mxu3 %vm3551_vm7, %v13714_v1  ;;  %9935 = vmatmul.msk.f32.gmra.mxu0 %vm3551_vm7, %v13876_v38 }
 0x601   : > { %v13882_v34 = vpop.f32.mrf.mxu3 }
 0x606   : > { %9882 = vmatmul.msk.f32.gmra.mxu3 %vm3551_vm7, %v13734_v27  ;;  %9936 = vmatmul.msk.f32.gmra.mxu0 %vm3551_vm7, %v13889_v52 }
 0x609   : > { %v13895_v1 = vpop.f32.mrf.mxu3 }
 0x60b   : > { %v4909_v28 = vpop.f32.mrf.mxu0 }
 0x60c   : > { %v5005_v27 = vadd.f32 %v4909_v28, %v4114_v51  ;;  %v4500_v51 = vpop.permute.xlu0 %4499 }
 0x60e   : > { %9883 = vmatmul.msk.f32.gmra.mxu3 %vm3551_vm7, %v13754_v8  ;;  %v13918_v12 = vadd.f32 %v13902_v31, %v5005_v27  ;;  %9937 = vmatmul.msk.f32.gmra.mxu0 %vm3551_vm7, %v13907_v18  ;;  %v4578_v8 = vsel %vm513_vm0, %v4226_v30, %v13531_v5  ;;  %v13946_v5 = vpop.f32.mrf.mxu1 }
 0x60f   : > { %v13932_v32 = vsel %vm3065_vm6, %v4578_v8, %v4500_v51  ;;  %v13950_v51 = vpop.f32.mrf.mxu2 }
 0x610   : > { %9430 = vst.msk [vmem:[%s13913_s30] sm:$0xff] %vm1037_vm4, %v13918_v12 }
 0x611   : > { %v13925_v61 = vpop.f32.mrf.mxu3 }
 0x612   : > { %17704 = vst [vmem:[#allocation13_spill] sm:$0xff] %v13925_v61 }
 0x613   : > { %v4912_v36 = vpop.f32.mrf.mxu0 }
 0x614   : > { %v5006_v28 = vadd.f32 %v4912_v36, %v4117_v21  ;;  %v4502_v21 = vpop.permute.xlu1 %4501 }
 0x616   : > { %9884 = vmatmul.msk.f32.gmra.mxu3 %vm3551_vm7, %v13772_v39  ;;  %v13937_v27 = vadd.f32 %v13902_v31, %v5006_v28  ;;  %9938 = vmatmul.msk.f32.gmra.mxu0 %vm3551_vm7, %v13932_v32  ;;  %v4227_v39 = vld [vmem:[#allocation2 + $0x167] sm:$0xff] }
 0x617   : > { %v4579_v36 = vsel %vm513_vm0, %v4227_v39, %v13514_v44  ;;  %v4123_v44 = vadd.f32 %v13221_v60, %v13717_v56  ;;  %v4506_v56 = vpop.permute.xlu0 %4505 }
 0x618   : > { %9431 = vst.msk [vmem:[%s13913_s30 + $0x8] sm:$0xff] %vm1037_vm4, %v13937_v27  ;;  %v13955_v28 = vsel %vm3065_vm6, %v4579_v36, %v4502_v21  ;;  %v13971_v21 = vpop.f32.mrf.mxu1  ;;  %v13975_v36 = vpop.f32.mrf.mxu2 }
 0x619   : > { %v13944_v13 = vpop.f32.mrf.mxu3 }
 0x61a   : > { %17705 = vst [vmem:[#allocation46_spill] sm:$0xff] %v13944_v13 }
 0x61b   : > { %v4915_v30 = vpop.f32.mrf.mxu0 }
 0x61c   : > { %v5007_v8 = vadd.f32 %v4915_v30, %v4120_v25  ;;  %v4228_v25 = vld [vmem:[#allocation2 + $0x16f] sm:$0xff] }
 0x61d   : > { %v4580_v39 = vsel %vm513_vm0, %v4228_v25, %v13536_v57  ;;  %v4126_v57 = vadd.f32 %v13255_v10, %v13740_v49  ;;  %v4129_v49 = vadd.f32 %v13294_v59, %v13762_v29 }
 0x61e   : > { %9885 = vmatmul.msk.f32.gmra.mxu3 %vm3551_vm7, %v13794_v14  ;;  %v13960_v13 = vadd.f32 %v13902_v31, %v5007_v8  ;;  %9939 = vmatmul.msk.f32.gmra.mxu0 %vm3551_vm7, %v13955_v28  ;;  %v13978_v8 = vsel %vm3065_vm6, %v4580_v39, %v4504_v45 }
 0x620   : > { %9432 = vst.msk [vmem:[%s13913_s30 + $0x10] sm:$0xff] %vm1037_vm4, %v13960_v13  ;;  %v14008_v10 = vpop.f32.mrf.mxu2 }
 0x621   : > { %v13967_v26 = vpop.f32.mrf.mxu3 }
 0x622   : > { %17706 = vst [vmem:[#allocation47_spill] sm:$0xff] %v13967_v26 }
 0x623   : > { %v4918_v14 = vpop.f32.mrf.mxu0 }
 0x624   : > { %v5008_v30 = vadd.f32 %v4918_v14, %v4123_v44  ;;  %v4229_v44 = vld [vmem:[#allocation2 + $0x187] sm:$0xff]  ;;  %v13996_v14 = vpop.f32.mrf.mxu1 }
 0x626   : > { %9886 = vmatmul.msk.f32.gmra.mxu3 %vm3551_vm7, %v13811_v20  ;;  %v13983_v26 = vadd.f32 %v13902_v31, %v5008_v30  ;;  %9940 = vmatmul.msk.f32.gmra.mxu0 %vm3551_vm7, %v13978_v8  ;;  %v4581_v20 = vsel %vm513_vm0, %v4229_v44, %v13554_v7 }
 0x627   : > { %v13999_v39 = vsel %vm3065_vm6, %v4581_v20, %v4506_v56  ;;  %v4230_v56 = vld [vmem:[#allocation2 + $0x18f] sm:$0xff] }
 0x628   : > { %9433 = vst.msk [vmem:[%s13913_s30 + $0x18] sm:$0xff] %vm1037_vm4, %v13983_v26  ;;  %v4582_v44 = vsel %vm513_vm0, %v4230_v56, %v13547_v41  ;;  %v14036_v29 = vpop.f32.mrf.mxu2 }
 0x629   : > { %v13990_v60 = vpop.f32.mrf.mxu3 }
 0x62a   : > { %17707 = vst [vmem:[#allocation48_spill] sm:$0xff] %v13990_v60 }
 0x62b   : > { %v4921_v45 = vpop.f32.mrf.mxu0 }
 0x62c   : > { %v5009_v25 = vadd.f32 %v4921_v45, %v4126_v57  ;;  %v4508_v57 = vpop.permute.xlu1 %4507  ;;  %v14029_v59 = vpop.f32.mrf.mxu1 }
 0x62d   : > { %v14020_v20 = vsel %vm3065_vm6, %v4582_v44, %v4508_v57  ;;  %v4231_v57 = vld [vmem:[#allocation2 + $0x1a7] sm:$0xff] }
 0x62e   : > { %9887 = vmatmul.msk.f32.gmra.mxu3 %vm3551_vm7, %v13826_v54  ;;  %v14004_v30 = vadd.f32 %v13902_v31, %v5009_v25  ;;  %9941 = vmatmul.msk.f32.gmra.mxu0 %vm3551_vm7, %v13999_v39 }
 0x630   : > { %9434 = vst.msk [vmem:[%s13913_s30 + $0x20] sm:$0xff] %vm1037_vm4, %v14004_v30 }
 0x631   : > { %v14013_v7 = vpop.f32.mrf.mxu3 }
 0x632   : > { %17708 = vst [vmem:[#allocation49_spill] sm:$0xff] %v14013_v7 }
 0x633   : > { %v4924_v54 = vpop.f32.mrf.mxu0 }
 0x634   : > { %v5010_v45 = vadd.f32 %v4924_v54, %v4129_v49  ;;  %v4132_v49 = vadd.f32 %v13340_v19, %v13791_v53  ;;  %v4583_v54 = vsel %vm513_vm0, %v4231_v57, %v13568_v63  ;;  %v14057_v63 = vpop.f32.mrf.mxu1  ;;  %v17711_v53 = vld [vmem:[#allocation25_spill] sm:$0xff]  ;;  %v14061_v57 = vpop.f32.mrf.mxu2 }
 0x636   : > { %9888 = vmatmul.msk.f32.gmra.mxu3 %vm3551_vm7, %v13839_v6  ;;  %v14025_v25 = vadd.f32 %v13902_v31, %v5010_v45  ;;  %9942 = vmatmul.msk.f32.gmra.mxu0 %vm3551_vm7, %v14020_v20  ;;  %v4510_v6 = vpop.permute.xlu2 %4509 }
 0x637   : > { %v14043_v45 = vsel %vm3065_vm6, %v4583_v54, %v4510_v6  ;;  %v4512_v6 = vpop.permute.xlu0 %4511 }
 0x638   : > { %9435 = vst.msk [vmem:[%s13913_s30 + $0x28] sm:$0xff] %vm1037_vm4, %v14025_v25 }
 0x639   : > { %v14034_v41 = vpop.f32.mrf.mxu3 }
 0x63a   : > { %17709 = vst [vmem:[#allocation50_spill] sm:$0xff] %v14034_v41 }
 0x63b   : > { %v4927_v56 = vpop.f32.mrf.mxu0 }
 0x63c   : > { %v5011_v44 = vadd.f32 %v4927_v56, %v4132_v49  ;;  %v4135_v49 = vadd.f32 %v17711_v53, %v13814_v3  ;;  %v4514_v53 = vpop.permute.xlu1 %4513 }
 0x63e   : > { %9889 = vmatmul.msk.f32.gmra.mxu3 %vm3551_vm7, %v13850_v11  ;;  %v14048_v41 = vadd.f32 %v13902_v31, %v5011_v44  ;;  %9943 = vmatmul.msk.f32.gmra.mxu0 %vm3551_vm7, %v14043_v45  ;;  %v4232_v11 = vld [vmem:[#allocation2 + $0x1af] sm:$0xff] }
 0x63f   : > { %v4584_v54 = vsel %vm513_vm0, %v4232_v11, %v13577_v58  ;;  %v4138_v58 = vadd.f32 %v13950_v51, %v13946_v5  ;;  %v4516_v51 = vpop.permute.xlu2 %4515 }
 0x640   : > { %9436 = vst.msk [vmem:[%s13913_s30 + $0x30] sm:$0xff] %vm1037_vm4, %v14048_v41  ;;  %v14066_v7 = vsel %vm3065_vm6, %v4584_v54, %v4512_v6  ;;  %v14082_v6 = vpop.f32.mrf.mxu1  ;;  %v14086_v54 = vpop.f32.mrf.mxu2 }
 0x641   : > { %v14055_v19 = vpop.f32.mrf.mxu3 }
 0x642   : > { %17710 = vst [vmem:[#allocation51_spill] sm:$0xff] %v14055_v19 }
 0x643   : > { %v4930_v56 = vpop.f32.mrf.mxu0 }
 0x644   : > { %v5012_v44 = vadd.f32 %v4930_v56, %v4135_v49  ;;  %v4233_v49 = vld [vmem:[#allocation2 + $0x1c7] sm:$0xff] }
 0x645   : > { %v4585_v11 = vsel %vm513_vm0, %v4233_v49, %v13575_v40  ;;  %v4141_v40 = vadd.f32 %v13975_v36, %v13971_v21 }
 0x646   : > { %9890 = vmatmul.msk.f32.gmra.mxu3 %vm3551_vm7, %v13863_v17  ;;  %v14071_v19 = vadd.f32 %v13902_v31, %v5012_v44  ;;  %9944 = vmatmul.msk.f32.gmra.mxu0 %vm3551_vm7, %v14066_v7  ;;  %v14089_v44 = vsel %vm3065_vm6, %v4585_v11, %v4514_v53  ;;  %v5365_v53 = vld [vmem:[#allocation2 + $0x8] sm:$0xff] }
 0x647   : > { %5461 = vrot.lane.b32.xlu0 %v5365_v53, %s10351_s20  ;;  %v4235_v53 = vld [vmem:[#allocation2 + $0x1e7] sm:$0xff] }
 0x648   : > { %9437 = vst.msk [vmem:[%s13913_s30 + $0x38] sm:$0xff] %vm1037_vm4, %v14071_v19  ;;  %v14121_v36 = vpop.f32.mrf.mxu2 }
 0x649   : > { %v14078_v3 = vpop.f32.mrf.mxu3 }
 0x64a   : > { %17712 = vst [vmem:[#allocation25_spill] sm:$0xff] %v14078_v3 }
 0x64b   : > { %v4933_v17 = vpop.f32.mrf.mxu0 }
 0x64c   : > { %v5013_v56 = vadd.f32 %v4933_v17, %v4138_v58  ;;  %v5141_v58 = vmul.f32 0.5, %v13918_v12 }
 0x64e   : > { %9891 = vmatmul.msk.f32.gmra.mxu3 %vm3551_vm7, %v13876_v38  ;;  %v14094_v3 = vadd.f32 %v13902_v31, %v5013_v56  ;;  %9945 = vmatmul.msk.f32.gmra.mxu0 %vm3551_vm7, %v14089_v44  ;;  %v4234_v38 = vld [vmem:[#allocation2 + $0x1cf] sm:$0xff]  ;;  %v5173_v21 = vmul.f32 1.442695, %v5141_v58 }
 0x64f   : > { %v4586_v17 = vsel %vm513_vm0, %v4234_v38, %v13590_v62  ;;  %v5366_v58 = vld [vmem:[#allocation2 + $0x10] sm:$0xff] }
 0x650   : > { %9438 = vst.msk [vmem:[%s13913_s30 + $0x40] sm:$0xff] %vm1037_vm4, %v14094_v3  ;;  %v14110_v56 = vsel %vm3065_vm6, %v4586_v17, %v4516_v51  ;;  %v4518_v51 = vpop.permute.xlu0 %4517  ;;  %10207 = vpow2.f32 %v5173_v21  ;;  %5463 = vrot.lane.b32.xlu1 %v5366_v58, %s10351_s20  ;;  %v5109_v58 = vld [vmem:[%s14143_s18] sm:$0xff] }
 0x651   : > { %v14101_v5 = vpop.f32.mrf.mxu3 }
 0x652   : > { %17713 = vst [vmem:[#allocation52_spill] sm:$0xff] %v14101_v5  ;;  %v14112_v5 = vpop.f32.mrf.mxu1 }
 0x653   : > { %v4936_v49 = vpop.f32.mrf.mxu0 }
 0x654   : > { %v5014_v11 = vadd.f32 %v4936_v49, %v4141_v40  ;;  %v4144_v40 = vadd.f32 %v14008_v10, %v13996_v14  ;;  %v4587_v49 = vsel %vm513_vm0, %v4235_v53, %v13592_v47  ;;  %v17715_v47 = vld [vmem:[#allocation41_spill] sm:$0xff]  ;;  %v17716_v10 = vld [vmem:[#allocation11_spill] sm:$0xff]  ;;  %v14163_v53 = vpop.f32.mrf.mxu2 }
 0x655   : > { %v3875_v21 = vadd.f32 %v17716_v10, %v17715_v47  ;;  %v5143_v47 = vmul.f32 0.5, %v13960_v13  ;;  %v4236_v10 = vld [vmem:[#allocation2 + $0x1ef] sm:$0xff] }
 0x656   : > { %9892 = vmatmul.msk.f32.gmra.mxu3 %vm3551_vm7, %v13889_v52  ;;  %v14117_v12 = vadd.f32 %v13902_v31, %v5014_v11  ;;  %9946 = vmatmul.msk.f32.gmra.mxu0 %vm3551_vm7, %v14110_v56  ;;  %v5142_v52 = vmul.f32 0.5, %v13937_v27  ;;  %v14135_v11 = vsel %vm3065_vm6, %v4587_v49, %v4518_v51  ;;  %v10208_v51 = vpop.eup %10207  ;;  %v4147_v49 = vadd.f32 %v14036_v29, %v14029_v59 }
 0x657   : > { %v5237_v60 = vmul.f32 %v10208_v51, %v5109_v58  ;;  %v5177_v61 = vmul.f32 1.442695, %v5143_v47  ;;  %v17718_v51 = vld [vmem:[#allocation33_spill] sm:$0xff]  ;;  %v17719_v58 = vld [vmem:[#allocation4_spill] sm:$0xff]  ;;  %v4522_v47 = vpop.permute.xlu2 %4521 }
 0x658   : > { %9439 = vst.msk [vmem:[%s13913_s30 + $0x48] sm:$0xff] %vm1037_vm4, %v14117_v12  ;;  %v5175_v27 = vmul.f32 1.442695, %v5142_v52 }
 0x659   : > { %v14126_v62 = vpop.f32.mrf.mxu3 }
 0x65a   : > { %17714 = vst [vmem:[#allocation53_spill] sm:$0xff] %v14126_v62  ;;  %10209 = vpow2.f32 %v5175_v27 }
 0x65b   : > { %v4939_v38 = vpop.f32.mrf.mxu0  ;;  %10211 = vpow2.f32 %v5177_v61 }
 0x65c   : > { %v5015_v17 = vadd.f32 %v4939_v38, %v4144_v40  ;;  %v14152_v40 = vpop.f32.mrf.mxu1 }
 0x65e   : > { %9893 = vmatmul.msk.f32.gmra.mxu3 %vm3551_vm7, %v13907_v18  ;;  %v14146_v14 = vadd.f32 %v13902_v31, %v5015_v17  ;;  %9947 = vmatmul.msk.f32.gmra.mxu0 %vm3551_vm7, %v14135_v11  ;;  %v14157_v18 = vld [vmem:[%s17401_s5] ss:$0 sm:$0xff]  ;;  %v4520_v17 = vpop.permute.xlu1 %4519 }
 0x660   : > { %9440 = vst.msk [vmem:[%s13913_s30 + $0x50] sm:$0xff] %vm1037_vm4, %v14146_v14 }
 0x661   : > { %v4751_v52 = vpop.f32.mrf.mxu3 }
 0x662   : > { %v4847_v38 = vadd.f32 %v4751_v52, %v3875_v21  ;;  %v17717_v52 = vld [vmem:[#allocation32_spill] sm:$0xff] }
 0x663   : > { %v4942_v21 = vpop.f32.mrf.mxu0  ;;  %v4588_v59 = vsel %vm513_vm0, %v4236_v10, %v17717_v52  ;;  %v4150_v10 = vadd.f32 %v14061_v57, %v14057_v63  ;;  %v14201_v52 = vpop.f32.mrf.mxu2 }
 0x664   : > { %v5041_v62 = vadd.f32 %v14157_v18, %v4847_v38  ;;  %v5016_v29 = vadd.f32 %v4942_v21, %v4147_v49  ;;  %v14178_v27 = vsel %vm3065_vm6, %v4588_v59, %v4520_v17  ;;  %v3878_v38 = vadd.f32 %v17719_v58, %v17718_v51  ;;  %v10210_v49 = vpop.eup %10209 }
 0x665   : > { %v5144_v21 = vmul.f32 0.5, %v13983_v26  ;;  %v4589_v51 = vsel %vm513_vm0, %v13782_v35, %v13613_v15  ;;  %v17720_v15 = vld [vmem:[#allocation37_spill] sm:$0xff]  ;;  %v17721_v35 = vld [vmem:[#allocation24_spill] sm:$0xff] }
 0x666   : > { %v5269_v13 = vadd.f32 %v5237_v60, %v5041_v62  ;;  %9398 = vst.msk [vmem:[%s14172_s26] sm:$0xff] %vm1037_vm4, %v5041_v62  ;;  %9894 = vmatmul.msk.f32.gmra.mxu3 %vm3551_vm7, %v13932_v32  ;;  %v14185_v24 = vadd.f32 %v13902_v31, %v5016_v29  ;;  %9948 = vmatmul.msk.f32.gmra.mxu0 %vm3551_vm7, %v14178_v27  ;;  %v5110_v62 = vld [vmem:[%s14143_s18 + $0x8] sm:$0xff]  ;;  %v14196_v32 = vpop.f32.mrf.mxu1 }
 0x667   : > { %v5238_v29 = vmul.f32 %v10210_v49, %v5110_v62  ;;  %v5179_v61 = vmul.f32 1.442695, %v5144_v21  ;;  %v3881_v49 = vadd.f32 %v17721_v35, %v17720_v15  ;;  %v5111_v62 = vld [vmem:[%s14143_s18 + $0x10] sm:$0xff]  ;;  %v5145_v21 = vmul.f32 0.5, %v14004_v30 }
 0x668   : > { %5301 = vst.msk [vmem:[#allocation2 + $0x28] sm:$0xff] %vm1037_vm4, %v5269_v13 }
 0x669   : > { %9441 = vst.msk [vmem:[%s13913_s30 + $0x58] sm:$0xff] %vm1037_vm4, %v14185_v24  ;;  %v4754_v60 = vpop.f32.mrf.mxu3  ;;  %10213 = vpow2.f32 %v5179_v61  ;;  %v5181_v30 = vmul.f32 1.442695, %v5145_v21 }
 0x66a   : > { %v4848_v17 = vadd.f32 %v4754_v60, %v3878_v38  ;;  %v14208_v38 = vsel %vm3065_vm6, %v4589_v51, %v4522_v47  ;;  %v10212_v60 = vpop.eup %10211  ;;  %v4153_v47 = vadd.f32 %v14086_v54, %v14082_v6 }
 0x66b   : > { %v4945_v13 = vpop.f32.mrf.mxu0  ;;  %v5239_v51 = vmul.f32 %v10212_v60, %v5111_v62  ;;  %v14235_v35 = vpop.f32.mrf.mxu2  ;;  %v17723_v60 = vld [vmem:[#allocation6_spill] sm:$0xff]  ;;  %10215 = vpow2.f32 %v5181_v30 }
 0x66c   : > { %v5042_v59 = vadd.f32 %v14157_v18, %v4848_v17  ;;  %v5017_v58 = vadd.f32 %v4945_v13, %v4150_v10  ;;  %v4524_v10 = vpop.permute.xlu0 %4523 }
 0x66e   : > { %v5270_v63 = vadd.f32 %v5238_v29, %v5042_v59  ;;  %9399 = vst.msk [vmem:[%s14172_s26 + $0x8] sm:$0xff] %vm1037_vm4, %v5042_v59  ;;  %9895 = vmatmul.msk.f32.gmra.mxu3 %vm3551_vm7, %v13955_v28  ;;  %v14215_v26 = vadd.f32 %v13902_v31, %v5017_v58  ;;  %9949 = vmatmul.msk.f32.gmra.mxu0 %vm3551_vm7, %v14208_v38  ;;  %v4238_v59 = vld [vmem:[#allocation2 + $0x20f] sm:$0xff]  ;;  %v14230_v29 = vpop.f32.mrf.mxu1 }
 0x66f   : > { %v5367_v57 = vld [vmem:[#allocation2 + $0x28] sm:$0xff] }
 0x670   : > { %5302 = vst.msk [vmem:[#allocation2 + $0x30] sm:$0xff] %vm1037_vm4, %v5270_v63  ;;  %5465 = vrot.lane.b32.xlu2 %v5367_v57, %s10351_s20  ;;  %v17722_v63 = vld [vmem:[#allocation5_spill] sm:$0xff] }
 0x671   : > { %9442 = vst.msk [vmem:[%s13913_s30 + $0x60] sm:$0xff] %vm1037_vm4, %v14215_v26  ;;  %v4757_v28 = vpop.f32.mrf.mxu3  ;;  %v4590_v57 = vsel %vm513_vm0, %v4238_v59, %v17722_v63  ;;  %v4156_v59 = vadd.f32 %v14121_v36, %v14112_v5 }
 0x672   : > { %v4849_v17 = vadd.f32 %v4757_v28, %v3881_v49  ;;  %v14238_v6 = vsel %vm3065_vm6, %v4590_v57, %v4524_v10  ;;  %v17724_v28 = vld [vmem:[#allocation19_spill] sm:$0xff] }
 0x673   : > { %v4948_v58 = vpop.f32.mrf.mxu0  ;;  %v3884_v62 = vadd.f32 %v17724_v28, %v17723_v60  ;;  %v4239_v10 = vld [vmem:[#allocation2 + $0x227] sm:$0xff]  ;;  %v14277_v30 = vpop.f32.mrf.mxu2  ;;  %v17725_v28 = vld [vmem:[#allocation38_spill] sm:$0xff] }
 0x674   : > { %v5043_v13 = vadd.f32 %v14157_v18, %v4849_v17  ;;  %v5018_v15 = vadd.f32 %v4948_v58, %v4153_v47  ;;  %v10214_v17 = vpop.eup %10213  ;;  %v5112_v47 = vld [vmem:[%s14143_s18 + $0x18] sm:$0xff] }
 0x675   : > { %v5240_v63 = vmul.f32 %v10214_v17, %v5112_v47  ;;  %v10216_v47 = vpop.eup %10215 }
 0x676   : > { %v5271_v54 = vadd.f32 %v5239_v51, %v5043_v13  ;;  %9400 = vst.msk [vmem:[%s14172_s26 + $0x10] sm:$0xff] %vm1037_vm4, %v5043_v13  ;;  %9896 = vmatmul.msk.f32.gmra.mxu3 %vm3551_vm7, %v13978_v8  ;;  %v14245_v61 = vadd.f32 %v13902_v31, %v5018_v15  ;;  %9950 = vmatmul.msk.f32.gmra.mxu0 %vm3551_vm7, %v14238_v6  ;;  %v4526_v13 = vpop.permute.xlu1 %4525  ;;  %v5146_v51 = vmul.f32 0.5, %v14025_v25  ;;  %v14266_v60 = vpop.f32.mrf.mxu1 }
 0x677   : > { %v5368_v49 = vld [vmem:[#allocation2 + $0x30] sm:$0xff]  ;;  %v4591_v15 = vsel %vm513_vm0, %v4239_v10, %v13616_v55  ;;  %v5113_v10 = vld [vmem:[%s14143_s18 + $0x20] sm:$0xff] }
 0x678   : > { %5303 = vst.msk [vmem:[#allocation2 + $0x48] sm:$0xff] %vm1037_vm4, %v5271_v54  ;;  %5467 = vrot.lane.b32.xlu0 %v5368_v49, %s10351_s20  ;;  %v14264_v49 = vsel %vm3065_vm6, %v4591_v15, %v4526_v13  ;;  %v5183_v25 = vmul.f32 1.442695, %v5146_v51  ;;  %v4159_v13 = vadd.f32 %v14163_v53, %v14152_v40  ;;  %v4528_v51 = vpop.permute.xlu2 %4527  ;;  %v17727_v53 = vld [vmem:[#allocation34_spill] sm:$0xff] }
 0x679   : > { %9443 = vst.msk [vmem:[%s13913_s30 + $0x68] sm:$0xff] %vm1037_vm4, %v14245_v61  ;;  %v4760_v8 = vpop.f32.mrf.mxu3 }
 0x67a   : > { %v4850_v21 = vadd.f32 %v4760_v8, %v3884_v62  ;;  %v17726_v62 = vld [vmem:[#allocation15_spill] sm:$0xff]  ;;  %v4240_v8 = vld [vmem:[#allocation2 + $0x22f] sm:$0xff]  ;;  %10217 = vpow2.f32 %v5183_v25 }
 0x67b   : > { %v4951_v57 = vpop.f32.mrf.mxu0  ;;  %v3887_v17 = vadd.f32 %v17726_v62, %v17725_v28  ;;  %v17728_v25 = vld [vmem:[#allocation29_spill] sm:$0xff] }
 0x67c   : > { %v5044_v58 = vadd.f32 %v14157_v18, %v4850_v21  ;;  %v5019_v54 = vadd.f32 %v4951_v57, %v4156_v59  ;;  %v4592_v59 = vsel %vm513_vm0, %v4240_v8, %v13638_v9  ;;  %v5241_v57 = vmul.f32 %v10216_v47, %v5113_v10  ;;  %v5114_v8 = vld [vmem:[%s14143_s18 + $0x28] sm:$0xff]  ;;  %v14315_v47 = vpop.f32.mrf.mxu2 }
 0x67d   : > { %v3890_v28 = vadd.f32 %v17728_v25, %v17727_v53  ;;  %v4162_v10 = vadd.f32 %v14201_v52, %v14196_v32  ;;  %v17729_v52 = vld [vmem:[#allocation8_spill] sm:$0xff]  ;;  %v4165_v25 = vadd.f32 %v14235_v35, %v14230_v29  ;;  %v17731_v35 = vld [vmem:[#allocation21_spill] sm:$0xff] }
 0x67e   : > { %v5272_v5 = vadd.f32 %v5240_v63, %v5044_v58  ;;  %9401 = vst.msk [vmem:[%s14172_s26 + $0x18] sm:$0xff] %vm1037_vm4, %v5044_v58  ;;  %9897 = vmatmul.msk.f32.gmra.mxu3 %vm3551_vm7, %v13999_v39  ;;  %v14273_v36 = vadd.f32 %v13902_v31, %v5019_v54  ;;  %9951 = vmatmul.msk.f32.gmra.mxu0 %vm3551_vm7, %v14264_v49  ;;  %v5147_v58 = vmul.f32 0.5, %v14048_v41  ;;  %v14307_v62 = vpop.f32.mrf.mxu1 }
 0x67f   : > { %v5369_v55 = vld [vmem:[#allocation2 + $0x48] sm:$0xff] }
 0x680   : > { %5304 = vst.msk [vmem:[#allocation2 + $0x50] sm:$0xff] %vm1037_vm4, %v5272_v5  ;;  %5469 = vrot.lane.b32.xlu1 %v5369_v55, %s10351_s20  ;;  %v14294_v5 = vsel %vm3065_vm6, %v4592_v59, %v4528_v51  ;;  %v5185_v9 = vmul.f32 1.442695, %v5147_v58 }
 0x681   : > { %9444 = vst.msk [vmem:[%s13913_s30 + $0x70] sm:$0xff] %vm1037_vm4, %v14273_v36  ;;  %v4763_v39 = vpop.f32.mrf.mxu3 }
 0x682   : > { %v4851_v21 = vadd.f32 %v4763_v39, %v3887_v17  ;;  %v10218_v17 = vpop.eup %10217  ;;  %10219 = vpow2.f32 %v5185_v9 }
 0x683   : > { %v4954_v15 = vpop.f32.mrf.mxu0 }
 0x684   : > { %v5045_v63 = vadd.f32 %v14157_v18, %v4851_v21  ;;  %v5020_v54 = vadd.f32 %v4954_v15, %v4159_v13  ;;  %v5148_v21 = vmul.f32 0.5, %v14071_v19  ;;  %v5242_v13 = vmul.f32 %v10218_v17, %v5114_v8  ;;  %v14341_v17 = vpop.f32.mrf.mxu2 }
 0x686   : > { %v5273_v55 = vadd.f32 %v5241_v57, %v5045_v63  ;;  %9402 = vst.msk [vmem:[%s14172_s26 + $0x20] sm:$0xff] %vm1037_vm4, %v5045_v63  ;;  %9898 = vmatmul.msk.f32.gmra.mxu3 %vm3551_vm7, %v14020_v20  ;;  %v14301_v40 = vadd.f32 %v13902_v31, %v5020_v54  ;;  %9952 = vmatmul.msk.f32.gmra.mxu0 %vm3551_vm7, %v14294_v5  ;;  %v5187_v57 = vmul.f32 1.442695, %v5148_v21  ;;  %v17730_v54 = vld [vmem:[#allocation27_spill] sm:$0xff] }
 0x687   : > { %v5370_v41 = vld [vmem:[#allocation2 + $0x50] sm:$0xff]  ;;  %v3893_v19 = vadd.f32 %v17730_v54, %v17729_v52 }
 0x688   : > { %5305 = vst.msk [vmem:[#allocation2 + $0x68] sm:$0xff] %vm1037_vm4, %v5273_v55  ;;  %5471 = vrot.lane.b32.xlu2 %v5370_v41, %s10351_s20  ;;  %v10220_v55 = vpop.eup %10219  ;;  %v5115_v41 = vld [vmem:[%s14143_s18 + $0x30] sm:$0xff]  ;;  %10221 = vpow2.f32 %v5187_v57  ;;  %v4168_v57 = vadd.f32 %v14277_v30, %v14266_v60 }
 0x689   : > { %9445 = vst.msk [vmem:[%s13913_s30 + $0x78] sm:$0xff] %vm1037_vm4, %v14301_v40  ;;  %v4766_v20 = vpop.f32.mrf.mxu3  ;;  %v5243_v8 = vmul.f32 %v10220_v55, %v5115_v41 }
 0x68a   : > { %v4852_v39 = vadd.f32 %v4766_v20, %v3890_v28  ;;  %v5149_v28 = vmul.f32 0.5, %v14094_v3 }
 0x68b   : > { %v4957_v51 = vpop.f32.mrf.mxu0 }
 0x68c   : > { %v5046_v59 = vadd.f32 %v14157_v18, %v4852_v39  ;;  %v5021_v58 = vadd.f32 %v4957_v51, %v4162_v10 }
 0x68e   : > { %v5274_v63 = vadd.f32 %v5242_v13, %v5046_v59  ;;  %9403 = vst.msk [vmem:[%s14172_s26 + $0x28] sm:$0xff] %vm1037_vm4, %v5046_v59  ;;  %9899 = vmatmul.msk.f32.gmra.mxu3 %vm3551_vm7, %v14043_v45  ;;  %v14326_v15 = vadd.f32 %v13902_v31, %v5021_v58  ;;  %v14336_v45 = vpop.f32.mrf.mxu1  ;;  %v5189_v59 = vmul.f32 1.442695, %v5149_v28  ;;  %v3896_v13 = vadd.f32 %v17731_v35, %v13661_v4  ;;  %v10222_v51 = vpop.eup %10221 }
 0x68f   : > { %v5371_v32 = vld [vmem:[#allocation2 + $0x68] sm:$0xff] }
 0x690   : > { %5306 = vst.msk [vmem:[#allocation2 + $0x70] sm:$0xff] %vm1037_vm4, %v5274_v63  ;;  %5473 = vrot.lane.b32.xlu0 %v5371_v32, %s10351_s20  ;;  %v5116_v63 = vld [vmem:[%s14143_s18 + $0x38] sm:$0xff]  ;;  %10223 = vpow2.f32 %v5189_v59  ;;  %v5150_v32 = vmul.f32 0.5, %v14117_v12 }
 0x691   : > { %9446 = vst.msk [vmem:[%s13913_s30 + $0x80] sm:$0xff] %vm1037_vm4, %v14326_v15  ;;  %v4769_v9 = vpop.f32.mrf.mxu3  ;;  %v5244_v54 = vmul.f32 %v10222_v51, %v5116_v63 }
 0x692   : > { %v4853_v53 = vadd.f32 %v4769_v9, %v3893_v19  ;;  %v4176_v9 = vpop.f32.mrf.mxu2  ;;  %v5191_v60 = vmul.f32 1.442695, %v5150_v32 }
 0x693   : > { %v4960_v39 = vpop.f32.mrf.mxu0 }
 0x694   : > { %v5047_v20 = vadd.f32 %v14157_v18, %v4853_v53  ;;  %v5022_v10 = vadd.f32 %v4960_v39, %v4165_v25  ;;  %v17732_v53 = vld [vmem:[#allocation39_spill] sm:$0xff]  ;;  %v4171_v39 = vadd.f32 %v14315_v47, %v14307_v62  ;;  %10225 = vpow2.f32 %v5191_v60 }
 0x695   : > { %v3899_v25 = vadd.f32 %v17732_v53, %v13681_v50 }
 0x696   : > { %v5275_v21 = vadd.f32 %v5243_v8, %v5047_v20  ;;  %9404 = vst.msk [vmem:[%s14172_s26 + $0x30] sm:$0xff] %vm1037_vm4, %v5047_v20  ;;  %9900 = vmatmul.msk.f32.gmra.mxu3 %vm3551_vm7, %v14066_v7  ;;  %v14349_v29 = vadd.f32 %v13902_v31, %v5022_v10  ;;  %v14362_v52 = vpop.f32.mrf.mxu1  ;;  %v10224_v28 = vpop.eup %10223  ;;  %v5117_v8 = vld [vmem:[%s14143_s18 + $0x40] sm:$0xff]  ;;  %v5151_v10 = vmul.f32 0.5, %v14146_v14 }
 0x697   : > { %v5372_v3 = vld [vmem:[#allocation2 + $0x70] sm:$0xff] }
 0x698   : > { %5307 = vst.msk [vmem:[#allocation2 + $0x88] sm:$0xff] %vm1037_vm4, %v5275_v21  ;;  %5475 = vrot.lane.b32.xlu1 %v5372_v3, %s10351_s20  ;;  %v5245_v21 = vmul.f32 %v10224_v28, %v5117_v8  ;;  %v5193_v51 = vmul.f32 1.442695, %v5151_v10 }
 0x699   : > { %9447 = vst.msk [vmem:[%s13913_s30 + $0x88] sm:$0xff] %vm1037_vm4, %v14349_v29  ;;  %v4772_v58 = vpop.f32.mrf.mxu3 }
 0x69a   : > { %v4854_v7 = vadd.f32 %v4772_v58, %v3896_v13  ;;  %v4179_v14 = vpop.f32.mrf.mxu2  ;;  %v17733_v58 = vld [vmem:[#allocation18_spill] sm:$0xff]  ;;  %10227 = vpow2.f32 %v5193_v51 }
 0x69b   : > { %v4963_v19 = vpop.f32.mrf.mxu0  ;;  %v3902_v63 = vadd.f32 %v17733_v58, %v13699_v16 }
 0x69c   : > { %v5048_v4 = vadd.f32 %v14157_v18, %v4854_v7  ;;  %v5023_v55 = vadd.f32 %v4963_v19, %v4168_v57  ;;  %v10226_v7 = vpop.eup %10225 }
 0x69e   : > { %v5276_v41 = vadd.f32 %v5244_v54, %v5048_v4  ;;  %9405 = vst.msk [vmem:[%s14172_s26 + $0x38] sm:$0xff] %vm1037_vm4, %v5048_v4  ;;  %9901 = vmatmul.msk.f32.gmra.mxu3 %vm3551_vm7, %v14089_v44  ;;  %v14370_v30 = vadd.f32 %v13902_v31, %v5023_v55  ;;  %v4066_v35 = vpop.f32.mrf.mxu1  ;;  %v4174_v4 = vadd.f32 %v14341_v17, %v14336_v45  ;;  %v5152_v54 = vmul.f32 0.5, %v14185_v24  ;;  %v17734_v24 = vld [vmem:[#allocation31_spill] sm:$0xff] }
 0x69f   : > { %v5373_v12 = vld [vmem:[#allocation2 + $0x88] sm:$0xff]  ;;  %v3905_v17 = vadd.f32 %v17734_v24, %v13722_v48  ;;  %v5153_v48 = vmul.f32 0.5, %v14215_v26 }
 0x6a0   : > { %5308 = vst.msk [vmem:[#allocation2 + $0x90] sm:$0xff] %vm1037_vm4, %v5276_v41  ;;  %5477 = vrot.lane.b32.xlu2 %v5373_v12, %s10351_s20  ;;  %v5195_v12 = vmul.f32 1.442695, %v5152_v54  ;;  %v10228_v28 = vpop.eup %10227 }
 0x6a1   : > { %9448 = vst.msk [vmem:[%s13913_s30 + $0x90] sm:$0xff] %vm1037_vm4, %v14370_v30  ;;  %v4775_v20 = vpop.f32.mrf.mxu3 }
 0x6a2   : > { %v4855_v44 = vadd.f32 %v4775_v20, %v3899_v25  ;;  %v4182_v8 = vpop.f32.mrf.mxu2  ;;  %10229 = vpow2.f32 %v5195_v12  ;;  %v5121_v12 = vld [vmem:[%s14143_s18 + $0x60] sm:$0xff] }
 0x6a3   : > { %v4966_v59 = vpop.f32.mrf.mxu0 }
 0x6a4   : > { %v5049_v50 = vadd.f32 %v14157_v18, %v4855_v44  ;;  %v5024_v3 = vadd.f32 %v4966_v59, %v4171_v39  ;;  %v4177_v39 = vadd.f32 %v4176_v9, %v14362_v52  ;;  %v17735_v9 = vld [vmem:[#allocation17_spill] sm:$0xff] }
 0x6a5   : > { %v3908_v26 = vadd.f32 %v17735_v9, %v13742_v46 }
 0x6a6   : > { %v5277_v13 = vadd.f32 %v5245_v21, %v5049_v50  ;;  %9406 = vst.msk [vmem:[%s14172_s26 + $0x40] sm:$0xff] %vm1037_vm4, %v5049_v50  ;;  %9902 = vmatmul.msk.f32.gmra.mxu3 %vm3551_vm7, %v14110_v56  ;;  %v14389_v62 = vadd.f32 %v13902_v31, %v5024_v3  ;;  %v5118_v56 = vld [vmem:[%s14143_s18 + $0x48] sm:$0xff]  ;;  %v4069_v25 = vpop.f32.mrf.mxu1 }
 0x6a7   : > { %v5374_v47 = vld [vmem:[#allocation2 + $0x90] sm:$0xff]  ;;  %v5246_v19 = vmul.f32 %v10226_v7, %v5118_v56  ;;  %v5154_v56 = vmul.f32 0.5, %v14245_v61  ;;  %v17736_v61 = vld [vmem:[#allocation7_spill] sm:$0xff]  ;;  %v4183_v24 = vadd.f32 %v4182_v8, %v4069_v25  ;;  %v17737_v8 = vld [vmem:[#allocation26_spill] sm:$0xff] }
 0x6a8   : > { %5309 = vst.msk [vmem:[#allocation2 + $0xa8] sm:$0xff] %vm1037_vm4, %v5277_v13  ;;  %5479 = vrot.lane.b32.xlu0 %v5374_v47, %s10351_s20  ;;  %v5197_v13 = vmul.f32 1.442695, %v5153_v48  ;;  %v10230_v47 = vpop.eup %10229 }
 0x6a9   : > { %9449 = vst.msk [vmem:[%s13913_s30 + $0x98] sm:$0xff] %vm1037_vm4, %v14389_v62  ;;  %v4778_v57 = vpop.f32.mrf.mxu3 }
 0x6aa   : > { %v4856_v32 = vadd.f32 %v4778_v57, %v3902_v63  ;;  %v5120_v63 = vld [vmem:[%s14143_s18 + $0x58] sm:$0xff]  ;;  %v4180_v57 = vadd.f32 %v4179_v14, %v4066_v35  ;;  %10231 = vpow2.f32 %v5197_v13 }
 0x6ab   : > { %v4969_v55 = vpop.f32.mrf.mxu0 }
 0x6ac   : > { %v5050_v16 = vadd.f32 %v14157_v18, %v4856_v32  ;;  %v5025_v41 = vadd.f32 %v4969_v55, %v4174_v4  ;;  %v4185_v32 = vpop.f32.mrf.mxu2  ;;  %v5248_v4 = vmul.f32 %v10230_v47, %v5120_v63  ;;  %v5199_v55 = vmul.f32 1.442695, %v5154_v56  ;;  %v17738_v56 = vld [vmem:[#allocation10_spill] sm:$0xff] }
 0x6ae   : > { %v5278_v60 = vadd.f32 %v5246_v19, %v5050_v16  ;;  %9407 = vst.msk [vmem:[%s14172_s26 + $0x48] sm:$0xff] %vm1037_vm4, %v5050_v16  ;;  %9903 = vmatmul.msk.f32.gmra.mxu3 %vm3551_vm7, %v14135_v11  ;;  %v14408_v53 = vadd.f32 %v13902_v31, %v5025_v41  ;;  %v5119_v11 = vld [vmem:[%s14143_s18 + $0x50] sm:$0xff]  ;;  %v3911_v41 = vadd.f32 %v17736_v61, %v13760_v22  ;;  %10233 = vpow2.f32 %v5199_v55 }
 0x6af   : > { %v5375_v45 = vld [vmem:[#allocation2 + $0xa8] sm:$0xff]  ;;  %v5247_v50 = vmul.f32 %v10228_v28, %v5119_v11 }
 0x6b0   : > { %5310 = vst.msk [vmem:[#allocation2 + $0xb0] sm:$0xff] %vm1037_vm4, %v5278_v60  ;;  %5481 = vrot.lane.b32.xlu1 %v5375_v45, %s10351_s20  ;;  %v10232_v60 = vpop.eup %10231 }
 0x6b1   : > { %9450 = vst.msk [vmem:[%s13913_s30 + $0xa0] sm:$0xff] %vm1037_vm4, %v14408_v53  ;;  %v4781_v20 = vpop.f32.mrf.mxu3 }
 0x6b2   : > { %v4857_v44 = vadd.f32 %v4781_v20, %v3905_v17  ;;  %v5155_v17 = vmul.f32 0.5, %v14273_v36  ;;  %v5249_v20 = vmul.f32 %v10232_v60, %v5121_v12 }
 0x6b3   : > { %v4972_v21 = vpop.f32.mrf.mxu0 }
 0x6b4   : > { %v5051_v10 = vadd.f32 %v14157_v18, %v4857_v44  ;;  %v5026_v59 = vadd.f32 %v4972_v21, %v4177_v39  ;;  %v4188_v39 = vpop.f32.mrf.mxu2  ;;  %v10234_v21 = vpop.eup %10233 }
 0x6b6   : > { %v5279_v3 = vadd.f32 %v5247_v50, %v5051_v10  ;;  %9408 = vst.msk [vmem:[%s14172_s26 + $0x50] sm:$0xff] %vm1037_vm4, %v5051_v10  ;;  %9904 = vmatmul.msk.f32.gmra.mxu3 %vm3551_vm7, %v14178_v27  ;;  %v14426_v51 = vadd.f32 %v13902_v31, %v5026_v59  ;;  %v4072_v27 = vpop.f32.mrf.mxu1  ;;  %v5201_v10 = vmul.f32 1.442695, %v5155_v17  ;;  %v3914_v50 = vadd.f32 %v17737_v8, %v13780_v42  ;;  %v5122_v59 = vld [vmem:[%s14143_s18 + $0x68] sm:$0xff] }
 0x6b7   : > { %v5376_v52 = vld [vmem:[#allocation2 + $0xb0] sm:$0xff]  ;;  %v4186_v13 = vadd.f32 %v4185_v32, %v4072_v27  ;;  %v5250_v42 = vmul.f32 %v10234_v21, %v5122_v59  ;;  %v3917_v32 = vadd.f32 %v17738_v56, %v13800_v37 }
 0x6b8   : > { %5311 = vst.msk [vmem:[#allocation2 + $0xc8] sm:$0xff] %vm1037_vm4, %v5279_v3  ;;  %5483 = vrot.lane.b32.xlu2 %v5376_v52, %s10351_s20  ;;  %10235 = vpow2.f32 %v5201_v10  ;;  %v5156_v52 = vmul.f32 0.5, %v14301_v40 }
 0x6b9   : > { %9451 = vst.msk [vmem:[%s13913_s30 + $0xa8] sm:$0xff] %vm1037_vm4, %v14426_v51  ;;  %v4784_v58 = vpop.f32.mrf.mxu3 }
 0x6ba   : > { %v4858_v7 = vadd.f32 %v4784_v58, %v3908_v26 }
 0x6bb   : > { %v4975_v54 = vpop.f32.mrf.mxu0 }
 0x6bc   : > { %v5052_v46 = vadd.f32 %v14157_v18, %v4858_v7  ;;  %v5027_v16 = vadd.f32 %v4975_v54, %v4180_v57  ;;  %v5203_v7 = vmul.f32 1.442695, %v5156_v52  ;;  %v4191_v40 = vpop.f32.mrf.mxu2 }
 0x6be   : > { %v5280_v19 = vadd.f32 %v5248_v4, %v5052_v46  ;;  %9409 = vst.msk [vmem:[%s14172_s26 + $0x58] sm:$0xff] %vm1037_vm4, %v5052_v46  ;;  %9905 = vmatmul.msk.f32.gmra.mxu3 %vm3551_vm7, %v14208_v38  ;;  %v14443_v35 = vadd.f32 %v13902_v31, %v5027_v16  ;;  %v4075_v28 = vpop.f32.mrf.mxu1  ;;  %v10236_v46 = vpop.eup %10235  ;;  %v5123_v4 = vld [vmem:[%s14143_s18 + $0x70] sm:$0xff]  ;;  %10237 = vpow2.f32 %v5203_v7  ;;  %v5157_v16 = vmul.f32 0.5, %v14326_v15 }
 0x6bf   : > { %v14445_v14 = vld [vmem:[#allocation2 + $0xc8] sm:$0xff]  ;;  %v4189_v54 = vadd.f32 %v4188_v39, %v4075_v28  ;;  %v5251_v37 = vmul.f32 %v10236_v46, %v5123_v4 }
 0x6c0   : > { %5312 = vst.msk [vmem:[#allocation2 + $0xd0] sm:$0xff] %vm1037_vm4, %v5280_v19  ;;  %5485 = vrot.lane.b32.xlu0 %v14445_v14, %s10351_s20  ;;  %v5205_v60 = vmul.f32 1.442695, %v5157_v16 }
 0x6c1   : > { %9452 = vst.msk [vmem:[%s13913_s30 + $0xb0] sm:$0xff] %vm1037_vm4, %v14443_v35  ;;  %v4787_v38 = vpop.f32.mrf.mxu3 }
 0x6c2   : > { %v4859_v45 = vadd.f32 %v4787_v38, %v3911_v41  ;;  %v14505_v38 = vld [vmem:[%s17403_s7] ss:$0 sm:$0xff]  ;;  %10239 = vpow2.f32 %v5205_v60 }
 0x6c3   : > { %v4978_v11 = vpop.f32.mrf.mxu0 }
 0x6c4   : > { %v5053_v22 = vadd.f32 %v14157_v18, %v4859_v45  ;;  %v5028_v44 = vadd.f32 %v4978_v11, %v4183_v24  ;;  %v17739_v45 = vld [vmem:[#allocation16_spill] sm:$0xff] }
 0x6c5   : > { %v3920_v24 = vadd.f32 %v17739_v45, %v13819_v0  ;;  %v5158_v0 = vmul.f32 0.5, %v14349_v29 }
 0x6c6   : > { %v5281_v48 = vadd.f32 %v5249_v20, %v5053_v22  ;;  %9410 = vst.msk [vmem:[%s14172_s26 + $0x60] sm:$0xff] %vm1037_vm4, %v5053_v22  ;;  %9906 = vmatmul.msk.f32.gmra.mxu3 %vm3551_vm7, %v14238_v6  ;;  %v14463_v25 = vadd.f32 %v13902_v31, %v5028_v44  ;;  %v4078_v58 = vpop.f32.mrf.mxu1  ;;  %v5124_v22 = vld [vmem:[%s14143_s18 + $0x78] sm:$0xff]  ;;  %v4194_v20 = vpop.f32.mrf.mxu2 }
 0x6c7   : > { %v14465_v36 = vld [vmem:[#allocation2 + $0xd0] sm:$0xff]  ;;  %v4192_v44 = vadd.f32 %v4191_v40, %v4078_v58  ;;  %v5207_v21 = vmul.f32 1.442695, %v5158_v0  ;;  %v5159_v58 = vmul.f32 0.5, %v14370_v30 }
 0x6c8   : > { %5313 = vst.msk [vmem:[#allocation2 + $0xe8] sm:$0xff] %vm1037_vm4, %v5281_v48  ;;  %5487 = vrot.lane.b32.xlu1 %v14465_v36, %s10351_s20 }
 0x6c9   : > { %9453 = vst.msk [vmem:[%s13913_s30 + $0xb8] sm:$0xff] %vm1037_vm4, %v14463_v25  ;;  %v4790_v6 = vpop.f32.mrf.mxu3  ;;  %10241 = vpow2.f32 %v5207_v21  ;;  %v5209_v46 = vmul.f32 1.442695, %v5159_v58 }
 0x6ca   : > { %v4860_v3 = vadd.f32 %v4790_v6, %v3914_v50 }
 0x6cb   : > { %v4981_v26 = vpop.f32.mrf.mxu0  ;;  %10243 = vpow2.f32 %v5209_v46 }
 0x6cc   : > { %v5054_v9 = vadd.f32 %v14157_v18, %v4860_v3  ;;  %v5029_v47 = vadd.f32 %v4981_v26, %v4186_v13  ;;  %v17740_v3 = vld [vmem:[#allocation12_spill] sm:$0xff] }
 0x6cd   : > { %v3923_v13 = vadd.f32 %v17740_v3, %v13832_v33 }
 0x6ce   : > { %v5282_v63 = vadd.f32 %v5250_v42, %v5054_v9  ;;  %9411 = vst.msk [vmem:[%s14172_s26 + $0x68] sm:$0xff] %vm1037_vm4, %v5054_v9  ;;  %9907 = vmatmul.msk.f32.gmra.mxu3 %vm3551_vm7, %v14264_v49  ;;  %v14483_v27 = vadd.f32 %v13902_v31, %v5029_v47  ;;  %v4081_v17 = vpop.f32.mrf.mxu1  ;;  %v5125_v9 = vld [vmem:[%s14143_s18 + $0x80] sm:$0xff]  ;;  %v4197_v33 = vpop.f32.mrf.mxu2 }
 0x6cf   : > { %v14485_v57 = vld [vmem:[#allocation2 + $0xe8] sm:$0xff]  ;;  %v4195_v47 = vadd.f32 %v4194_v20, %v4081_v17 }
 0x6d0   : > { %5314 = vst.msk [vmem:[#allocation2 + $0xf0] sm:$0xff] %vm1037_vm4, %v5282_v63  ;;  %5489 = vrot.lane.b32.xlu2 %v14485_v57, %s10351_s20 }
 0x6d1   : > { %9454 = vst.msk [vmem:[%s13913_s30 + $0xc0] sm:$0xff] %vm1037_vm4, %v14483_v27  ;;  %v4793_v49 = vpop.f32.mrf.mxu3 }
 0x6d2   : > { %v4861_v31 = vadd.f32 %v4793_v49, %v3917_v32 }
 0x6d3   : > { %v4984_v55 = vpop.f32.mrf.mxu0 }
 0x6d4   : > { %v5055_v19 = vadd.f32 %v14157_v18, %v4861_v31  ;;  %v5030_v61 = vadd.f32 %v4984_v55, %v4189_v54  ;;  %v17741_v31 = vld [vmem:[#allocation9_spill] sm:$0xff] }
 0x6d5   : > { %v3926_v54 = vadd.f32 %v17741_v31, %v13845_v2 }
 0x6d6   : > { %v5283_v41 = vadd.f32 %v5251_v37, %v5055_v19  ;;  %9412 = vst.msk [vmem:[%s14172_s26 + $0x70] sm:$0xff] %vm1037_vm4, %v5055_v19  ;;  %9908 = vmatmul.msk.f32.gmra.mxu3 %vm3551_vm7, %v14294_v5  ;;  %v14508_v15 = vadd.f32 %v14505_v38, %v5030_v61  ;;  %v10238_v5 = vpop.eup %10237  ;;  %v4084_v42 = vpop.f32.mrf.mxu1  ;;  %v5126_v19 = vld [vmem:[%s14143_s18 + $0x88] sm:$0xff]  ;;  %v5160_v61 = vmul.f32 0.5, %v14389_v62  ;;  %v17742_v62 = vld [vmem:[#allocation30_spill] sm:$0xff] }
 0x6d7   : > { %v14510_v12 = vld [vmem:[#allocation2 + $0xf0] sm:$0xff]  ;;  %v5252_v48 = vmul.f32 %v10238_v5, %v5124_v22  ;;  %v10240_v29 = vpop.eup %10239  ;;  %v4198_v55 = vadd.f32 %v4197_v33, %v4084_v42  ;;  %v4200_v17 = vpop.f32.mrf.mxu2 }
 0x6d8   : > { %5315 = vst.msk [vmem:[#allocation2 + $0x108] sm:$0xff] %vm1037_vm4, %v5283_v41  ;;  %5491 = vrot.lane.b32.xlu0 %v14510_v12, %s10351_s20  ;;  %v5253_v7 = vmul.f32 %v10240_v29, %v5125_v9  ;;  %v10242_v30 = vpop.eup %10241 }
 0x6d9   : > { %9455 = vst.msk [vmem:[%s13913_s30 + $0xc8] sm:$0xff] %vm1037_vm4, %v14508_v15  ;;  %v4796_v28 = vpop.f32.mrf.mxu3  ;;  %v5254_v60 = vmul.f32 %v10242_v30, %v5126_v19 }
 0x6da   : > { %v4862_v11 = vadd.f32 %v4796_v28, %v3920_v24  ;;  %v5211_v28 = vmul.f32 1.442695, %v5160_v61 }
 0x6db   : > { %v4987_v10 = vpop.f32.mrf.mxu0 }
 0x6dc   : > { %v5056_v39 = vadd.f32 %v14157_v18, %v4862_v11  ;;  %v5031_v8 = vadd.f32 %v4987_v10, %v4192_v44  ;;  %v3929_v11 = vadd.f32 %v17742_v62, %v13858_v43  ;;  %v10244_v44 = vpop.eup %10243  ;;  %10245 = vpow2.f32 %v5211_v28 }
 0x6de   : > { %v5284_v50 = vadd.f32 %v5252_v48, %v5056_v39  ;;  %9413 = vst.msk [vmem:[%s14172_s26 + $0x78] sm:$0xff] %vm1037_vm4, %v5056_v39  ;;  %v14526_v6 = vadd.f32 %v14505_v38, %v5031_v8  ;;  %v4087_v41 = vpop.f32.mrf.mxu1  ;;  %v5127_v39 = vld [vmem:[%s14143_s18 + $0x90] sm:$0xff]  ;;  %v5161_v8 = vmul.f32 0.5, %v14408_v53  ;;  %v17743_v53 = vld [vmem:[#allocation14_spill] sm:$0xff] }
 0x6df   : > { %v14528_v59 = vld [vmem:[#allocation2 + $0x108] sm:$0xff]  ;;  %v4201_v10 = vadd.f32 %v4200_v17, %v4087_v41 }
 0x6e0   : > { %5316 = vst.msk [vmem:[#allocation2 + $0x110] sm:$0xff] %vm1037_vm4, %v5284_v50  ;;  %5493 = vrot.lane.b32.xlu1 %v14528_v59, %s10351_s20  ;;  %v5255_v50 = vmul.f32 %v10244_v44, %v5127_v39 }
 0x6e1   : > { %9456 = vst.msk [vmem:[%s13913_s30 + $0xd0] sm:$0xff] %vm1037_vm4, %v14526_v6  ;;  %v4799_v52 = vpop.f32.mrf.mxu3 }
 0x6e2   : > { %v4863_v26 = vadd.f32 %v4799_v52, %v3923_v13  ;;  %v5213_v52 = vmul.f32 1.442695, %v5161_v8  ;;  %v10246_v58 = vpop.eup %10245 }
 0x6e3   : > { %v4990_v40 = vpop.f32.mrf.mxu0 }
 0x6e4   : > { %v5057_v63 = vadd.f32 %v14157_v18, %v4863_v26  ;;  %v5032_v56 = vadd.f32 %v4990_v40, %v4195_v47  ;;  %v4203_v26 = vpop.f32.mrf.mxu2  ;;  %v3932_v47 = vadd.f32 %v17743_v53, %v13869_v23  ;;  %10247 = vpow2.f32 %v5213_v52  ;;  %v17746_v52 = vld [vmem:[#allocation13_spill] sm:$0xff] }
 0x6e6   : > { %v5285_v32 = vadd.f32 %v5253_v7, %v5057_v63  ;;  %9414 = vst.msk [vmem:[%s14172_s26 + $0x80] sm:$0xff] %vm1037_vm4, %v5057_v63  ;;  %v14544_v49 = vadd.f32 %v14505_v38, %v5032_v56  ;;  %v4090_v13 = vpop.f32.mrf.mxu1  ;;  %v5128_v63 = vld [vmem:[%s14143_s18 + $0x98] sm:$0xff]  ;;  %v5162_v56 = vmul.f32 0.5, %v14426_v51 }
 0x6e7   : > { %v14546_v4 = vld [vmem:[#allocation2 + $0x110] sm:$0xff]  ;;  %v4204_v40 = vadd.f32 %v4203_v26, %v4090_v13  ;;  %v17747_v26 = vld [vmem:[#allocation35_spill] sm:$0xff] }
 0x6e8   : > { %5317 = vst.msk [vmem:[#allocation2 + $0x128] sm:$0xff] %vm1037_vm4, %v5285_v32  ;;  %5495 = vrot.lane.b32.xlu2 %v14546_v4, %s10351_s20  ;;  %v5256_v32 = vmul.f32 %v10246_v58, %v5128_v63  ;;  %v5215_v30 = vmul.f32 1.442695, %v5162_v56  ;;  %v3941_v53 = vadd.f32 %v17747_v26, %v17746_v52  ;;  %v5131_v58 = vld [vmem:[%s14143_s18 + $0xb0] sm:$0xff]  ;;  %v14645_v63 = vld [vmem:[%s17401_s5] ss:$0 sm:$0xff] }
 0x6e9   : > { %9457 = vst.msk [vmem:[%s13913_s30 + $0xd8] sm:$0xff] %vm1037_vm4, %v14544_v49  ;;  %v4802_v16 = vpop.f32.mrf.mxu3 }
 0x6ea   : > { %v4864_v37 = vadd.f32 %v4802_v16, %v3926_v54  ;;  %v10248_v51 = vpop.eup %10247  ;;  %10249 = vpow2.f32 %v5215_v30 }
 0x6eb   : > { %v4993_v45 = vpop.f32.mrf.mxu0 }
 0x6ec   : > { %v5058_v2 = vadd.f32 %v14157_v18, %v4864_v37  ;;  %v5033_v24 = vadd.f32 %v4993_v45, %v4198_v55  ;;  %v17744_v37 = vld [vmem:[#allocation3_spill] sm:$0xff] }
 0x6ed   : > { %v3935_v55 = vadd.f32 %v17744_v37, %v13882_v34  ;;  %v5163_v34 = vmul.f32 0.5, %v14443_v35  ;;  %v5132_v37 = vld [vmem:[%s14143_s18 + $0xb8] sm:$0xff] }
 0x6ee   : > { %v5286_v5 = vadd.f32 %v5254_v60, %v5058_v2  ;;  %9415 = vst.msk [vmem:[%s14172_s26 + $0x88] sm:$0xff] %vm1037_vm4, %v5058_v2  ;;  %v14562_v22 = vadd.f32 %v14505_v38, %v5033_v24  ;;  %v4093_v61 = vpop.f32.mrf.mxu1  ;;  %v5129_v2 = vld [vmem:[%s14143_s18 + $0xa0] sm:$0xff]  ;;  %v4206_v60 = vpop.f32.mrf.mxu2 }
 0x6ef   : > { %v14564_v20 = vld [vmem:[#allocation2 + $0x128] sm:$0xff]  ;;  %v4207_v24 = vadd.f32 %v4206_v60, %v4093_v61  ;;  %v5217_v44 = vmul.f32 1.442695, %v5163_v34  ;;  %v5166_v61 = vmul.f32 0.5, %v14508_v15  ;;  %v17751_v34 = vld [vmem:[#allocation23_spill] sm:$0xff] }
 0x6f0   : > { %5318 = vst.msk [vmem:[#allocation2 + $0x130] sm:$0xff] %vm1037_vm4, %v5286_v5  ;;  %5497 = vrot.lane.b32.xlu0 %v14564_v20, %s10351_s20  ;;  %v5257_v5 = vmul.f32 %v10248_v51, %v5129_v2  ;;  %v10250_v35 = vpop.eup %10249 }
 0x6f1   : > { %9458 = vst.msk [vmem:[%s13913_s30 + $0xe0] sm:$0xff] %vm1037_vm4, %v14562_v22  ;;  %v4805_v0 = vpop.f32.mrf.mxu3  ;;  %10251 = vpow2.f32 %v5217_v44  ;;  %v5223_v60 = vmul.f32 1.442695, %v5166_v61 }
 0x6f2   : > { %v4865_v48 = vadd.f32 %v4805_v0, %v3929_v11 }
 0x6f3   : > { %v4996_v21 = vpop.f32.mrf.mxu0 }
 0x6f4   : > { %v5059_v43 = vadd.f32 %v14157_v18, %v4865_v48  ;;  %v5034_v3 = vadd.f32 %v4996_v21, %v4201_v10  ;;  %v17745_v48 = vld [vmem:[#allocation42_spill] sm:$0xff] }
 0x6f5   : > { %v3938_v10 = vadd.f32 %v17745_v48, %v13895_v1 }
 0x6f6   : > { %v5287_v29 = vadd.f32 %v5255_v50, %v5059_v43  ;;  %9416 = vst.msk [vmem:[%s14172_s26 + $0x90] sm:$0xff] %vm1037_vm4, %v5059_v43  ;;  %v14580_v9 = vadd.f32 %v14505_v38, %v5034_v3  ;;  %v5130_v43 = vld [vmem:[%s14143_s18 + $0xa8] sm:$0xff] }
 0x6f7   : > { %v14582_v42 = vld [vmem:[#allocation2 + $0x130] sm:$0xff]  ;;  %v5258_v3 = vmul.f32 %v10250_v35, %v5130_v43  ;;  %v17752_v43 = vld [vmem:[#allocation48_spill] sm:$0xff] }
 0x6f8   : > { %5319 = vst.msk [vmem:[#allocation2 + $0x148] sm:$0xff] %vm1037_vm4, %v5287_v29  ;;  %5499 = vrot.lane.b32.xlu1 %v14582_v42, %s10351_s20 }
 0x6f9   : > { %9459 = vst.msk [vmem:[%s13913_s30 + $0xe8] sm:$0xff] %vm1037_vm4, %v14580_v9  ;;  %v4808_v33 = vpop.f32.mrf.mxu3 }
 0x6fa   : > { %v4866_v7 = vadd.f32 %v4808_v33, %v3932_v47  ;;  %v10252_v47 = vpop.eup %10251  ;;  %v5165_v33 = vmul.f32 0.5, %v14483_v27 }
 0x6fb   : > { %v4999_v46 = vpop.f32.mrf.mxu0 }
 0x6fc   : > { %v5060_v23 = vadd.f32 %v14157_v18, %v4866_v7  ;;  %v5035_v31 = vadd.f32 %v4999_v46, %v4204_v40  ;;  %v5259_v40 = vmul.f32 %v10252_v47, %v5131_v58  ;;  %v17748_v46 = vld [vmem:[#allocation46_spill] sm:$0xff]  ;;  %v17754_v58 = vld [vmem:[#allocation49_spill] sm:$0xff] }
 0x6fe   : > { %v5288_v54 = vadd.f32 %v5256_v32, %v5060_v23  ;;  %9417 = vst.msk [vmem:[%s14172_s26 + $0x98] sm:$0xff] %vm1037_vm4, %v5060_v23  ;;  %v14598_v16 = vadd.f32 %v14505_v38, %v5035_v31  ;;  %v5221_v23 = vmul.f32 1.442695, %v5165_v33  ;;  %v17749_v31 = vld [vmem:[#allocation36_spill] sm:$0xff] }
 0x6ff   : > { %v14600_v19 = vld [vmem:[#allocation2 + $0x148] sm:$0xff] }
 0x700   : > { %5320 = vst.msk [vmem:[#allocation2 + $0x150] sm:$0xff] %vm1037_vm4, %v5288_v54  ;;  %5501 = vrot.lane.b32.xlu2 %v14600_v19, %s10351_s20  ;;  %v3944_v54 = vadd.f32 %v17749_v31, %v17748_v46 }
 0x701   : > { %9460 = vst.msk [vmem:[%s13913_s30 + $0xf0] sm:$0xff] %vm1037_vm4, %v14598_v16  ;;  %v4811_v41 = vpop.f32.mrf.mxu3 }
 0x702   : > { %v4867_v45 = vadd.f32 %v4811_v41, %v3935_v55 }
 0x703   : > { %v5002_v28 = vpop.f32.mrf.mxu0 }
 0x704   : > { %v5061_v17 = vadd.f32 %v14157_v18, %v4867_v45  ;;  %v5036_v62 = vadd.f32 %v5002_v28, %v4207_v24  ;;  %v17750_v24 = vld [vmem:[#allocation47_spill] sm:$0xff] }
 0x705   : > { %v5133_v28 = vld [vmem:[%s14143_s18 + $0xc0] sm:$0xff] }
 0x706   : > { %v5289_v11 = vadd.f32 %v5257_v5, %v5061_v17  ;;  %9418 = vst.msk [vmem:[%s14172_s26 + $0xa0] sm:$0xff] %vm1037_vm4, %v5061_v17  ;;  %v14616_v0 = vadd.f32 %v14505_v38, %v5036_v62  ;;  %v5164_v38 = vmul.f32 0.5, %v14463_v25  ;;  %v3947_v17 = vadd.f32 %v17751_v34, %v17750_v24 }
 0x707   : > { %v14618_v39 = vld [vmem:[#allocation2 + $0x150] sm:$0xff] }
 0x708   : > { %5321 = vst.msk [vmem:[#allocation2 + $0x168] sm:$0xff] %vm1037_vm4, %v5289_v11  ;;  %5503 = vrot.lane.b32.xlu0 %v14618_v39, %s10351_s20  ;;  %v5219_v13 = vmul.f32 1.442695, %v5164_v38  ;;  %v5167_v11 = vmul.f32 0.5, %v14526_v6 }
 0x709   : > { %9461 = vst.msk [vmem:[%s13913_s30 + $0xf8] sm:$0xff] %vm1037_vm4, %v14616_v0  ;;  %v4814_v8 = vpop.f32.mrf.mxu3 }
 0x70a   : > { %v4868_v50 = vadd.f32 %v4814_v8, %v3938_v10  ;;  %10253 = vpow2.f32 %v5219_v13  ;;  %v5225_v35 = vmul.f32 1.442695, %v5167_v11  ;;  %v5168_v13 = vmul.f32 0.5, %v14544_v49 }
 0x70b   : > { %10255 = vpow2.f32 %v5221_v23  ;;  %v5169_v23 = vmul.f32 0.5, %v14562_v22 }
 0x70c   : > { %v5062_v21 = vadd.f32 %v14157_v18, %v4868_v50  ;;  %10257 = vpow2.f32 %v5223_v60  ;;  %v17753_v50 = vld [vmem:[#allocation22_spill] sm:$0xff]  ;;  %v5227_v47 = vmul.f32 1.442695, %v5168_v13  ;;  %v5170_v60 = vmul.f32 0.5, %v14580_v9 }
 0x70d   : > { %v3950_v38 = vadd.f32 %v17753_v50, %v17752_v43  ;;  %10259 = vpow2.f32 %v5225_v35  ;;  %v5171_v35 = vmul.f32 0.5, %v14598_v16 }
 0x70e   : > { %v5290_v1 = vadd.f32 %v5258_v3, %v5062_v21  ;;  %9419 = vst.msk [vmem:[%s14172_s26 + $0xa8] sm:$0xff] %vm1037_vm4, %v5062_v21  ;;  %v5134_v3 = vld [vmem:[%s14143_s18 + $0xc8] sm:$0xff]  ;;  %10261 = vpow2.f32 %v5227_v47  ;;  %v5172_v47 = vmul.f32 0.5, %v14616_v0 }
 0x70f   : > { %v14633_v29 = vld [vmem:[#allocation2 + $0x168] sm:$0xff] }
 0x710   : > { %5322 = vst.msk [vmem:[#allocation2 + $0x170] sm:$0xff] %vm1037_vm4, %v5290_v1  ;;  %5505 = vrot.lane.b32.xlu1 %v14633_v29, %s10351_s20  ;;  %v10254_v27 = vpop.eup %10253 }
 0x711   : > { %v4817_v25 = vpop.f32.mrf.mxu3  ;;  %v5260_v41 = vmul.f32 %v10254_v27, %v5132_v37  ;;  %v10256_v5 = vpop.eup %10255  ;;  %v5229_v27 = vmul.f32 1.442695, %v5169_v23  ;;  %v17756_v37 = vld [vmem:[#allocation50_spill] sm:$0xff]  ;;  %v17763_v23 = vld [vmem:[#allocation44_spill] sm:$0xff] }
 0x712   : > { %v4869_v18 = vadd.f32 %v4817_v25, %v3941_v53  ;;  %v5261_v48 = vmul.f32 %v10256_v5, %v5133_v28  ;;  %v10258_v21 = vpop.eup %10257  ;;  %v5231_v5 = vmul.f32 1.442695, %v5170_v60  ;;  %v17758_v28 = vld [vmem:[#allocation51_spill] sm:$0xff]  ;;  %v17765_v60 = vld [vmem:[#allocation45_spill] sm:$0xff] }
 0x713   : > { %v5262_v26 = vmul.f32 %v10258_v21, %v5134_v3  ;;  %10263 = vpow2.f32 %v5229_v27  ;;  %v5233_v21 = vmul.f32 1.442695, %v5171_v35  ;;  %v17760_v3 = vld [vmem:[#allocation25_spill] sm:$0xff] }
 0x714   : > { %v5063_v7 = vadd.f32 %v14645_v63, %v4869_v18  ;;  %v17755_v18 = vld [vmem:[#allocation20_spill] sm:$0xff]  ;;  %10265 = vpow2.f32 %v5231_v5  ;;  %v5140_v5 = vld [vmem:[%s14143_s18 + $0xf8] sm:$0xff] }
 0x715   : > { %v3953_v33 = vadd.f32 %v17755_v18, %v17754_v58  ;;  %10267 = vpow2.f32 %v5233_v21  ;;  %v14773_v35 = vld [vmem:[#allocation2 + $0x49] sm:$0xff] }
 0x716   : > { %v5291_v56 = vadd.f32 %v5259_v40, %v5063_v7  ;;  %9420 = vst.msk [vmem:[%s14172_s26 + $0xb0] sm:$0xff] %vm1037_vm4, %v5063_v7  ;;  %v10260_v7 = vpop.eup %10259  ;;  %v5135_v40 = vld [vmem:[%s14143_s18 + $0xd0] sm:$0xff] }
 0x717   : > { %v14650_v32 = vld [vmem:[#allocation2 + $0x170] sm:$0xff]  ;;  %v5263_v31 = vmul.f32 %v10260_v7, %v5135_v40 }
 0x718   : > { %5323 = vst.msk [vmem:[#allocation2 + $0x188] sm:$0xff] %vm1037_vm4, %v5291_v56  ;;  %5507 = vrot.lane.b32.xlu2 %v14650_v32, %s10351_s20 }
 0x719   : > { %v4820_v30 = vpop.f32.mrf.mxu3 }
 0x71a   : > { %v4870_v55 = vadd.f32 %v4820_v30, %v3944_v54 }
 0x71c   : > { %v5064_v51 = vadd.f32 %v14645_v63, %v4870_v55  ;;  %v17757_v55 = vld [vmem:[#allocation40_spill] sm:$0xff] }
 0x71d   : > { %v3956_v61 = vadd.f32 %v17757_v55, %v17756_v37 }
 0x71e   : > { %v5292_v2 = vadd.f32 %v5260_v41, %v5064_v51  ;;  %9421 = vst.msk [vmem:[%s14172_s26 + $0xb8] sm:$0xff] %vm1037_vm4, %v5064_v51  ;;  %v10262_v51 = vpop.eup %10261  ;;  %v5136_v41 = vld [vmem:[%s14143_s18 + $0xd8] sm:$0xff] }
 0x71f   : > { %v14662_v45 = vld [vmem:[#allocation2 + $0x188] sm:$0xff]  ;;  %v5264_v34 = vmul.f32 %v10262_v51, %v5136_v41  ;;  %v5398_v51 = vld [vmem:[#allocation2 + $0x11] sm:$0xff] }
 0x720   : > { %5324 = vst.msk [vmem:[#allocation2 + $0x190] sm:$0xff] %vm1037_vm4, %v5292_v2  ;;  %5509 = vrot.lane.b32.xlu0 %v14662_v45, %s10351_s20 }
 0x721   : > { %v4823_v15 = vpop.f32.mrf.mxu3 }
 0x722   : > { %v4871_v62 = vadd.f32 %v4823_v15, %v3947_v17 }
 0x724   : > { %v5065_v44 = vadd.f32 %v14645_v63, %v4871_v62  ;;  %v17759_v62 = vld [vmem:[#allocation28_spill] sm:$0xff] }
 0x725   : > { %v3959_v11 = vadd.f32 %v17759_v62, %v17758_v28  ;;  %v14759_v28 = vpop.permute.xlu2 %5465 }
 0x726   : > { %v5293_v10 = vadd.f32 %v5261_v48, %v5065_v44  ;;  %9422 = vst.msk [vmem:[%s14172_s26 + $0xc0] sm:$0xff] %vm1037_vm4, %v5065_v44  ;;  %v10264_v44 = vpop.eup %10263  ;;  %v5137_v48 = vld [vmem:[%s14143_s18 + $0xe0] sm:$0xff] }
 0x727   : > { %v14674_v8 = vld [vmem:[#allocation2 + $0x190] sm:$0xff]  ;;  %v5265_v50 = vmul.f32 %v10264_v44, %v5137_v48 }
 0x728   : > { %5325 = vst.msk [vmem:[#allocation2 + $0x1a8] sm:$0xff] %vm1037_vm4, %v5293_v10  ;;  %5511 = vrot.lane.b32.xlu1 %v14674_v8, %s10351_s20  ;;  %v14764_v48 = vld [vmem:[#allocation2 + $0x29] sm:$0xff] }
 0x729   : > { %v4826_v6 = vpop.f32.mrf.mxu3 }
 0x72a   : > { %v4872_v1 = vadd.f32 %v4826_v6, %v3950_v38 }
 0x72c   : > { %v5066_v52 = vadd.f32 %v14645_v63, %v4872_v1  ;;  %v17761_v1 = vld [vmem:[#allocation43_spill] sm:$0xff] }
 0x72d   : > { %v3962_v13 = vadd.f32 %v17761_v1, %v17760_v3  ;;  %v14793_v3 = vld [vmem:[#allocation2 + $0x89] sm:$0xff] }
 0x72e   : > { %v5294_v53 = vadd.f32 %v5262_v26, %v5066_v52  ;;  %9423 = vst.msk [vmem:[%s14172_s26 + $0xc8] sm:$0xff] %vm1037_vm4, %v5066_v52  ;;  %v10266_v52 = vpop.eup %10265  ;;  %v5138_v26 = vld [vmem:[%s14143_s18 + $0xe8] sm:$0xff] }
 0x72f   : > { %v14686_v25 = vld [vmem:[#allocation2 + $0x1a8] sm:$0xff]  ;;  %v5266_v18 = vmul.f32 %v10266_v52, %v5138_v26  ;;  %v10268_v0 = vpop.eup %10267  ;;  %v14809_v26 = vpop.permute.xlu1 %5463 }
 0x730   : > { %5326 = vst.msk [vmem:[#allocation2 + $0x1b0] sm:$0xff] %vm1037_vm4, %v5294_v53  ;;  %5513 = vrot.lane.b32.xlu2 %v14686_v25, %s10351_s20  ;;  %v14795_v1 = vld [vmem:[#allocation2 + $0xc9] sm:$0xff] }
 0x731   : > { %v4829_v49 = vpop.f32.mrf.mxu3  ;;  %v14803_v52 = vld [vmem:[#allocation2 + $0xa9] sm:$0xff] }
 0x732   : > { %v4873_v56 = vadd.f32 %v4829_v49, %v3953_v33  ;;  %v5397_v33 = vld [vmem:[#allocation2 + $0x9] sm:$0xff]  ;;  %v5235_v49 = vmul.f32 1.442695, %v5172_v47  ;;  %v14813_v47 = vld [vmem:[#allocation2 + $0xf1] sm:$0xff] }
 0x734   : > { %v5067_v46 = vadd.f32 %v14645_v63, %v4873_v56  ;;  %v17762_v56 = vld [vmem:[#allocation52_spill] sm:$0xff]  ;;  %10269 = vpow2.f32 %v5235_v49 }
 0x735   : > { %v14829_v49 = vld [vmem:[#allocation2 + $0x129] sm:$0xff] }
 0x736   : > { %v5295_v54 = vadd.f32 %v5263_v31, %v5067_v46  ;;  %9424 = vst.msk [vmem:[%s14172_s26 + $0xd0] sm:$0xff] %vm1037_vm4, %v5067_v46  ;;  %v3965_v46 = vadd.f32 %v17763_v23, %v17762_v56  ;;  %v14835_v56 = vld [vmem:[#allocation2 + $0x109] sm:$0xff] }
 0x737   : > { %v14698_v30 = vld [vmem:[#allocation2 + $0x1b0] sm:$0xff]  ;;  %v14837_v23 = vpop.permute.xlu1 %5469 }
 0x738   : > { %5327 = vst.msk [vmem:[#allocation2 + $0x1c8] sm:$0xff] %vm1037_vm4, %v5295_v54  ;;  %5515 = vrot.lane.b32.xlu0 %v14698_v30, %s10351_s20  ;;  %v5139_v54 = vld [vmem:[%s14143_s18 + $0xf0] sm:$0xff] }
 0x739   : > { %v4832_v22 = vpop.f32.mrf.mxu3  ;;  %v5267_v55 = vmul.f32 %v10268_v0, %v5139_v54  ;;  %v14848_v54 = vld [vmem:[#allocation2 + $0x111] sm:$0xff] }
 0x73a   : > { %v4874_v2 = vadd.f32 %v4832_v22, %v3956_v61  ;;  %v14746_v22 = vld [vmem:[#allocation2 + $0x31] sm:$0xff] }
 0x73c   : > { %v5068_v24 = vadd.f32 %v14645_v63, %v4874_v2  ;;  %v17764_v2 = vld [vmem:[#allocation53_spill] sm:$0xff] }
 0x73e   : > { %v5296_v17 = vadd.f32 %v5264_v34, %v5068_v24  ;;  %9425 = vst.msk [vmem:[%s14172_s26 + $0xd8] sm:$0xff] %vm1037_vm4, %v5068_v24  ;;  %v3968_v24 = vadd.f32 %v17765_v60, %v17764_v2  ;;  %v10270_v34 = vpop.eup %10269  ;;  %v5750_v60 = vld [vmem:[%s17404_s8] sm:$0xff] }
 0x73f   : > { %v14710_v15 = vld [vmem:[#allocation2 + $0x1c8] sm:$0xff]  ;;  %v5268_v44 = vmul.f32 %v10270_v34, %v5140_v5 }
 0x740   : > { %5328 = vst.msk [vmem:[#allocation2 + $0x1d0] sm:$0xff] %vm1037_vm4, %v5296_v17  ;;  %5517 = vrot.lane.b32.xlu1 %v14710_v15, %s10351_s20  ;;  %v14874_v34 = vld [vmem:[#allocation2 + $0x189] sm:$0xff] }
 0x741   : > { %v4835_v9 = vpop.f32.mrf.mxu3  ;;  %17769 = vst [vmem:[#allocation33_spill] sm:$0xff] %v14874_v34 }
 0x742   : > { %v4875_v10 = vadd.f32 %v4835_v9, %v3959_v11 }
 0x744   : > { %v5069_v43 = vadd.f32 %v14645_v63, %v4875_v10  ;;  %v14766_v10 = vld [vmem:[#allocation2 + $0x69] sm:$0xff] }
 0x746   : > { %v5297_v38 = vadd.f32 %v5265_v50, %v5069_v43  ;;  %9426 = vst.msk [vmem:[%s14172_s26 + $0xe0] sm:$0xff] %vm1037_vm4, %v5069_v43  ;;  %v14779_v43 = vld [vmem:[#allocation2 + $0x51] sm:$0xff] }
 0x747   : > { %v14722_v6 = vld [vmem:[#allocation2 + $0x1d0] sm:$0xff] }
 0x748   : > { %5329 = vst.msk [vmem:[#allocation2 + $0x1e8] sm:$0xff] %vm1037_vm4, %v5297_v38  ;;  %5519 = vrot.lane.b32.xlu2 %v14722_v6, %s10351_s20  ;;  %v14781_v50 = vld [vmem:[#allocation2 + $0x91] sm:$0xff] }
 0x749   : > { %v4838_v16 = vpop.f32.mrf.mxu3  ;;  %v14787_v38 = vld [vmem:[#allocation2 + $0x71] sm:$0xff] }
 0x74a   : > { %v4876_v53 = vadd.f32 %v4838_v16, %v3962_v13  ;;  %v14797_v13 = vpop.permute.xlu0 %5461 }
 0x74c   : > { %v5070_v58 = vadd.f32 %v14645_v63, %v4876_v53  ;;  %v14811_v53 = vld [vmem:[#allocation2 + $0xb1] sm:$0xff] }
 0x74e   : > { %v5298_v7 = vadd.f32 %v5266_v18, %v5070_v58  ;;  %9427 = vst.msk [vmem:[%s14172_s26 + $0xe8] sm:$0xff] %vm1037_vm4, %v5070_v58  ;;  %v14819_v58 = vld [vmem:[#allocation2 + $0xd1] sm:$0xff] }
 0x74f   : > { %v14734_v40 = vld [vmem:[#allocation2 + $0x1e8] sm:$0xff] }
 0x750   : > { %5330 = vst.msk [vmem:[#allocation2 + $0x1f0] sm:$0xff] %vm1037_vm4, %v5298_v7  ;;  %5589 = vrot.lane.b32.xlu2 %v5397_v33, %s10354_s17  ;;  %5521 = vrot.lane.b32.xlu0 %v14734_v40, %s10351_s20  ;;  %v14827_v7 = vld [vmem:[#allocation2 + $0xe9] sm:$0xff] }
 0x751   : > { %v4841_v31 = vpop.f32.mrf.mxu3 }
 0x752   : > { %v4877_v27 = vadd.f32 %v4841_v31, %v3965_v46  ;;  %v14823_v18 = vpop.permute.xlu0 %5467  ;;  %v5752_v31 = vld [vmem:[%s17404_s8 + $0x10] sm:$0xff] }
 0x753   : > { %6492 = vmatpush.msra.mxu2 %v5752_v31  ;;  %v14898_v31 = vld [vmem:[#allocation2 + $0x191] sm:$0xff] }
 0x754   : > { %v5071_v37 = vadd.f32 %v14645_v63, %v4877_v27  ;;  %v14850_v27 = vld [vmem:[#allocation2 + $0x151] sm:$0xff]  ;;  %17773 = vst [vmem:[#allocation5_spill] sm:$0xff] %v14898_v31 }
 0x755   : > { %17767 = vst [vmem:[#allocation11_spill] sm:$0xff] %v14850_v27 }
 0x756   : > { %v5299_v61 = vadd.f32 %v5267_v55, %v5071_v37  ;;  %9428 = vst.msk [vmem:[%s14172_s26 + $0xf0] sm:$0xff] %vm1037_vm4, %v5071_v37  ;;  %v14856_v37 = vld [vmem:[#allocation2 + $0x131] sm:$0xff]  ;;  %v14858_v55 = vpop.permute.xlu1 %5475 }
 0x757   : > { %v14748_v41 = vld [vmem:[#allocation2 + $0x1f0] sm:$0xff] }
 0x758   : > { %5331 = vst.msk [vmem:[#allocation2 + $0x208] sm:$0xff] %vm1037_vm4, %v5299_v61  ;;  %5595 = vrot.lane.b32.xlu2 %v14746_v22, %s10354_s17  ;;  %5523 = vrot.lane.b32.xlu1 %v14748_v41, %s10351_s20  ;;  %v5751_v61 = vld [vmem:[%s17404_s8 + $0x8] sm:$0xff] }
 0x759   : > { %5591 = vrot.lane.b32.xlu0 %v5398_v51, %s10354_s17  ;;  %v4844_v17 = vpop.f32.mrf.mxu3  ;;  %6493 = vmatpush.msra.mxu2 %v5751_v61 }
 0x75a   : > { %v4878_v62 = vadd.f32 %v4844_v17, %v3968_v24  ;;  %v14841_v46 = vpop.permute.xlu0 %5473  ;;  %v14872_v24 = vld [vmem:[#allocation2 + $0x149] sm:$0xff] }
 0x75b   : > { %6494 = vmatpush.msra.mxu2 %v5750_v60  ;;  %v14880_v17 = vld [vmem:[#allocation2 + $0x169] sm:$0xff] }
 0x75c   : > { %v5072_v11 = vadd.f32 %v14645_v63, %v4878_v62  ;;  %v14777_v63 = vpop.permute.xlu2 %5471 }
 0x75e   : > { %v5300_v9 = vadd.f32 %v5268_v44, %v5072_v11  ;;  %9429 = vst.msk [vmem:[%s14172_s26 + $0xf8] sm:$0xff] %vm1037_vm4, %v5072_v11  ;;  %v14882_v5 = vpop.permute.xlu1 %5481  ;;  %v14890_v44 = vld [vmem:[#allocation2 + $0x171] sm:$0xff] }
 0x75f   : > { %17771 = vst [vmem:[#allocation37_spill] sm:$0xff] %v14890_v44 }
 0x760   : > { %5332 = vst.msk [vmem:[#allocation2 + $0x210] sm:$0xff] %vm1037_vm4, %v5300_v9  ;;  %5593 = vrot.lane.b32.xlu1 %v14764_v48, %s10354_s17  ;;  %5601 = vrot.lane.b32.xlu2 %v14766_v10, %s10354_s17  ;;  %v14892_v9 = vld [vmem:[#allocation2 + $0x1b1] sm:$0xff] }
 0x761   : > { %5597 = vrot.lane.b32.xlu0 %v14773_v35, %s10354_s17  ;;  %17772 = vst [vmem:[#allocation24_spill] sm:$0xff] %v14892_v9 }
 0x762   : > { %v14865_v51 = vpop.permute.xlu0 %5479 }
 0x764   : > { %v14791_v21 = vpop.permute.xlu2 %5477 }
 0x766   : > { %v14900_v61 = vpop.permute.xlu1 %5487 }
 0x768   : > { %5599 = vrot.lane.b32.xlu1 %v14779_v43, %s10354_s17  ;;  %5607 = vrot.lane.b32.xlu2 %v14781_v50, %s10354_s17 }
 0x769   : > { %5603 = vrot.lane.b32.xlu0 %v14787_v38, %s10354_s17 }
 0x76a   : > { %v14886_v62 = vpop.permute.xlu0 %5485 }
 0x76c   : > { %v14807_v16 = vpop.permute.xlu2 %5483 }
 0x770   : > { %5605 = vrot.lane.b32.xlu1 %v14793_v3, %s10354_s17  ;;  %5613 = vrot.lane.b32.xlu2 %v14795_v1, %s10354_s17 }
 0x771   : > { %5609 = vrot.lane.b32.xlu0 %v14803_v52, %s10354_s17 }
 0x772   : > { %v14904_v60 = vpop.permute.xlu0 %5491 }
 0x773   : > { %17774 = vst [vmem:[#allocation6_spill] sm:$0xff] %v14904_v60 }
 0x774   : > { %v14825_v33 = vpop.permute.xlu2 %5489 }
 0x778   : > { %5611 = vrot.lane.b32.xlu1 %v14811_v53, %s10354_s17  ;;  %5619 = vrot.lane.b32.xlu2 %v14813_v47, %s10354_s17 }
 0x779   : > { %5615 = vrot.lane.b32.xlu0 %v14819_v58, %s10354_s17 }
 0x77a   : > { %v14922_v60 = vpop.permute.xlu0 %5497 }
 0x77b   : > { %17780 = vst [vmem:[#allocation8_spill] sm:$0xff] %v14922_v60 }
 0x77c   : > { %v14843_v0 = vpop.permute.xlu2 %5495 }
 0x77d   : > { %17766 = vst [vmem:[#allocation41_spill] sm:$0xff] %v14843_v0  ;;  %v14910_v0 = vld [vmem:[#allocation2 + $0x1e9] sm:$0xff] }
 0x77e   : > { %17777 = vst [vmem:[#allocation15_spill] sm:$0xff] %v14910_v0 }
 0x780   : > { %5617 = vrot.lane.b32.xlu1 %v14827_v7, %s10354_s17  ;;  %5625 = vrot.lane.b32.xlu2 %v14829_v49, %s10354_s17 }
 0x781   : > { %5621 = vrot.lane.b32.xlu0 %v14835_v56, %s10354_s17 }
 0x782   : > { %v14939_v60 = vpop.permute.xlu0 %5503 }
 0x783   : > { %17785 = vst [vmem:[#allocation31_spill] sm:$0xff] %v14939_v60 }
 0x784   : > { %v14867_v2 = vpop.permute.xlu2 %5501 }
 0x785   : > { %17768 = vst [vmem:[#allocation32_spill] sm:$0xff] %v14867_v2  ;;  %v14908_v2 = vld [vmem:[#allocation2 + $0x1a9] sm:$0xff] }
 0x786   : > { %17776 = vst [vmem:[#allocation38_spill] sm:$0xff] %v14908_v2 }
 0x788   : > { %5623 = vrot.lane.b32.xlu1 %v14848_v54, %s10354_s17  ;;  %5631 = vrot.lane.b32.xlu2 %v14850_v27, %s10354_s17  ;;  %v5786_v27 = vld [vmem:[#allocation2 + $0x30] sm:$0xff] }
 0x789   : > { %5627 = vrot.lane.b32.xlu0 %v14856_v37, %s10354_s17 }
 0x78c   : > { %v14888_v11 = vpop.permute.xlu2 %5507 }
 0x78d   : > { %17770 = vst [vmem:[#allocation4_spill] sm:$0xff] %v14888_v11 }
 0x790   : > { %5629 = vrot.lane.b32.xlu1 %v14872_v24, %s10354_s17  ;;  %5637 = vrot.lane.b32.xlu2 %v14874_v34, %s10354_s17  ;;  %v14918_v34 = vpop.permute.xlu1 %5493 }
 0x791   : > { %5633 = vrot.lane.b32.xlu0 %v14880_v17, %s10354_s17  ;;  %17779 = vst [vmem:[#allocation29_spill] sm:$0xff] %v14918_v34 }
 0x794   : > { %v14906_v11 = vpop.permute.xlu2 %5513 }
 0x795   : > { %17775 = vst [vmem:[#allocation19_spill] sm:$0xff] %v14906_v11 }
 0x798   : > { %5635 = vrot.lane.b32.xlu1 %v14890_v44, %s10354_s17  ;;  %5643 = vrot.lane.b32.xlu2 %v14892_v9, %s10354_s17  ;;  %v14916_v9 = vld [vmem:[#allocation2 + $0x1c9] sm:$0xff]  ;;  %v14933_v34 = vpop.permute.xlu1 %5499 }
 0x799   : > { %5639 = vrot.lane.b32.xlu0 %v14898_v31, %s10354_s17  ;;  %17778 = vst [vmem:[#allocation34_spill] sm:$0xff] %v14916_v9  ;;  %v5333_v44 = vld [vmem:[#allocation2 + $0x7] sm:$0xff]  ;;  %v14926_v31 = vld [vmem:[#allocation2 + $0x1d1] sm:$0xff] }
 0x79a   : > { %17782 = vst [vmem:[#allocation21_spill] sm:$0xff] %v14926_v31 }
 0x79b   : > { %17784 = vst [vmem:[#allocation18_spill] sm:$0xff] %v14933_v34  ;;  %v14948_v34 = vld [vmem:[#allocation2 + $0x48] sm:$0xff] }
 0x7a0   : > { %5641 = vrot.lane.b32.xlu1 %v14908_v2, %s10354_s17  ;;  %5649 = vrot.lane.b32.xlu2 %v14910_v0, %s10354_s17  ;;  %v14931_v0 = vld [vmem:[#allocation2 + $0x1f1] sm:$0xff] }
 0x7a1   : > { %5645 = vrot.lane.b32.xlu0 %v14916_v9, %s10354_s17  ;;  %17783 = vst [vmem:[#allocation39_spill] sm:$0xff] %v14931_v0 }
 0x7a2   : > { %v14924_v11 = vpop.permute.xlu2 %5519 }
 0x7a3   : > { %17781 = vst [vmem:[#allocation27_spill] sm:$0xff] %v14924_v11  ;;  %v5685_v11 = vsel %vm1037_vm4, %v5333_v44, %v14797_v13  ;;  %v14954_v13 = vpop.permute.xlu0 %5509  ;;  %v10337_v44 = vld [vmem:[#allocation2 + $0x90] sm:$0xff] }
 0x7a4   : > { %17788 = vst [vmem:[#allocation26_spill] sm:$0xff] %v14954_v13  ;;  %v14971_v13 = vld [vmem:[#allocation2 + $0x88] sm:$0xff] }
 0x7a5   : > { %17793 = vst [vmem:[#allocation30_spill] sm:$0xff] %v14971_v13 }
 0x7a8   : > { %5647 = vrot.lane.b32.xlu1 %v14926_v31, %s10354_s17  ;;  %5883 = vrot.lane.b32.xlu2 %v5786_v27, %s10351_s20  ;;  %v5785_v27 = vld [vmem:[#allocation2 + $0x28] sm:$0xff] }
 0x7a9   : > { %5651 = vrot.lane.b32.xlu0 %v14931_v0, %s10354_s17  ;;  %v14943_v31 = vld [vmem:[#allocation2 + $0x68] sm:$0xff]  ;;  %v14950_v0 = vpop.permute.xlu1 %5505 }
 0x7aa   : > { %v5590_v2 = vpop.permute.xlu2 %5589  ;;  %17786 = vst [vmem:[#allocation17_spill] sm:$0xff] %v14943_v31 }
 0x7ab   : > { %v5718_v9 = vsel %vm5717_vm8, %v5685_v11, %v5590_v2  ;;  %17787 = vst [vmem:[#allocation7_spill] sm:$0xff] %v14950_v0  ;;  %v14956_v11 = vld [vmem:[#allocation2 + $0x50] sm:$0xff]  ;;  %v14967_v0 = vpop.permute.xlu0 %5515 }
 0x7ac   : > { %9988 = vmatmul.msk.f32.vlgmr.msra.gmra.mxu2 %vm6173_vm9, %v5718_v9  ;;  %17789 = vst [vmem:[#allocation10_spill] sm:$0xff] %v14956_v11  ;;  %v14961_v9 = vld [vmem:[#allocation2 + $0x70] sm:$0xff] }
 0x7ad   : > { %17790 = vst [vmem:[#allocation16_spill] sm:$0xff] %v14961_v9 }
 0x7ae   : > { %17792 = vst [vmem:[#allocation9_spill] sm:$0xff] %v14967_v0  ;;  %v5334_v0 = vld [vmem:[#allocation2 + $0xf] sm:$0xff] }
 0x7b0   : > { %5881 = vrot.lane.b32.xlu1 %v5785_v27, %s10351_s20  ;;  %5889 = vrot.lane.b32.xlu2 %v14943_v31, %s10351_s20  ;;  %v10338_v31 = vld [vmem:[#allocation2 + $0xa8] sm:$0xff] }
 0x7b1   : > { %5885 = vrot.lane.b32.xlu0 %v14948_v34, %s10351_s20  ;;  %v14963_v27 = vpop.permute.xlu1 %5511 }
 0x7b2   : > { %v5596_v2 = vpop.permute.xlu2 %5595  ;;  %17791 = vst [vmem:[#allocation12_spill] sm:$0xff] %v14963_v27 }
 0x7b8   : > { %5887 = vrot.lane.b32.xlu1 %v14956_v11, %s10351_s20  ;;  %5895 = vrot.lane.b32.xlu2 %v10337_v44, %s10351_s20 }
 0x7b9   : > { %5891 = vrot.lane.b32.xlu0 %v14961_v9, %s10351_s20  ;;  %v14977_v44 = vpop.permute.xlu1 %5517  ;;  %v10339_v9 = vld [vmem:[#allocation2 + $0xb0] sm:$0xff] }
 0x7ba   : > { %v14969_v60 = vpop.permute.xlu2 %5601  ;;  %17794 = vst [vmem:[#allocation14_spill] sm:$0xff] %v14977_v44 }
 0x7c0   : > { %5893 = vrot.lane.b32.xlu1 %v14971_v13, %s10351_s20  ;;  %5901 = vrot.lane.b32.xlu2 %v14445_v14, %s10351_s20 }
 0x7c1   : > { %5897 = vrot.lane.b32.xlu0 %v10338_v31, %s10351_s20  ;;  %v5686_v31 = vsel %vm1037_vm4, %v5334_v0, %v14809_v26 }
 0x7c2   : > { %v14980_v27 = vpop.permute.xlu2 %5607  ;;  %v14982_v11 = vpop.permute.xlu0 %5521 }
 0x7c3   : > { %17795 = vst [vmem:[#allocation3_spill] sm:$0xff] %v14982_v11 }
 0x7c8   : > { %5899 = vrot.lane.b32.xlu1 %v10339_v9, %s10351_s20  ;;  %5907 = vrot.lane.b32.xlu2 %v14510_v12, %s10351_s20  ;;  %v5335_v12 = vld [vmem:[#allocation2 + $0x27] sm:$0xff] }
 0x7c9   : > { %5903 = vrot.lane.b32.xlu0 %v14465_v36, %s10351_s20  ;;  %v5687_v36 = vsel %vm1037_vm4, %v5335_v12, %v14759_v28 }
 0x7ca   : > { %v14989_v14 = vpop.permute.xlu1 %5523  ;;  %v14991_v44 = vpop.permute.xlu2 %5613 }
 0x7cb   : > { %v5592_v13 = vpop.permute.xlu0 %5591 }
 0x7cc   : > { %v5719_v11 = vsel %vm5717_vm8, %v5686_v31, %v5592_v13 }
 0x7cd   : > { %9989 = vmatmul.msk.f32.gmra.mxu2 %vm6173_vm9, %v5719_v11 }
 0x7d0   : > { %5905 = vrot.lane.b32.xlu1 %v14485_v57, %s10351_s20  ;;  %5913 = vrot.lane.b32.xlu2 %v14564_v20, %s10351_s20  ;;  %v15015_v57 = vld [vmem:[#allocation2 + $0x2f] sm:$0xff] }
 0x7d1   : > { %5909 = vrot.lane.b32.xlu0 %v14528_v59, %s10351_s20  ;;  %v5688_v28 = vsel %vm1037_vm4, %v15015_v57, %v14823_v18 }
 0x7d2   : > { %v5594_v9 = vpop.permute.xlu1 %5593  ;;  %v15005_v26 = vpop.permute.xlu2 %5619  ;;  %v5721_v31 = vsel %vm5717_vm8, %v5688_v28, %v5596_v2  ;;  %v15098_v28 = vld [vmem:[#allocation2 + $0x208] sm:$0xff] }
 0x7d3   : > { %v5720_v0 = vsel %vm5717_vm8, %v5687_v36, %v5594_v9  ;;  %v5598_v13 = vpop.permute.xlu0 %5597 }
 0x7d5   : > { %9990 = vmatmul.msk.f32.gmra.mxu2 %vm6173_vm9, %v5720_v0 }
 0x7d8   : > { %5911 = vrot.lane.b32.xlu1 %v14546_v4, %s10351_s20  ;;  %5919 = vrot.lane.b32.xlu2 %v14618_v39, %s10351_s20  ;;  %v15030_v4 = vld [vmem:[#allocation2 + $0x47] sm:$0xff] }
 0x7d9   : > { %5915 = vrot.lane.b32.xlu0 %v14582_v42, %s10351_s20  ;;  %v5689_v18 = vsel %vm1037_vm4, %v15030_v4, %v14837_v23 }
 0x7da   : > { %v5600_v59 = vpop.permute.xlu1 %5599  ;;  %v15017_v20 = vpop.permute.xlu2 %5625  ;;  %v5722_v12 = vsel %vm5717_vm8, %v5689_v18, %v5598_v13 }
 0x7db   : > { %v5604_v11 = vpop.permute.xlu0 %5603 }
 0x7dd   : > { %9991 = vmatmul.msk.f32.gmra.mxu2 %vm6173_vm9, %v5721_v31 }
 0x7e0   : > { %5917 = vrot.lane.b32.xlu1 %v14600_v19, %s10351_s20  ;;  %5925 = vrot.lane.b32.xlu2 %v14662_v45, %s10351_s20  ;;  %v5338_v19 = vld [vmem:[#allocation2 + $0x4f] sm:$0xff] }
 0x7e1   : > { %5921 = vrot.lane.b32.xlu0 %v14633_v29, %s10351_s20  ;;  %v5690_v23 = vsel %vm1037_vm4, %v5338_v19, %v14777_v63 }
 0x7e2   : > { %v5606_v42 = vpop.permute.xlu1 %5605  ;;  %v15032_v39 = vpop.permute.xlu2 %5631  ;;  %v5723_v9 = vsel %vm5717_vm8, %v5690_v23, %v5600_v59 }
 0x7e3   : > { %v15037_v2 = vpop.permute.xlu0 %5609 }
 0x7e5   : > { %9992 = vmatmul.msk.f32.gmra.mxu2 %vm6173_vm9, %v5722_v12 }
 0x7e8   : > { %5923 = vrot.lane.b32.xlu1 %v14650_v32, %s10351_s20  ;;  %5931 = vrot.lane.b32.xlu2 %v14698_v30, %s10351_s20  ;;  %v15063_v32 = vld [vmem:[#allocation2 + $0x67] sm:$0xff] }
 0x7e9   : > { %5927 = vrot.lane.b32.xlu0 %v14674_v8, %s10351_s20  ;;  %v5691_v63 = vsel %vm1037_vm4, %v15063_v32, %v14841_v46 }
 0x7ea   : > { %v15047_v29 = vpop.permute.xlu1 %5611  ;;  %v15049_v45 = vpop.permute.xlu2 %5637 }
 0x7eb   : > { %v15053_v36 = vpop.permute.xlu0 %5615 }
 0x7ed   : > { %9993 = vmatmul.msk.f32.gmra.mxu2 %vm6173_vm9, %v5723_v9 }
 0x7f0   : > { %5929 = vrot.lane.b32.xlu1 %v14686_v25, %s10351_s20  ;;  %5937 = vrot.lane.b32.xlu2 %v14734_v40, %s10351_s20  ;;  %v5724_v25 = vsel %vm5717_vm8, %v5691_v63, %v14969_v60  ;;  %v15077_v40 = vld [vmem:[#allocation2 + $0x210] sm:$0xff] }
 0x7f1   : > { %5933 = vrot.lane.b32.xlu0 %v14710_v15, %s10351_s20  ;;  %v15085_v15 = vld [vmem:[#allocation2 + $0x6f] sm:$0xff] }
 0x7f2   : > { %v15065_v8 = vpop.permute.xlu1 %5617  ;;  %v15067_v30 = vpop.permute.xlu2 %5643  ;;  %v5692_v60 = vsel %vm1037_vm4, %v15085_v15, %v14858_v55 }
 0x7f3   : > { %v15072_v0 = vpop.permute.xlu0 %5621 }
 0x7f5   : > { %9994 = vmatmul.msk.f32.gmra.mxu2 %vm6173_vm9, %v5724_v25 }
 0x7f8   : > { %5935 = vrot.lane.b32.xlu1 %v14722_v6, %s10351_s20  ;;  %5943 = vrot.lane.b32.xlu2 %v15077_v40, %s10351_s20  ;;  %v5725_v6 = vsel %vm5717_vm8, %v5692_v60, %v5604_v11 }
 0x7f9   : > { %5939 = vrot.lane.b32.xlu0 %v14748_v41, %s10351_s20  ;;  %v15106_v41 = vld [vmem:[#allocation2 + $0x87] sm:$0xff] }
 0x7fa   : > { %v15087_v46 = vpop.permute.xlu1 %5623  ;;  %v15089_v13 = vpop.permute.xlu2 %5649  ;;  %v5693_v11 = vsel %vm1037_vm4, %v15106_v41, %v14791_v21  ;;  %v15131_v21 = vld [vmem:[#allocation2 + $0x8f] sm:$0xff] }
 0x7fb   : > { %v15094_v59 = vpop.permute.xlu0 %5627  ;;  %v5726_v12 = vsel %vm5717_vm8, %v5693_v11, %v5606_v42  ;;  %v5694_v23 = vsel %vm1037_vm4, %v15131_v21, %v14865_v51 }
 0x7fd   : > { %9995 = vmatmul.msk.f32.gmra.mxu2 %vm6173_vm9, %v5725_v6 }
 0x800   : > { %5941 = vrot.lane.b32.xlu1 %v15098_v28, %s10351_s20  ;;  %6013 = vrot.lane.b32.xlu2 %v14773_v35, %s10354_s17  ;;  %v9955_v35 = vld [vmem:[%s17404_s8 + $0x28] sm:$0xff] }
 0x801   : > { %6009 = vrot.lane.b32.xlu0 %v14764_v48, %s10354_s17  ;;  %v10022_v48 = vld [vmem:[%s17404_s8 + $0x40] sm:$0xff]  ;;  %6283 = vmatpush.msra.mxu1 %v9955_v35 }
 0x802   : > { %v15108_v55 = vpop.permute.xlu1 %5629  ;;  %v15110_v31 = vpop.permute.xlu2 %5883  ;;  %7121 = vmatpush.msrb.mxu3 %v10022_v48  ;;  %v15251_v48 = vld [vmem:[#allocation2 + $0xef] sm:$0xff] }
 0x803   : > { %v15115_v18 = vpop.permute.xlu0 %5633 }
 0x805   : > { %9996 = vmatmul.msk.f32.gmra.mxu2 %vm6173_vm9, %v5726_v12  ;;  %v17799_v12 = vld [vmem:[#allocation37_spill] sm:$0xff] }
 0x808   : > { %6011 = vrot.lane.b32.xlu1 %v14746_v22, %s10354_s17  ;;  %6019 = vrot.lane.b32.xlu2 %v14787_v38, %s10354_s17  ;;  %v5727_v22 = vsel %vm5717_vm8, %v5694_v23, %v14980_v27  ;;  %v17801_v23 = vld [vmem:[#allocation6_spill] sm:$0xff] }
 0x809   : > { %6015 = vrot.lane.b32.xlu0 %v14779_v43, %s10354_s17  ;;  %v15151_v43 = vld [vmem:[#allocation2 + $0xa7] sm:$0xff] }
 0x80a   : > { %v15133_v42 = vpop.permute.xlu1 %5635  ;;  %v15135_v19 = vpop.permute.xlu2 %5889  ;;  %v5695_v27 = vsel %vm1037_vm4, %v15151_v43, %v14882_v5 }
 0x80b   : > { %v15140_v9 = vpop.permute.xlu0 %5639 }
 0x80d   : > { %9997 = vmatmul.msk.f32.gmra.mxu2 %vm6173_vm9, %v5727_v22 }
 0x810   : > { %6017 = vrot.lane.b32.xlu1 %v14766_v10, %s10354_s17  ;;  %6025 = vrot.lane.b32.xlu2 %v14803_v52, %s10354_s17  ;;  %v5728_v10 = vsel %vm5717_vm8, %v5695_v27, %v15037_v2 }
 0x811   : > { %6021 = vrot.lane.b32.xlu0 %v14793_v3, %s10354_s17  ;;  %v15171_v3 = vld [vmem:[#allocation2 + $0xaf] sm:$0xff] }
 0x812   : > { %v15153_v38 = vpop.permute.xlu1 %5641  ;;  %v15155_v51 = vpop.permute.xlu2 %5895  ;;  %v5696_v2 = vsel %vm1037_vm4, %v15171_v3, %v14807_v16 }
 0x813   : > { %v15160_v63 = vpop.permute.xlu0 %5645 }
 0x815   : > { %9998 = vmatmul.msk.f32.gmra.mxu2 %vm6173_vm9, %v5728_v10  ;;  %v17802_v10 = vld [vmem:[#allocation33_spill] sm:$0xff] }
 0x818   : > { %6023 = vrot.lane.b32.xlu1 %v14781_v50, %s10354_s17  ;;  %6031 = vrot.lane.b32.xlu2 %v14819_v58, %s10354_s17  ;;  %v5729_v50 = vsel %vm5717_vm8, %v5696_v2, %v15047_v29  ;;  %v17803_v2 = vld [vmem:[#allocation34_spill] sm:$0xff] }
 0x819   : > { %6027 = vrot.lane.b32.xlu0 %v14811_v53, %s10354_s17  ;;  %v15191_v53 = vld [vmem:[#allocation2 + $0xc7] sm:$0xff] }
 0x81a   : > { %v15173_v52 = vpop.permute.xlu1 %5647  ;;  %v15175_v5 = vpop.permute.xlu2 %5901  ;;  %v5697_v29 = vsel %vm1037_vm4, %v15191_v53, %v14886_v62 }
 0x81b   : > { %v15180_v25 = vpop.permute.xlu0 %5651 }
 0x81d   : > { %9999 = vmatmul.msk.f32.gmra.mxu2 %vm6173_vm9, %v5729_v50  ;;  %v17804_v50 = vld [vmem:[#allocation38_spill] sm:$0xff] }
 0x820   : > { %6029 = vrot.lane.b32.xlu1 %v14795_v1, %s10354_s17  ;;  %6037 = vrot.lane.b32.xlu2 %v14835_v56, %s10354_s17  ;;  %v5730_v1 = vsel %vm5717_vm8, %v5697_v29, %v14991_v44  ;;  %v15271_v29 = vld [vmem:[#allocation2 + $0x107] sm:$0xff] }
 0x821   : > { %6033 = vrot.lane.b32.xlu0 %v14827_v7, %s10354_s17  ;;  %v15211_v7 = vld [vmem:[#allocation2 + $0xcf] sm:$0xff] }
 0x822   : > { %v15193_v58 = vpop.permute.xlu1 %5881  ;;  %v15195_v16 = vpop.permute.xlu2 %5907  ;;  %v5698_v44 = vsel %vm1037_vm4, %v15211_v7, %v14900_v61 }
 0x823   : > { %v15200_v60 = vpop.permute.xlu0 %5885 }
 0x825   : > { %10000 = vmatmul.msk.f32.gmra.mxu2 %vm6173_vm9, %v5730_v1 }
 0x828   : > { %6035 = vrot.lane.b32.xlu1 %v14813_v47, %s10354_s17  ;;  %6043 = vrot.lane.b32.xlu2 %v14856_v37, %s10354_s17  ;;  %v5731_v47 = vsel %vm5717_vm8, %v5698_v44, %v15053_v36 }
 0x829   : > { %6039 = vrot.lane.b32.xlu0 %v14848_v54, %s10354_s17  ;;  %v15231_v54 = vld [vmem:[#allocation2 + $0xe7] sm:$0xff] }
 0x82a   : > { %v15213_v56 = vpop.permute.xlu1 %5887  ;;  %v15215_v62 = vpop.permute.xlu2 %5913  ;;  %v5699_v36 = vsel %vm1037_vm4, %v15231_v54, %v14825_v33 }
 0x82b   : > { %v15220_v6 = vpop.permute.xlu0 %5891 }
 0x82d   : > { %10001 = vmatmul.msk.f32.gmra.mxu2 %vm6173_vm9, %v5731_v47  ;;  %v17806_v47 = vld [vmem:[#allocation29_spill] sm:$0xff] }
 0x830   : > { %6041 = vrot.lane.b32.xlu1 %v14829_v49, %s10354_s17  ;;  %6049 = vrot.lane.b32.xlu2 %v14880_v17, %s10354_s17  ;;  %v5732_v49 = vsel %vm5717_vm8, %v5699_v36, %v15065_v8  ;;  %v17797_v17 = vld [vmem:[#allocation11_spill] sm:$0xff]  ;;  %v5700_v8 = vsel %vm1037_vm4, %v15251_v48, %v17801_v23  ;;  %v15291_v23 = vld [vmem:[#allocation2 + $0x10f] sm:$0xff] }
 0x831   : > { %6045 = vrot.lane.b32.xlu0 %v14872_v24, %s10354_s17  ;;  %v17798_v24 = vld [vmem:[#allocation5_spill] sm:$0xff]  ;;  %v5733_v27 = vsel %vm5717_vm8, %v5700_v8, %v15005_v26  ;;  %v5701_v26 = vsel %vm1037_vm4, %v15271_v29, %v17806_v47  ;;  %v17812_v47 = vld [vmem:[#allocation15_spill] sm:$0xff] }
 0x832   : > { %v15233_v37 = vpop.permute.xlu1 %5893  ;;  %v15235_v61 = vpop.permute.xlu2 %5919 }
 0x833   : > { %17796 = vst [vmem:[#allocation42_spill] sm:$0xff] %v15235_v61  ;;  %v15240_v11 = vpop.permute.xlu0 %5897 }
 0x835   : > { %10002 = vmatmul.msk.f32.gmra.mxu2 %vm6173_vm9, %v5732_v49  ;;  %v5734_v49 = vsel %vm5717_vm8, %v5701_v26, %v15072_v0  ;;  %v15309_v26 = vld [vmem:[#allocation2 + $0x209] sm:$0xff] }
 0x838   : > { %6047 = vrot.lane.b32.xlu1 %v17797_v17, %s10354_s17  ;;  %6055 = vrot.lane.b32.xlu2 %v17798_v24, %s10354_s17  ;;  %v17807_v17 = vld [vmem:[#allocation24_spill] sm:$0xff]  ;;  %v17808_v24 = vld [vmem:[#allocation39_spill] sm:$0xff] }
 0x839   : > { %6051 = vrot.lane.b32.xlu0 %v17799_v12, %s10354_s17  ;;  %v17809_v12 = vld [vmem:[#allocation21_spill] sm:$0xff] }
 0x83a   : > { %v15253_v35 = vpop.permute.xlu1 %5899  ;;  %v15255_v33 = vpop.permute.xlu2 %5925 }
 0x83b   : > { %17800 = vst [vmem:[#allocation13_spill] sm:$0xff] %v15255_v33  ;;  %v15260_v22 = vpop.permute.xlu0 %5903  ;;  %v17821_v33 = vld [vmem:[#allocation17_spill] sm:$0xff] }
 0x83d   : > { %10003 = vmatmul.msk.f32.gmra.mxu2 %vm6173_vm9, %v5733_v27 }
 0x840   : > { %6053 = vrot.lane.b32.xlu1 %v17802_v10, %s10354_s17  ;;  %6061 = vrot.lane.b32.xlu2 %v17803_v2, %s10354_s17  ;;  %v17811_v10 = vld [vmem:[#allocation41_spill] sm:$0xff] }
 0x841   : > { %6057 = vrot.lane.b32.xlu0 %v17804_v50, %s10354_s17  ;;  %v5702_v0 = vsel %vm1037_vm4, %v15291_v23, %v17811_v10 }
 0x842   : > { %v15273_v1 = vpop.permute.xlu1 %5905  ;;  %v15275_v44 = vpop.permute.xlu2 %5931  ;;  %v5735_v50 = vsel %vm5717_vm8, %v5702_v0, %v15087_v46 }
 0x843   : > { %17805 = vst [vmem:[#allocation35_spill] sm:$0xff] %v15275_v44  ;;  %v15280_v36 = vpop.permute.xlu0 %5909 }
 0x845   : > { %10004 = vmatmul.msk.f32.gmra.mxu2 %vm6173_vm9, %v5734_v49  ;;  %v9954_v49 = vld [vmem:[%s17404_s8 + $0x20] sm:$0xff] }
 0x846   : > { %6284 = vmatpush.msra.mxu1 %v9954_v49  ;;  %v17816_v49 = vld [vmem:[#allocation16_spill] sm:$0xff] }
 0x848   : > { %6059 = vrot.lane.b32.xlu1 %v17807_v17, %s10354_s17  ;;  %6067 = vrot.lane.b32.xlu2 %v17808_v24, %s10354_s17  ;;  %v15316_v17 = vld [vmem:[#allocation2 + $0x127] sm:$0xff] }
 0x849   : > { %6063 = vrot.lane.b32.xlu0 %v17809_v12, %s10354_s17  ;;  %v17814_v12 = vld [vmem:[#allocation8_spill] sm:$0xff] }
 0x84a   : > { %v15293_v8 = vpop.permute.xlu1 %5911  ;;  %v15295_v27 = vpop.permute.xlu2 %5937 }
 0x84b   : > { %17810 = vst [vmem:[#allocation46_spill] sm:$0xff] %v15295_v27  ;;  %v15300_v2 = vpop.permute.xlu0 %5915 }
 0x84d   : > { %10005 = vmatmul.msk.f32.gmra.mxu2 %vm6173_vm9, %v5735_v50  ;;  %v9953_v50 = vld [vmem:[%s17404_s8 + $0x18] sm:$0xff] }
 0x84e   : > { %6285 = vmatpush.msra.mxu1 %v9953_v50  ;;  %v17819_v50 = vld [vmem:[#allocation18_spill] sm:$0xff] }
 0x850   : > { %6065 = vrot.lane.b32.xlu1 %v17812_v47, %s10354_s17  ;;  %6720 = vrot.lane.b32.xlu2 %v14948_v34, %s10351_s20  ;;  %v5703_v34 = vsel %vm1037_vm4, %v15316_v17, %v17814_v12  ;;  %v15333_v47 = vld [vmem:[#allocation2 + $0x211] sm:$0xff] }
 0x851   : > { %6069 = vrot.lane.b32.xlu0 %v15309_v26, %s10354_s17  ;;  %v5736_v0 = vsel %vm5717_vm8, %v5703_v34, %v15017_v20  ;;  %v17817_v12 = vld [vmem:[#allocation10_spill] sm:$0xff]  ;;  %v15344_v34 = vld [vmem:[#allocation2 + $0x12f] sm:$0xff] }
 0x852   : > { %v15318_v46 = vpop.permute.xlu1 %5917  ;;  %v15320_v24 = vpop.permute.xlu2 %5943  ;;  %v10021_v20 = vld [vmem:[%s17404_s8 + $0x38] sm:$0xff]  ;;  %v5704_v27 = vsel %vm1037_vm4, %v15344_v34, %v17819_v50 }
 0x853   : > { %17813 = vst [vmem:[#allocation36_spill] sm:$0xff] %v15320_v24  ;;  %v15325_v10 = vpop.permute.xlu0 %5921  ;;  %7122 = vmatpush.msrb.mxu3 %v10021_v20  ;;  %v15363_v20 = vld [vmem:[#allocation2 + $0x147] sm:$0xff] }
 0x854   : > { %17815 = vst [vmem:[#allocation47_spill] sm:$0xff] %v15325_v10 }
 0x855   : > { %10006 = vmatmul.msk.f32.gmra.mxu2 %vm6173_vm9, %v5736_v0  ;;  %17823 = vst [vmem:[#allocation22_spill] sm:$0xff] %v15363_v20 }
 0x858   : > { %6071 = vrot.lane.b32.xlu1 %v15333_v47, %s10354_s17  ;;  %6726 = vrot.lane.b32.xlu2 %v17816_v49, %s10351_s20  ;;  %v5737_v49 = vsel %vm5717_vm8, %v5704_v27, %v15094_v59 }
 0x859   : > { %6722 = vrot.lane.b32.xlu0 %v17817_v12, %s10351_s20  ;;  %v6630_v12 = vld [vmem:[#allocation2 + $0xa8] sm:$0xff] }
 0x85a   : > { %v15346_v24 = vpop.permute.xlu1 %5923  ;;  %v15348_v0 = vpop.permute.xlu2 %6013 }
 0x85b   : > { %17818 = vst [vmem:[#allocation23_spill] sm:$0xff] %v15346_v24  ;;  %v15353_v44 = vpop.permute.xlu0 %5927  ;;  %v17822_v24 = vld [vmem:[#allocation30_spill] sm:$0xff] }
 0x85c   : > { %17820 = vst [vmem:[#allocation48_spill] sm:$0xff] %v15353_v44  ;;  %v17825_v44 = vld [vmem:[#allocation32_spill] sm:$0xff] }
 0x85d   : > { %10007 = vmatmul.msk.f32.gmra.mxu2 %vm6173_vm9, %v5737_v49  ;;  %v5705_v59 = vsel %vm1037_vm4, %v15363_v20, %v17825_v44  ;;  %v6629_v49 = vld [vmem:[#allocation2 + $0x90] sm:$0xff]  ;;  %v5753_v20 = vld [vmem:[#allocation2 + $0x27] sm:$0xff] }
 0x860   : > { %6724 = vrot.lane.b32.xlu1 %v17821_v33, %s10351_s20  ;;  %6732 = vrot.lane.b32.xlu2 %v6630_v12, %s10351_s20  ;;  %v5738_v33 = vsel %vm5717_vm8, %v5705_v59, %v15108_v55  ;;  %v6633_v12 = vld [vmem:[#allocation2 + $0xd0] sm:$0xff] }
 0x861   : > { %6728 = vrot.lane.b32.xlu0 %v17822_v24, %s10351_s20  ;;  %v6631_v24 = vld [vmem:[#allocation2 + $0xb0] sm:$0xff] }
 0x862   : > { %v15365_v10 = vpop.permute.xlu1 %5929  ;;  %v15367_v50 = vpop.permute.xlu2 %6019 }
 0x863   : > { %17824 = vst [vmem:[#allocation49_spill] sm:$0xff] %v15365_v10  ;;  %v15372_v27 = vpop.permute.xlu0 %5933  ;;  %v15380_v10 = vld [vmem:[#allocation2 + $0x14f] sm:$0xff] }
 0x864   : > { %17826 = vst [vmem:[#allocation20_spill] sm:$0xff] %v15372_v27  ;;  %v17829_v27 = vld [vmem:[#allocation31_spill] sm:$0xff] }
 0x865   : > { %10008 = vmatmul.msk.f32.gmra.mxu2 %vm6173_vm9, %v5738_v33  ;;  %17827 = vst [vmem:[#allocation50_spill] sm:$0xff] %v15380_v10  ;;  %v5706_v55 = vsel %vm1037_vm4, %v15380_v10, %v17829_v27  ;;  %v6639_v10 = vld [vmem:[#allocation2 + $0x130] sm:$0xff] }
 0x866   : > { %v5739_v33 = vsel %vm5717_vm8, %v5706_v55, %v15032_v39  ;;  %v6105_v55 = vsel %vm1037_vm4, %v5753_v20, %v15193_v58  ;;  %v15415_v58 = vpop.f32.mrf.mxu2  ;;  %v6106_v20 = vsel %vm1037_vm4, %v15015_v57, %v15110_v31  ;;  %v6640_v57 = vld [vmem:[#allocation2 + $0x148] sm:$0xff] }
 0x867   : > { %17833 = vst [vmem:[#allocation25_spill] sm:$0xff] %v15415_v58  ;;  %v6642_v58 = vld [vmem:[#allocation2 + $0x168] sm:$0xff] }
 0x868   : > { %6730 = vrot.lane.b32.xlu1 %v6629_v49, %s10351_s20  ;;  %6738 = vrot.lane.b32.xlu2 %v6633_v12, %s10351_s20  ;;  %v6632_v49 = vld [vmem:[#allocation2 + $0xc8] sm:$0xff] }
 0x869   : > { %6734 = vrot.lane.b32.xlu0 %v6631_v24, %s10351_s20  ;;  %v6636_v12 = vld [vmem:[#allocation2 + $0x108] sm:$0xff] }
 0x86a   : > { %v15382_v61 = vpop.permute.xlu1 %5935  ;;  %v15384_v44 = vpop.permute.xlu2 %6025  ;;  %v6634_v24 = vld [vmem:[#allocation2 + $0xe8] sm:$0xff] }
 0x86b   : > { %17828 = vst [vmem:[#allocation40_spill] sm:$0xff] %v15382_v61  ;;  %v15389_v59 = vpop.permute.xlu0 %5939  ;;  %v15397_v61 = vld [vmem:[#allocation2 + $0x167] sm:$0xff] }
 0x86c   : > { %17830 = vst [vmem:[#allocation51_spill] sm:$0xff] %v15389_v59  ;;  %v17832_v59 = vld [vmem:[#allocation7_spill] sm:$0xff] }
 0x86d   : > { %10009 = vmatmul.msk.f32.gmra.mxu2 %vm6173_vm9, %v5739_v33  ;;  %v5707_v39 = vsel %vm1037_vm4, %v15397_v61, %v17832_v59  ;;  %v6637_v59 = vld [vmem:[#allocation2 + $0x110] sm:$0xff] }
 0x86e   : > { %v15435_v31 = vpop.f32.mrf.mxu2 }
 0x86f   : > { %17835 = vst [vmem:[#allocation43_spill] sm:$0xff] %v15435_v31 }
 0x870   : > { %6736 = vrot.lane.b32.xlu1 %v6632_v49, %s10351_s20  ;;  %6744 = vrot.lane.b32.xlu2 %v6636_v12, %s10351_s20  ;;  %v5740_v49 = vsel %vm5717_vm8, %v5707_v39, %v15115_v18  ;;  %v15418_v18 = vld [vmem:[#allocation2 + $0x16f] sm:$0xff] }
 0x871   : > { %6740 = vrot.lane.b32.xlu0 %v6634_v24, %s10351_s20 }
 0x872   : > { %v15399_v27 = vpop.permute.xlu1 %5941  ;;  %v15408_v12 = vpop.permute.xlu2 %6031 }
 0x873   : > { %17831 = vst [vmem:[#allocation28_spill] sm:$0xff] %v15399_v27  ;;  %v6010_v33 = vpop.permute.xlu0 %6009  ;;  %v6635_v27 = vld [vmem:[#allocation2 + $0xf0] sm:$0xff] }
 0x874   : > { %v6137_v24 = vsel %vm5717_vm8, %v6105_v55, %v6010_v33  ;;  %v17834_v55 = vld [vmem:[#allocation4_spill] sm:$0xff] }
 0x875   : > { %9956 = vmatmul.msk.f32.vlgmr.msra.gmra.mxu1 %vm6173_vm9, %v6137_v24  ;;  %10010 = vmatmul.msk.f32.gmra.mxu2 %vm6173_vm9, %v5740_v49  ;;  %v5708_v33 = vsel %vm1037_vm4, %v15418_v18, %v17834_v55 }
 0x878   : > { %6742 = vrot.lane.b32.xlu1 %v6635_v27, %s10351_s20  ;;  %6750 = vrot.lane.b32.xlu2 %v6639_v10, %s10351_s20  ;;  %v5741_v10 = vsel %vm5717_vm8, %v5708_v33, %v15133_v42  ;;  %v6107_v33 = vsel %vm1037_vm4, %v15030_v4, %v15200_v60  ;;  %v6643_v4 = vld [vmem:[#allocation2 + $0x170] sm:$0xff] }
 0x879   : > { %6746 = vrot.lane.b32.xlu0 %v6637_v59, %s10351_s20  ;;  %v6638_v59 = vld [vmem:[#allocation2 + $0x128] sm:$0xff] }
 0x87a   : > { %v6012_v39 = vpop.permute.xlu1 %6011  ;;  %v15431_v24 = vpop.permute.xlu2 %6037  ;;  %v15459_v60 = vld [vmem:[#allocation2 + $0x18f] sm:$0xff] }
 0x87b   : > { %v6138_v27 = vsel %vm5717_vm8, %v6106_v20, %v6012_v39  ;;  %v6016_v49 = vpop.permute.xlu0 %6015  ;;  %v15438_v20 = vld [vmem:[#allocation2 + $0x187] sm:$0xff]  ;;  %v17837_v39 = vld [vmem:[#allocation26_spill] sm:$0xff]  ;;  %17838 = vst [vmem:[#allocation44_spill] sm:$0xff] %v15459_v60 }
 0x87c   : > { %17836 = vst [vmem:[#allocation52_spill] sm:$0xff] %v15438_v20  ;;  %v5709_v55 = vsel %vm1037_vm4, %v15438_v20, %v17837_v39  ;;  %v17839_v39 = vld [vmem:[#allocation12_spill] sm:$0xff] }
 0x87d   : > { %9957 = vmatmul.msk.f32.gmra.mxu1 %vm6173_vm9, %v6138_v27  ;;  %10011 = vmatmul.msk.f32.gmra.mxu2 %vm6173_vm9, %v5741_v10  ;;  %v6139_v10 = vsel %vm5717_vm8, %v6107_v33, %v15348_v0  ;;  %v6648_v20 = vld [vmem:[#allocation2 + $0x1c8] sm:$0xff] }
 0x880   : > { %6748 = vrot.lane.b32.xlu1 %v6638_v59, %s10351_s20  ;;  %6756 = vrot.lane.b32.xlu2 %v6642_v58, %s10351_s20  ;;  %v5742_v58 = vsel %vm5717_vm8, %v5709_v55, %v15049_v45  ;;  %v6641_v59 = vld [vmem:[#allocation2 + $0x150] sm:$0xff]  ;;  %v5710_v55 = vsel %vm1037_vm4, %v15459_v60, %v17839_v39  ;;  %v15483_v39 = vld [vmem:[#allocation2 + $0x1a7] sm:$0xff] }
 0x881   : > { %6752 = vrot.lane.b32.xlu0 %v6640_v57, %s10351_s20  ;;  %v6645_v57 = vld [vmem:[#allocation2 + $0x190] sm:$0xff] }
 0x882   : > { %v6018_v42 = vpop.permute.xlu1 %6017  ;;  %v15454_v31 = vpop.permute.xlu2 %6043  ;;  %v15461_v45 = vld [vmem:[#allocation2 + $0x4f] sm:$0xff] }
 0x883   : > { %v15446_v27 = vpop.permute.xlu0 %6021  ;;  %v6108_v33 = vsel %vm1037_vm4, %v15461_v45, %v15213_v56  ;;  %v6646_v56 = vld [vmem:[#allocation2 + $0x1a8] sm:$0xff]  ;;  %v6651_v60 = vld [vmem:[#allocation2 + $0x1f0] sm:$0xff] }
 0x885   : > { %9958 = vmatmul.msk.f32.gmra.mxu1 %vm6173_vm9, %v6139_v10  ;;  %10012 = vmatmul.msk.f32.gmra.mxu2 %vm6173_vm9, %v5742_v58  ;;  %v15471_v58 = vpop.f32.mrf.mxu2 }
 0x886   : > { %17840 = vst [vmem:[#allocation53_spill] sm:$0xff] %v15471_v58 }
 0x888   : > { %6754 = vrot.lane.b32.xlu1 %v6641_v59, %s10351_s20  ;;  %6762 = vrot.lane.b32.xlu2 %v6645_v57, %s10351_s20  ;;  %v5743_v59 = vsel %vm5717_vm8, %v5710_v55, %v15140_v9  ;;  %v6140_v57 = vsel %vm5717_vm8, %v6108_v33, %v6016_v49  ;;  %v17841_v49 = vld [vmem:[#allocation19_spill] sm:$0xff]  ;;  %v6109_v33 = vsel %vm1037_vm4, %v15063_v32, %v15135_v19  ;;  %v6649_v32 = vld [vmem:[#allocation2 + $0x1d0] sm:$0xff] }
 0x889   : > { %6758 = vrot.lane.b32.xlu0 %v6643_v4, %s10351_s20  ;;  %v6644_v4 = vld [vmem:[#allocation2 + $0x188] sm:$0xff]  ;;  %v5711_v55 = vsel %vm1037_vm4, %v15483_v39, %v17841_v49 }
 0x88a   : > { %v15463_v0 = vpop.permute.xlu1 %6023  ;;  %v15485_v58 = vpop.permute.xlu2 %6049  ;;  %v15507_v19 = vld [vmem:[#allocation2 + $0x1af] sm:$0xff] }
 0x88b   : > { %v15473_v10 = vpop.permute.xlu0 %6027 }
 0x88d   : > { %9959 = vmatmul.msk.f32.gmra.mxu1 %vm6173_vm9, %v6140_v57  ;;  %10013 = vmatmul.msk.f32.gmra.mxu2 %vm6173_vm9, %v5743_v59  ;;  %v6141_v57 = vsel %vm5717_vm8, %v6109_v33, %v6018_v42  ;;  %v17842_v42 = vld [vmem:[#allocation9_spill] sm:$0xff] }
 0x88e   : > { %v5712_v49 = vsel %vm1037_vm4, %v15507_v19, %v17842_v42  ;;  %v6650_v42 = vld [vmem:[#allocation2 + $0x1e8] sm:$0xff] }
 0x890   : > { %6760 = vrot.lane.b32.xlu1 %v6644_v4, %s10351_s20  ;;  %6768 = vrot.lane.b32.xlu2 %v6648_v20, %s10351_s20  ;;  %v5744_v20 = vsel %vm5717_vm8, %v5711_v55, %v15153_v38  ;;  %v15500_v4 = vpop.f32.mrf.mxu2  ;;  %v6110_v55 = vsel %vm1037_vm4, %v15085_v15, %v15220_v6  ;;  %v17843_v6 = vld [vmem:[#allocation14_spill] sm:$0xff] }
 0x891   : > { %6764 = vrot.lane.b32.xlu0 %v6646_v56, %s10351_s20  ;;  %v6647_v56 = vld [vmem:[#allocation2 + $0x1b0] sm:$0xff] }
 0x892   : > { %v15487_v9 = vpop.permute.xlu1 %6029 }
 0x893   : > { %v15495_v59 = vpop.permute.xlu0 %6033 }
 0x895   : > { %9960 = vmatmul.msk.f32.gmra.mxu1 %vm6173_vm9, %v6141_v57  ;;  %10014 = vmatmul.msk.f32.gmra.mxu2 %vm6173_vm9, %v5744_v20  ;;  %v6142_v20 = vsel %vm5717_vm8, %v6110_v55, %v15367_v50  ;;  %v15523_v57 = vpop.permute.xlu2 %6055 }
 0x898   : > { %6766 = vrot.lane.b32.xlu1 %v6647_v56, %s10351_s20  ;;  %6774 = vrot.lane.b32.xlu2 %v6651_v60, %s10351_s20  ;;  %v5745_v60 = vsel %vm5717_vm8, %v5712_v49, %v15067_v30  ;;  %v6654_v56 = vld [vmem:[#allocation2 + $0x228] sm:$0xff]  ;;  %v6111_v49 = vsel %vm1037_vm4, %v15106_v41, %v15233_v37 }
 0x899   : > { %6770 = vrot.lane.b32.xlu0 %v6649_v32, %s10351_s20  ;;  %v15527_v32 = vpop.f32.mrf.mxu2  ;;  %v15533_v30 = vld [vmem:[#allocation2 + $0x1c7] sm:$0xff] }
 0x89a   : > { %v15509_v38 = vpop.permute.xlu1 %6035  ;;  %v5713_v50 = vsel %vm1037_vm4, %v15533_v30, %v17843_v6 }
 0x89b   : > { %v15517_v33 = vpop.permute.xlu0 %6039 }
 0x89d   : > { %9961 = vmatmul.msk.f32.gmra.mxu1 %vm6173_vm9, %v6142_v20  ;;  %10015 = vmatmul.msk.f32.gmra.mxu2 %vm6173_vm9, %v5745_v60  ;;  %v5746_v60 = vsel %vm5717_vm8, %v5713_v50, %v15160_v63  ;;  %v15551_v20 = vpop.permute.xlu2 %6061  ;;  %v15559_v63 = vld [vmem:[#allocation2 + $0x1cf] sm:$0xff]  ;;  %v6112_v50 = vsel %vm1037_vm4, %v15131_v21, %v15155_v51 }
 0x89e   : > { %v6658_v21 = vld [vmem:[#allocation2 + $0x69] sm:$0xff] }
 0x89f   : > { %v10020_v51 = vld [vmem:[%s17404_s8 + $0x30] sm:$0xff] }
 0x8a0   : > { %6772 = vrot.lane.b32.xlu1 %v6650_v42, %s10351_s20  ;;  %6780 = vrot.lane.b32.xlu2 %v6654_v56, %s10351_s20  ;;  %v6655_v56 = vld [vmem:[#allocation2 + $0x230] sm:$0xff] }
 0x8a1   : > { %6776 = vrot.lane.b32.xlu0 %v15098_v28, %s10351_s20  ;;  %v6143_v28 = vsel %vm5717_vm8, %v6111_v49, %v15446_v27  ;;  %v6657_v42 = vld [vmem:[#allocation2 + $0x51] sm:$0xff]  ;;  %v15556_v41 = vpop.f32.mrf.mxu2  ;;  %v17844_v27 = vld [vmem:[#allocation27_spill] sm:$0xff]  ;;  %7123 = vmatpush.msrb.mxu3 %v10020_v51 }
 0x8a2   : > { %v15535_v15 = vpop.permute.xlu1 %6041  ;;  %v5714_v6 = vsel %vm1037_vm4, %v15559_v63, %v17844_v27  ;;  %v17845_v27 = vld [vmem:[#allocation3_spill] sm:$0xff]  ;;  %v6663_v51 = vld [vmem:[#allocation2 + $0xb1] sm:$0xff] }
 0x8a3   : > { %v15543_v55 = vpop.permute.xlu0 %6045 }
 0x8a5   : > { %9962 = vmatmul.msk.f32.gmra.mxu1 %vm6173_vm9, %v6143_v28  ;;  %10016 = vmatmul.msk.f32.gmra.mxu2 %vm6173_vm9, %v5746_v60  ;;  %v6144_v60 = vsel %vm5717_vm8, %v6112_v50, %v15463_v0  ;;  %v6656_v28 = vld [vmem:[#allocation2 + $0x49] sm:$0xff]  ;;  %v6113_v50 = vsel %vm1037_vm4, %v15151_v43, %v15240_v11  ;;  %v6661_v43 = vld [vmem:[#allocation2 + $0x91] sm:$0xff] }
 0x8a6   : > { %v15608_v11 = vld [vmem:[#allocation2 + $0x1ef] sm:$0xff] }
 0x8a8   : > { %6778 = vrot.lane.b32.xlu1 %v15077_v40, %s10351_s20  ;;  %6850 = vrot.lane.b32.xlu2 %v6657_v42, %s10354_s17  ;;  %v5747_v40 = vsel %vm5717_vm8, %v5714_v6, %v15173_v52  ;;  %v15577_v42 = vpop.permute.xlu2 %6067  ;;  %v15585_v52 = vld [vmem:[#allocation2 + $0x1e7] sm:$0xff] }
 0x8a9   : > { %6782 = vrot.lane.b32.xlu0 %v6655_v56, %s10351_s20  ;;  %v6660_v56 = vld [vmem:[#allocation2 + $0x89] sm:$0xff]  ;;  %v5715_v6 = vsel %vm1037_vm4, %v15585_v52, %v17845_v27 }
 0x8aa   : > { %v15561_v37 = vpop.permute.xlu1 %6047 }
 0x8ab   : > { %v15569_v49 = vpop.permute.xlu0 %6051 }
 0x8ad   : > { %9963 = vmatmul.msk.f32.gmra.mxu1 %vm6173_vm9, %v6144_v60  ;;  %10017 = vmatmul.msk.f32.gmra.mxu2 %vm6173_vm9, %v5747_v40  ;;  %v15595_v40 = vpop.f32.mrf.mxu2 }
 0x8b0   : > { %6848 = vrot.lane.b32.xlu1 %v6656_v28, %s10354_s17  ;;  %6856 = vrot.lane.b32.xlu2 %v6660_v56, %s10354_s17  ;;  %v5748_v28 = vsel %vm5717_vm8, %v5715_v6, %v15089_v13  ;;  %v6145_v56 = vsel %vm5717_vm8, %v6113_v50, %v15384_v44  ;;  %v15610_v27 = vpop.permute.xlu2 %6720  ;;  %v5716_v44 = vsel %vm1037_vm4, %v15608_v11, %v14989_v14  ;;  %v6666_v14 = vld [vmem:[#allocation2 + $0xe9] sm:$0xff] }
 0x8b1   : > { %6852 = vrot.lane.b32.xlu0 %v6658_v21, %s10354_s17  ;;  %v6659_v21 = vld [vmem:[#allocation2 + $0x71] sm:$0xff]  ;;  %v6114_v6 = vsel %vm1037_vm4, %v15171_v3, %v15253_v35  ;;  %v6664_v3 = vld [vmem:[#allocation2 + $0xc9] sm:$0xff] }
 0x8b2   : > { %v15587_v0 = vpop.permute.xlu1 %6053 }
 0x8b3   : > { %v15597_v60 = vpop.permute.xlu0 %6057 }
 0x8b5   : > { %9964 = vmatmul.msk.f32.gmra.mxu1 %vm6173_vm9, %v6145_v56  ;;  %10018 = vmatmul.msk.f32.gmra.mxu2 %vm6173_vm9, %v5748_v28  ;;  %v5749_v28 = vsel %vm5717_vm8, %v5716_v44, %v15180_v25  ;;  %v6146_v56 = vsel %vm5717_vm8, %v6114_v6, %v15473_v10  ;;  %v6115_v25 = vsel %vm1037_vm4, %v15191_v53, %v15175_v5  ;;  %v6665_v6 = vld [vmem:[#allocation2 + $0xd1] sm:$0xff] }
 0x8b6   : > { %v6116_v5 = vsel %vm1037_vm4, %v15211_v7, %v15260_v22  ;;  %v6117_v7 = vsel %vm1037_vm4, %v15231_v54, %v15273_v1  ;;  %v6118_v54 = vsel %vm1037_vm4, %v15251_v48, %v15195_v16  ;;  %v6119_v16 = vsel %vm1037_vm4, %v15271_v29, %v15280_v36 }
 0x8b7   : > { %v6120_v29 = vsel %vm1037_vm4, %v15291_v23, %v15293_v8  ;;  %v6121_v23 = vsel %vm1037_vm4, %v15316_v17, %v15215_v62  ;;  %v6122_v62 = vsel %vm1037_vm4, %v15344_v34, %v15300_v2 }
 0x8b8   : > { %6854 = vrot.lane.b32.xlu1 %v6659_v21, %s10354_s17  ;;  %6862 = vrot.lane.b32.xlu2 %v6663_v51, %s10354_s17  ;;  %v15626_v21 = vpop.f32.mrf.mxu2  ;;  %v6662_v51 = vld [vmem:[#allocation2 + $0xa9] sm:$0xff]  ;;  %v15642_v44 = vpop.permute.xlu2 %6726  ;;  %v6153_v8 = vsel %vm5717_vm8, %v6121_v23, %v15535_v15  ;;  %v6154_v17 = vsel %vm5717_vm8, %v6122_v62, %v15454_v31  ;;  %v17847_v23 = vld [vmem:[#allocation42_spill] sm:$0xff]  ;;  %v17849_v62 = vld [vmem:[#allocation47_spill] sm:$0xff] }
 0x8b9   : > { %6858 = vrot.lane.b32.xlu0 %v6661_v43, %s10354_s17  ;;  %v6147_v43 = vsel %vm5717_vm8, %v6115_v25, %v15487_v9  ;;  %v6148_v9 = vsel %vm5717_vm8, %v6116_v5, %v15408_v12  ;;  %v6672_v25 = vld [vmem:[#allocation2 + $0x149] sm:$0xff]  ;;  %v6149_v12 = vsel %vm5717_vm8, %v6117_v7, %v15495_v59  ;;  %v6150_v59 = vsel %vm5717_vm8, %v6118_v54, %v15509_v38  ;;  %v6679_v54 = vld [vmem:[#allocation2 + $0x1b1] sm:$0xff] }
 0x8ba   : > { %v15612_v13 = vpop.permute.xlu1 %6059  ;;  %v6676_v7 = vld [vmem:[#allocation2 + $0x189] sm:$0xff]  ;;  %v6151_v38 = vsel %vm5717_vm8, %v6119_v16, %v15431_v24  ;;  %v6152_v24 = vsel %vm5717_vm8, %v6120_v29, %v15517_v33 }
 0x8bb   : > { %v15620_v50 = vpop.permute.xlu0 %6063  ;;  %v6686_v15 = vld [vmem:[#allocation2 + $0x229] sm:$0xff] }
 0x8bd   : > { %9965 = vmatmul.msk.f32.gmra.mxu1 %vm6173_vm9, %v6146_v56  ;;  %10019 = vmatmul.msk.f32.gmra.mxu2 %vm6173_vm9, %v5749_v28  ;;  %v6669_v28 = vld [vmem:[#allocation2 + $0x111] sm:$0xff] }
 0x8be   : > { %v6667_v56 = vld [vmem:[#allocation2 + $0xf1] sm:$0xff] }
 0x8c0   : > { %6860 = vrot.lane.b32.xlu1 %v6662_v51, %s10354_s17  ;;  %6868 = vrot.lane.b32.xlu2 %v6666_v14, %s10354_s17  ;;  %v15658_v14 = vpop.permute.xlu2 %6732 }
 0x8c1   : > { %6864 = vrot.lane.b32.xlu0 %v6664_v3, %s10354_s17  ;;  %v6668_v3 = vld [vmem:[#allocation2 + $0x109] sm:$0xff] }
 0x8c2   : > { %v15633_v35 = vpop.permute.xlu1 %6065 }
 0x8c3   : > { %v15638_v10 = vpop.permute.xlu0 %6069 }
 0x8c5   : > { %9966 = vmatmul.msk.f32.gmra.mxu1 %vm6173_vm9, %v6147_v43  ;;  %v6670_v43 = vld [vmem:[#allocation2 + $0x129] sm:$0xff] }
 0x8c8   : > { %6866 = vrot.lane.b32.xlu1 %v6665_v6, %s10354_s17  ;;  %6874 = vrot.lane.b32.xlu2 %v6669_v28, %s10354_s17  ;;  %v6671_v28 = vld [vmem:[#allocation2 + $0x131] sm:$0xff]  ;;  %v15673_v5 = vpop.permute.xlu2 %6738 }
 0x8c9   : > { %6870 = vrot.lane.b32.xlu0 %v6667_v56, %s10354_s17  ;;  %v6675_v56 = vld [vmem:[#allocation2 + $0x171] sm:$0xff] }
 0x8ca   : > { %v15648_v51 = vpop.permute.xlu1 %6071 }
 0x8cb   : > { %v15653_v53 = vpop.permute.xlu0 %6722 }
 0x8cd   : > { %9967 = vmatmul.msk.f32.gmra.mxu1 %vm6173_vm9, %v6148_v9  ;;  %v6673_v9 = vld [vmem:[#allocation2 + $0x151] sm:$0xff] }
 0x8d0   : > { %6872 = vrot.lane.b32.xlu1 %v6668_v3, %s10354_s17  ;;  %6880 = vrot.lane.b32.xlu2 %v6672_v25, %s10354_s17  ;;  %v6674_v25 = vld [vmem:[#allocation2 + $0x169] sm:$0xff] }
 0x8d1   : > { %6876 = vrot.lane.b32.xlu0 %v6670_v43, %s10354_s17  ;;  %v6678_v43 = vld [vmem:[#allocation2 + $0x1a9] sm:$0xff] }
 0x8d2   : > { %v15663_v6 = vpop.permute.xlu1 %6724 }
 0x8d3   : > { %v15668_v22 = vpop.permute.xlu0 %6728 }
 0x8d5   : > { %9968 = vmatmul.msk.f32.gmra.mxu1 %vm6173_vm9, %v6149_v12  ;;  %v15691_v12 = vpop.permute.xlu2 %6744 }
 0x8d8   : > { %6878 = vrot.lane.b32.xlu1 %v6671_v28, %s10354_s17  ;;  %6886 = vrot.lane.b32.xlu2 %v6675_v56, %s10354_s17  ;;  %v6677_v56 = vld [vmem:[#allocation2 + $0x191] sm:$0xff] }
 0x8d9   : > { %6882 = vrot.lane.b32.xlu0 %v6673_v9, %s10354_s17  ;;  %v6681_v9 = vld [vmem:[#allocation2 + $0x1d1] sm:$0xff] }
 0x8da   : > { %v15678_v3 = vpop.permute.xlu1 %6730 }
 0x8db   : > { %v15683_v1 = vpop.permute.xlu0 %6734 }
 0x8dd   : > { %9969 = vmatmul.msk.f32.gmra.mxu1 %vm6173_vm9, %v6150_v59 }
 0x8e0   : > { %6884 = vrot.lane.b32.xlu1 %v6674_v25, %s10354_s17  ;;  %6892 = vrot.lane.b32.xlu2 %v6678_v43, %s10354_s17  ;;  %v15715_v25 = vpop.permute.xlu2 %6750  ;;  %v6680_v43 = vld [vmem:[#allocation2 + $0x1c9] sm:$0xff] }
 0x8e1   : > { %6888 = vrot.lane.b32.xlu0 %v6676_v7, %s10354_s17  ;;  %v6682_v7 = vld [vmem:[#allocation2 + $0x1e9] sm:$0xff] }
 0x8e2   : > { %v15693_v28 = vpop.permute.xlu1 %6736 }
 0x8e3   : > { %v15698_v48 = vpop.permute.xlu0 %6740 }
 0x8e5   : > { %9970 = vmatmul.msk.f32.gmra.mxu1 %vm6173_vm9, %v6151_v38  ;;  %v6687_v38 = vld [vmem:[#allocation2 + $0x231] sm:$0xff] }
 0x8e8   : > { %6890 = vrot.lane.b32.xlu1 %v6677_v56, %s10354_s17  ;;  %6898 = vrot.lane.b32.xlu2 %v6681_v9, %s10354_s17  ;;  %v15732_v56 = vpop.permute.xlu2 %6756 }
 0x8e9   : > { %6894 = vrot.lane.b32.xlu0 %v6679_v54, %s10354_s17 }
 0x8ea   : > { %v15706_v59 = vpop.permute.xlu1 %6742 }
 0x8eb   : > { %v15711_v36 = vpop.permute.xlu0 %6746 }
 0x8ed   : > { %9971 = vmatmul.msk.f32.gmra.mxu1 %vm6173_vm9, %v6152_v24 }
 0x8f0   : > { %6896 = vrot.lane.b32.xlu1 %v6680_v43, %s10354_s17  ;;  %6904 = vrot.lane.b32.xlu2 %v15309_v26, %s10354_s17  ;;  %v6683_v26 = vld [vmem:[#allocation2 + $0x1f1] sm:$0xff]  ;;  %v15748_v29 = vpop.permute.xlu2 %6762 }
 0x8f1   : > { %6900 = vrot.lane.b32.xlu0 %v6682_v7, %s10354_s17 }
 0x8f2   : > { %v15722_v16 = vpop.permute.xlu1 %6748 }
 0x8f3   : > { %v15729_v33 = vpop.permute.xlu0 %6752 }
 0x8f5   : > { %9972 = vmatmul.msk.f32.gmra.mxu1 %vm6173_vm9, %v6153_v8  ;;  %v17848_v8 = vld [vmem:[#allocation50_spill] sm:$0xff] }
 0x8f8   : > { %6902 = vrot.lane.b32.xlu1 %v6683_v26, %s10354_s17  ;;  %6910 = vrot.lane.b32.xlu2 %v6687_v38, %s10354_s17  ;;  %v15761_v31 = vpop.permute.xlu2 %6768  ;;  %v6124_v38 = vsel %vm1037_vm4, %v17848_v8, %v17847_v23 }
 0x8f9   : > { %6906 = vrot.lane.b32.xlu0 %v15333_v47, %s10354_s17  ;;  %v17846_v47 = vld [vmem:[#allocation22_spill] sm:$0xff]  ;;  %v6156_v26 = vsel %vm5717_vm8, %v6124_v38, %v15561_v37  ;;  %v17850_v37 = vld [vmem:[#allocation23_spill] sm:$0xff] }
 0x8fa   : > { %v15738_v9 = vpop.permute.xlu1 %6754  ;;  %v6123_v43 = vsel %vm1037_vm4, %v17846_v47, %v15318_v46 }
 0x8fb   : > { %v15746_v54 = vpop.permute.xlu0 %6758  ;;  %v6155_v2 = vsel %vm5717_vm8, %v6123_v43, %v15543_v55 }
 0x8fd   : > { %9973 = vmatmul.msk.f32.gmra.mxu1 %vm6173_vm9, %v6154_v17  ;;  %v6125_v17 = vsel %vm1037_vm4, %v15397_v61, %v17849_v62  ;;  %v17851_v62 = vld [vmem:[#allocation13_spill] sm:$0xff] }
 0x900   : > { %6908 = vrot.lane.b32.xlu1 %v6686_v15, %s10354_s17  ;;  %v6157_v15 = vsel %vm5717_vm8, %v6125_v17, %v15485_v58  ;;  %v15780_v47 = vpop.permute.xlu2 %6774  ;;  %v6592_v58 = vld [vmem:[#allocation2 + $0x47] sm:$0xff] }
 0x901   : > { %v6944_v38 = vsel %vm1037_vm4, %v6592_v58, %v15610_v27  ;;  %v17852_v17 = vld [vmem:[#allocation52_spill] sm:$0xff]  ;;  %v6945_v27 = vsel %vm1037_vm4, %v15461_v45, %v15653_v53  ;;  %v17855_v53 = vld [vmem:[#allocation49_spill] sm:$0xff] }
 0x902   : > { %v15751_v24 = vpop.permute.xlu1 %6760  ;;  %v17853_v58 = vld [vmem:[#allocation48_spill] sm:$0xff] }
 0x903   : > { %v15759_v34 = vpop.permute.xlu0 %6764 }
 0x905   : > { %9974 = vmatmul.msk.f32.gmra.mxu1 %vm6173_vm9, %v6155_v2  ;;  %v6126_v2 = vsel %vm1037_vm4, %v15418_v18, %v17850_v37 }
 0x906   : > { %v6158_v23 = vsel %vm5717_vm8, %v6126_v2, %v15569_v49  ;;  %v15807_v2 = vpop.f32.mrf.mxu1 }
 0x908   : > { %v15793_v61 = vpop.permute.xlu2 %6780 }
 0x90a   : > { %v15763_v7 = vpop.permute.xlu1 %6766 }
 0x90b   : > { %v15771_v46 = vpop.permute.xlu0 %6770 }
 0x90d   : > { %9975 = vmatmul.msk.f32.gmra.mxu1 %vm6173_vm9, %v6156_v26 }
 0x912   : > { %v15773_v55 = vpop.permute.xlu1 %6772 }
 0x913   : > { %v15790_v8 = vpop.permute.xlu0 %6776 }
 0x915   : > { %9976 = vmatmul.msk.f32.gmra.mxu1 %vm6173_vm9, %v6157_v15  ;;  %v6127_v15 = vsel %vm1037_vm4, %v17852_v17, %v17851_v62  ;;  %v17854_v62 = vld [vmem:[#allocation44_spill] sm:$0xff] }
 0x916   : > { %v6159_v49 = vsel %vm5717_vm8, %v6127_v15, %v15587_v0  ;;  %v6594_v15 = vld [vmem:[#allocation2 + $0x67] sm:$0xff] }
 0x917   : > { %v6946_v45 = vsel %vm1037_vm4, %v6594_v15, %v15663_v6  ;;  %v17857_v15 = vld [vmem:[#allocation20_spill] sm:$0xff] }
 0x91a   : > { %v15783_v43 = vpop.permute.xlu1 %6778 }
 0x91b   : > { %v15805_v37 = vpop.permute.xlu0 %6782 }
 0x91d   : > { %9977 = vmatmul.msk.f32.gmra.mxu1 %vm6173_vm9, %v6158_v23  ;;  %v6851_v23 = vpop.permute.xlu2 %6850 }
 0x922   : > { %v6849_v26 = vpop.permute.xlu1 %6848 }
 0x923   : > { %v6976_v18 = vsel %vm5717_vm8, %v6944_v38, %v6849_v26  ;;  %v6128_v38 = vsel %vm1037_vm4, %v17854_v62, %v17853_v58  ;;  %v6977_v26 = vsel %vm5717_vm8, %v6945_v27, %v6851_v23  ;;  %v6853_v17 = vpop.permute.xlu0 %6852  ;;  %v6595_v58 = vld [vmem:[#allocation2 + $0x6f] sm:$0xff] }
 0x924   : > { %10023 = vmatmul.msk.f32.vlgmr.msrb.gmra.mxu3 %vm6173_vm9, %v6976_v18  ;;  %v6160_v0 = vsel %vm5717_vm8, %v6128_v38, %v15523_v57  ;;  %v15820_v18 = vpop.f32.mrf.mxu1  ;;  %v6978_v23 = vsel %vm5717_vm8, %v6946_v45, %v6853_v17  ;;  %v6947_v62 = vsel %vm1037_vm4, %v6595_v58, %v15642_v44  ;;  %v17856_v38 = vld [vmem:[#allocation35_spill] sm:$0xff] }
 0x925   : > { %9978 = vmatmul.msk.f32.gmra.mxu1 %vm6173_vm9, %v6159_v49  ;;  %v6129_v49 = vsel %vm1037_vm4, %v15483_v39, %v17855_v53  ;;  %v6130_v6 = vsel %vm1037_vm4, %v15507_v19, %v17856_v38  ;;  %v6596_v17 = vld [vmem:[#allocation2 + $0x87] sm:$0xff]  ;;  %v6131_v19 = vsel %vm1037_vm4, %v15533_v30, %v17857_v15 }
 0x926   : > { %v6161_v57 = vsel %vm5717_vm8, %v6129_v49, %v15597_v60  ;;  %v6162_v60 = vsel %vm5717_vm8, %v6130_v6, %v15612_v13  ;;  %v6948_v44 = vsel %vm1037_vm4, %v6596_v17, %v15668_v22  ;;  %v6163_v53 = vsel %vm5717_vm8, %v6131_v19, %v15551_v20  ;;  %v6598_v38 = vld [vmem:[#allocation2 + $0xa7] sm:$0xff]  ;;  %v17859_v6 = vld [vmem:[#allocation46_spill] sm:$0xff] }
 0x92a   : > { %v6855_v27 = vpop.permute.xlu1 %6854 }
 0x92b   : > { %v6979_v39 = vsel %vm5717_vm8, %v6947_v62, %v6855_v27  ;;  %v6859_v49 = vpop.permute.xlu0 %6858 }
 0x92c   : > { %10024 = vmatmul.msk.f32.gmra.mxu3 %vm6173_vm9, %v6977_v26  ;;  %v15837_v26 = vpop.f32.mrf.mxu1 }
 0x92d   : > { %9979 = vmatmul.msk.f32.gmra.mxu1 %vm6173_vm9, %v6160_v0  ;;  %v6857_v0 = vpop.permute.xlu2 %6856 }
 0x92e   : > { %v6980_v45 = vsel %vm5717_vm8, %v6948_v44, %v6857_v0  ;;  %v6599_v0 = vld [vmem:[#allocation2 + $0xaf] sm:$0xff]  ;;  %v17860_v44 = vld [vmem:[#allocation51_spill] sm:$0xff] }
 0x932   : > { %v6861_v62 = vpop.permute.xlu1 %6860 }
 0x933   : > { %v6865_v19 = vpop.permute.xlu0 %6864 }
 0x934   : > { %10025 = vmatmul.msk.f32.gmra.mxu3 %vm6173_vm9, %v6978_v23  ;;  %v15853_v13 = vpop.f32.mrf.mxu1  ;;  %v6597_v23 = vld [vmem:[#allocation2 + $0x8f] sm:$0xff] }
 0x935   : > { %9980 = vmatmul.msk.f32.gmra.mxu1 %vm6173_vm9, %v6161_v57  ;;  %v6949_v22 = vsel %vm1037_vm4, %v6597_v23, %v15678_v3  ;;  %v17858_v57 = vld [vmem:[#allocation40_spill] sm:$0xff]  ;;  %v6950_v3 = vsel %vm1037_vm4, %v6598_v38, %v15658_v14  ;;  %v6951_v14 = vsel %vm1037_vm4, %v6599_v0, %v15683_v1 }
 0x936   : > { %v6132_v30 = vsel %vm1037_vm4, %v15559_v63, %v17858_v57  ;;  %v6981_v27 = vsel %vm5717_vm8, %v6949_v22, %v6859_v49  ;;  %v6133_v63 = vsel %vm1037_vm4, %v15585_v52, %v17859_v6  ;;  %v6134_v52 = vsel %vm1037_vm4, %v15608_v11, %v17860_v44  ;;  %v17861_v49 = vld [vmem:[#allocation28_spill] sm:$0xff] }
 0x937   : > { %v6164_v20 = vsel %vm5717_vm8, %v6132_v30, %v15620_v50  ;;  %v6165_v50 = vsel %vm5717_vm8, %v6133_v63, %v15633_v35  ;;  %v6166_v35 = vsel %vm5717_vm8, %v6134_v52, %v15577_v42  ;;  %v6601_v30 = vld [vmem:[#allocation2 + $0xcf] sm:$0xff]  ;;  %v6602_v63 = vld [vmem:[#allocation2 + $0xe7] sm:$0xff] }
 0x938   : > { %v6604_v44 = vld [vmem:[#allocation2 + $0x107] sm:$0xff] }
 0x939   : > { %v6956_v52 = vsel %vm1037_vm4, %v6604_v44, %v15691_v12 }
 0x93a   : > { %v6867_v57 = vpop.permute.xlu1 %6866 }
 0x93c   : > { %10026 = vmatmul.msk.f32.gmra.mxu3 %vm6173_vm9, %v6979_v39  ;;  %v15866_v58 = vpop.f32.mrf.mxu1  ;;  %v6982_v39 = vsel %vm5717_vm8, %v6950_v3, %v6861_v62 }
 0x93d   : > { %9981 = vmatmul.msk.f32.gmra.mxu1 %vm6173_vm9, %v6162_v60  ;;  %v6863_v60 = vpop.permute.xlu2 %6862 }
 0x93e   : > { %v6983_v15 = vsel %vm5717_vm8, %v6951_v14, %v6863_v60  ;;  %v6603_v60 = vld [vmem:[#allocation2 + $0xef] sm:$0xff] }
 0x942   : > { %v6873_v14 = vpop.permute.xlu1 %6872 }
 0x944   : > { %10027 = vmatmul.msk.f32.gmra.mxu3 %vm6173_vm9, %v6980_v45  ;;  %v15878_v17 = vpop.f32.mrf.mxu1  ;;  %v6600_v45 = vld [vmem:[#allocation2 + $0xc7] sm:$0xff] }
 0x945   : > { %9982 = vmatmul.msk.f32.gmra.mxu1 %vm6173_vm9, %v6163_v53  ;;  %v15890_v53 = vld [vmem:[#allocation2 + $0x207] sm:$0xff]  ;;  %v6952_v1 = vsel %vm1037_vm4, %v6600_v45, %v15693_v28  ;;  %v6953_v28 = vsel %vm1037_vm4, %v6601_v30, %v15673_v5  ;;  %v6869_v6 = vpop.permute.xlu2 %6868  ;;  %v6954_v5 = vsel %vm1037_vm4, %v6602_v63, %v15698_v48  ;;  %v6988_v48 = vsel %vm5717_vm8, %v6956_v52, %v6873_v14  ;;  %v7386_v30 = vld [vmem:[#allocation2 + $0x10] sm:$0xff] }
 0x946   : > { %v6135_v11 = vsel %vm1037_vm4, %v15890_v53, %v17861_v49  ;;  %v6984_v22 = vsel %vm5717_vm8, %v6952_v1, %v6865_v19  ;;  %v6985_v38 = vsel %vm5717_vm8, %v6953_v28, %v6867_v57  ;;  %v6606_v1 = vld [vmem:[#allocation2 + $0x127] sm:$0xff]  ;;  %7483 = vrot.lane.b32.xlu1 %v7386_v30, %s10352_s19 }
 0x947   : > { %v6167_v42 = vsel %vm5717_vm8, %v6135_v11, %v15638_v10  ;;  %v6958_v49 = vsel %vm1037_vm4, %v6606_v1, %v15722_v16  ;;  %v7385_v11 = vld [vmem:[#allocation2 + $0x8] sm:$0xff] }
 0x948   : > { %7481 = vrot.lane.b32.xlu0 %v7385_v11, %s10352_s19  ;;  %v6608_v28 = vld [vmem:[#allocation2 + $0x147] sm:$0xff] }
 0x94c   : > { %10028 = vmatmul.msk.f32.gmra.mxu3 %vm6173_vm9, %v6981_v27  ;;  %v15897_v23 = vpop.f32.mrf.mxu1  ;;  %v15904_v27 = vld [vmem:[#allocation2 + $0x20f] sm:$0xff] }
 0x94d   : > { %9983 = vmatmul.msk.f32.gmra.mxu1 %vm6173_vm9, %v6164_v20  ;;  %v17862_v20 = vld [vmem:[#allocation36_spill] sm:$0xff] }
 0x94e   : > { %v6136_v62 = vsel %vm1037_vm4, %v15904_v27, %v17862_v20  ;;  %v6960_v20 = vsel %vm1037_vm4, %v6608_v28, %v15729_v33 }
 0x94f   : > { %v6168_v10 = vsel %vm5717_vm8, %v6136_v62, %v15648_v51  ;;  %v6955_v51 = vsel %vm1037_vm4, %v6603_v60, %v15706_v59 }
 0x954   : > { %10029 = vmatmul.msk.f32.gmra.mxu3 %vm6173_vm9, %v6982_v39  ;;  %v15915_v3 = vpop.f32.mrf.mxu1  ;;  %v6986_v39 = vsel %vm5717_vm8, %v6954_v5, %v6869_v6 }
 0x955   : > { %9984 = vmatmul.msk.f32.gmra.mxu1 %vm6173_vm9, %v6165_v50  ;;  %v6871_v50 = vpop.permute.xlu0 %6870 }
 0x956   : > { %v6987_v0 = vsel %vm5717_vm8, %v6955_v51, %v6871_v50 }
 0x95c   : > { %10030 = vmatmul.msk.f32.gmra.mxu3 %vm6173_vm9, %v6983_v15  ;;  %v6875_v15 = vpop.permute.xlu2 %6874 }
 0x95d   : > { %9985 = vmatmul.msk.f32.gmra.mxu1 %vm6173_vm9, %v6166_v35  ;;  %v6605_v35 = vld [vmem:[#allocation2 + $0x10f] sm:$0xff]  ;;  %v6877_v45 = vpop.permute.xlu0 %6876 }
 0x95e   : > { %v6957_v19 = vsel %vm1037_vm4, %v6605_v35, %v15711_v36  ;;  %v6990_v12 = vsel %vm5717_vm8, %v6958_v49, %v6877_v45 }
 0x95f   : > { %v6989_v59 = vsel %vm5717_vm8, %v6957_v19, %v6875_v15 }
 0x964   : > { %10031 = vmatmul.msk.f32.gmra.mxu3 %vm6173_vm9, %v6984_v22  ;;  %v6879_v22 = vpop.permute.xlu1 %6878  ;;  %v6881_v16 = vpop.permute.xlu2 %6880 }
 0x965   : > { %9986 = vmatmul.msk.f32.gmra.mxu1 %vm6173_vm9, %v6167_v42  ;;  %v6607_v42 = vld [vmem:[#allocation2 + $0x12f] sm:$0xff]  ;;  %v6992_v62 = vsel %vm5717_vm8, %v6960_v20, %v6881_v16  ;;  %v6883_v63 = vpop.permute.xlu0 %6882  ;;  %v6506_v16 = vadd.f32 %v15500_v4, %v15853_v13 }
 0x966   : > { %v6959_v36 = vsel %vm1037_vm4, %v6607_v42, %v15715_v25  ;;  %v15953_v25 = vld [vmem:[%s17405_s9] ss:$0 sm:$0xff] }
 0x967   : > { %v6991_v57 = vsel %vm5717_vm8, %v6959_v36, %v6879_v22  ;;  %v6611_v22 = vld [vmem:[#allocation2 + $0x16f] sm:$0xff] }
 0x968   : > { %v6963_v42 = vsel %vm1037_vm4, %v6611_v22, %v15746_v54 }
 0x96c   : > { %10032 = vmatmul.msk.f32.gmra.mxu3 %vm6173_vm9, %v6985_v38  ;;  %v17863_v38 = vld [vmem:[#allocation25_spill] sm:$0xff]  ;;  %v6885_v44 = vpop.permute.xlu1 %6884 }
 0x96d   : > { %9987 = vmatmul.msk.f32.gmra.mxu1 %vm6173_vm9, %v6168_v10  ;;  %v6497_v10 = vadd.f32 %v17863_v38, %v15807_v2  ;;  %v17864_v2 = vld [vmem:[#allocation43_spill] sm:$0xff]  ;;  %v6889_v20 = vpop.permute.xlu0 %6888 }
 0x974   : > { %10033 = vmatmul.msk.f32.gmra.mxu3 %vm6173_vm9, %v6986_v39  ;;  %v6609_v39 = vld [vmem:[#allocation2 + $0x14f] sm:$0xff] }
 0x975   : > { %v6961_v50 = vsel %vm1037_vm4, %v6609_v39, %v15738_v9  ;;  %v6509_v39 = vadd.f32 %v15527_v32, %v15866_v58 }
 0x976   : > { %v6993_v60 = vsel %vm5717_vm8, %v6961_v50, %v6883_v63 }
 0x97c   : > { %10034 = vmatmul.msk.f32.gmra.mxu3 %vm6173_vm9, %v6987_v0  ;;  %v6500_v0 = vadd.f32 %v17864_v2, %v15820_v18  ;;  %v17865_v18 = vld [vmem:[#allocation53_spill] sm:$0xff] }
 0x97d   : > { %v6503_v1 = vadd.f32 %v17865_v18, %v15837_v26 }
 0x984   : > { %10035 = vmatmul.msk.f32.gmra.mxu3 %vm6173_vm9, %v6988_v48  ;;  %v6610_v48 = vld [vmem:[#allocation2 + $0x167] sm:$0xff] }
 0x985   : > { %v6962_v15 = vsel %vm1037_vm4, %v6610_v48, %v15732_v56  ;;  %v15977_v56 = vpop.f32.mrf.mxu2 }
 0x986   : > { %v6994_v35 = vsel %vm5717_vm8, %v6962_v15, %v6885_v44 }
 0x98c   : > { %10036 = vmatmul.msk.f32.gmra.mxu3 %vm6173_vm9, %v6989_v59  ;;  %v15968_v59 = vpop.f32.mrf.mxu1 }
 0x98d   : > { %v15993_v38 = vpop.f32.mrf.mxu2 }
 0x994   : > { %10037 = vmatmul.msk.f32.gmra.mxu3 %vm6173_vm9, %v6990_v12  ;;  %v6887_v12 = vpop.permute.xlu2 %6886  ;;  %v15991_v28 = vpop.f32.mrf.mxu1 }
 0x99c   : > { %10038 = vmatmul.msk.f32.gmra.mxu3 %vm6173_vm9, %v6991_v57  ;;  %v6995_v57 = vsel %vm5717_vm8, %v6963_v42, %v6887_v12  ;;  %v6893_v48 = vpop.permute.xlu2 %6892  ;;  %v6515_v12 = vadd.f32 %v15595_v40, %v15897_v23  ;;  %v6615_v42 = vld [vmem:[#allocation2 + $0x1af] sm:$0xff] }
 0x9a4   : > { %10039 = vmatmul.msk.f32.gmra.mxu3 %vm6173_vm9, %v6992_v62 }
 0x9a7   : > { %v7125_v6 = vpop.f32.mrf.mxu3 }
 0x9a8   : > { %v7221_v5 = vadd.f32 %v7125_v6, %v6497_v10  ;;  %v6612_v10 = vld [vmem:[#allocation2 + $0x187] sm:$0xff] }
 0x9a9   : > { %v6964_v6 = vsel %vm1037_vm4, %v6612_v10, %v15751_v24 }
 0x9aa   : > { %v7257_v33 = vadd.f32 %v15953_v25, %v7221_v5  ;;  %v6996_v4 = vsel %vm5717_vm8, %v6964_v6, %v6889_v20  ;;  %v6616_v6 = vld [vmem:[#allocation2 + $0x1c7] sm:$0xff] }
 0x9ac   : > { %v7289_v51 = vmax.f32 %v7257_v33, 0.0  ;;  %10040 = vmatmul.msk.f32.gmra.mxu3 %vm6173_vm9, %v6993_v60  ;;  %v6891_v33 = vpop.permute.xlu1 %6890  ;;  %v6613_v60 = vld [vmem:[#allocation2 + $0x18f] sm:$0xff] }
 0x9ad   : > { %v6965_v2 = vsel %vm1037_vm4, %v6613_v60, %v15748_v29 }
 0x9ae   : > { %7321 = vst.msk [vmem:[#allocation2 + $0x28] sm:$0xff] %vm513_vm0, %v7289_v51  ;;  %v16007_v51 = vpop.f32.mrf.mxu1  ;;  %v6997_v32 = vsel %vm5717_vm8, %v6965_v2, %v6891_v33  ;;  %v6899_v33 = vpop.permute.xlu2 %6898  ;;  %v6617_v2 = vld [vmem:[#allocation2 + $0x1cf] sm:$0xff] }
 0x9af   : > { %v7128_v14 = vpop.f32.mrf.mxu3 }
 0x9b0   : > { %v7222_v52 = vadd.f32 %v7128_v14, %v6500_v0  ;;  %v16012_v14 = vpop.f32.mrf.mxu2 }
 0x9b2   : > { %v7258_v9 = vadd.f32 %v15953_v25, %v7222_v52  ;;  %v6512_v52 = vadd.f32 %v15556_v41, %v15878_v17 }
 0x9b4   : > { %v7290_v19 = vmax.f32 %v7258_v9, 0.0  ;;  %10041 = vmatmul.msk.f32.gmra.mxu3 %vm6173_vm9, %v6994_v35  ;;  %v6614_v9 = vld [vmem:[#allocation2 + $0x1a7] sm:$0xff] }
 0x9b5   : > { %v15970_v45 = vld [vmem:[#allocation2 + $0x28] sm:$0xff]  ;;  %v6966_v35 = vsel %vm1037_vm4, %v6614_v9, %v15759_v34 }
 0x9b6   : > { %7322 = vst.msk [vmem:[#allocation2 + $0x30] sm:$0xff] %vm513_vm0, %v7290_v19  ;;  %7485 = vrot.lane.b32.xlu2 %v15970_v45, %s10352_s19  ;;  %v6998_v18 = vsel %vm5717_vm8, %v6966_v35, %v6893_v48 }
 0x9b7   : > { %v7131_v49 = vpop.f32.mrf.mxu3 }
 0x9b8   : > { %v7223_v11 = vadd.f32 %v7131_v49, %v6503_v1  ;;  %v16027_v1 = vpop.f32.mrf.mxu1  ;;  %v16030_v41 = vpop.f32.mrf.mxu2 }
 0x9ba   : > { %v7259_v36 = vadd.f32 %v15953_v25, %v7223_v11  ;;  %v6895_v11 = vpop.permute.xlu0 %6894 }
 0x9bc   : > { %v7291_v30 = vmax.f32 %v7259_v36, 0.0  ;;  %10042 = vmatmul.msk.f32.gmra.mxu3 %vm6173_vm9, %v6995_v57  ;;  %v6967_v36 = vsel %vm1037_vm4, %v6615_v42, %v15763_v7 }
 0x9bd   : > { %v15984_v26 = vld [vmem:[#allocation2 + $0x30] sm:$0xff] }
 0x9be   : > { %7323 = vst.msk [vmem:[#allocation2 + $0x48] sm:$0xff] %vm513_vm0, %v7291_v30  ;;  %7487 = vrot.lane.b32.xlu0 %v15984_v26, %s10352_s19  ;;  %v6999_v30 = vsel %vm5717_vm8, %v6967_v36, %v6895_v11 }
 0x9bf   : > { %v7134_v54 = vpop.f32.mrf.mxu3 }
 0x9c0   : > { %v7224_v62 = vadd.f32 %v7134_v54, %v6506_v16  ;;  %v16044_v40 = vpop.f32.mrf.mxu1  ;;  %v6518_v54 = vadd.f32 %v15626_v21, %v15915_v3  ;;  %v16053_v7 = vpop.f32.mrf.mxu2  ;;  %v6521_v3 = vadd.f32 %v15977_v56, %v15968_v59 }
 0x9c2   : > { %v7260_v63 = vadd.f32 %v15953_v25, %v7224_v62  ;;  %v6897_v62 = vpop.permute.xlu1 %6896  ;;  %v6901_v48 = vpop.permute.xlu0 %6900 }
 0x9c4   : > { %v7292_v13 = vmax.f32 %v7260_v63, 0.0  ;;  %10043 = vmatmul.msk.f32.gmra.mxu3 %vm6173_vm9, %v6996_v4  ;;  %v6968_v63 = vsel %vm1037_vm4, %v6616_v6, %v15761_v31 }
 0x9c5   : > { %v16000_v5 = vld [vmem:[#allocation2 + $0x48] sm:$0xff] }
 0x9c6   : > { %7324 = vst.msk [vmem:[#allocation2 + $0x50] sm:$0xff] %vm513_vm0, %v7292_v13  ;;  %7489 = vrot.lane.b32.xlu1 %v16000_v5, %s10352_s19  ;;  %v7000_v13 = vsel %vm5717_vm8, %v6968_v63, %v6897_v62 }
 0x9c7   : > { %v7137_v50 = vpop.f32.mrf.mxu3 }
 0x9c8   : > { %v7225_v24 = vadd.f32 %v7137_v50, %v6509_v39  ;;  %v16067_v50 = vpop.f32.mrf.mxu1  ;;  %v16069_v60 = vpop.f32.mrf.mxu2 }
 0x9ca   : > { %v7261_v0 = vadd.f32 %v15953_v25, %v7225_v24 }
 0x9cc   : > { %v7293_v58 = vmax.f32 %v7261_v0, 0.0  ;;  %10044 = vmatmul.msk.f32.gmra.mxu3 %vm6173_vm9, %v6997_v32  ;;  %v6969_v0 = vsel %vm1037_vm4, %v6617_v2, %v15771_v46 }
 0x9cd   : > { %v16016_v44 = vld [vmem:[#allocation2 + $0x50] sm:$0xff]  ;;  %v7001_v59 = vsel %vm5717_vm8, %v6969_v0, %v6899_v33  ;;  %v6622_v0 = vld [vmem:[#allocation2 + $0x227] sm:$0xff] }
 0x9ce   : > { %7325 = vst.msk [vmem:[#allocation2 + $0x68] sm:$0xff] %vm513_vm0, %v7293_v58  ;;  %7491 = vrot.lane.b32.xlu2 %v16016_v44, %s10352_s19 }
 0x9cf   : > { %v7140_v29 = vpop.f32.mrf.mxu3 }
 0x9d0   : > { %v7226_v15 = vadd.f32 %v7140_v29, %v6512_v52  ;;  %v6524_v52 = vadd.f32 %v15993_v38, %v15991_v28  ;;  %v16083_v9 = vpop.f32.mrf.mxu1 }
 0x9d2   : > { %v7262_v19 = vadd.f32 %v15953_v25, %v7226_v15  ;;  %v6618_v15 = vld [vmem:[#allocation2 + $0x1e7] sm:$0xff] }
 0x9d3   : > { %v6970_v35 = vsel %vm1037_vm4, %v6618_v15, %v15773_v55  ;;  %v6903_v55 = vpop.permute.xlu1 %6902  ;;  %v6623_v15 = vld [vmem:[#allocation2 + $0x22f] sm:$0xff] }
 0x9d4   : > { %v7294_v49 = vmax.f32 %v7262_v19, 0.0  ;;  %10045 = vmatmul.msk.f32.gmra.mxu3 %vm6173_vm9, %v6998_v18  ;;  %v6538_v18 = vpop.f32.mrf.mxu2 }
 0x9d5   : > { %v16032_v17 = vld [vmem:[#allocation2 + $0x68] sm:$0xff] }
 0x9d6   : > { %7326 = vst.msk [vmem:[#allocation2 + $0x70] sm:$0xff] %vm513_vm0, %v7294_v49  ;;  %7493 = vrot.lane.b32.xlu0 %v16032_v17, %s10352_s19  ;;  %v7002_v49 = vsel %vm5717_vm8, %v6970_v35, %v6901_v48 }
 0x9d7   : > { %v7143_v34 = vpop.f32.mrf.mxu3 }
 0x9d8   : > { %v7227_v22 = vadd.f32 %v7143_v34, %v6515_v12  ;;  %v6527_v12 = vadd.f32 %v16012_v14, %v16007_v51 }
 0x9da   : > { %v7263_v57 = vadd.f32 %v15953_v25, %v7227_v22  ;;  %v6619_v22 = vld [vmem:[#allocation2 + $0x1ef] sm:$0xff] }
 0x9db   : > { %v6971_v42 = vsel %vm1037_vm4, %v6619_v22, %v15780_v47 }
 0x9dc   : > { %v7295_v16 = vmax.f32 %v7263_v57, 0.0  ;;  %10046 = vmatmul.msk.f32.gmra.mxu3 %vm6173_vm9, %v6999_v30  ;;  %v6332_v57 = vpop.f32.mrf.mxu1  ;;  %v7003_v30 = vsel %vm5717_vm8, %v6971_v42, %v6903_v55  ;;  %v6541_v51 = vpop.f32.mrf.mxu2 }
 0x9dd   : > { %v16046_v23 = vld [vmem:[#allocation2 + $0x70] sm:$0xff] }
 0x9de   : > { %7327 = vst.msk [vmem:[#allocation2 + $0x88] sm:$0xff] %vm513_vm0, %v7295_v16  ;;  %7495 = vrot.lane.b32.xlu1 %v16046_v23, %s10352_s19 }
 0x9df   : > { %v7146_v20 = vpop.f32.mrf.mxu3 }
 0x9e0   : > { %v7228_v10 = vadd.f32 %v7146_v20, %v6518_v54  ;;  %v6530_v54 = vadd.f32 %v16030_v41, %v16027_v1  ;;  %v6905_v20 = vpop.permute.xlu2 %6904 }
 0x9e2   : > { %v7264_v4 = vadd.f32 %v15953_v25, %v7228_v10  ;;  %v6972_v10 = vsel %vm1037_vm4, %v15890_v53, %v15790_v8  ;;  %v6907_v53 = vpop.permute.xlu0 %6906 }
 0x9e3   : > { %v7004_v63 = vsel %vm5717_vm8, %v6972_v10, %v6905_v20 }
 0x9e4   : > { %v7296_v39 = vmax.f32 %v7264_v4, 0.0  ;;  %10047 = vmatmul.msk.f32.gmra.mxu3 %vm6173_vm9, %v7000_v13  ;;  %v6335_v1 = vpop.f32.mrf.mxu1  ;;  %v6533_v13 = vadd.f32 %v16053_v7, %v16044_v40  ;;  %v6536_v7 = vadd.f32 %v16069_v60, %v16067_v50  ;;  %v6539_v60 = vadd.f32 %v6538_v18, %v16083_v9 }
 0x9e5   : > { %v16060_v21 = vld [vmem:[#allocation2 + $0x88] sm:$0xff]  ;;  %v6542_v18 = vadd.f32 %v6541_v51, %v6332_v57 }
 0x9e6   : > { %7328 = vst.msk [vmem:[#allocation2 + $0x90] sm:$0xff] %vm513_vm0, %v7296_v39  ;;  %7497 = vrot.lane.b32.xlu2 %v16060_v21, %s10352_s19  ;;  %v6544_v39 = vpop.f32.mrf.mxu2 }
 0x9e7   : > { %v7149_v31 = vpop.f32.mrf.mxu3 }
 0x9e8   : > { %v7229_v24 = vadd.f32 %v7149_v31, %v6521_v3  ;;  %v6973_v31 = vsel %vm1037_vm4, %v15904_v27, %v15783_v43  ;;  %v6909_v27 = vpop.permute.xlu1 %6908 }
 0x9ea   : > { %v7265_v32 = vadd.f32 %v15953_v25, %v7229_v24  ;;  %v7005_v24 = vsel %vm5717_vm8, %v6973_v31, %v6907_v53 }
 0x9ec   : > { %v7297_v56 = vmax.f32 %v7265_v32, 0.0  ;;  %10048 = vmatmul.msk.f32.gmra.mxu3 %vm6173_vm9, %v7001_v59  ;;  %v6338_v32 = vpop.f32.mrf.mxu1 }
 0x9ed   : > { %v16076_v58 = vld [vmem:[#allocation2 + $0x90] sm:$0xff] }
 0x9ee   : > { %7329 = vst.msk [vmem:[#allocation2 + $0xa8] sm:$0xff] %vm513_vm0, %v7297_v56  ;;  %7499 = vrot.lane.b32.xlu0 %v16076_v58, %s10352_s19  ;;  %v6547_v56 = vpop.f32.mrf.mxu2 }
 0x9ef   : > { %v7152_v29 = vpop.f32.mrf.mxu3 }
 0x9f0   : > { %v7230_v46 = vadd.f32 %v7152_v29, %v6524_v52  ;;  %v6974_v52 = vsel %vm1037_vm4, %v6622_v0, %v15793_v61 }
 0x9f1   : > { %v7006_v48 = vsel %vm5717_vm8, %v6974_v52, %v6909_v27 }
 0x9f2   : > { %v7266_v19 = vadd.f32 %v15953_v25, %v7230_v46 }
 0x9f4   : > { %v7298_v28 = vmax.f32 %v7266_v19, 0.0  ;;  %10049 = vmatmul.msk.f32.gmra.mxu3 %vm6173_vm9, %v7002_v49  ;;  %v6911_v19 = vpop.permute.xlu2 %6910  ;;  %v6341_v49 = vpop.f32.mrf.mxu1 }
 0x9f5   : > { %v16090_v38 = vld [vmem:[#allocation2 + $0xa8] sm:$0xff] }
 0x9f6   : > { %7330 = vst.msk [vmem:[#allocation2 + $0xb0] sm:$0xff] %vm513_vm0, %v7298_v28  ;;  %7501 = vrot.lane.b32.xlu1 %v16090_v38, %s10352_s19  ;;  %v6975_v28 = vsel %vm1037_vm4, %v6623_v15, %v15805_v37 }
 0x9f7   : > { %v7155_v34 = vpop.f32.mrf.mxu3  ;;  %v7007_v55 = vsel %vm5717_vm8, %v6975_v28, %v6911_v19 }
 0x9f8   : > { %v7231_v11 = vadd.f32 %v7155_v34, %v6527_v12  ;;  %v6550_v34 = vpop.f32.mrf.mxu2 }
 0x9fa   : > { %v7267_v36 = vadd.f32 %v15953_v25, %v7231_v11 }
 0x9fc   : > { %v7299_v16 = vmax.f32 %v7267_v36, 0.0  ;;  %10050 = vmatmul.msk.f32.gmra.mxu3 %vm6173_vm9, %v7003_v30  ;;  %v6344_v36 = vpop.f32.mrf.mxu1 }
 0x9fd   : > { %v16102_v14 = vld [vmem:[#allocation2 + $0xb0] sm:$0xff] }
 0x9fe   : > { %7331 = vst.msk [vmem:[#allocation2 + $0xc8] sm:$0xff] %vm513_vm0, %v7299_v16  ;;  %7503 = vrot.lane.b32.xlu2 %v16102_v14, %s10352_s19 }
 0x9ff   : > { %v7158_v47 = vpop.f32.mrf.mxu3 }
 0xa00   : > { %v7232_v62 = vadd.f32 %v7158_v47, %v6530_v54  ;;  %v6553_v16 = vpop.f32.mrf.mxu2  ;;  %v6545_v47 = vadd.f32 %v6544_v39, %v6335_v1 }
 0xa02   : > { %v7268_v6 = vadd.f32 %v15953_v25, %v7232_v62 }
 0xa04   : > { %v7300_v4 = vmax.f32 %v7268_v6, 0.0  ;;  %10051 = vmatmul.msk.f32.gmra.mxu3 %vm6173_vm9, %v7004_v63  ;;  %v6347_v10 = vpop.f32.mrf.mxu1  ;;  %v6548_v63 = vadd.f32 %v6547_v56, %v6338_v32 }
 0xa05   : > { %v16115_v41 = vld [vmem:[#allocation2 + $0xc8] sm:$0xff] }
 0xa06   : > { %7332 = vst.msk [vmem:[#allocation2 + $0xd0] sm:$0xff] %vm513_vm0, %v7300_v4  ;;  %7505 = vrot.lane.b32.xlu0 %v16115_v41, %s10352_s19 }
 0xa07   : > { %v7161_v8 = vpop.f32.mrf.mxu3 }
 0xa08   : > { %v7233_v3 = vadd.f32 %v7161_v8, %v6533_v13  ;;  %v6556_v4 = vpop.f32.mrf.mxu2 }
 0xa0a   : > { %v7269_v33 = vadd.f32 %v15953_v25, %v7233_v3  ;;  %v6551_v3 = vadd.f32 %v6550_v34, %v6341_v49 }
 0xa0c   : > { %v7301_v2 = vmax.f32 %v7269_v33, 0.0  ;;  %10052 = vmatmul.msk.f32.gmra.mxu3 %vm6173_vm9, %v7005_v24  ;;  %v6350_v31 = vpop.f32.mrf.mxu1 }
 0xa0d   : > { %v16128_v40 = vld [vmem:[#allocation2 + $0xd0] sm:$0xff] }
 0xa0e   : > { %7333 = vst.msk [vmem:[#allocation2 + $0xe8] sm:$0xff] %vm513_vm0, %v7301_v2  ;;  %7507 = vrot.lane.b32.xlu1 %v16128_v40, %s10352_s19 }
 0xa0f   : > { %v7164_v43 = vpop.f32.mrf.mxu3 }
 0xa10   : > { %v7234_v59 = vadd.f32 %v7164_v43, %v6536_v7  ;;  %v6559_v2 = vpop.f32.mrf.mxu2  ;;  %v6554_v43 = vadd.f32 %v6553_v16, %v6344_v36 }
 0xa11   : > { %v6560_v34 = vadd.f32 %v6559_v2, %v6350_v31 }
 0xa12   : > { %v7270_v29 = vadd.f32 %v15953_v25, %v7234_v59 }
 0xa14   : > { %v7302_v46 = vmax.f32 %v7270_v29, 0.0  ;;  %10053 = vmatmul.msk.f32.gmra.mxu3 %vm6173_vm9, %v7006_v48  ;;  %v6353_v56 = vpop.f32.mrf.mxu1 }
 0xa15   : > { %v16140_v50 = vld [vmem:[#allocation2 + $0xe8] sm:$0xff] }
 0xa16   : > { %7334 = vst.msk [vmem:[#allocation2 + $0xf0] sm:$0xff] %vm513_vm0, %v7302_v46  ;;  %7509 = vrot.lane.b32.xlu2 %v16140_v50, %s10352_s19 }
 0xa17   : > { %v7167_v35 = vpop.f32.mrf.mxu3 }
 0xa18   : > { %v7235_v61 = vadd.f32 %v7167_v35, %v6539_v60  ;;  %v6562_v29 = vpop.f32.mrf.mxu2  ;;  %v6557_v60 = vadd.f32 %v6556_v4, %v6347_v10 }
 0xa19   : > { %v6563_v36 = vadd.f32 %v6562_v29, %v6353_v56 }
 0xa1a   : > { %v7271_v12 = vadd.f32 %v15953_v25, %v7235_v61 }
 0xa1c   : > { %v7303_v11 = vmax.f32 %v7271_v12, 0.0  ;;  %10054 = vmatmul.msk.f32.gmra.mxu3 %vm6173_vm9, %v7007_v55  ;;  %v6356_v61 = vpop.f32.mrf.mxu1 }
 0xa1d   : > { %v16151_v9 = vld [vmem:[#allocation2 + $0xf0] sm:$0xff] }
 0xa1e   : > { %7335 = vst.msk [vmem:[#allocation2 + $0x108] sm:$0xff] %vm513_vm0, %v7303_v11  ;;  %7511 = vrot.lane.b32.xlu0 %v16151_v9, %s10352_s19 }
 0xa1f   : > { %v7170_v22 = vpop.f32.mrf.mxu3 }
 0xa20   : > { %v7236_v42 = vadd.f32 %v7170_v22, %v6542_v18  ;;  %v6565_v28 = vpop.f32.mrf.mxu2 }
 0xa22   : > { %v7272_v37 = vadd.f32 %v15953_v25, %v7236_v42 }
 0xa24   : > { %v7304_v30 = vmax.f32 %v7272_v37, 0.0  ;;  %v6359_v42 = vpop.f32.mrf.mxu1 }
 0xa25   : > { %v16157_v54 = vld [vmem:[#allocation2 + $0x108] sm:$0xff] }
 0xa26   : > { %7336 = vst.msk [vmem:[#allocation2 + $0x110] sm:$0xff] %vm513_vm0, %v7304_v30  ;;  %7513 = vrot.lane.b32.xlu1 %v16157_v54, %s10352_s19 }
 0xa27   : > { %v7173_v57 = vpop.f32.mrf.mxu3 }
 0xa28   : > { %v7237_v51 = vadd.f32 %v7173_v57, %v6545_v47  ;;  %v6568_v30 = vpop.f32.mrf.mxu2 }
 0xa2a   : > { %v7273_v20 = vadd.f32 %v15953_v25, %v7237_v51 }
 0xa2c   : > { %v7305_v62 = vmax.f32 %v7273_v20, 0.0  ;;  %v6362_v10 = vpop.f32.mrf.mxu1 }
 0xa2d   : > { %v16163_v6 = vld [vmem:[#allocation2 + $0x110] sm:$0xff] }
 0xa2e   : > { %7337 = vst.msk [vmem:[#allocation2 + $0x128] sm:$0xff] %vm513_vm0, %v7305_v62  ;;  %7515 = vrot.lane.b32.xlu2 %v16163_v6, %s10352_s19  ;;  %v6566_v62 = vadd.f32 %v6565_v28, %v6356_v61 }
 0xa2f   : > { %v7176_v1 = vpop.f32.mrf.mxu3 }
 0xa30   : > { %v7238_v13 = vadd.f32 %v7176_v1, %v6548_v63  ;;  %v6571_v1 = vpop.f32.mrf.mxu2 }
 0xa32   : > { %v7274_v39 = vadd.f32 %v15953_v25, %v7238_v13 }
 0xa34   : > { %v7306_v8 = vmax.f32 %v7274_v39, 0.0 }
 0xa35   : > { %v16169_v53 = vld [vmem:[#allocation2 + $0x128] sm:$0xff] }
 0xa36   : > { %7338 = vst.msk [vmem:[#allocation2 + $0x130] sm:$0xff] %vm513_vm0, %v7306_v8  ;;  %7517 = vrot.lane.b32.xlu0 %v16169_v53, %s10352_s19 }
 0xa37   : > { %v7179_v33 = vpop.f32.mrf.mxu3 }
 0xa38   : > { %v7239_v24 = vadd.f32 %v7179_v33, %v6551_v3  ;;  %v6569_v3 = vadd.f32 %v6568_v30, %v6359_v42 }
 0xa3a   : > { %v7275_v7 = vadd.f32 %v15953_v25, %v7239_v24  ;;  %v6365_v24 = vpop.f32.mrf.mxu1 }
 0xa3c   : > { %v7307_v0 = vmax.f32 %v7275_v7, 0.0  ;;  %v6574_v7 = vpop.f32.mrf.mxu2 }
 0xa3d   : > { %v16175_v32 = vld [vmem:[#allocation2 + $0x130] sm:$0xff] }
 0xa3e   : > { %7339 = vst.msk [vmem:[#allocation2 + $0x148] sm:$0xff] %vm513_vm0, %v7307_v0  ;;  %7519 = vrot.lane.b32.xlu1 %v16175_v32, %s10352_s19 }
 0xa3f   : > { %v7182_v27 = vpop.f32.mrf.mxu3 }
 0xa40   : > { %v7240_v59 = vadd.f32 %v7182_v27, %v6554_v43  ;;  %v6572_v27 = vadd.f32 %v6571_v1, %v6362_v10 }
 0xa42   : > { %v7276_v52 = vadd.f32 %v15953_v25, %v7240_v59  ;;  %v6368_v29 = vpop.f32.mrf.mxu1 }
 0xa44   : > { %v7308_v48 = vmax.f32 %v7276_v52, 0.0 }
 0xa45   : > { %v7405_v46 = vld [vmem:[#allocation2 + $0x148] sm:$0xff] }
 0xa46   : > { %7340 = vst.msk [vmem:[#allocation2 + $0x150] sm:$0xff] %vm513_vm0, %v7308_v48  ;;  %7521 = vrot.lane.b32.xlu2 %v7405_v46, %s10352_s19  ;;  %v6577_v46 = vpop.f32.mrf.mxu2 }
 0xa47   : > { %v7185_v15 = vpop.f32.mrf.mxu3 }
 0xa48   : > { %v7241_v35 = vadd.f32 %v7185_v15, %v6557_v60  ;;  %v6575_v15 = vadd.f32 %v6574_v7, %v6365_v24  ;;  %v10142_v7 = vld [vmem:[%s17406_s10 + $0x118] sm:$0xff] }
 0xa49   : > { %9157 = vmatpush.msrb.mxu2 %v10142_v7 }
 0xa4a   : > { %v7277_v19 = vadd.f32 %v15953_v25, %v7241_v35  ;;  %v6371_v28 = vpop.f32.mrf.mxu1 }
 0xa4c   : > { %v7309_v49 = vmax.f32 %v7277_v19, 0.0 }
 0xa4d   : > { %v7406_v12 = vld [vmem:[#allocation2 + $0x150] sm:$0xff] }
 0xa4e   : > { %7341 = vst.msk [vmem:[#allocation2 + $0x168] sm:$0xff] %vm513_vm0, %v7309_v49  ;;  %7523 = vrot.lane.b32.xlu0 %v7406_v12, %s10352_s19 }
 0xa4f   : > { %v7188_v55 = vpop.f32.mrf.mxu3 }
 0xa50   : > { %v7242_v11 = vadd.f32 %v7188_v55, %v6560_v34  ;;  %v6578_v34 = vadd.f32 %v6577_v46, %v6368_v29  ;;  %v6580_v55 = vpop.f32.mrf.mxu2 }
 0xa52   : > { %v7278_v18 = vadd.f32 %v15953_v25, %v7242_v11  ;;  %v6374_v30 = vpop.f32.mrf.mxu1 }
 0xa54   : > { %v7310_v22 = vmax.f32 %v7278_v18, 0.0 }
 0xa55   : > { %v7407_v37 = vld [vmem:[#allocation2 + $0x168] sm:$0xff] }
 0xa56   : > { %7342 = vst.msk [vmem:[#allocation2 + $0x170] sm:$0xff] %vm513_vm0, %v7310_v22  ;;  %7525 = vrot.lane.b32.xlu1 %v7407_v37, %s10352_s19 }
 0xa57   : > { %v7191_v16 = vpop.f32.mrf.mxu3 }
 0xa58   : > { %v7243_v47 = vadd.f32 %v7191_v16, %v6563_v36  ;;  %v6581_v36 = vadd.f32 %v6580_v55, %v6371_v28  ;;  %v16234_v28 = vld [vmem:[#allocation2 + $0x29] sm:$0xff]  ;;  %v16249_v55 = vld [vmem:[#allocation2 + $0x51] sm:$0xff] }
 0xa5a   : > { %v7279_v57 = vadd.f32 %v15953_v25, %v7243_v47  ;;  %v6377_v1 = vpop.f32.mrf.mxu1 }
 0xa5c   : > { %v7311_v51 = vmax.f32 %v7279_v57, 0.0  ;;  %v6583_v57 = vpop.f32.mrf.mxu2 }
 0xa5d   : > { %v7408_v20 = vld [vmem:[#allocation2 + $0x170] sm:$0xff]  ;;  %v6584_v10 = vadd.f32 %v6583_v57, %v6374_v30  ;;  %v16270_v30 = vpop.permute.xlu0 %7481 }
 0xa5e   : > { %7343 = vst.msk [vmem:[#allocation2 + $0x188] sm:$0xff] %vm513_vm0, %v7311_v51  ;;  %7527 = vrot.lane.b32.xlu2 %v7408_v20, %s10352_s19  ;;  %v7779_v57 = vld [vmem:[%s17406_s10 + $0x50] sm:$0xff] }
 0xa5f   : > { %v7194_v63 = vpop.f32.mrf.mxu3 }
 0xa60   : > { %v7244_v4 = vadd.f32 %v7194_v63, %v6566_v62 }
 0xa62   : > { %v7280_v13 = vadd.f32 %v15953_v25, %v7244_v4 }
 0xa64   : > { %v7312_v39 = vmax.f32 %v7280_v13, 0.0 }
 0xa65   : > { %v7409_v8 = vld [vmem:[#allocation2 + $0x188] sm:$0xff] }
 0xa66   : > { %7344 = vst.msk [vmem:[#allocation2 + $0x190] sm:$0xff] %vm513_vm0, %v7312_v39  ;;  %7529 = vrot.lane.b32.xlu0 %v7409_v8, %s10352_s19  ;;  %v6586_v39 = vpop.f32.mrf.mxu2  ;;  %v7417_v8 = vld [vmem:[#allocation2 + $0x9] sm:$0xff] }
 0xa67   : > { %v7197_v31 = vpop.f32.mrf.mxu3 }
 0xa68   : > { %v7245_v33 = vadd.f32 %v7197_v31, %v6569_v3 }
 0xa6a   : > { %v7281_v2 = vadd.f32 %v15953_v25, %v7245_v33  ;;  %v6587_v33 = vadd.f32 %v6586_v39, %v6377_v1  ;;  %v16305_v1 = vpop.permute.xlu0 %7487  ;;  %v7777_v39 = vld [vmem:[%s17406_s10 + $0x40] sm:$0xff] }
 0xa6c   : > { %v7313_v0 = vmax.f32 %v7281_v2, 0.0 }
 0xa6d   : > { %v7410_v43 = vld [vmem:[#allocation2 + $0x190] sm:$0xff] }
 0xa6e   : > { %7345 = vst.msk [vmem:[#allocation2 + $0x1a8] sm:$0xff] %vm513_vm0, %v7313_v0  ;;  %7531 = vrot.lane.b32.xlu1 %v7410_v43, %s10352_s19  ;;  %v6380_v43 = vpop.f32.mrf.mxu1 }
 0xa6f   : > { %v7200_v59 = vpop.f32.mrf.mxu3 }
 0xa70   : > { %v7246_v56 = vadd.f32 %v7200_v59, %v6572_v27  ;;  %v7418_v27 = vld [vmem:[#allocation2 + $0x11] sm:$0xff] }
 0xa72   : > { %v7282_v52 = vadd.f32 %v15953_v25, %v7246_v56  ;;  %v6589_v56 = vpop.f32.mrf.mxu2 }
 0xa73   : > { %v6590_v29 = vadd.f32 %v6589_v56, %v6380_v43  ;;  %v10140_v43 = vld [vmem:[%s17406_s10 + $0x108] sm:$0xff] }
 0xa74   : > { %v7314_v48 = vmax.f32 %v7282_v52, 0.0 }
 0xa75   : > { %v7411_v60 = vld [vmem:[#allocation2 + $0x1a8] sm:$0xff] }
 0xa76   : > { %7346 = vst.msk [vmem:[#allocation2 + $0x1b0] sm:$0xff] %vm513_vm0, %v7314_v48  ;;  %7533 = vrot.lane.b32.xlu2 %v7411_v60, %s10352_s19  ;;  %v16221_v48 = vld [vmem:[#allocation2 + $0x31] sm:$0xff]  ;;  %v16225_v60 = vpop.permute.xlu2 %7485 }
 0xa77   : > { %v7203_v35 = vpop.f32.mrf.mxu3 }
 0xa78   : > { %v7247_v19 = vadd.f32 %v7203_v35, %v6575_v15  ;;  %v10066_v35 = vld [vmem:[%s17406_s10 + $0xb8] sm:$0xff] }
 0xa79   : > { %8310 = vmatpush.msrb.mxu0 %v10066_v35 }
 0xa7a   : > { %v7283_v61 = vadd.f32 %v15953_v25, %v7247_v19  ;;  %v7780_v19 = vld [vmem:[%s17406_s10 + $0x58] sm:$0xff] }
 0xa7b   : > { %8519 = vmatpush.msrb.mxu1 %v7780_v19 }
 0xa7c   : > { %v7315_v49 = vmax.f32 %v7283_v61, 0.0 }
 0xa7d   : > { %v7412_v12 = vld [vmem:[#allocation2 + $0x1b0] sm:$0xff]  ;;  %8520 = vmatpush.msrb.mxu1 %v7779_v57 }
 0xa7e   : > { %7347 = vst.msk [vmem:[#allocation2 + $0x1c8] sm:$0xff] %vm513_vm0, %v7315_v49  ;;  %7535 = vrot.lane.b32.xlu0 %v7412_v12, %s10352_s19  ;;  %v16236_v12 = vld [vmem:[#allocation2 + $0x49] sm:$0xff] }
 0xa7f   : > { %v7206_v11 = vpop.f32.mrf.mxu3 }
 0xa80   : > { %v7248_v18 = vadd.f32 %v7206_v11, %v6578_v34  ;;  %v16243_v34 = vld [vmem:[#allocation2 + $0x69] sm:$0xff]  ;;  %v16251_v11 = vld [vmem:[#allocation2 + $0x71] sm:$0xff] }
 0xa82   : > { %v7284_v22 = vadd.f32 %v15953_v25, %v7248_v18  ;;  %v16257_v18 = vld [vmem:[#allocation2 + $0x91] sm:$0xff] }
 0xa84   : > { %v7316_v42 = vmax.f32 %v7284_v22, 0.0 }
 0xa85   : > { %v7413_v37 = vld [vmem:[#allocation2 + $0x1c8] sm:$0xff] }
 0xa86   : > { %7348 = vst.msk [vmem:[#allocation2 + $0x1d0] sm:$0xff] %vm513_vm0, %v7316_v42  ;;  %7537 = vrot.lane.b32.xlu1 %v7413_v37, %s10352_s19  ;;  %v10141_v42 = vld [vmem:[%s17406_s10 + $0x110] sm:$0xff] }
 0xa87   : > { %v7209_v16 = vpop.f32.mrf.mxu3  ;;  %9158 = vmatpush.msrb.mxu2 %v10141_v42  ;;  %v16266_v37 = vld [vmem:[#allocation2 + $0xa9] sm:$0xff] }
 0xa88   : > { %v7249_v47 = vadd.f32 %v7209_v16, %v6581_v36  ;;  %v16268_v36 = vld [vmem:[#allocation2 + $0x89] sm:$0xff] }
 0xa89   : > { %v16276_v16 = vld [vmem:[#allocation2 + $0xc9] sm:$0xff]  ;;  %9159 = vmatpush.msrb.mxu2 %v10140_v43 }
 0xa8a   : > { %v7285_v51 = vadd.f32 %v15953_v25, %v7249_v47  ;;  %v10065_v47 = vld [vmem:[%s17406_s10 + $0xb0] sm:$0xff] }
 0xa8b   : > { %8311 = vmatpush.msrb.mxu0 %v10065_v47  ;;  %v10063_v47 = vld [vmem:[%s17406_s10 + $0xa0] sm:$0xff] }
 0xa8c   : > { %v7317_v20 = vmax.f32 %v7285_v51, 0.0 }
 0xa8d   : > { %v7414_v62 = vld [vmem:[#allocation2 + $0x1d0] sm:$0xff] }
 0xa8e   : > { %7349 = vst.msk [vmem:[#allocation2 + $0x1e8] sm:$0xff] %vm513_vm0, %v7317_v20  ;;  %7539 = vrot.lane.b32.xlu2 %v7414_v62, %s10352_s19  ;;  %v16288_v20 = vpop.permute.xlu1 %7483  ;;  %v16290_v62 = vld [vmem:[#allocation2 + $0xd1] sm:$0xff] }
 0xa8f   : > { %v7212_v63 = vpop.f32.mrf.mxu3 }
 0xa90   : > { %v7250_v4 = vadd.f32 %v7212_v63, %v6584_v10  ;;  %v16292_v10 = vld [vmem:[#allocation2 + $0xb1] sm:$0xff] }
 0xa91   : > { %v16298_v63 = vld [vmem:[#allocation2 + $0xf1] sm:$0xff] }
 0xa92   : > { %v7286_v13 = vadd.f32 %v15953_v25, %v7250_v4  ;;  %v7778_v4 = vld [vmem:[%s17406_s10 + $0x48] sm:$0xff] }
 0xa93   : > { %8521 = vmatpush.msrb.mxu1 %v7778_v4  ;;  %v7353_v4 = vld [vmem:[#allocation2 + $0x7] sm:$0xff] }
 0xa94   : > { %v7318_v3 = vmax.f32 %v7286_v13, 0.0 }
 0xa95   : > { %v7415_v31 = vld [vmem:[#allocation2 + $0x1e8] sm:$0xff]  ;;  %8522 = vmatpush.msrb.mxu1 %v7777_v39 }
 0xa96   : > { %7350 = vst.msk [vmem:[#allocation2 + $0x1f0] sm:$0xff] %vm513_vm0, %v7318_v3  ;;  %7541 = vrot.lane.b32.xlu0 %v7415_v31, %s10352_s19  ;;  %7609 = vrot.lane.b32.xlu2 %v7417_v8, %s10353_s23  ;;  %v7776_v8 = vld [vmem:[%s17406_s10 + $0x38] sm:$0xff]  ;;  %v7775_v3 = vld [vmem:[%s17406_s10 + $0x30] sm:$0xff] }
 0xa97   : > { %v7215_v24 = vpop.f32.mrf.mxu3  ;;  %8523 = vmatpush.msrb.mxu1 %v7776_v8  ;;  %v16318_v31 = vld [vmem:[#allocation2 + $0xe9] sm:$0xff] }
 0xa98   : > { %v7251_v2 = vadd.f32 %v7215_v24, %v6587_v33  ;;  %v16324_v33 = vpop.permute.xlu1 %7489  ;;  %v7774_v24 = vld [vmem:[%s17406_s10 + $0x28] sm:$0xff] }
 0xa99   : > { %8524 = vmatpush.msrb.mxu1 %v7775_v3 }
 0xa9a   : > { %v7287_v0 = vadd.f32 %v15953_v25, %v7251_v2  ;;  %v16331_v2 = vpop.permute.xlu0 %7493 }
 0xa9b   : > { %8525 = vmatpush.msrb.mxu1 %v7774_v24 }
 0xa9c   : > { %v7319_v59 = vmax.f32 %v7287_v0, 0.0  ;;  %v7773_v0 = vld [vmem:[%s17406_s10 + $0x20] sm:$0xff] }
 0xa9d   : > { %v7416_v52 = vld [vmem:[#allocation2 + $0x1f0] sm:$0xff]  ;;  %8526 = vmatpush.msrb.mxu1 %v7773_v0 }
 0xa9e   : > { %7351 = vst.msk [vmem:[#allocation2 + $0x208] sm:$0xff] %vm513_vm0, %v7319_v59  ;;  %7543 = vrot.lane.b32.xlu1 %v7416_v52, %s10352_s19  ;;  %7611 = vrot.lane.b32.xlu0 %v7418_v27, %s10353_s23  ;;  %v10064_v27 = vld [vmem:[%s17406_s10 + $0xa8] sm:$0xff]  ;;  %v7771_v59 = vld [vmem:[%s17406_s10 + $0x10] sm:$0xff] }
 0xa9f   : > { %7615 = vrot.lane.b32.xlu2 %v16221_v48, %s10353_s23  ;;  %v7218_v46 = vpop.f32.mrf.mxu3  ;;  %8312 = vmatpush.msrb.mxu0 %v10064_v27  ;;  %v7770_v52 = vld [vmem:[%s17406_s10 + $0x8] sm:$0xff] }
 0xaa0   : > { %v7252_v15 = vadd.f32 %v7218_v46, %v6590_v29  ;;  %v16354_v56 = vpop.permute.xlu1 %7495 }
 0xaa1   : > { %8313 = vmatpush.msrb.mxu0 %v10063_v47 }
 0xaa2   : > { %v7288_v61 = vadd.f32 %v15953_v25, %v7252_v15  ;;  %v16247_v25 = vpop.permute.xlu2 %7491  ;;  %v16361_v29 = vpop.permute.xlu0 %7499  ;;  %v7769_v15 = vld [vmem:[%s17406_s10] sm:$0xff] }
 0xaa4   : > { %v7320_v49 = vmax.f32 %v7288_v61, 0.0 }
 0xaa6   : > { %7352 = vst.msk [vmem:[#allocation2 + $0x210] sm:$0xff] %vm513_vm0, %v7320_v49  ;;  %7613 = vrot.lane.b32.xlu1 %v16234_v28, %s10353_s23  ;;  %7617 = vrot.lane.b32.xlu0 %v16236_v12, %s10353_s23  ;;  %v10139_v49 = vld [vmem:[%s17406_s10 + $0x100] sm:$0xff] }
 0xaa7   : > { %7621 = vrot.lane.b32.xlu2 %v16243_v34, %s10353_s23  ;;  %9160 = vmatpush.msrb.mxu2 %v10139_v49 }
 0xaa8   : > { %v16372_v35 = vpop.permute.xlu1 %7501 }
 0xaaa   : > { %v16261_v22 = vpop.permute.xlu2 %7497  ;;  %v16376_v19 = vpop.permute.xlu0 %7505 }
 0xaae   : > { %7619 = vrot.lane.b32.xlu1 %v16249_v55, %s10353_s23  ;;  %7623 = vrot.lane.b32.xlu0 %v16251_v11, %s10353_s23 }
 0xaaf   : > { %7627 = vrot.lane.b32.xlu2 %v16257_v18, %s10353_s23 }
 0xab2   : > { %v16286_v51 = vpop.permute.xlu2 %7503 }
 0xab6   : > { %7629 = vrot.lane.b32.xlu0 %v16266_v37, %s10353_s23  ;;  %7625 = vrot.lane.b32.xlu1 %v16268_v36, %s10353_s23 }
 0xab7   : > { %7633 = vrot.lane.b32.xlu2 %v16276_v16, %s10353_s23 }
 0xaba   : > { %v16307_v13 = vpop.permute.xlu2 %7509 }
 0xabe   : > { %7635 = vrot.lane.b32.xlu0 %v16290_v62, %s10353_s23  ;;  %7631 = vrot.lane.b32.xlu1 %v16292_v10, %s10353_s23 }
 0xabf   : > { %7639 = vrot.lane.b32.xlu2 %v16298_v63, %s10353_s23 }
 0xac2   : > { %v16333_v7 = vpop.permute.xlu2 %7515 }
 0xac6   : > { %8756 = vrot.lane.b32.xlu0 %v16000_v5, %s10352_s19  ;;  %7637 = vrot.lane.b32.xlu1 %v16318_v31, %s10353_s23 }
 0xac7   : > { %7909 = vrot.lane.b32.xlu2 %v15970_v45, %s10352_s19  ;;  %v7772_v45 = vld [vmem:[%s17406_s10 + $0x18] sm:$0xff] }
 0xac8   : > { %8527 = vmatpush.msrb.mxu1 %v7772_v45 }
 0xaca   : > { %8528 = vmatpush.msrb.mxu1 %v7771_v59  ;;  %v16363_v46 = vpop.permute.xlu2 %7521 }
 0xacc   : > { %8529 = vmatpush.msrb.mxu1 %v7770_v52  ;;  %v10137_v52 = vld [vmem:[%s17406_s10 + $0xf0] sm:$0xff] }
 0xace   : > { %8037 = vrot.lane.b32.xlu0 %v16234_v28, %s10353_s23  ;;  %8884 = vrot.lane.b32.xlu1 %v16236_v12, %s10353_s23  ;;  %v16391_v28 = vpop.permute.xlu0 %7511 }
 0xacf   : > { %8886 = vrot.lane.b32.xlu2 %v16249_v55, %s10353_s23  ;;  %8530 = vmatpush.msrb.mxu1 %v7769_v15  ;;  %v10061_v15 = vld [vmem:[%s17406_s10 + $0x90] sm:$0xff] }
 0xad2   : > { %v16378_v61 = vpop.permute.xlu2 %7527 }
 0xad6   : > { %7911 = vrot.lane.b32.xlu0 %v15984_v26, %s10352_s19  ;;  %8758 = vrot.lane.b32.xlu1 %v16016_v44, %s10352_s19  ;;  %v16387_v26 = vpop.permute.xlu1 %7507 }
 0xad7   : > { %8760 = vrot.lane.b32.xlu2 %v16032_v17, %s10352_s19 }
 0xada   : > { %v16393_v42 = vpop.permute.xlu2 %7533 }
 0xade   : > { %8888 = vrot.lane.b32.xlu0 %v16243_v34, %s10353_s23  ;;  %8039 = vrot.lane.b32.xlu1 %v16221_v48, %s10353_s23  ;;  %v16402_v48 = vpop.permute.xlu1 %7513 }
 0xadf   : > { %8041 = vrot.lane.b32.xlu2 %v16236_v12, %s10353_s23  ;;  %v16406_v12 = vpop.permute.xlu0 %7517 }
 0xae6   : > { %8762 = vrot.lane.b32.xlu0 %v16046_v23, %s10352_s19  ;;  %7913 = vrot.lane.b32.xlu1 %v16000_v5, %s10352_s19  ;;  %v16414_v39 = vpop.permute.xlu1 %7519  ;;  %v7705_v5 = vsel %vm513_vm0, %v7353_v4, %v16270_v30  ;;  %v10062_v30 = vld [vmem:[%s17406_s10 + $0x98] sm:$0xff] }
 0xae7   : > { %7915 = vrot.lane.b32.xlu2 %v16016_v44, %s10352_s19  ;;  %v16420_v44 = vpop.permute.xlu0 %7523  ;;  %8314 = vmatpush.msrb.mxu0 %v10062_v30 }
 0xae8   : > { %v16408_v57 = vpop.permute.xlu2 %7539 }
 0xae9   : > { %8315 = vmatpush.msrb.mxu0 %v10061_v15  ;;  %v10059_v15 = vld [vmem:[%s17406_s10 + $0x80] sm:$0xff] }
 0xaee   : > { %8043 = vrot.lane.b32.xlu0 %v16249_v55, %s10353_s23  ;;  %8890 = vrot.lane.b32.xlu1 %v16251_v11, %s10353_s23  ;;  %v10138_v55 = vld [vmem:[%s17406_s10 + $0xf8] sm:$0xff]  ;;  %v16436_v24 = vpop.permute.xlu1 %7525 }
 0xaef   : > { %8892 = vrot.lane.b32.xlu2 %v16268_v36, %s10353_s23  ;;  %9161 = vmatpush.msrb.mxu2 %v10138_v55  ;;  %v16438_v0 = vpop.permute.xlu0 %7529 }
 0xaf0   : > { %v7610_v8 = vpop.permute.xlu2 %7609 }
 0xaf1   : > { %v7737_v3 = vsel %vm3065_vm6, %v7705_v5, %v7610_v8  ;;  %9162 = vmatpush.msrb.mxu2 %v10137_v52  ;;  %v10136_v8 = vld [vmem:[%s17406_s10 + $0xe8] sm:$0xff] }
 0xaf2   : > { %10099 = vmatmul.msk.f32.vlgmr.msrb.gmra.mxu1 %vm3551_vm7, %v7737_v3 }
 0xaf3   : > { %9163 = vmatpush.msrb.mxu2 %v10136_v8  ;;  %v10056_v8 = vld [vmem:[%s17406_s10 + $0x68] sm:$0xff] }
 0xaf6   : > { %7917 = vrot.lane.b32.xlu0 %v16032_v17, %s10352_s19  ;;  %8764 = vrot.lane.b32.xlu1 %v16060_v21, %s10352_s19  ;;  %v16448_v17 = vpop.permute.xlu1 %7531 }
 0xaf7   : > { %8766 = vrot.lane.b32.xlu2 %v16076_v58, %s10352_s19  ;;  %v16450_v45 = vpop.permute.xlu0 %7535 }
 0xaf9   : > { %v16440_v43 = vpop.permute.xlu2 %7615 }
 0xafe   : > { %8894 = vrot.lane.b32.xlu0 %v16257_v18, %s10353_s23  ;;  %8045 = vrot.lane.b32.xlu1 %v16243_v34, %s10353_s23  ;;  %v16460_v59 = vpop.permute.xlu1 %7537 }
 0xaff   : > { %8047 = vrot.lane.b32.xlu2 %v16251_v11, %s10353_s23 }
 0xb01   : > { %v16452_v27 = vpop.permute.xlu2 %7621 }
 0xb06   : > { %8768 = vrot.lane.b32.xlu0 %v16090_v38, %s10352_s19  ;;  %7919 = vrot.lane.b32.xlu1 %v16046_v23, %s10352_s19  ;;  %v7354_v23 = vld [vmem:[#allocation2 + $0xf] sm:$0xff] }
 0xb07   : > { %7921 = vrot.lane.b32.xlu2 %v16060_v21, %s10352_s19  ;;  %v7706_v21 = vsel %vm513_vm0, %v7354_v23, %v16288_v20  ;;  %v10060_v20 = vld [vmem:[%s17406_s10 + $0x88] sm:$0xff]  ;;  %v10135_v23 = vld [vmem:[%s17406_s10 + $0xe0] sm:$0xff] }
 0xb08   : > { %v16462_v34 = vpop.permute.xlu0 %7541  ;;  %8316 = vmatpush.msrb.mxu0 %v10060_v20  ;;  %9164 = vmatpush.msrb.mxu2 %v10135_v23  ;;  %v16529_v20 = vld [vmem:[#allocation2 + $0x2f] sm:$0xff]  ;;  %v10055_v23 = vld [vmem:[%s17406_s10 + $0x60] sm:$0xff] }
 0xb09   : > { %v16464_v11 = vpop.permute.xlu2 %7627 }
 0xb0a   : > { %8317 = vmatpush.msrb.mxu0 %v10059_v15 }
 0xb0e   : > { %8049 = vrot.lane.b32.xlu0 %v16268_v36, %s10353_s23  ;;  %8896 = vrot.lane.b32.xlu1 %v16266_v37, %s10353_s23  ;;  %v16490_v36 = vld [vmem:[#allocation2 + $0x27] sm:$0xff] }
 0xb0f   : > { %8898 = vrot.lane.b32.xlu2 %v16292_v10, %s10353_s23 }
 0xb10   : > { %v16480_v49 = vpop.permute.xlu1 %7543  ;;  %v7612_v47 = vpop.permute.xlu0 %7611 }
 0xb11   : > { %v7738_v4 = vsel %vm3065_vm6, %v7706_v21, %v7612_v47  ;;  %v16483_v5 = vpop.permute.xlu2 %7633  ;;  %v10134_v21 = vld [vmem:[%s17406_s10 + $0xd8] sm:$0xff]  ;;  %v10057_v47 = vld [vmem:[%s17406_s10 + $0x70] sm:$0xff] }
 0xb12   : > { %10100 = vmatmul.msk.f32.gmra.mxu1 %vm3551_vm7, %v7738_v4  ;;  %9165 = vmatpush.msrb.mxu2 %v10134_v21  ;;  %v10133_v4 = vld [vmem:[%s17406_s10 + $0xd0] sm:$0xff] }
 0xb14   : > { %9166 = vmatpush.msrb.mxu2 %v10133_v4 }
 0xb16   : > { %7923 = vrot.lane.b32.xlu0 %v16076_v58, %s10352_s19  ;;  %8770 = vrot.lane.b32.xlu1 %v16102_v14, %s10352_s19  ;;  %v7707_v58 = vsel %vm513_vm0, %v16490_v36, %v16225_v60  ;;  %v10058_v60 = vld [vmem:[%s17406_s10 + $0x78] sm:$0xff] }
 0xb17   : > { %8772 = vrot.lane.b32.xlu2 %v16115_v41, %s10352_s19  ;;  %8318 = vmatpush.msrb.mxu0 %v10058_v60  ;;  %v10131_v60 = vld [vmem:[%s17406_s10 + $0xc0] sm:$0xff] }
 0xb18   : > { %v7614_v3 = vpop.permute.xlu1 %7613  ;;  %v7618_v55 = vpop.permute.xlu0 %7617 }
 0xb19   : > { %v7739_v30 = vsel %vm3065_vm6, %v7707_v58, %v7614_v3  ;;  %v16504_v52 = vpop.permute.xlu2 %7639  ;;  %8319 = vmatpush.msrb.mxu0 %v10057_v47  ;;  %v10132_v58 = vld [vmem:[%s17406_s10 + $0xc8] sm:$0xff]  ;;  %v7708_v3 = vsel %vm513_vm0, %v16529_v20, %v16305_v1 }
 0xb1a   : > { %10101 = vmatmul.msk.f32.gmra.mxu1 %vm3551_vm7, %v7739_v30  ;;  %v7740_v15 = vsel %vm3065_vm6, %v7708_v3, %v16440_v43  ;;  %9167 = vmatpush.msrb.mxu2 %v10132_v58  ;;  %v16555_v1 = vld [vmem:[#allocation2 + $0x47] sm:$0xff] }
 0xb1b   : > { %8320 = vmatpush.msrb.mxu0 %v10056_v8  ;;  %v7709_v43 = vsel %vm513_vm0, %v16555_v1, %v16324_v33 }
 0xb1c   : > { %9168 = vmatpush.msrb.mxu2 %v10131_v60  ;;  %v7741_v4 = vsel %vm3065_vm6, %v7709_v43, %v7618_v55 }
 0xb1d   : > { %8321 = vmatpush.msrb.mxu0 %v10055_v23 }
 0xb1e   : > { %8900 = vrot.lane.b32.xlu0 %v16276_v16, %s10353_s23  ;;  %8051 = vrot.lane.b32.xlu1 %v16257_v18, %s10353_s23 }
 0xb1f   : > { %8053 = vrot.lane.b32.xlu2 %v16266_v37, %s10353_s23 }
 0xb20   : > { %v7620_v30 = vpop.permute.xlu1 %7619  ;;  %v7624_v18 = vpop.permute.xlu0 %7623 }
 0xb21   : > { %v7910_v37 = vpop.permute.xlu2 %7909 }
 0xb22   : > { %10102 = vmatmul.msk.f32.gmra.mxu1 %vm3551_vm7, %v7740_v15 }
 0xb26   : > { %8774 = vrot.lane.b32.xlu0 %v16128_v40, %s10352_s19  ;;  %7925 = vrot.lane.b32.xlu1 %v16090_v38, %s10352_s19  ;;  %v16570_v38 = vld [vmem:[#allocation2 + $0x4f] sm:$0xff] }
 0xb27   : > { %7927 = vrot.lane.b32.xlu2 %v16102_v14, %s10352_s19  ;;  %v7710_v14 = vsel %vm513_vm0, %v16570_v38, %v16247_v25 }
 0xb28   : > { %v16562_v21 = vpop.permute.xlu0 %7629  ;;  %v7626_v47 = vpop.permute.xlu1 %7625  ;;  %v7742_v58 = vsel %vm3065_vm6, %v7710_v14, %v7620_v30 }
 0xb29   : > { %v8887_v8 = vpop.permute.xlu2 %8886 }
 0xb2a   : > { %10103 = vmatmul.msk.f32.gmra.mxu1 %vm3551_vm7, %v7741_v4 }
 0xb2e   : > { %8055 = vrot.lane.b32.xlu0 %v16292_v10, %s10353_s23  ;;  %8902 = vrot.lane.b32.xlu1 %v16290_v62, %s10353_s23  ;;  %v16587_v10 = vld [vmem:[#allocation2 + $0x67] sm:$0xff] }
 0xb2f   : > { %8904 = vrot.lane.b32.xlu2 %v16318_v31, %s10353_s23  ;;  %v7711_v25 = vsel %vm513_vm0, %v16587_v10, %v16331_v2 }
 0xb30   : > { %v16577_v33 = vpop.permute.xlu0 %7635  ;;  %v16579_v55 = vpop.permute.xlu1 %7631  ;;  %v7743_v23 = vsel %vm3065_vm6, %v7711_v25, %v16452_v27  ;;  %v8133_v27 = vsel %vm513_vm0, %v16490_v36, %v7910_v37 }
 0xb31   : > { %v8761_v3 = vpop.permute.xlu2 %8760 }
 0xb32   : > { %10104 = vmatmul.msk.f32.gmra.mxu1 %vm3551_vm7, %v7742_v58 }
 0xb36   : > { %7929 = vrot.lane.b32.xlu0 %v16115_v41, %s10352_s19  ;;  %8776 = vrot.lane.b32.xlu1 %v16140_v50, %s10352_s19  ;;  %v16603_v41 = vld [vmem:[#allocation2 + $0x6f] sm:$0xff] }
 0xb37   : > { %8778 = vrot.lane.b32.xlu2 %v16151_v9, %s10352_s19  ;;  %v7712_v2 = vsel %vm513_vm0, %v16603_v41, %v16354_v56 }
 0xb38   : > { %v8757_v15 = vpop.permute.xlu0 %8756  ;;  %v16594_v30 = vpop.permute.xlu1 %7637  ;;  %v7744_v58 = vsel %vm3065_vm6, %v7712_v2, %v7624_v18  ;;  %v8982_v2 = vsel %vm513_vm0, %v16587_v10, %v8761_v3 }
 0xb39   : > { %v8042_v60 = vpop.permute.xlu2 %8041  ;;  %v8980_v43 = vsel %vm513_vm0, %v16555_v1, %v8757_v15 }
 0xb3a   : > { %10105 = vmatmul.msk.f32.gmra.mxu1 %vm3551_vm7, %v7743_v23 }
 0xb3e   : > { %8906 = vrot.lane.b32.xlu0 %v16298_v63, %s10353_s23  ;;  %8057 = vrot.lane.b32.xlu1 %v16276_v16, %s10353_s23 }
 0xb3f   : > { %8059 = vrot.lane.b32.xlu2 %v16290_v62, %s10353_s23  ;;  %v16624_v62 = vld [vmem:[#allocation2 + $0x87] sm:$0xff] }
 0xb40   : > { %v8038_v4 = vpop.permute.xlu0 %8037  ;;  %v8885_v14 = vpop.permute.xlu1 %8884  ;;  %v7713_v56 = vsel %vm513_vm0, %v16624_v62, %v16261_v22  ;;  %v16645_v22 = vld [vmem:[#allocation2 + $0x111] sm:$0xff] }
 0xb41   : > { %v8165_v16 = vsel %vm3065_vm6, %v8133_v27, %v8038_v4  ;;  %v9012_v25 = vsel %vm3065_vm6, %v8980_v43, %v8885_v14  ;;  %v7916_v23 = vpop.permute.xlu2 %7915  ;;  %v7745_v37 = vsel %vm3065_vm6, %v7713_v56, %v7626_v47  ;;  %v16647_v47 = vld [vmem:[#allocation2 + $0x8f] sm:$0xff] }
 0xb42   : > { %10067 = vmatmul.msk.f32.vlgmr.msrb.gmra.mxu0 %vm3551_vm7, %v8165_v16  ;;  %10106 = vmatmul.msk.f32.gmra.mxu1 %vm3551_vm7, %v7744_v58 }
 0xb43   : > { %10143 = vmatmul.msk.f32.vlgmr.msrb.gmra.mxu2 %vm3551_vm7, %v9012_v25 }
 0xb46   : > { %8780 = vrot.lane.b32.xlu0 %v16157_v54, %s10352_s19  ;;  %7931 = vrot.lane.b32.xlu1 %v16128_v40, %s10352_s19 }
 0xb47   : > { %7933 = vrot.lane.b32.xlu2 %v16140_v50, %s10352_s19  ;;  %v16639_v50 = vld [vmem:[#allocation2 + $0x109] sm:$0xff] }
 0xb48   : > { %v7912_v36 = vpop.permute.xlu0 %7911  ;;  %v8759_v18 = vpop.permute.xlu1 %8758 }
 0xb49   : > { %v8981_v15 = vsel %vm513_vm0, %v16570_v38, %v8759_v18  ;;  %v16634_v54 = vpop.permute.xlu2 %8892 }
 0xb4a   : > { %10107 = vmatmul.msk.f32.gmra.mxu1 %vm3551_vm7, %v7745_v37  ;;  %v9013_v40 = vsel %vm3065_vm6, %v8981_v15, %v8887_v8  ;;  %v7714_v8 = vsel %vm513_vm0, %v16647_v47, %v16361_v29  ;;  %v16669_v29 = vld [vmem:[#allocation2 + $0xa7] sm:$0xff] }
 0xb4b   : > { %10144 = vmatmul.msk.f32.gmra.mxu2 %vm3551_vm7, %v9013_v40  ;;  %v7746_v4 = vsel %vm3065_vm6, %v7714_v8, %v16464_v11  ;;  %v7715_v11 = vsel %vm513_vm0, %v16669_v29, %v16372_v35  ;;  %v7364_v35 = vld [vmem:[#allocation2 + $0xaf] sm:$0xff] }
 0xb4c   : > { %v7747_v25 = vsel %vm3065_vm6, %v7715_v11, %v16562_v21  ;;  %v8136_v21 = vsel %vm513_vm0, %v16570_v38, %v7916_v23  ;;  %v7828_v38 = vld [vmem:[#allocation2 + $0x110] sm:$0xff]  ;;  %v16709_v23 = vld [vmem:[#allocation2 + $0xc7] sm:$0xff] }
 0xb4e   : > { %8061 = vrot.lane.b32.xlu0 %v16318_v31, %s10353_s23  ;;  %8908 = vrot.lane.b32.xlu1 %v16639_v50, %s10353_s23  ;;  %v8134_v31 = vsel %vm513_vm0, %v16529_v20, %v7912_v36 }
 0xb4f   : > { %8910 = vrot.lane.b32.xlu2 %v16645_v22, %s10353_s23 }
 0xb50   : > { %v8889_v27 = vpop.permute.xlu0 %8888  ;;  %v8040_v43 = vpop.permute.xlu1 %8039 }
 0xb51   : > { %v9014_v14 = vsel %vm3065_vm6, %v8982_v2, %v8889_v27  ;;  %v8166_v58 = vsel %vm3065_vm6, %v8134_v31, %v8040_v43  ;;  %v8767_v16 = vpop.permute.xlu2 %8766 }
 0xb52   : > { %10068 = vmatmul.msk.f32.gmra.mxu0 %vm3551_vm7, %v8166_v58  ;;  %10108 = vmatmul.msk.f32.gmra.mxu1 %vm3551_vm7, %v7746_v4  ;;  %v16725_v4 = vld [vmem:[#allocation2 + $0x131] sm:$0xff] }
 0xb53   : > { %10145 = vmatmul.msk.f32.gmra.mxu2 %vm3551_vm7, %v9014_v14  ;;  %v8985_v14 = vsel %vm513_vm0, %v16647_v47, %v8767_v16  ;;  %v8676_v47 = vld [vmem:[#allocation2 + $0x148] sm:$0xff] }
 0xb56   : > { %7935 = vrot.lane.b32.xlu0 %v16151_v9, %s10352_s19  ;;  %8782 = vrot.lane.b32.xlu1 %v16163_v6, %s10352_s19 }
 0xb57   : > { %8784 = vrot.lane.b32.xlu2 %v16169_v53, %s10352_s19  ;;  %v16685_v53 = vld [vmem:[#allocation2 + $0x129] sm:$0xff] }
 0xb58   : > { %v8763_v20 = vpop.permute.xlu0 %8762  ;;  %v7914_v3 = vpop.permute.xlu1 %7913 }
 0xb59   : > { %v8135_v9 = vsel %vm513_vm0, %v16555_v1, %v7914_v3  ;;  %v16680_v56 = vpop.permute.xlu2 %8047  ;;  %v7716_v1 = vsel %vm513_vm0, %v7364_v35, %v16286_v51  ;;  %v7827_v51 = vld [vmem:[#allocation2 + $0x108] sm:$0xff] }
 0xb5a   : > { %10109 = vmatmul.msk.f32.gmra.mxu1 %vm3551_vm7, %v7747_v25  ;;  %v8167_v6 = vsel %vm3065_vm6, %v8135_v9, %v8042_v60  ;;  %v8983_v60 = vsel %vm513_vm0, %v16603_v41, %v8763_v20  ;;  %v7748_v37 = vsel %vm3065_vm6, %v7716_v1, %v16579_v55  ;;  %v7717_v55 = vsel %vm513_vm0, %v16709_v23, %v16376_v19  ;;  %v16731_v19 = vld [vmem:[#allocation2 + $0x149] sm:$0xff] }
 0xb5b   : > { %10069 = vmatmul.msk.f32.gmra.mxu0 %vm3551_vm7, %v8167_v6  ;;  %v7749_v31 = vsel %vm3065_vm6, %v7717_v55, %v16483_v5  ;;  %v16733_v5 = vld [vmem:[#allocation2 + $0xcf] sm:$0xff] }
 0xb5e   : > { %8912 = vrot.lane.b32.xlu0 %v16685_v53, %s10353_s23  ;;  %8063 = vrot.lane.b32.xlu1 %v16298_v63, %s10353_s23 }
 0xb5f   : > { %8065 = vrot.lane.b32.xlu2 %v16639_v50, %s10353_s23 }
 0xb60   : > { %v8044_v36 = vpop.permute.xlu0 %8043  ;;  %v8891_v18 = vpop.permute.xlu1 %8890 }
 0xb61   : > { %v8168_v63 = vsel %vm3065_vm6, %v8136_v21, %v8044_v36  ;;  %v9015_v15 = vsel %vm3065_vm6, %v8983_v60, %v8891_v18  ;;  %v7922_v40 = vpop.permute.xlu2 %7921  ;;  %v8677_v18 = vld [vmem:[#allocation2 + $0x150] sm:$0xff] }
 0xb62   : > { %10110 = vmatmul.msk.f32.gmra.mxu1 %vm3551_vm7, %v7748_v37  ;;  %10146 = vmatmul.msk.f32.gmra.mxu2 %vm3551_vm7, %v9015_v15  ;;  %v16768_v37 = vld [vmem:[#allocation2 + $0xef] sm:$0xff] }
 0xb63   : > { %10070 = vmatmul.msk.f32.gmra.mxu0 %vm3551_vm7, %v8168_v63 }
 0xb66   : > { %8786 = vrot.lane.b32.xlu0 %v16175_v32, %s10352_s19  ;;  %7937 = vrot.lane.b32.xlu1 %v7827_v51, %s10352_s19 }
 0xb67   : > { %7939 = vrot.lane.b32.xlu2 %v7828_v38, %s10352_s19 }
 0xb68   : > { %v7918_v8 = vpop.permute.xlu0 %7917  ;;  %v8765_v2 = vpop.permute.xlu1 %8764 }
 0xb69   : > { %v8984_v27 = vsel %vm513_vm0, %v16624_v62, %v8765_v2  ;;  %v16719_v32 = vpop.permute.xlu2 %8898  ;;  %v8137_v58 = vsel %vm513_vm0, %v16587_v10, %v7918_v8  ;;  %v7367_v10 = vld [vmem:[#allocation2 + $0xe7] sm:$0xff] }
 0xb6a   : > { %10111 = vmatmul.msk.f32.gmra.mxu1 %vm3551_vm7, %v7749_v31  ;;  %v9016_v43 = vsel %vm3065_vm6, %v8984_v27, %v16634_v54  ;;  %v7718_v54 = vsel %vm513_vm0, %v16733_v5, %v16387_v26  ;;  %v7829_v26 = vld [vmem:[#allocation2 + $0x128] sm:$0xff] }
 0xb6b   : > { %10147 = vmatmul.msk.f32.gmra.mxu2 %vm3551_vm7, %v9016_v43  ;;  %v7750_v3 = vsel %vm3065_vm6, %v7718_v54, %v16577_v33  ;;  %v7719_v33 = vsel %vm513_vm0, %v7367_v10, %v16307_v13  ;;  %v7830_v13 = vld [vmem:[#allocation2 + $0x130] sm:$0xff] }
 0xb6c   : > { %v7751_v1 = vsel %vm3065_vm6, %v7719_v33, %v16594_v30  ;;  %v7720_v30 = vsel %vm513_vm0, %v16768_v37, %v16391_v28  ;;  %v16785_v28 = vld [vmem:[#allocation2 + $0x151] sm:$0xff]  ;;  %v16796_v27 = vld [vmem:[#allocation2 + $0x169] sm:$0xff] }
 0xb6d   : > { %v8679_v10 = vld [vmem:[#allocation2 + $0x170] sm:$0xff] }
 0xb6e   : > { %8067 = vrot.lane.b32.xlu0 %v16645_v22, %s10353_s23  ;;  %8914 = vrot.lane.b32.xlu1 %v16725_v4, %s10353_s23 }
 0xb6f   : > { %8916 = vrot.lane.b32.xlu2 %v16731_v19, %s10353_s23 }
 0xb70   : > { %v8895_v11 = vpop.permute.xlu0 %8894  ;;  %v8046_v20 = vpop.permute.xlu1 %8045 }
 0xb71   : > { %v9017_v25 = vsel %vm3065_vm6, %v8985_v14, %v8895_v11  ;;  %v8169_v9 = vsel %vm3065_vm6, %v8137_v58, %v8046_v20  ;;  %v8773_v6 = vpop.permute.xlu2 %8772 }
 0xb72   : > { %10071 = vmatmul.msk.f32.gmra.mxu0 %vm3551_vm7, %v8169_v9  ;;  %10112 = vmatmul.msk.f32.gmra.mxu1 %vm3551_vm7, %v7750_v3  ;;  %v8988_v43 = vsel %vm513_vm0, %v16709_v23, %v8773_v6  ;;  %v7789_v3 = vld [vmem:[#allocation2 + $0xa7] sm:$0xff] }
 0xb73   : > { %10148 = vmatmul.msk.f32.gmra.mxu2 %vm3551_vm7, %v9017_v25 }
 0xb76   : > { %7941 = vrot.lane.b32.xlu0 %v7829_v26, %s10352_s19  ;;  %8788 = vrot.lane.b32.xlu1 %v8676_v47, %s10352_s19 }
 0xb77   : > { %8069 = vrot.lane.b32.xlu2 %v16685_v53, %s10353_s23 }
 0xb78   : > { %v8769_v16 = vpop.permute.xlu0 %8768  ;;  %v7920_v35 = vpop.permute.xlu1 %7919 }
 0xb79   : > { %v8138_v21 = vsel %vm513_vm0, %v16603_v41, %v7920_v35  ;;  %v8054_v60 = vpop.permute.xlu2 %8053  ;;  %v8139_v41 = vsel %vm513_vm0, %v16624_v62, %v7922_v40  ;;  %v7790_v62 = vld [vmem:[#allocation2 + $0xaf] sm:$0xff] }
 0xb7a   : > { %10113 = vmatmul.msk.f32.gmra.mxu1 %vm3551_vm7, %v7751_v1  ;;  %v8170_v36 = vsel %vm3065_vm6, %v8138_v21, %v16680_v56  ;;  %v8986_v56 = vsel %vm513_vm0, %v16669_v29, %v8769_v16 }
 0xb7b   : > { %10072 = vmatmul.msk.f32.gmra.mxu0 %vm3551_vm7, %v8170_v36  ;;  %v8680_v36 = vld [vmem:[#allocation2 + $0x188] sm:$0xff] }
 0xb7e   : > { %8790 = vrot.lane.b32.xlu0 %v8677_v18, %s10352_s19  ;;  %7641 = vrot.lane.b32.xlu1 %v16639_v50, %s10353_s23  ;;  %v7752_v50 = vsel %vm3065_vm6, %v7720_v30, %v16504_v52  ;;  %v8678_v52 = vld [vmem:[#allocation2 + $0x168] sm:$0xff] }
 0xb7f   : > { %7943 = vrot.lane.b32.xlu2 %v7830_v13, %s10352_s19 }
 0xb80   : > { %v8050_v63 = vpop.permute.xlu0 %8049  ;;  %v8897_v15 = vpop.permute.xlu1 %8896 }
 0xb81   : > { %v8171_v51 = vsel %vm3065_vm6, %v8139_v41, %v8050_v63  ;;  %v9018_v38 = vsel %vm3065_vm6, %v8986_v56, %v8897_v15  ;;  %v7928_v55 = vpop.permute.xlu2 %7927  ;;  %v16839_v63 = vld [vmem:[#allocation2 + $0x189] sm:$0xff] }
 0xb82   : > { %10114 = vmatmul.msk.f32.gmra.mxu1 %vm3551_vm7, %v7752_v50  ;;  %10149 = vmatmul.msk.f32.gmra.mxu2 %vm3551_vm7, %v9018_v38  ;;  %v7791_v15 = vld [vmem:[#allocation2 + $0xc7] sm:$0xff] }
 0xb83   : > { %10073 = vmatmul.msk.f32.gmra.mxu0 %vm3551_vm7, %v8171_v51 }
 0xb86   : > { %7643 = vrot.lane.b32.xlu0 %v16645_v22, %s10353_s23  ;;  %8918 = vrot.lane.b32.xlu1 %v16785_v28, %s10353_s23  ;;  %v7788_v22 = vld [vmem:[#allocation2 + $0x8f] sm:$0xff] }
 0xb87   : > { %8792 = vrot.lane.b32.xlu2 %v8678_v52, %s10352_s19 }
 0xb88   : > { %v7924_v29 = vpop.permute.xlu0 %7923  ;;  %v8771_v40 = vpop.permute.xlu1 %8770 }
 0xb89   : > { %v8987_v8 = vsel %vm513_vm0, %v7790_v62, %v8771_v40  ;;  %v8905_v2 = vpop.permute.xlu2 %8904  ;;  %v8140_v54 = vsel %vm513_vm0, %v7788_v22, %v7924_v29  ;;  %v7792_v40 = vld [vmem:[#allocation2 + $0xcf] sm:$0xff] }
 0xb8a   : > { %v9019_v31 = vsel %vm3065_vm6, %v8987_v8, %v16719_v32 }
 0xb8b   : > { %10150 = vmatmul.msk.f32.gmra.mxu2 %vm3551_vm7, %v9019_v31 }
 0xb8e   : > { %8920 = vrot.lane.b32.xlu0 %v16796_v27, %s10353_s23  ;;  %8071 = vrot.lane.b32.xlu1 %v16725_v4, %s10353_s23 }
 0xb8f   : > { %7645 = vrot.lane.b32.xlu2 %v16685_v53, %s10353_s23  ;;  %v16814_v53 = vld [vmem:[#allocation2 + $0x171] sm:$0xff] }
 0xb90   : > { %v8901_v32 = vpop.permute.xlu0 %8900  ;;  %v8052_v14 = vpop.permute.xlu1 %8051 }
 0xb91   : > { %v9020_v58 = vsel %vm3065_vm6, %v8988_v43, %v8901_v32  ;;  %v8172_v11 = vsel %vm3065_vm6, %v8140_v54, %v8052_v14  ;;  %v8779_v20 = vpop.permute.xlu2 %8778  ;;  %v16869_v43 = vld [vmem:[#allocation2 + $0x1a9] sm:$0xff] }
 0xb92   : > { %10074 = vmatmul.msk.f32.gmra.mxu0 %vm3551_vm7, %v8172_v11  ;;  %v8991_v50 = vsel %vm513_vm0, %v16768_v37, %v8779_v20  ;;  %v16871_v54 = vld [vmem:[#allocation2 + $0x107] sm:$0xff] }
 0xb93   : > { %10151 = vmatmul.msk.f32.gmra.mxu2 %vm3551_vm7, %v9020_v58 }
 0xb96   : > { %8073 = vrot.lane.b32.xlu0 %v16731_v19, %s10353_s23  ;;  %7945 = vrot.lane.b32.xlu1 %v8676_v47, %s10352_s19  ;;  %v8142_v47 = vsel %vm513_vm0, %v7790_v62, %v7928_v55 }
 0xb97   : > { %8922 = vrot.lane.b32.xlu2 %v16814_v53, %s10353_s23 }
 0xb98   : > { %v8775_v23 = vpop.permute.xlu0 %8774  ;;  %v7926_v25 = vpop.permute.xlu1 %7925 }
 0xb99   : > { %v8141_v9 = vsel %vm513_vm0, %v7789_v3, %v7926_v25  ;;  %v8060_v6 = vpop.permute.xlu2 %8059  ;;  %v8989_v33 = vsel %vm513_vm0, %v16733_v5, %v8775_v23  ;;  %v7793_v5 = vld [vmem:[#allocation2 + $0xe7] sm:$0xff]  ;;  %v8532_v25 = vpop.f32.mrf.mxu1 }
 0xb9a   : > { %v8173_v26 = vsel %vm3065_vm6, %v8141_v9, %v8054_v60 }
 0xb9b   : > { %10075 = vmatmul.msk.f32.gmra.mxu0 %vm3551_vm7, %v8173_v26  ;;  %v16889_v26 = vld [vmem:[#allocation2 + $0x1a8] sm:$0xff] }
 0xb9e   : > { %7947 = vrot.lane.b32.xlu0 %v8677_v18, %s10352_s19  ;;  %8794 = vrot.lane.b32.xlu1 %v8679_v10, %s10352_s19 }
 0xb9f   : > { %8075 = vrot.lane.b32.xlu2 %v16785_v28, %s10353_s23 }
 0xba0   : > { %v8056_v16 = vpop.permute.xlu0 %8055  ;;  %v8903_v35 = vpop.permute.xlu1 %8902 }
 0xba1   : > { %v8174_v1 = vsel %vm3065_vm6, %v8142_v47, %v8056_v16  ;;  %v9021_v21 = vsel %vm3065_vm6, %v8989_v33, %v8903_v35  ;;  %v7934_v60 = vpop.permute.xlu2 %7933  ;;  %v7796_v33 = vld [vmem:[#allocation2 + $0x10f] sm:$0xff] }
 0xba2   : > { %10152 = vmatmul.msk.f32.gmra.mxu2 %vm3551_vm7, %v9021_v21 }
 0xba3   : > { %10076 = vmatmul.msk.f32.gmra.mxu0 %vm3551_vm7, %v8174_v1 }
 0xba6   : > { %8796 = vrot.lane.b32.xlu0 %v8680_v36, %s10352_s19  ;;  %7647 = vrot.lane.b32.xlu1 %v16725_v4, %s10353_s23  ;;  %v8681_v4 = vld [vmem:[#allocation2 + $0x190] sm:$0xff] }
 0xba7   : > { %7949 = vrot.lane.b32.xlu2 %v8678_v52, %s10352_s19 }
 0xba8   : > { %v7930_v18 = vpop.permute.xlu0 %7929  ;;  %v8777_v13 = vpop.permute.xlu1 %8776 }
 0xba9   : > { %v8990_v30 = vsel %vm513_vm0, %v7793_v5, %v8777_v13  ;;  %v8911_v41 = vpop.permute.xlu2 %8910  ;;  %v8143_v51 = vsel %vm513_vm0, %v7791_v15, %v7930_v18  ;;  %v16902_v18 = vld [vmem:[#allocation2 + $0x1b0] sm:$0xff]  ;;  %v16908_v13 = vld [vmem:[#allocation2 + $0x127] sm:$0xff] }
 0xbaa   : > { %v9022_v56 = vsel %vm3065_vm6, %v8990_v30, %v8905_v2  ;;  %v7794_v30 = vld [vmem:[#allocation2 + $0xef] sm:$0xff] }
 0xbab   : > { %10153 = vmatmul.msk.f32.gmra.mxu2 %vm3551_vm7, %v9022_v56 }
 0xbae   : > { %7649 = vrot.lane.b32.xlu0 %v16731_v19, %s10353_s23  ;;  %8924 = vrot.lane.b32.xlu1 %v16839_v63, %s10353_s23  ;;  %v16853_v19 = vld [vmem:[#allocation2 + $0x191] sm:$0xff] }
 0xbaf   : > { %8798 = vrot.lane.b32.xlu2 %v8681_v4, %s10352_s19 }
 0xbb0   : > { %v8907_v38 = vpop.permute.xlu0 %8906  ;;  %v8058_v55 = vpop.permute.xlu1 %8057 }
 0xbb1   : > { %v9023_v52 = vsel %vm3065_vm6, %v8991_v50, %v8907_v38  ;;  %v8175_v62 = vsel %vm3065_vm6, %v8143_v51, %v8058_v55  ;;  %v8785_v29 = vpop.permute.xlu2 %8784 }
 0xbb2   : > { %10077 = vmatmul.msk.f32.gmra.mxu0 %vm3551_vm7, %v8175_v62  ;;  %v8994_v56 = vsel %vm513_vm0, %v16908_v13, %v8785_v29  ;;  %v16927_v29 = vld [vmem:[#allocation2 + $0x1b1] sm:$0xff] }
 0xbb3   : > { %10154 = vmatmul.msk.f32.gmra.mxu2 %vm3551_vm7, %v9023_v52 }
 0xbb6   : > { %8926 = vrot.lane.b32.xlu0 %v16853_v19, %s10353_s23  ;;  %8077 = vrot.lane.b32.xlu1 %v16796_v27, %s10353_s23 }
 0xbb7   : > { %7651 = vrot.lane.b32.xlu2 %v16785_v28, %s10353_s23  ;;  %v8145_v28 = vsel %vm513_vm0, %v7793_v5, %v7934_v60 }
 0xbb8   : > { %v8781_v37 = vpop.permute.xlu0 %8780  ;;  %v7932_v8 = vpop.permute.xlu1 %7931 }
 0xbb9   : > { %v8144_v2 = vsel %vm513_vm0, %v7792_v40, %v7932_v8  ;;  %v16862_v31 = vpop.permute.xlu2 %8065  ;;  %v8992_v32 = vsel %vm513_vm0, %v16871_v54, %v8781_v37  ;;  %v16933_v8 = vld [vmem:[#allocation2 + $0x1c8] sm:$0xff] }
 0xbba   : > { %v8176_v22 = vsel %vm3065_vm6, %v8144_v2, %v8060_v6  ;;  %v16887_v6 = vld [vmem:[%s17407_s11] ss:$0 sm:$0xff] }
 0xbbb   : > { %10078 = vmatmul.msk.f32.gmra.mxu0 %vm3551_vm7, %v8176_v22 }
 0xbbe   : > { %8079 = vrot.lane.b32.xlu0 %v16814_v53, %s10353_s23  ;;  %7951 = vrot.lane.b32.xlu1 %v8679_v10, %s10352_s19 }
 0xbbf   : > { %8928 = vrot.lane.b32.xlu2 %v16869_v43, %s10353_s23  ;;  %v8323_v3 = vpop.f32.mrf.mxu0 }
 0xbc0   : > { %v8062_v14 = vpop.permute.xlu0 %8061  ;;  %v8909_v58 = vpop.permute.xlu1 %8908  ;;  %v8533_v9 = vadd.f32 %v8532_v25, %v8323_v3 }
 0xbc1   : > { %v8177_v11 = vsel %vm3065_vm6, %v8145_v28, %v8062_v14  ;;  %v9024_v20 = vsel %vm3065_vm6, %v8992_v32, %v8909_v58  ;;  %v16880_v23 = vpop.permute.xlu2 %7939 }
 0xbc2   : > { %10155 = vmatmul.msk.f32.gmra.mxu2 %vm3551_vm7, %v9024_v20 }
 0xbc3   : > { %10079 = vmatmul.msk.f32.gmra.mxu0 %vm3551_vm7, %v8177_v11 }
 0xbc6   : > { %v9170_v10 = vpop.f32.mrf.mxu2  ;;  %7953 = vrot.lane.b32.xlu0 %v8680_v36, %s10352_s19  ;;  %8800 = vrot.lane.b32.xlu1 %v16889_v26, %s10352_s19  ;;  %v8535_v36 = vpop.f32.mrf.mxu1 }
 0xbc7   : > { %v9266_v47 = vadd.f32 %v9170_v10, %v8533_v9  ;;  %8081 = vrot.lane.b32.xlu2 %v16839_v63, %s10353_s23  ;;  %v16946_v9 = vld [vmem:[#allocation2 + $0x1c9] sm:$0xff] }
 0xbc8   : > { %v7936_v16 = vpop.permute.xlu0 %7935  ;;  %v8783_v35 = vpop.permute.xlu1 %8782 }
 0xbc9   : > { %v9302_v1 = vadd.f32 %v16887_v6, %v9266_v47  ;;  %v8993_v21 = vsel %vm513_vm0, %v7796_v33, %v8783_v35  ;;  %v16898_v60 = vpop.permute.xlu2 %8916  ;;  %v8146_v15 = vsel %vm513_vm0, %v7794_v30, %v7936_v16 }
 0xbca   : > { %v9025_v5 = vsel %vm3065_vm6, %v8993_v21, %v8911_v41 }
 0xbcb   : > { %10271 = vtanh.f32 %v9302_v1  ;;  %10156 = vmatmul.msk.f32.gmra.mxu2 %vm3551_vm7, %v9025_v5 }
 0xbce   : > { %8802 = vrot.lane.b32.xlu0 %v16902_v18, %s10352_s19  ;;  %7653 = vrot.lane.b32.xlu1 %v16796_v27, %s10353_s23  ;;  %v9173_v55 = vpop.f32.mrf.mxu2  ;;  %v8538_v2 = vpop.f32.mrf.mxu1 }
 0xbcf   : > { %7955 = vrot.lane.b32.xlu2 %v8681_v4, %s10352_s19  ;;  %v8326_v41 = vpop.f32.mrf.mxu0 }
 0xbd0   : > { %v8536_v50 = vadd.f32 %v8535_v36, %v8326_v41  ;;  %v8913_v51 = vpop.permute.xlu0 %8912  ;;  %v8064_v27 = vpop.permute.xlu1 %8063 }
 0xbd1   : > { %v10272_v38 = vpop.eup %10271  ;;  %v9026_v52 = vsel %vm3065_vm6, %v8994_v56, %v8913_v51  ;;  %v8178_v62 = vsel %vm3065_vm6, %v8146_v15, %v8064_v27  ;;  %v8070_v37 = vpop.permute.xlu2 %8069  ;;  %v16971_v56 = vld [vmem:[#allocation2 + $0x1d1] sm:$0xff]  ;;  %v16978_v27 = vld [vmem:[#allocation2 + $0x147] sm:$0xff] }
 0xbd2   : > { %9366 = vst.msk [vmem:[%s16914_s22] sm:$0xff] %vm620_vm1, %v10272_v38  ;;  %v9267_v40 = vadd.f32 %v9173_v55, %v8536_v50  ;;  %10080 = vmatmul.msk.f32.gmra.mxu0 %vm3551_vm7, %v8178_v62  ;;  %v7797_v50 = vld [vmem:[#allocation2 + $0x127] sm:$0xff] }
 0xbd3   : > { %10157 = vmatmul.msk.f32.gmra.mxu2 %vm3551_vm7, %v9026_v52 }
 0xbd4   : > { %v9303_v4 = vadd.f32 %v16887_v6, %v9267_v40 }
 0xbd6   : > { %10273 = vtanh.f32 %v9303_v4  ;;  %7655 = vrot.lane.b32.xlu0 %v16814_v53, %s10353_s23  ;;  %8930 = vrot.lane.b32.xlu1 %v16927_v29, %s10353_s23  ;;  %v9176_v20 = vpop.f32.mrf.mxu2 }
 0xbd7   : > { %8804 = vrot.lane.b32.xlu2 %v16933_v8, %s10352_s19 }
 0xbd8   : > { %v8787_v22 = vpop.permute.xlu0 %8786  ;;  %v7938_v28 = vpop.permute.xlu1 %7937 }
 0xbd9   : > { %v8147_v32 = vsel %vm513_vm0, %v16871_v54, %v7938_v28  ;;  %v8329_v14 = vpop.f32.mrf.mxu0  ;;  %v16939_v58 = vpop.permute.xlu2 %7943  ;;  %v16953_v54 = vld [vmem:[#allocation2 + $0x12f] sm:$0xff] }
 0xbda   : > { %v8539_v11 = vadd.f32 %v8538_v2, %v8329_v14  ;;  %v8179_v53 = vsel %vm3065_vm6, %v8147_v32, %v16862_v31  ;;  %v8148_v31 = vsel %vm513_vm0, %v7796_v33, %v16880_v23  ;;  %v8995_v47 = vsel %vm513_vm0, %v16953_v54, %v8787_v22  ;;  %v16988_v2 = vld [vmem:[#allocation2 + $0x1d0] sm:$0xff]  ;;  %v7369_v22 = vld [vmem:[#allocation2 + $0x107] sm:$0xff] }
 0xbdb   : > { %10081 = vmatmul.msk.f32.gmra.mxu0 %vm3551_vm7, %v8179_v53 }
 0xbdc   : > { %v10274_v3 = vpop.eup %10273  ;;  %v9268_v25 = vadd.f32 %v9176_v20, %v8539_v11 }
 0xbdd   : > { %9367 = vst.msk [vmem:[%s16914_s22 + $0x8] sm:$0xff] %vm620_vm1, %v10274_v3 }
 0xbde   : > { %v9304_v10 = vadd.f32 %v16887_v6, %v9268_v25  ;;  %8932 = vrot.lane.b32.xlu0 %v16946_v9, %s10353_s23  ;;  %8083 = vrot.lane.b32.xlu1 %v16853_v19, %s10353_s23 }
 0xbdf   : > { %7657 = vrot.lane.b32.xlu2 %v16839_v63, %s10353_s23  ;;  %v8541_v63 = vpop.f32.mrf.mxu1 }
 0xbe0   : > { %10275 = vtanh.f32 %v9304_v10  ;;  %v8068_v16 = vpop.permute.xlu0 %8067  ;;  %v8915_v35 = vpop.permute.xlu1 %8914  ;;  %v17005_v10 = vld [vmem:[#allocation2 + $0x1e8] sm:$0xff] }
 0xbe1   : > { %v8180_v1 = vsel %vm3065_vm6, %v8148_v31, %v8068_v16  ;;  %v9027_v21 = vsel %vm3065_vm6, %v8995_v47, %v8915_v35  ;;  %v8332_v5 = vpop.f32.mrf.mxu0  ;;  %v16963_v36 = vpop.permute.xlu2 %8792  ;;  %v17011_v47 = vld [vmem:[#allocation2 + $0x14f] sm:$0xff] }
 0xbe2   : > { %10158 = vmatmul.msk.f32.gmra.mxu2 %vm3551_vm7, %v9027_v21  ;;  %v8542_v23 = vadd.f32 %v8541_v63, %v8332_v5 }
 0xbe3   : > { %10082 = vmatmul.msk.f32.gmra.mxu0 %vm3551_vm7, %v8180_v1 }
 0xbe5   : > { %v9179_v33 = vpop.f32.mrf.mxu2 }
 0xbe6   : > { %v10276_v30 = vpop.eup %10275  ;;  %v9269_v41 = vadd.f32 %v9179_v33, %v8542_v23  ;;  %8085 = vrot.lane.b32.xlu0 %v16869_v43, %s10353_s23  ;;  %7957 = vrot.lane.b32.xlu1 %v16889_v26, %s10352_s19 }
 0xbe7   : > { %9368 = vst.msk [vmem:[%s16914_s22 + $0x10] sm:$0xff] %vm620_vm1, %v10276_v30  ;;  %8934 = vrot.lane.b32.xlu2 %v16971_v56, %s10353_s23  ;;  %v8544_v4 = vpop.f32.mrf.mxu1 }
 0xbe8   : > { %v9305_v15 = vadd.f32 %v16887_v6, %v9269_v41  ;;  %v7942_v51 = vpop.permute.xlu0 %7941  ;;  %v8789_v38 = vpop.permute.xlu1 %8788  ;;  %v17027_v41 = vld [vmem:[#allocation2 + $0x1e9] sm:$0xff] }
 0xbe9   : > { %v8149_v55 = vsel %vm513_vm0, %v7797_v50, %v7942_v51  ;;  %v8996_v52 = vsel %vm513_vm0, %v16978_v27, %v8789_v38  ;;  %v7646_v26 = vpop.permute.xlu2 %7645  ;;  %v17034_v50 = vld [vmem:[#allocation2 + $0x1f0] sm:$0xff]  ;;  %v17036_v51 = vld [vmem:[#allocation2 + $0x167] sm:$0xff]  ;;  %v7723_v38 = vsel %vm513_vm0, %v16908_v13, %v16406_v12 }
 0xbea   : > { %10277 = vtanh.f32 %v9305_v15  ;;  %v8181_v62 = vsel %vm3065_vm6, %v8149_v55, %v8070_v37  ;;  %v9028_v40 = vsel %vm3065_vm6, %v8996_v52, %v16898_v60  ;;  %v7721_v60 = vsel %vm513_vm0, %v7369_v22, %v16402_v48  ;;  %v7370_v48 = vld [vmem:[#allocation2 + $0x10f] sm:$0xff] }
 0xbeb   : > { %10083 = vmatmul.msk.f32.gmra.mxu0 %vm3551_vm7, %v8181_v62  ;;  %10159 = vmatmul.msk.f32.gmra.mxu2 %vm3551_vm7, %v9028_v40  ;;  %v7722_v16 = vsel %vm513_vm0, %v7370_v48, %v16333_v7  ;;  %v8150_v55 = vsel %vm513_vm0, %v16953_v54, %v16939_v58  ;;  %v7755_v40 = vsel %vm3065_vm6, %v7723_v38, %v7646_v26 }
 0xbee   : > { %7959 = vrot.lane.b32.xlu0 %v16902_v18, %s10352_s19  ;;  %8806 = vrot.lane.b32.xlu1 %v16988_v2, %s10352_s19  ;;  %v9182_v53 = vpop.f32.mrf.mxu2 }
 0xbef   : > { %8087 = vrot.lane.b32.xlu2 %v16927_v29, %s10353_s23  ;;  %v8335_v37 = vpop.f32.mrf.mxu0  ;;  %v8547_v31 = vpop.f32.mrf.mxu1 }
 0xbf0   : > { %v10278_v28 = vpop.eup %10277  ;;  %v8545_v32 = vadd.f32 %v8544_v4, %v8335_v37  ;;  %v8791_v14 = vpop.permute.xlu0 %8790 }
 0xbf1   : > { %v7642_v11 = vpop.permute.xlu1 %7641  ;;  %9369 = vst.msk [vmem:[%s16914_s22 + $0x18] sm:$0xff] %vm620_vm1, %v10278_v28  ;;  %v17001_v20 = vpop.permute.xlu2 %8922  ;;  %v8997_v35 = vsel %vm513_vm0, %v17011_v47, %v8791_v14 }
 0xbf2   : > { %v7753_v18 = vsel %vm3065_vm6, %v7721_v60, %v7642_v11  ;;  %v9270_v3 = vadd.f32 %v9182_v53, %v8545_v32 }
 0xbf3   : > { %10115 = vmatmul.msk.f32.gmra.mxu1 %vm3551_vm7, %v7753_v18 }
 0xbf4   : > { %v9306_v25 = vadd.f32 %v16887_v6, %v9270_v3 }
 0xbf6   : > { %10279 = vtanh.f32 %v9306_v25  ;;  %8808 = vrot.lane.b32.xlu0 %v17005_v10, %s10352_s19  ;;  %7659 = vrot.lane.b32.xlu1 %v16853_v19, %s10353_s23 }
 0xbf7   : > { %7961 = vrot.lane.b32.xlu2 %v16933_v8, %s10352_s19  ;;  %v9185_v8 = vpop.f32.mrf.mxu2  ;;  %v8550_v13 = vpop.f32.mrf.mxu1 }
 0xbf8   : > { %v7644_v1 = vpop.permute.xlu0 %7643  ;;  %v8338_v63 = vpop.f32.mrf.mxu0 }
 0xbf9   : > { %v8919_v21 = vpop.permute.xlu1 %8918  ;;  %v7754_v5 = vsel %vm3065_vm6, %v7722_v16, %v7644_v1  ;;  %v17021_v23 = vpop.permute.xlu2 %8075  ;;  %v8548_v33 = vadd.f32 %v8547_v31, %v8338_v63  ;;  %v17082_v16 = vld [vmem:[#allocation2 + $0x16f] sm:$0xff] }
 0xbfa   : > { %v9029_v19 = vsel %vm3065_vm6, %v8997_v35, %v8919_v21 }
 0xbfb   : > { %10116 = vmatmul.msk.f32.gmra.mxu1 %vm3551_vm7, %v7754_v5  ;;  %10160 = vmatmul.msk.f32.gmra.mxu2 %vm3551_vm7, %v9029_v19  ;;  %v9271_v7 = vadd.f32 %v9185_v8, %v8548_v33 }
 0xbfc   : > { %v10280_v30 = vpop.eup %10279 }
 0xbfd   : > { %9370 = vst.msk [vmem:[%s16914_s22 + $0x20] sm:$0xff] %vm620_vm1, %v10280_v30  ;;  %v9307_v15 = vadd.f32 %v16887_v6, %v9271_v7  ;;  %v17099_v30 = vld [vmem:[#allocation2 + $0x208] sm:$0xff] }
 0xbfe   : > { %7661 = vrot.lane.b32.xlu0 %v16869_v43, %s10353_s23  ;;  %8936 = vrot.lane.b32.xlu1 %v17027_v41, %s10353_s23  ;;  %v8998_v43 = vsel %vm513_vm0, %v17036_v51, %v16963_v36  ;;  %v17057_v36 = vld [vmem:[#allocation2 + $0x1f1] sm:$0xff] }
 0xbff   : > { %8810 = vrot.lane.b32.xlu2 %v17034_v50, %s10352_s19  ;;  %10281 = vtanh.f32 %v9307_v15  ;;  %v8553_v3 = vpop.f32.mrf.mxu1 }
 0xc00   : > { %v8921_v52 = vpop.permute.xlu0 %8920  ;;  %v8341_v37 = vpop.f32.mrf.mxu0 }
 0xc01   : > { %v8072_v62 = vpop.permute.xlu1 %8071  ;;  %v9030_v4 = vsel %vm3065_vm6, %v8998_v43, %v8921_v52  ;;  %v17052_v12 = vpop.permute.xlu2 %7949  ;;  %v8551_v58 = vadd.f32 %v8550_v13, %v8341_v37  ;;  %v17122_v37 = vld [vmem:[#allocation2 + $0x187] sm:$0xff] }
 0xc02   : > { %v8182_v22 = vsel %vm3065_vm6, %v8150_v55, %v8072_v62 }
 0xc03   : > { %10084 = vmatmul.msk.f32.gmra.mxu0 %vm3551_vm7, %v8182_v22  ;;  %10117 = vmatmul.msk.f32.gmra.mxu1 %vm3551_vm7, %v7755_v40 }
 0xc04   : > { %10161 = vmatmul.msk.f32.gmra.mxu2 %vm3551_vm7, %v9030_v4  ;;  %v17115_v4 = vld [vmem:[#allocation2 + $0x210] sm:$0xff] }
 0xc05   : > { %v9188_v54 = vpop.f32.mrf.mxu2  ;;  %v10282_v26 = vpop.eup %10281 }
 0xc06   : > { %v9272_v28 = vadd.f32 %v9188_v54, %v8551_v58  ;;  %8938 = vrot.lane.b32.xlu0 %v17057_v36, %s10353_s23  ;;  %8089 = vrot.lane.b32.xlu1 %v16946_v9, %s10353_s23  ;;  %9371 = vst.msk [vmem:[%s16914_s22 + $0x28] sm:$0xff] %vm620_vm1, %v10282_v26 }
 0xc07   : > { %7663 = vrot.lane.b32.xlu2 %v16927_v29, %s10353_s23  ;;  %v17078_v29 = vld [vmem:[#allocation2 + $0x209] sm:$0xff] }
 0xc08   : > { %v9308_v60 = vadd.f32 %v16887_v6, %v9272_v28  ;;  %v8074_v32 = vpop.permute.xlu0 %8073 }
 0xc09   : > { %v7946_v14 = vpop.permute.xlu1 %7945  ;;  %v17070_v53 = vpop.permute.xlu2 %8798 }
 0xc0a   : > { %v8151_v11 = vsel %vm513_vm0, %v16978_v27, %v7946_v14  ;;  %10283 = vtanh.f32 %v9308_v60  ;;  %v8690_v14 = vld [vmem:[#allocation2 + $0x228] sm:$0xff] }
 0xc0b   : > { %v8183_v18 = vsel %vm3065_vm6, %v8151_v11, %v8074_v32 }
 0xc0c   : > { %10085 = vmatmul.msk.f32.gmra.mxu0 %vm3551_vm7, %v8183_v18  ;;  %v17136_v18 = vld [vmem:[#allocation2 + $0x211] sm:$0xff] }
 0xc0e   : > { %8091 = vrot.lane.b32.xlu0 %v16971_v56, %s10353_s23  ;;  %7963 = vrot.lane.b32.xlu1 %v16988_v2, %s10352_s19  ;;  %v9191_v1 = vpop.f32.mrf.mxu2 }
 0xc0f   : > { %8940 = vrot.lane.b32.xlu2 %v17078_v29, %s10353_s23  ;;  %v8344_v27 = vpop.f32.mrf.mxu0 }
 0xc10   : > { %v10284_v25 = vpop.eup %10283  ;;  %v8554_v48 = vadd.f32 %v8553_v3, %v8344_v27  ;;  %v7948_v31 = vpop.permute.xlu0 %7947 }
 0xc11   : > { %v8795_v35 = vpop.permute.xlu1 %8794  ;;  %9372 = vst.msk [vmem:[%s16914_s22 + $0x30] sm:$0xff] %vm620_vm1, %v10284_v25  ;;  %v8152_v21 = vsel %vm513_vm0, %v17011_v47, %v7948_v31  ;;  %v17090_v5 = vpop.permute.xlu2 %7651  ;;  %v7372_v47 = vld [vmem:[#allocation2 + $0x12f] sm:$0xff] }
 0xc12   : > { %v8999_v2 = vsel %vm513_vm0, %v17082_v16, %v8795_v35  ;;  %v9273_v19 = vadd.f32 %v9191_v1, %v8554_v48  ;;  %v8184_v63 = vsel %vm3065_vm6, %v8152_v21, %v17021_v23  ;;  %v8556_v23 = vpop.f32.mrf.mxu1  ;;  %v7374_v25 = vld [vmem:[#allocation2 + $0x14f] sm:$0xff]  ;;  %v8153_v35 = vsel %vm513_vm0, %v17036_v51, %v17052_v12 }
 0xc13   : > { %v9031_v33 = vsel %vm3065_vm6, %v8999_v2, %v17001_v20  ;;  %v7724_v20 = vsel %vm513_vm0, %v7372_v47, %v16414_v39  ;;  %v7373_v39 = vld [vmem:[#allocation2 + $0x147] sm:$0xff]  ;;  %v17142_v48 = vld [vmem:[#allocation2 + $0x18f] sm:$0xff]  ;;  %v7726_v31 = vsel %vm513_vm0, %v7374_v25, %v16420_v44 }
 0xc14   : > { %10086 = vmatmul.msk.f32.gmra.mxu0 %vm3551_vm7, %v8184_v63  ;;  %10162 = vmatmul.msk.f32.gmra.mxu2 %vm3551_vm7, %v9031_v33  ;;  %v9309_v8 = vadd.f32 %v16887_v6, %v9273_v19  ;;  %v7725_v13 = vsel %vm513_vm0, %v7373_v39, %v16363_v46  ;;  %v7758_v19 = vsel %vm3065_vm6, %v7726_v31, %v17090_v5  ;;  %v8722_v51 = vld [vmem:[#allocation2 + $0x229] sm:$0xff] }
 0xc16   : > { %10285 = vtanh.f32 %v9309_v8  ;;  %7965 = vrot.lane.b32.xlu0 %v17005_v10, %s10352_s19  ;;  %8812 = vrot.lane.b32.xlu1 %v17099_v30, %s10352_s19  ;;  %v9194_v52 = vpop.f32.mrf.mxu2 }
 0xc17   : > { %8093 = vrot.lane.b32.xlu2 %v17027_v41, %s10353_s23 }
 0xc18   : > { %v8797_v7 = vpop.permute.xlu0 %8796  ;;  %v8347_v55 = vpop.f32.mrf.mxu0 }
 0xc19   : > { %v7648_v15 = vpop.permute.xlu1 %7647  ;;  %v17110_v43 = vpop.permute.xlu2 %8928  ;;  %v8557_v10 = vadd.f32 %v8556_v23, %v8347_v55  ;;  %v9000_v58 = vsel %vm513_vm0, %v17122_v37, %v8797_v7 }
 0xc1a   : > { %v7756_v38 = vsel %vm3065_vm6, %v7724_v20, %v7648_v15 }
 0xc1b   : > { %10118 = vmatmul.msk.f32.gmra.mxu1 %vm3551_vm7, %v7756_v38  ;;  %v9274_v40 = vadd.f32 %v9194_v52, %v8557_v10  ;;  %v8723_v10 = vld [vmem:[#allocation2 + $0x231] sm:$0xff] }
 0xc1c   : > { %v10286_v62 = vpop.eup %10285 }
 0xc1d   : > { %9373 = vst.msk [vmem:[%s16914_s22 + $0x38] sm:$0xff] %vm620_vm1, %v10286_v62  ;;  %v9310_v22 = vadd.f32 %v16887_v6, %v9274_v40  ;;  %v17184_v62 = vld [vmem:[#allocation2 + $0x1a7] sm:$0xff] }
 0xc1e   : > { %8814 = vrot.lane.b32.xlu0 %v17115_v4, %s10352_s19  ;;  %7665 = vrot.lane.b32.xlu1 %v16946_v9, %s10353_s23 }
 0xc1f   : > { %7967 = vrot.lane.b32.xlu2 %v17034_v50, %s10352_s19  ;;  %10287 = vtanh.f32 %v9310_v22  ;;  %v8559_v50 = vpop.f32.mrf.mxu1 }
 0xc20   : > { %v7650_v54 = vpop.permute.xlu0 %7649  ;;  %v8350_v9 = vpop.f32.mrf.mxu0 }
 0xc21   : > { %v8925_v26 = vpop.permute.xlu1 %8924  ;;  %v7757_v28 = vsel %vm3065_vm6, %v7725_v13, %v7650_v54  ;;  %v17132_v32 = vpop.permute.xlu2 %8081  ;;  %v8560_v46 = vadd.f32 %v8559_v50, %v8350_v9 }
 0xc22   : > { %v9032_v60 = vsel %vm3065_vm6, %v9000_v58, %v8925_v26 }
 0xc23   : > { %10119 = vmatmul.msk.f32.gmra.mxu1 %vm3551_vm7, %v7757_v28  ;;  %10163 = vmatmul.msk.f32.gmra.mxu2 %vm3551_vm7, %v9032_v60  ;;  %v8691_v28 = vld [vmem:[#allocation2 + $0x230] sm:$0xff] }
 0xc25   : > { %v9197_v11 = vpop.f32.mrf.mxu2  ;;  %v10288_v3 = vpop.eup %10287 }
 0xc26   : > { %v9275_v27 = vadd.f32 %v9197_v11, %v8560_v46  ;;  %7667 = vrot.lane.b32.xlu0 %v16971_v56, %s10353_s23  ;;  %8942 = vrot.lane.b32.xlu1 %v17136_v18, %s10353_s23  ;;  %9374 = vst.msk [vmem:[%s16914_s22 + $0x40] sm:$0xff] %vm620_vm1, %v10288_v3  ;;  %v9001_v56 = vsel %vm513_vm0, %v17142_v48, %v17070_v53 }
 0xc27   : > { %8816 = vrot.lane.b32.xlu2 %v8690_v14, %s10352_s19  ;;  %v8562_v12 = vpop.f32.mrf.mxu1 }
 0xc28   : > { %v9311_v1 = vadd.f32 %v16887_v6, %v9275_v27  ;;  %v8927_v21 = vpop.permute.xlu0 %8926 }
 0xc29   : > { %v8078_v2 = vpop.permute.xlu1 %8077  ;;  %v9033_v63 = vsel %vm3065_vm6, %v9001_v56, %v8927_v21  ;;  %v17160_v44 = vpop.permute.xlu2 %7955 }
 0xc2a   : > { %v8185_v33 = vsel %vm3065_vm6, %v8153_v35, %v8078_v2  ;;  %10289 = vtanh.f32 %v9311_v1 }
 0xc2b   : > { %10087 = vmatmul.msk.f32.gmra.mxu0 %vm3551_vm7, %v8185_v33  ;;  %10120 = vmatmul.msk.f32.gmra.mxu1 %vm3551_vm7, %v7758_v19 }
 0xc2c   : > { %10164 = vmatmul.msk.f32.gmra.mxu2 %vm3551_vm7, %v9033_v63 }
 0xc2e   : > { %8944 = vrot.lane.b32.xlu0 %v8722_v51, %s10353_s23  ;;  %8095 = vrot.lane.b32.xlu1 %v17057_v36, %s10353_s23  ;;  %v9200_v20 = vpop.f32.mrf.mxu2  ;;  %v7377_v51 = vld [vmem:[#allocation2 + $0x187] sm:$0xff] }
 0xc2f   : > { %7669 = vrot.lane.b32.xlu2 %v17027_v41, %s10353_s23  ;;  %v8353_v53 = vpop.f32.mrf.mxu0  ;;  %v8565_v52 = vpop.f32.mrf.mxu1 }
 0xc30   : > { %v10290_v5 = vpop.eup %10289  ;;  %v8563_v8 = vadd.f32 %v8562_v12, %v8353_v53  ;;  %v8080_v47 = vpop.permute.xlu0 %8079 }
 0xc31   : > { %v7952_v23 = vpop.permute.xlu1 %7951  ;;  %9375 = vst.msk [vmem:[%s16914_s22 + $0x48] sm:$0xff] %vm620_vm1, %v10290_v5  ;;  %v17174_v15 = vpop.permute.xlu2 %8804 }
 0xc32   : > { %v8154_v7 = vsel %vm513_vm0, %v17082_v16, %v7952_v23  ;;  %v9276_v38 = vadd.f32 %v9200_v20, %v8563_v8  ;;  %v7729_v8 = vsel %vm513_vm0, %v7377_v51, %v16438_v0 }
 0xc33   : > { %v8186_v55 = vsel %vm3065_vm6, %v8154_v7, %v8080_v47  ;;  %v8156_v47 = vsel %vm513_vm0, %v17142_v48, %v17160_v44 }
 0xc34   : > { %10088 = vmatmul.msk.f32.gmra.mxu0 %vm3551_vm7, %v8186_v55  ;;  %v9312_v41 = vadd.f32 %v16887_v6, %v9276_v38 }
 0xc36   : > { %10291 = vtanh.f32 %v9312_v41  ;;  %8097 = vrot.lane.b32.xlu0 %v17078_v29, %s10353_s23  ;;  %7969 = vrot.lane.b32.xlu1 %v17099_v30, %s10352_s19  ;;  %v9203_v26 = vpop.f32.mrf.mxu2 }
 0xc37   : > { %8946 = vrot.lane.b32.xlu2 %v8723_v10, %s10353_s23 }
 0xc38   : > { %v7954_v16 = vpop.permute.xlu0 %7953  ;;  %v8356_v13 = vpop.f32.mrf.mxu0 }
 0xc39   : > { %v8801_v40 = vpop.permute.xlu1 %8800  ;;  %v8155_v22 = vsel %vm513_vm0, %v17122_v37, %v7954_v16  ;;  %v7658_v58 = vpop.permute.xlu2 %7657  ;;  %v8566_v29 = vadd.f32 %v8565_v52, %v8356_v13 }
 0xc3a   : > { %v9002_v39 = vsel %vm513_vm0, %v17184_v62, %v8801_v40  ;;  %v8187_v30 = vsel %vm3065_vm6, %v8155_v22, %v17132_v32  ;;  %v7375_v32 = vld [vmem:[#allocation2 + $0x167] sm:$0xff]  ;;  %v7761_v55 = vsel %vm3065_vm6, %v7729_v8, %v7658_v58 }
 0xc3b   : > { %v9034_v54 = vsel %vm3065_vm6, %v9002_v39, %v17110_v43  ;;  %v9277_v37 = vadd.f32 %v9203_v26, %v8566_v29  ;;  %v7727_v43 = vsel %vm513_vm0, %v7375_v32, %v16436_v24  ;;  %v8651_v24 = vld [vmem:[#allocation2 + $0x1af] sm:$0xff] }
 0xc3c   : > { %10089 = vmatmul.msk.f32.gmra.mxu0 %vm3551_vm7, %v8187_v30  ;;  %10165 = vmatmul.msk.f32.gmra.mxu2 %vm3551_vm7, %v9034_v54  ;;  %v10292_v60 = vpop.eup %10291 }
 0xc3d   : > { %9376 = vst.msk [vmem:[%s16914_s22 + $0x50] sm:$0xff] %vm620_vm1, %v10292_v60  ;;  %v9313_v9 = vadd.f32 %v16887_v6, %v9277_v37  ;;  %v17250_v37 = vld [vmem:[#allocation2 + $0x1cf] sm:$0xff] }
 0xc3e   : > { %7971 = vrot.lane.b32.xlu0 %v17115_v4, %s10352_s19  ;;  %8818 = vrot.lane.b32.xlu1 %v8691_v28, %s10352_s19  ;;  %v8568_v4 = vpop.f32.mrf.mxu1 }
 0xc3f   : > { %8099 = vrot.lane.b32.xlu2 %v17136_v18, %s10353_s23  ;;  %10293 = vtanh.f32 %v9313_v9  ;;  %v7376_v18 = vld [vmem:[#allocation2 + $0x16f] sm:$0xff] }
 0xc40   : > { %v8803_v50 = vpop.permute.xlu0 %8802  ;;  %v8359_v11 = vpop.f32.mrf.mxu0  ;;  %v7728_v56 = vsel %vm513_vm0, %v7376_v18, %v16378_v61  ;;  %v17222_v61 = vld [vmem:[#allocation2 + $0x1c7] sm:$0xff] }
 0xc41   : > { %v7654_v46 = vpop.permute.xlu1 %7653  ;;  %v17207_v3 = vpop.permute.xlu2 %8934  ;;  %v8569_v27 = vadd.f32 %v8568_v4, %v8359_v11  ;;  %v9003_v1 = vsel %vm513_vm0, %v8651_v24, %v8803_v50  ;;  %v9004_v23 = vsel %vm513_vm0, %v17222_v61, %v17174_v15 }
 0xc42   : > { %v7759_v14 = vsel %vm3065_vm6, %v7727_v43, %v7654_v46 }
 0xc43   : > { %10121 = vmatmul.msk.f32.gmra.mxu1 %vm3551_vm7, %v7759_v14 }
 0xc45   : > { %v9206_v25 = vpop.f32.mrf.mxu2  ;;  %v10294_v31 = vpop.eup %10293 }
 0xc46   : > { %v9278_v35 = vadd.f32 %v9206_v25, %v8569_v27  ;;  %7671 = vrot.lane.b32.xlu1 %v17057_v36, %s10353_s23  ;;  %9377 = vst.msk [vmem:[%s16914_s22 + $0x58] sm:$0xff] %vm620_vm1, %v10294_v31  ;;  %v8571_v12 = vpop.f32.mrf.mxu1  ;;  %v7378_v31 = vld [vmem:[#allocation2 + $0x18f] sm:$0xff] }
 0xc48   : > { %v9314_v21 = vadd.f32 %v16887_v6, %v9278_v35  ;;  %v7656_v2 = vpop.permute.xlu0 %7655  ;;  %v7730_v35 = vsel %vm513_vm0, %v7378_v31, %v16448_v17 }
 0xc49   : > { %v8931_v19 = vpop.permute.xlu1 %8930  ;;  %v7760_v63 = vsel %vm3065_vm6, %v7728_v56, %v7656_v2  ;;  %v8088_v36 = vpop.permute.xlu2 %8087  ;;  %v8654_v2 = vld [vmem:[#allocation2 + $0x1e7] sm:$0xff] }
 0xc4a   : > { %v9035_v33 = vsel %vm3065_vm6, %v9003_v1, %v8931_v19  ;;  %10295 = vtanh.f32 %v9314_v21  ;;  %v7379_v21 = vld [vmem:[#allocation2 + $0x1a7] sm:$0xff] }
 0xc4b   : > { %10122 = vmatmul.msk.f32.gmra.mxu1 %vm3551_vm7, %v7760_v63  ;;  %10166 = vmatmul.msk.f32.gmra.mxu2 %vm3551_vm7, %v9035_v33 }
 0xc4e   : > { %v9209_v41 = vpop.f32.mrf.mxu2  ;;  %v8574_v40 = vpop.f32.mrf.mxu1 }
 0xc4f   : > { %v8362_v53 = vpop.f32.mrf.mxu0 }
 0xc50   : > { %v10296_v5 = vpop.eup %10295  ;;  %v8572_v20 = vadd.f32 %v8571_v12, %v8362_v53  ;;  %v8933_v7 = vpop.permute.xlu0 %8932 }
 0xc51   : > { %v8084_v38 = vpop.permute.xlu1 %8083  ;;  %9378 = vst.msk [vmem:[%s16914_s22 + $0x60] sm:$0xff] %vm620_vm1, %v10296_v5  ;;  %v9036_v10 = vsel %vm3065_vm6, %v9004_v23, %v8933_v7  ;;  %v17241_v44 = vpop.permute.xlu2 %7961  ;;  %v7380_v7 = vld [vmem:[#allocation2 + $0x1af] sm:$0xff] }
 0xc52   : > { %v8188_v0 = vsel %vm3065_vm6, %v8156_v47, %v8084_v38  ;;  %v9279_v52 = vadd.f32 %v9209_v41, %v8572_v20  ;;  %v17277_v38 = vld [vmem:[#allocation2 + $0x1ef] sm:$0xff]  ;;  %v8159_v41 = vsel %vm513_vm0, %v17222_v61, %v17241_v44 }
 0xc53   : > { %10090 = vmatmul.msk.f32.gmra.mxu0 %vm3551_vm7, %v8188_v0  ;;  %10123 = vmatmul.msk.f32.gmra.mxu1 %vm3551_vm7, %v7761_v55  ;;  %v7732_v55 = vsel %vm513_vm0, %v7380_v7, %v16450_v45  ;;  %v7383_v7 = vld [vmem:[#allocation2 + $0x1e7] sm:$0xff] }
 0xc54   : > { %10167 = vmatmul.msk.f32.gmra.mxu2 %vm3551_vm7, %v9036_v10  ;;  %v9315_v48 = vadd.f32 %v16887_v6, %v9279_v52 }
 0xc56   : > { %10297 = vtanh.f32 %v9315_v48  ;;  %v9212_v29 = vpop.f32.mrf.mxu2  ;;  %v8577_v14 = vpop.f32.mrf.mxu1 }
 0xc58   : > { %v8086_v15 = vpop.permute.xlu0 %8085  ;;  %v8365_v39 = vpop.f32.mrf.mxu0 }
 0xc59   : > { %v7958_v16 = vpop.permute.xlu1 %7957  ;;  %v8575_v13 = vadd.f32 %v8574_v40, %v8365_v39  ;;  %v8811_v28 = vpop.permute.xlu2 %8810 }
 0xc5a   : > { %v8157_v22 = vsel %vm513_vm0, %v17184_v62, %v7958_v16  ;;  %v9007_v10 = vsel %vm513_vm0, %v17277_v38, %v8811_v28 }
 0xc5b   : > { %v8189_v58 = vsel %vm3065_vm6, %v8157_v22, %v8086_v15  ;;  %v9280_v54 = vadd.f32 %v9212_v29, %v8575_v13 }
 0xc5c   : > { %10091 = vmatmul.msk.f32.gmra.mxu0 %vm3551_vm7, %v8189_v58  ;;  %v10298_v30 = vpop.eup %10297 }
 0xc5d   : > { %9379 = vst.msk [vmem:[%s16914_s22 + $0x68] sm:$0xff] %vm620_vm1, %v10298_v30  ;;  %v9316_v26 = vadd.f32 %v16887_v6, %v9280_v54 }
 0xc5f   : > { %10299 = vtanh.f32 %v9316_v26 }
 0xc60   : > { %v7960_v60 = vpop.permute.xlu0 %7959  ;;  %v8368_v43 = vpop.f32.mrf.mxu0 }
 0xc61   : > { %v8807_v62 = vpop.permute.xlu1 %8806  ;;  %v8158_v9 = vsel %vm513_vm0, %v8651_v24, %v7960_v60  ;;  %v8578_v11 = vadd.f32 %v8577_v14, %v8368_v43  ;;  %v7664_v56 = vpop.permute.xlu2 %7663 }
 0xc62   : > { %v9005_v32 = vsel %vm513_vm0, %v17250_v37, %v8807_v62  ;;  %v8190_v50 = vsel %vm3065_vm6, %v8158_v9, %v8088_v36  ;;  %v7731_v36 = vsel %vm513_vm0, %v7379_v21, %v16393_v42  ;;  %v7764_v48 = vsel %vm3065_vm6, %v7732_v55, %v7664_v56  ;;  %v17299_v62 = vld [vmem:[#allocation2 + $0x207] sm:$0xff] }
 0xc63   : > { %v9037_v46 = vsel %vm3065_vm6, %v9005_v32, %v17207_v3  ;;  %v7735_v55 = vsel %vm513_vm0, %v7383_v7, %v16462_v34 }
 0xc64   : > { %10092 = vmatmul.msk.f32.gmra.mxu0 %vm3551_vm7, %v8190_v50  ;;  %10168 = vmatmul.msk.f32.gmra.mxu2 %vm3551_vm7, %v9037_v46 }
 0xc65   : > { %v9215_v4 = vpop.f32.mrf.mxu2  ;;  %v10300_v27 = vpop.eup %10299 }
 0xc66   : > { %v9281_v25 = vadd.f32 %v9215_v4, %v8578_v11  ;;  %9380 = vst.msk [vmem:[%s16914_s22 + $0x70] sm:$0xff] %vm620_vm1, %v10300_v27 }
 0xc68   : > { %v9317_v18 = vadd.f32 %v16887_v6, %v9281_v25  ;;  %v8809_v24 = vpop.permute.xlu0 %8808  ;;  %v8371_v19 = vpop.f32.mrf.mxu0 }
 0xc69   : > { %v7660_v3 = vpop.permute.xlu1 %7659  ;;  %v9006_v17 = vsel %vm513_vm0, %v8654_v2, %v8809_v24  ;;  %v8941_v20 = vpop.permute.xlu2 %8940 }
 0xc6a   : > { %v7762_v1 = vsel %vm3065_vm6, %v7730_v35, %v7660_v3  ;;  %10301 = vtanh.f32 %v9317_v18  ;;  %v7381_v35 = vld [vmem:[#allocation2 + $0x1c7] sm:$0xff] }
 0xc6b   : > { %10124 = vmatmul.msk.f32.gmra.mxu1 %vm3551_vm7, %v7762_v1  ;;  %v7733_v18 = vsel %vm513_vm0, %v7381_v35, %v16460_v59 }
 0xc6e   : > { %v9218_v5 = vpop.f32.mrf.mxu2 }
 0xc70   : > { %v8580_v63 = vpop.f32.mrf.mxu1  ;;  %v10302_v33 = vpop.eup %10301 }
 0xc71   : > { %v8581_v51 = vadd.f32 %v8580_v63, %v8371_v19  ;;  %v7662_v12 = vpop.permute.xlu0 %7661  ;;  %v8937_v53 = vpop.permute.xlu1 %8936  ;;  %9381 = vst.msk [vmem:[%s16914_s22 + $0x78] sm:$0xff] %vm620_vm1, %v10302_v33  ;;  %v8657_v19 = vld [vmem:[#allocation2 + $0x20f] sm:$0xff] }
 0xc72   : > { %v7763_v8 = vsel %vm3065_vm6, %v7731_v36, %v7662_v12  ;;  %v9038_v47 = vsel %vm3065_vm6, %v9006_v17, %v8937_v53  ;;  %v8094_v61 = vpop.permute.xlu2 %8093 }
 0xc73   : > { %v9282_v23 = vadd.f32 %v9218_v5, %v8581_v51  ;;  %10125 = vmatmul.msk.f32.gmra.mxu1 %vm3551_vm7, %v7763_v8  ;;  %10169 = vmatmul.msk.f32.gmra.mxu2 %vm3551_vm7, %v9038_v47 }
 0xc75   : > { %v9318_v42 = vadd.f32 %v16887_v6, %v9282_v23  ;;  %v8658_v23 = vld [vmem:[#allocation2 + $0x227] sm:$0xff] }
 0xc77   : > { %10303 = vtanh.f32 %v9318_v42 }
 0xc78   : > { %v8583_v44 = vpop.f32.mrf.mxu1 }
 0xc79   : > { %v8939_v0 = vpop.permute.xlu0 %8938  ;;  %v8090_v52 = vpop.permute.xlu1 %8089 }
 0xc7a   : > { %v9039_v15 = vsel %vm3065_vm6, %v9007_v10, %v8939_v0  ;;  %v8191_v16 = vsel %vm3065_vm6, %v8159_v41, %v8090_v52  ;;  %v7968_v28 = vpop.permute.xlu2 %7967 }
 0xc7b   : > { %10093 = vmatmul.msk.f32.gmra.mxu0 %vm3551_vm7, %v8191_v16  ;;  %10126 = vmatmul.msk.f32.gmra.mxu1 %vm3551_vm7, %v7764_v48  ;;  %v8162_v41 = vsel %vm513_vm0, %v17277_v38, %v7968_v28 }
 0xc7c   : > { %10170 = vmatmul.msk.f32.gmra.mxu2 %vm3551_vm7, %v9039_v15 }
 0xc7d   : > { %v10304_v45 = vpop.eup %10303 }
 0xc7e   : > { %9382 = vst.msk [vmem:[%s16914_s22 + $0x80] sm:$0xff] %vm620_vm1, %v10304_v45  ;;  %v9221_v58 = vpop.f32.mrf.mxu2 }
 0xc80   : > { %v8374_v40 = vpop.f32.mrf.mxu0  ;;  %v8586_v32 = vpop.f32.mrf.mxu1 }
 0xc81   : > { %v8584_v22 = vadd.f32 %v8583_v44, %v8374_v40  ;;  %v8092_v39 = vpop.permute.xlu0 %8091  ;;  %v7964_v13 = vpop.permute.xlu1 %7963 }
 0xc82   : > { %v8160_v29 = vsel %vm513_vm0, %v17250_v37, %v7964_v13  ;;  %v8817_v56 = vpop.permute.xlu2 %8816 }
 0xc83   : > { %v9283_v30 = vadd.f32 %v9221_v58, %v8584_v22  ;;  %v8192_v54 = vsel %vm3065_vm6, %v8160_v29, %v8092_v39  ;;  %v17345_v58 = vld [vmem:[%s17407_s11] ss:$0 sm:$0xff] }
 0xc84   : > { %10094 = vmatmul.msk.f32.gmra.mxu0 %vm3551_vm7, %v8192_v54 }
 0xc85   : > { %v9319_v26 = vadd.f32 %v16887_v6, %v9283_v30  ;;  %v8659_v30 = vld [vmem:[#allocation2 + $0x22f] sm:$0xff] }
 0xc87   : > { %10305 = vtanh.f32 %v9319_v26  ;;  %v9224_v4 = vpop.f32.mrf.mxu2 }
 0xc89   : > { %v7966_v60 = vpop.permute.xlu0 %7965  ;;  %v8813_v9 = vpop.permute.xlu1 %8812 }
 0xc8a   : > { %v8161_v43 = vsel %vm513_vm0, %v8654_v2, %v7966_v60  ;;  %v9008_v37 = vsel %vm513_vm0, %v17299_v62, %v8813_v9  ;;  %v8377_v50 = vpop.f32.mrf.mxu0  ;;  %v7382_v2 = vld [vmem:[#allocation2 + $0x1cf] sm:$0xff] }
 0xc8b   : > { %v8587_v46 = vadd.f32 %v8586_v32, %v8377_v50  ;;  %v8193_v14 = vsel %vm3065_vm6, %v8161_v43, %v8094_v61  ;;  %v9040_v11 = vsel %vm3065_vm6, %v9008_v37, %v8941_v20  ;;  %v7734_v36 = vsel %vm513_vm0, %v7382_v2, %v16408_v57  ;;  %v7670_v20 = vpop.permute.xlu2 %7669 }
 0xc8c   : > { %10095 = vmatmul.msk.f32.gmra.mxu0 %vm3551_vm7, %v8193_v14  ;;  %10171 = vmatmul.msk.f32.gmra.mxu2 %vm3551_vm7, %v9040_v11  ;;  %v9010_v57 = vsel %vm513_vm0, %v8658_v23, %v8817_v56  ;;  %v7767_v52 = vsel %vm3065_vm6, %v7735_v55, %v7670_v20 }
 0xc8d   : > { %v10306_v27 = vpop.eup %10305  ;;  %v9284_v25 = vadd.f32 %v9224_v4, %v8587_v46 }
 0xc8e   : > { %9383 = vst.msk [vmem:[%s16914_s22 + $0x88] sm:$0xff] %vm620_vm1, %v10306_v27  ;;  %v7384_v27 = vld [vmem:[#allocation2 + $0x1ef] sm:$0xff] }
 0xc8f   : > { %v9320_v31 = vadd.f32 %v16887_v6, %v9284_v25  ;;  %v7736_v25 = vsel %vm513_vm0, %v7384_v27, %v16480_v49 }
 0xc91   : > { %10307 = vtanh.f32 %v9320_v31  ;;  %v8815_v24 = vpop.permute.xlu0 %8814  ;;  %v7666_v3 = vpop.permute.xlu1 %7665 }
 0xc92   : > { %v7765_v1 = vsel %vm3065_vm6, %v7733_v18, %v7666_v3  ;;  %v8380_v63 = vpop.f32.mrf.mxu0  ;;  %v9009_v59 = vsel %vm513_vm0, %v8657_v19, %v8815_v24 }
 0xc93   : > { %10127 = vmatmul.msk.f32.gmra.mxu1 %vm3551_vm7, %v7765_v1  ;;  %v8947_v16 = vpop.permute.xlu2 %8946 }
 0xc97   : > { %v10308_v21 = vpop.eup %10307  ;;  %v9227_v53 = vpop.f32.mrf.mxu2 }
 0xc98   : > { %9384 = vst.msk [vmem:[%s16914_s22 + $0x90] sm:$0xff] %vm620_vm1, %v10308_v21  ;;  %v8589_v33 = vpop.f32.mrf.mxu1 }
 0xc99   : > { %v8590_v17 = vadd.f32 %v8589_v33, %v8380_v63  ;;  %v7668_v51 = vpop.permute.xlu0 %7667  ;;  %v8943_v12 = vpop.permute.xlu1 %8942 }
 0xc9a   : > { %v7766_v5 = vsel %vm3065_vm6, %v7734_v36, %v7668_v51  ;;  %v9041_v8 = vsel %vm3065_vm6, %v9009_v59, %v8943_v12 }
 0xc9b   : > { %v9285_v47 = vadd.f32 %v9227_v53, %v8590_v17  ;;  %10128 = vmatmul.msk.f32.gmra.mxu1 %vm3551_vm7, %v7766_v5  ;;  %10172 = vmatmul.msk.f32.gmra.mxu2 %vm3551_vm7, %v9041_v8  ;;  %v8100_v54 = vpop.permute.xlu2 %8099 }
 0xc9d   : > { %v9321_v42 = vadd.f32 %v16887_v6, %v9285_v47 }
 0xc9f   : > { %10309 = vtanh.f32 %v9321_v42 }
 0xca0   : > { %v8592_v34 = vpop.f32.mrf.mxu1 }
 0xca1   : > { %v8945_v10 = vpop.permute.xlu0 %8944  ;;  %v8096_v0 = vpop.permute.xlu1 %8095 }
 0xca2   : > { %v9042_v48 = vsel %vm3065_vm6, %v9010_v57, %v8945_v10  ;;  %v8194_v15 = vsel %vm3065_vm6, %v8162_v41, %v8096_v0 }
 0xca3   : > { %10096 = vmatmul.msk.f32.gmra.mxu0 %vm3551_vm7, %v8194_v15  ;;  %10129 = vmatmul.msk.f32.gmra.mxu1 %vm3551_vm7, %v7767_v52 }
 0xca4   : > { %10173 = vmatmul.msk.f32.gmra.mxu2 %vm3551_vm7, %v9042_v48 }
 0xca5   : > { %v10310_v6 = vpop.eup %10309 }
 0xca6   : > { %9385 = vst.msk [vmem:[%s16914_s22 + $0x98] sm:$0xff] %vm620_vm1, %v10310_v6  ;;  %v9230_v40 = vpop.f32.mrf.mxu2 }
 0xca8   : > { %v8383_v38 = vpop.f32.mrf.mxu0  ;;  %v8595_v60 = vpop.f32.mrf.mxu1 }
 0xca9   : > { %v8593_v45 = vadd.f32 %v8592_v34, %v8383_v38  ;;  %v8098_v61 = vpop.permute.xlu0 %8097  ;;  %v7970_v44 = vpop.permute.xlu1 %7969 }
 0xcaa   : > { %v8163_v22 = vsel %vm513_vm0, %v17299_v62, %v7970_v44 }
 0xcab   : > { %v9286_v39 = vadd.f32 %v9230_v40, %v8593_v45  ;;  %v8195_v13 = vsel %vm3065_vm6, %v8163_v22, %v8098_v61 }
 0xcac   : > { %10097 = vmatmul.msk.f32.gmra.mxu0 %vm3551_vm7, %v8195_v13 }
 0xcad   : > { %v9322_v29 = vadd.f32 %v17345_v58, %v9286_v39 }
 0xcaf   : > { %10311 = vtanh.f32 %v9322_v29  ;;  %v9233_v46 = vpop.f32.mrf.mxu2 }
 0xcb1   : > { %v7972_v26 = vpop.permute.xlu0 %7971  ;;  %v8819_v28 = vpop.permute.xlu1 %8818 }
 0xcb2   : > { %v8164_v62 = vsel %vm513_vm0, %v8657_v19, %v7972_v26  ;;  %v9011_v9 = vsel %vm513_vm0, %v8659_v30, %v8819_v28  ;;  %v8386_v32 = vpop.f32.mrf.mxu0 }
 0xcb3   : > { %v8596_v43 = vadd.f32 %v8595_v60, %v8386_v32  ;;  %v8196_v37 = vsel %vm3065_vm6, %v8164_v62, %v8100_v54  ;;  %v9043_v50 = vsel %vm3065_vm6, %v9011_v9, %v8947_v16 }
 0xcb4   : > { %10098 = vmatmul.msk.f32.gmra.mxu0 %vm3551_vm7, %v8196_v37  ;;  %10174 = vmatmul.msk.f32.gmra.mxu2 %vm3551_vm7, %v9043_v50 }
 0xcb5   : > { %v10312_v14 = vpop.eup %10311  ;;  %v9287_v11 = vadd.f32 %v9233_v46, %v8596_v43 }
 0xcb6   : > { %9386 = vst.msk [vmem:[%s16914_s22 + $0xa0] sm:$0xff] %vm620_vm1, %v10312_v14 }
 0xcb7   : > { %v9323_v4 = vadd.f32 %v17345_v58, %v9287_v11 }
 0xcb9   : > { %10313 = vtanh.f32 %v9323_v4  ;;  %v7672_v31 = vpop.permute.xlu1 %7671 }
 0xcba   : > { %v7768_v35 = vsel %vm3065_vm6, %v7736_v25, %v7672_v31  ;;  %v8389_v24 = vpop.f32.mrf.mxu0 }
 0xcbb   : > { %10130 = vmatmul.msk.f32.gmra.mxu1 %vm3551_vm7, %v7768_v35 }
 0xcbf   : > { %v10314_v18 = vpop.eup %10313  ;;  %v9236_v1 = vpop.f32.mrf.mxu2 }
 0xcc0   : > { %9387 = vst.msk [vmem:[%s16914_s22 + $0xa8] sm:$0xff] %vm620_vm1, %v10314_v18  ;;  %v8598_v3 = vpop.f32.mrf.mxu1 }
 0xcc1   : > { %v8599_v56 = vadd.f32 %v8598_v3, %v8389_v24 }
 0xcc3   : > { %v9288_v21 = vadd.f32 %v9236_v1, %v8599_v56 }
 0xcc5   : > { %v9324_v2 = vadd.f32 %v17345_v58, %v9288_v21 }
 0xcc7   : > { %10315 = vtanh.f32 %v9324_v2 }
 0xcc8   : > { %v8601_v49 = vpop.f32.mrf.mxu1 }
 0xccd   : > { %v10316_v19 = vpop.eup %10315 }
 0xcce   : > { %9388 = vst.msk [vmem:[%s16914_s22 + $0xb0] sm:$0xff] %vm620_vm1, %v10316_v19  ;;  %v9239_v33 = vpop.f32.mrf.mxu2 }
 0xcd0   : > { %v8392_v63 = vpop.f32.mrf.mxu0  ;;  %v8604_v51 = vpop.f32.mrf.mxu1 }
 0xcd1   : > { %v8602_v36 = vadd.f32 %v8601_v49, %v8392_v63 }
 0xcd3   : > { %v9289_v59 = vadd.f32 %v9239_v33, %v8602_v36 }
 0xcd5   : > { %v9325_v17 = vadd.f32 %v17345_v58, %v9289_v59 }
 0xcd7   : > { %10317 = vtanh.f32 %v9325_v17  ;;  %v9242_v5 = vpop.f32.mrf.mxu2 }
 0xcd9   : > { %v8395_v12 = vpop.f32.mrf.mxu0 }
 0xcda   : > { %v8605_v53 = vadd.f32 %v8604_v51, %v8395_v12 }
 0xcdc   : > { %v9290_v8 = vadd.f32 %v9242_v5, %v8605_v53 }
 0xcdd   : > { %v10318_v47 = vpop.eup %10317 }
 0xcde   : > { %9389 = vst.msk [vmem:[%s16914_s22 + $0xb8] sm:$0xff] %vm620_vm1, %v10318_v47  ;;  %v9326_v23 = vadd.f32 %v17345_v58, %v9290_v8 }
 0xce0   : > { %10319 = vtanh.f32 %v9326_v23 }
 0xce1   : > { %v8398_v42 = vpop.f32.mrf.mxu0 }
 0xce6   : > { %v10320_v20 = vpop.eup %10319 }
 0xce7   : > { %9390 = vst.msk [vmem:[%s16914_s22 + $0xc0] sm:$0xff] %vm620_vm1, %v10320_v20  ;;  %v9245_v55 = vpop.f32.mrf.mxu2 }
 0xce8   : > { %v8607_v57 = vpop.f32.mrf.mxu1 }
 0xce9   : > { %v8608_v7 = vadd.f32 %v8607_v57, %v8398_v42 }
 0xceb   : > { %v9291_v41 = vadd.f32 %v9245_v55, %v8608_v7 }
 0xced   : > { %v9327_v10 = vadd.f32 %v17345_v58, %v9291_v41 }
 0xcef   : > { %10321 = vtanh.f32 %v9327_v10 }
 0xcf0   : > { %v8610_v52 = vpop.f32.mrf.mxu1 }
 0xcf5   : > { %v10322_v0 = vpop.eup %10321 }
 0xcf6   : > { %9391 = vst.msk [vmem:[%s16914_s22 + $0xc8] sm:$0xff] %vm620_vm1, %v10322_v0  ;;  %v9248_v15 = vpop.f32.mrf.mxu2 }
 0xcf8   : > { %v8401_v48 = vpop.f32.mrf.mxu0  ;;  %v8613_v38 = vpop.f32.mrf.mxu1 }
 0xcf9   : > { %v8611_v6 = vadd.f32 %v8610_v52, %v8401_v48 }
 0xcfb   : > { %v9292_v16 = vadd.f32 %v9248_v15, %v8611_v6 }
 0xcfd   : > { %v9328_v34 = vadd.f32 %v17345_v58, %v9292_v16 }
 0xcff   : > { %10323 = vtanh.f32 %v9328_v34  ;;  %v9251_v44 = vpop.f32.mrf.mxu2 }
 0xd01   : > { %v8404_v45 = vpop.f32.mrf.mxu0 }
 0xd02   : > { %v8614_v61 = vadd.f32 %v8613_v38, %v8404_v45 }
 0xd04   : > { %v9293_v40 = vadd.f32 %v9251_v44, %v8614_v61 }
 0xd05   : > { %v10324_v22 = vpop.eup %10323 }
 0xd06   : > { %9392 = vst.msk [vmem:[%s16914_s22 + $0xd0] sm:$0xff] %vm620_vm1, %v10324_v22  ;;  %v9329_v39 = vadd.f32 %v17345_v58, %v9293_v40 }
 0xd08   : > { %10325 = vtanh.f32 %v9329_v39 }
 0xd09   : > { %v8407_v29 = vpop.f32.mrf.mxu0 }
 0xd0e   : > { %v10326_v13 = vpop.eup %10325 }
 0xd0f   : > { %9393 = vst.msk [vmem:[%s16914_s22 + $0xd8] sm:$0xff] %vm620_vm1, %v10326_v13  ;;  %v9254_v26 = vpop.f32.mrf.mxu2 }
 0xd10   : > { %v8616_v30 = vpop.f32.mrf.mxu1 }
 0xd11   : > { %v8617_v54 = vadd.f32 %v8616_v30, %v8407_v29 }
 0xd13   : > { %v9294_v28 = vadd.f32 %v9254_v26, %v8617_v54 }
 0xd15   : > { %v9330_v60 = vadd.f32 %v17345_v58, %v9294_v28 }
 0xd17   : > { %10327 = vtanh.f32 %v9330_v60 }
 0xd18   : > { %v8619_v9 = vpop.f32.mrf.mxu1 }
 0xd1d   : > { %v10328_v62 = vpop.eup %10327 }
 0xd1e   : > { %9394 = vst.msk [vmem:[%s16914_s22 + $0xe0] sm:$0xff] %vm620_vm1, %v10328_v62  ;;  %v9257_v43 = vpop.f32.mrf.mxu2 }
 0xd20   : > { %v8410_v32 = vpop.f32.mrf.mxu0  ;;  %v8622_v14 = vpop.f32.mrf.mxu1 }
 0xd21   : > { %v8620_v37 = vadd.f32 %v8619_v9, %v8410_v32 }
 0xd23   : > { %v9295_v50 = vadd.f32 %v9257_v43, %v8620_v37 }
 0xd25   : > { %v9331_v46 = vadd.f32 %v17345_v58, %v9295_v50 }
 0xd27   : > { %10329 = vtanh.f32 %v9331_v46  ;;  %v9260_v27 = vpop.f32.mrf.mxu2 }
 0xd29   : > { %v8413_v11 = vpop.f32.mrf.mxu0 }
 0xd2a   : > { %v8623_v4 = vadd.f32 %v8622_v14, %v8413_v11 }
 0xd2c   : > { %v9296_v25 = vadd.f32 %v9260_v27, %v8623_v4 }
 0xd2d   : > { %v10330_v31 = vpop.eup %10329 }
 0xd2e   : > { %9395 = vst.msk [vmem:[%s16914_s22 + $0xe8] sm:$0xff] %vm620_vm1, %v10330_v31  ;;  %v9332_v35 = vadd.f32 %v17345_v58, %v9296_v25 }
 0xd30   : > { %10331 = vtanh.f32 %v9332_v35 }
 0xd31   : > { %v8416_v24 = vpop.f32.mrf.mxu0 }
 0xd36   : > { %v10332_v18 = vpop.eup %10331 }
 0xd37   : > { %9396 = vst.msk [vmem:[%s16914_s22 + $0xf0] sm:$0xff] %vm620_vm1, %v10332_v18  ;;  %v9263_v1 = vpop.f32.mrf.mxu2 }
 0xd38   : > { %v8625_v3 = vpop.f32.mrf.mxu1 }
 0xd39   : > { %v8626_v56 = vadd.f32 %v8625_v3, %v8416_v24 }
 0xd3b   : > { %v9297_v21 = vadd.f32 %v9263_v1, %v8626_v56 }
 0xd3d   : > { %v9333_v2 = vadd.f32 %v17345_v58, %v9297_v21 }
 0xd3f   : > { %10333 = vtanh.f32 %v9333_v2 }
 0xd45   : > { %v10334_v19 = vpop.eup %10333 }
 0xd46   : > { %9397 = vst.msk [vmem:[%s16914_s22 + $0xf8] sm:$0xff] %vm620_vm1, %v10334_v19 }
 0xd47 PF: > { %s25_s29 = sadd.s32 1, %s10347_s29  }
 0xd48   : > { %p22_p4 = scmp.ge.s32.totalorder %s25_s29, 4  }
 0xd4a   :  { %24 = sbr.rel (!%p22_p4) target bundleno = 1 (0x1), region = 137 }

</bundles_post_ra>
